<compile_context>
chip_gen: v6e
topology: v6e:2x2x1
jax: 0.10.0
libtpu: 0.0.40
codegen_flags: <defaults>
</compile_context>

<pallas_src>
import functools

import jax
import jax.numpy as jnp
from jax import lax
from jax.experimental import pallas as pl
from jax.experimental.pallas import tpu as pltpu


# ---------------------------------------------------------------------------
# Fused Bottleneck kernel
# ---------------------------------------------------------------------------
def _bottleneck_kernel(*refs, h, w, cin, planes, cout, stride, th, wo, has_sc):
    if has_sc:
        (x_ref, w1_ref, b1_ref, w2_ref, b2_ref, w3_ref, bo_ref, wsc_ref,
         o_ref, out1_buf) = refs
    else:
        (x_ref, w1_ref, b1_ref, w2_ref, b2_ref, w3_ref, bo_ref,
         o_ref, out1_buf) = refs
        wsc_ref = None

    th_in = (th - 1) * stride + 3          # rows of conv1 output needed (with halo)
    row_step = th * stride
    j = pl.program_id(1)
    ps = pl.multiple_of(j * row_step, row_step)   # start row of tile (padded coords)

    # Tiny per-channel biases (BN scales are already folded into the weights).
    b1 = b1_ref[...]                        # (1, planes) f32
    b2 = b2_ref[...]                        # (1, planes) f32
    bo = bo_ref[...]                        # (1, cout)   f32 (= b3 [+ b_sc])

    # ---- stage 1: 1x1 conv + bias + ReLU over the halo window ----------------
    xt = x_ref[0, pl.ds(ps, th_in), :, :]                 # (th_in, w+2, cin) bf16
    m1 = th_in * (w + 2)
    y1 = jnp.dot(xt.reshape(m1, cin), w1_ref[...],
                 preferred_element_type=jnp.float32) + b1
    y1 = jnp.maximum(y1, 0.0).reshape(th_in, w + 2, planes)

    # Zero positions that are conv2's zero padding (conv1(0) = relu(b1) != 0).
    ri = lax.broadcasted_iota(jnp.int32, (th_in, w + 2, 1), 0) + ps
    ci = lax.broadcasted_iota(jnp.int32, (th_in, w + 2, 1), 1)
    valid = (ri >= 1) & (ri <= h) & (ci >= 1) & (ci <= w)
    out1_buf[...] = jnp.where(valid, y1, 0.0).astype(out1_buf.dtype)

    # ---- stage 2: 3x3 conv (stride) + bias + ReLU, nine 2-D tap matmuls ------
    m2 = th * wo
    acc = jnp.zeros((m2, planes), jnp.float32)
    for kh in range(3):
        for kw in range(3):
            if stride == 1:
                patch = out1_buf[pl.ds(kh, th), pl.ds(kw, wo), :]
            else:
                patch = out1_buf[pl.ds(kh, th, stride=stride),
                                 pl.ds(kw, wo, stride=stride), :]
            acc = acc + jnp.dot(patch.reshape(m2, planes), w2_ref[kh, kw, :, :],
                                preferred_element_type=jnp.float32)
    y2 = jnp.maximum(acc + b2, 0.0).astype(jnp.bfloat16)

    # ---- stage 3: 1x1 conv, fused shortcut, combined bias, residual ReLU -----
    y3 = jnp.dot(y2, w3_ref[...], preferred_element_type=jnp.float32)

    # Shortcut reads the strided (non-pad) pixels straight from the same block.
    if stride == 1:
        xs = x_ref[0, pl.ds(ps + 1, th), pl.ds(1, wo), :]
    else:
        xs = x_ref[0, pl.ds(ps + 1, th, stride=stride),
                   pl.ds(1, wo, stride=stride), :]
    xs = xs.reshape(m2, cin)
    if has_sc:
        sc = jnp.dot(xs, wsc_ref[...], preferred_element_type=jnp.float32)
    else:
        sc = xs.astype(jnp.float32)        # identity shortcut (cin == cout)

    o_ref[0] = jnp.maximum(y3 + sc + bo, 0.0).reshape(th, wo, cout).astype(o_ref.dtype)


# ---------------------------------------------------------------------------
# Wrapper: NCHW in / NCHW out, folds BN, builds grid + BlockSpecs
# ---------------------------------------------------------------------------
def bottleneck_forward(x_nchw, params, stride=1, *, tile_rows=None):
    n, cin, h, w = x_nchw.shape
    planes = params["w1"].shape[1]
    cout = params["w3"].shape[1]
    has_sc = params["w_sc"] is not None
    if not has_sc:
        assert cin == cout, "identity shortcut requires in_planes == expansion*planes"

    ho = (h - 1) // stride + 1
    wo = (w - 1) // stride + 1

    # Output-row tile size: largest divisor of ho keeping the M-tile ~<= 2048 rows.
    if tile_rows is None:
        target = max(1, 2048 // max(wo, 1))
        th = 1
        for cand in range(1, ho + 1):
            if ho % cand == 0 and cand <= target:
                th = cand
    else:
        th = int(tile_rows)
        assert ho % th == 0
    ht = ho // th
    th_in = (th - 1) * stride + 3

    # NCHW -> NHWC, pad H/W by 1, cast to bf16: one fused XLA copy.
    x_nhwc = jnp.transpose(x_nchw, (0, 2, 3, 1))
    xp = jnp.pad(x_nhwc, ((0, 0), (1, 1), (1, 1), (0, 0))).astype(jnp.bfloat16)

    # Fold eval-mode BN scales into the conv weights (tiny tensors, once per call).
    w1 = (params["w1"] * params["s1"][None, :]).astype(jnp.bfloat16)
    w2 = (params["w2"] * params["s2"][None, None, None, :]).astype(jnp.bfloat16)
    w3 = (params["w3"] * params["s3"][None, :]).astype(jnp.bfloat16)
    b1 = params["b1"].reshape(1, planes).astype(jnp.float32)
    b2 = params["b2"].reshape(1, planes).astype(jnp.float32)
    if has_sc:
        wsc = (params["w_sc"] * params["s_sc"][None, :]).astype(jnp.bfloat16)
        b_out = (params["b3"] + params["b_sc"]).reshape(1, cout).astype(jnp.float32)
    else:
        wsc = None
        b_out = params["b3"].reshape(1, cout).astype(jnp.float32)

    inputs = [xp, w1, b1, w2, b2, w3, b_out]
    in_specs = [
        pl.BlockSpec((1, h + 2, w + 2, cin), lambda ni, ji: (ni, 0, 0, 0)),
        pl.BlockSpec((cin, planes), lambda ni, ji: (0, 0)),
        pl.BlockSpec((1, planes), lambda ni, ji: (0, 0)),
        pl.BlockSpec((3, 3, planes, planes), lambda ni, ji: (0, 0, 0, 0)),
        pl.BlockSpec((1, planes), lambda ni, ji: (0, 0)),
        pl.BlockSpec((planes, cout), lambda ni, ji: (0, 0)),
        pl.BlockSpec((1, cout), lambda ni, ji: (0, 0)),
    ]
    if has_sc:
        inputs.append(wsc)
        in_specs.append(pl.BlockSpec((cin, cout), lambda ni, ji: (0, 0)))

    kern = functools.partial(
        _bottleneck_kernel, h=h, w=w, cin=cin, planes=planes, cout=cout,
        stride=stride, th=th, wo=wo, has_sc=has_sc)

    flops = (2 * n * h * w * cin * planes
             + 2 * n * ho * wo * (9 * planes * planes + planes * cout)
             + (2 * n * ho * wo * cin * cout if has_sc else 0))
    bytes_accessed = (xp.size * 2 + n * ho * wo * cout * 4
                      + sum(a.size * a.dtype.itemsize for a in inputs[1:]))

    out = pl.pallas_call(
        kern,
        out_shape=jax.ShapeDtypeStruct((n, ho, wo, cout), jnp.float32),
        grid=(n, ht),
        in_specs=in_specs,
        out_specs=pl.BlockSpec((1, th, wo, cout), lambda ni, ji: (ni, ji, 0, 0)),
        scratch_shapes=[pltpu.VMEM((th_in, w + 2, planes), jnp.bfloat16)],
        compiler_params=pltpu.CompilerParams(
            dimension_semantics=("parallel", "parallel"),
            vmem_limit_bytes=32 * 1024 * 1024),
        cost_estimate=pl.CostEstimate(flops=flops, transcendentals=0,
                                      bytes_accessed=int(bytes_accessed)),
    )(*inputs)

    return jnp.transpose(out, (0, 3, 1, 2))  # NHWC -> NCHW


# ---------------------------------------------------------------------------
# Deterministic parameter construction (BN folded to scale/bias, eval mode)
# ---------------------------------------------------------------------------
def init_params(key, in_planes, planes, stride=1, expansion=4):
    eps = 1e-5
    keys = jax.random.split(key, 20)
    ki = iter(range(20))

    def bn_fold(c):
        gamma = 1.0 + 0.1 * jax.random.normal(keys[next(ki)], (c,), jnp.float32)
        beta = 0.1 * jax.random.normal(keys[next(ki)], (c,), jnp.float32)
        mean = 0.1 * jax.random.normal(keys[next(ki)], (c,), jnp.float32)
        var = jnp.abs(jax.random.normal(keys[next(ki)], (c,), jnp.float32)) + 1.0
        scale = gamma / jnp.sqrt(var + eps)
        bias = beta - mean * scale
        return scale, bias

    c_out = expansion * planes
    w1 = 0.2 * jax.random.normal(keys[next(ki)], (in_planes, planes), jnp.float32)
    s1, b1 = bn_fold(planes)
    w2 = 0.2 * jax.random.normal(keys[next(ki)], (3, 3, planes, planes), jnp.float32)
    s2, b2 = bn_fold(planes)
    w3 = 0.2 * jax.random.normal(keys[next(ki)], (planes, c_out), jnp.float32)
    s3, b3 = bn_fold(c_out)

    if stride != 1 or in_planes != c_out:
        w_sc = 0.2 * jax.random.normal(keys[next(ki)], (in_planes, c_out), jnp.float32)
        s_sc, b_sc = bn_fold(c_out)
    else:
        w_sc, s_sc, b_sc = None, None, None

    return dict(w1=w1, s1=s1, b1=b1, w2=w2, s2=s2, b2=b2,
                w3=w3, s3=s3, b3=b3, w_sc=w_sc, s_sc=s_sc, b_sc=b_sc)


# ---------------------------------------------------------------------------
# Pure-JAX reference (f32, same math as the PyTorch module in eval mode)
# ---------------------------------------------------------------------------
def reference_forward(x_nchw, params, stride=1):
    hp = lax.Precision.HIGHEST
    x = jnp.transpose(x_nchw, (0, 2, 3, 1)).astype(jnp.float32)

    def conv1x1(t, wgt):
        return jnp.einsum("nhwc,cd->nhwd", t, wgt, precision=hp)

    o = jnp.maximum(conv1x1(x, params["w1"]) * params["s1"] + params["b1"], 0.0)
    o = lax.conv_general_dilated(o, params["w2"], (stride, stride),
                                 ((1, 1), (1, 1)),
                                 dimension_numbers=("NHWC", "HWIO", "NHWC"),
                                 precision=hp)
    o = jnp.maximum(o * params["s2"] + params["b2"], 0.0)
    o3 = conv1x1(o, params["w3"]) * params["s3"] + params["b3"]
    xs = x[:, ::stride, ::stride, :]
    if params["w_sc"] is not None:
        sc = conv1x1(xs, params["w_sc"]) * params["s_sc"] + params["b_sc"]
    else:
        sc = xs
    out = jnp.maximum(o3 + sc, 0.0)
    return jnp.transpose(out, (0, 3, 1, 2))


if __name__ == "__main__":
    # (in_planes, planes, stride, tile_rows)
    cases = [
        (4, 4, 1, None),   # projection shortcut, single row tile per image
        (16, 4, 1, 4),     # identity shortcut, 4 row tiles -> exercises halo/offsets
    ]
    key = jax.random.PRNGKey(0)
    for idx, (cin, planes, stride, tr) in enumerate(cases):
        kk = jax.random.fold_in(key, idx)
        k_x, k_p = jax.random.split(kk)
        x = jax.random.normal(k_x, (2, cin, 16, 16), jnp.float32)   # NCHW
        params = init_params(k_p, cin, planes, stride=stride)

        fwd = jax.jit(functools.partial(bottleneck_forward, stride=stride,
                                        tile_rows=tr))
        out = jax.block_until_ready(fwd(x, params))
        ref = jax.block_until_ready(reference_forward(x, params, stride=stride))

        assert out.shape == (2, 4 * planes, 16, 16), out.shape
        # bf16 matmul inputs with f32 accumulation -> loosened tolerance vs f32 ref.
        err = float(jnp.max(jnp.abs(out - ref)))
        assert jnp.allclose(out, ref, atol=5e-2, rtol=5e-2), (idx, err)

    print("KERNEL_OK")
</pallas_src>

<mosaic_0001>
module attributes {stable_mosaic.version = 11 : i64} {
  func.func @_bottleneck_kernel(%arg0: i32, %arg1: i32, %arg2: memref<1x18x18x4xbf16, #tpu.memory_space<vmem>>, %arg3: memref<4x4xbf16, #tpu.memory_space<vmem>>, %arg4: memref<1x4xf32, #tpu.memory_space<vmem>>, %arg5: memref<3x3x4x4xbf16, #tpu.memory_space<vmem>>, %arg6: memref<1x4xf32, #tpu.memory_space<vmem>>, %arg7: memref<4x16xbf16, #tpu.memory_space<vmem>>, %arg8: memref<1x16xf32, #tpu.memory_space<vmem>>, %arg9: memref<4x16xbf16, #tpu.memory_space<vmem>>, %arg10: memref<1x16x16x16xf32, #tpu.memory_space<vmem>>, %arg11: memref<18x18x4xbf16, #tpu.memory_space<vmem>>) attributes {dimension_semantics = [#tpu.dimension_semantics<parallel>, #tpu.dimension_semantics<parallel>], iteration_bounds = array<i64: 2, 1>, scalar_prefetch = 0 : i64, scratch_operands = 1 : i64, tpu.core_type = #tpu.core_type<tc>, window_params = [{transform_indices = @transform_0, window_bounds = array<i64: 1, 18, 18, 4>}, {pipeline_mode = #tpu.pipeline_mode<synchronous>, transform_indices = @transform_1, window_bounds = array<i64: 4, 4>}, {pipeline_mode = #tpu.pipeline_mode<synchronous>, transform_indices = @transform_2, window_bounds = array<i64: 1, 4>}, {pipeline_mode = #tpu.pipeline_mode<synchronous>, transform_indices = @transform_3, window_bounds = array<i64: 3, 3, 4, 4>}, {pipeline_mode = #tpu.pipeline_mode<synchronous>, transform_indices = @transform_4, window_bounds = array<i64: 1, 4>}, {pipeline_mode = #tpu.pipeline_mode<synchronous>, transform_indices = @transform_5, window_bounds = array<i64: 4, 16>}, {pipeline_mode = #tpu.pipeline_mode<synchronous>, transform_indices = @transform_6, window_bounds = array<i64: 1, 16>}, {pipeline_mode = #tpu.pipeline_mode<synchronous>, transform_indices = @transform_7, window_bounds = array<i64: 4, 16>}, {transform_indices = @transform_8, window_bounds = array<i64: 1, 16, 16, 16>}]} {
    %c16_i32 = arith.constant 16 : i32
    %0 = arith.muli %arg1, %c16_i32 : i32
    %1 = tpu.assume_multiple %0, 16 : i32
    %c0 = arith.constant 0 : index
    %c0_0 = arith.constant 0 : index
    %2 = vector.load %arg4[%c0, %c0_0] : memref<1x4xf32, #tpu.memory_space<vmem>>, vector<1x4xf32>
    %c0_1 = arith.constant 0 : index
    %c0_2 = arith.constant 0 : index
    %3 = vector.load %arg6[%c0_1, %c0_2] : memref<1x4xf32, #tpu.memory_space<vmem>>, vector<1x4xf32>
    %c0_3 = arith.constant 0 : index
    %c0_4 = arith.constant 0 : index
    %4 = vector.load %arg8[%c0_3, %c0_4] : memref<1x16xf32, #tpu.memory_space<vmem>>, vector<1x16xf32>
    %c0_5 = arith.constant 0 : index
    %5 = arith.index_cast %1 : i32 to index
    %c0_6 = arith.constant 0 : index
    %c0_7 = arith.constant 0 : index
    %6 = vector.load %arg2[%c0_5, %5, %c0_6, %c0_7] : memref<1x18x18x4xbf16, #tpu.memory_space<vmem>>, vector<1x18x18x4xbf16>
    %7 = vector.shape_cast %6 : vector<1x18x18x4xbf16> to vector<18x18x4xbf16>
    %8 = vector.shape_cast %7 : vector<18x18x4xbf16> to vector<324x4xbf16>
    %c0_8 = arith.constant 0 : index
    %c0_9 = arith.constant 0 : index
    %9 = vector.load %arg3[%c0_8, %c0_9] : memref<4x4xbf16, #tpu.memory_space<vmem>>, vector<4x4xbf16>
    %cst = arith.constant dense<0.000000e+00> : vector<324x4xf32>
    %10 = tpu.matmul %8, %9, %cst {dimension_numbers = #tpu.dot_dimension_numbers<[1], [0], [0], [1], [0, 0, 1, 1], [], []>} : vector<324x4xbf16>, vector<4x4xbf16>, vector<324x4xf32> -> vector<324x4xf32>
    %11 = vector.broadcast %2 : vector<1x4xf32> to vector<324x4xf32>
    %12 = arith.addf %10, %11 : vector<324x4xf32>
    %cst_10 = arith.constant 0.000000e+00 : f32
    %13 = vector.broadcast %cst_10 : f32 to vector<324x4xf32>
    %14 = arith.maximumf %12, %13 : vector<324x4xf32>
    %15 = vector.shape_cast %14 : vector<324x4xf32> to vector<18x18x4xf32>
    %16 = tpu.iota {dimensions = array<i32: 0>} : vector<18x18x1xi32>
    %17 = vector.broadcast %1 : i32 to vector<18x18x1xi32>
    %18 = arith.addi %16, %17 : vector<18x18x1xi32>
    %19 = tpu.iota {dimensions = array<i32: 1>} : vector<18x18x1xi32>
    %c1_i32 = arith.constant 1 : i32
    %20 = vector.broadcast %c1_i32 : i32 to vector<18x18x1xi32>
    %21 = arith.cmpi sge, %18, %20 : vector<18x18x1xi32>
    %c16_i32_11 = arith.constant 16 : i32
    %22 = vector.broadcast %c16_i32_11 : i32 to vector<18x18x1xi32>
    %23 = arith.cmpi sle, %18, %22 : vector<18x18x1xi32>
    %24 = arith.andi %21, %23 : vector<18x18x1xi1>
    %c1_i32_12 = arith.constant 1 : i32
    %25 = vector.broadcast %c1_i32_12 : i32 to vector<18x18x1xi32>
    %26 = arith.cmpi sge, %19, %25 : vector<18x18x1xi32>
    %27 = arith.andi %24, %26 : vector<18x18x1xi1>
    %c16_i32_13 = arith.constant 16 : i32
    %28 = vector.broadcast %c16_i32_13 : i32 to vector<18x18x1xi32>
    %29 = arith.cmpi sle, %19, %28 : vector<18x18x1xi32>
    %30 = arith.andi %27, %29 : vector<18x18x1xi1>
    %cst_14 = arith.constant 0.000000e+00 : f32
    %31 = vector.shape_cast %30 : vector<18x18x1xi1> to vector<18x18x1xi1>
    %32 = vector.broadcast %31 : vector<18x18x1xi1> to vector<18x18x4xi1>
    %33 = vector.broadcast %cst_14 : f32 to vector<18x18x4xf32>
    %34 = arith.select %32, %15, %33 : vector<18x18x4xi1>, vector<18x18x4xf32>
    %35 = arith.truncf %34 : vector<18x18x4xf32> to vector<18x18x4xbf16>
    %c0_15 = arith.constant 0 : index
    %c0_16 = arith.constant 0 : index
    %c0_17 = arith.constant 0 : index
    %36 = vector.load %arg11[%c0_15, %c0_16, %c0_17] : memref<18x18x4xbf16, #tpu.memory_space<vmem>>, vector<18x18x4xbf16>
    tpu.vector_store %arg11[%c0_15, %c0_16, %c0_17], %35 {strides = array<i32>} : memref<18x18x4xbf16, #tpu.memory_space<vmem>>, vector<18x18x4xbf16>,
    %cst_18 = arith.constant 0.000000e+00 : f32
    %37 = vector.broadcast %cst_18 : f32 to vector<256x4xf32>
    %c0_19 = arith.constant 0 : index
    %c0_20 = arith.constant 0 : index
    %c0_21 = arith.constant 0 : index
    %38 = vector.load %arg11[%c0_19, %c0_20, %c0_21] : memref<18x18x4xbf16, #tpu.memory_space<vmem>>, vector<16x16x4xbf16>
    %39 = vector.shape_cast %38 : vector<16x16x4xbf16> to vector<256x4xbf16>
    %c0_22 = arith.constant 0 : index
    %c0_23 = arith.constant 0 : index
    %c0_24 = arith.constant 0 : index
    %c0_25 = arith.constant 0 : index
    %40 = vector.load %arg5[%c0_22, %c0_23, %c0_24, %c0_25] : memref<3x3x4x4xbf16, #tpu.memory_space<vmem>>, vector<1x1x4x4xbf16>
    %41 = vector.shape_cast %40 : vector<1x1x4x4xbf16> to vector<4x4xbf16>
    %cst_26 = arith.constant dense<0.000000e+00> : vector<256x4xf32>
    %42 = tpu.matmul %39, %41, %cst_26 {dimension_numbers = #tpu.dot_dimension_numbers<[1], [0], [0], [1], [0, 0, 1, 1], [], []>} : vector<256x4xbf16>, vector<4x4xbf16>, vector<256x4xf32> -> vector<256x4xf32>
    %43 = arith.addf %37, %42 : vector<256x4xf32>
    %c0_27 = arith.constant 0 : index
    %c1 = arith.constant 1 : index
    %c0_28 = arith.constant 0 : index
    %44 = vector.load %arg11[%c0_27, %c1, %c0_28] : memref<18x18x4xbf16, #tpu.memory_space<vmem>>, vector<16x16x4xbf16>
    %45 = vector.shape_cast %44 : vector<16x16x4xbf16> to vector<256x4xbf16>
    %c0_29 = arith.constant 0 : index
    %c1_30 = arith.constant 1 : index
    %c0_31 = arith.constant 0 : index
    %c0_32 = arith.constant 0 : index
    %46 = vector.load %arg5[%c0_29, %c1_30, %c0_31, %c0_32] : memref<3x3x4x4xbf16, #tpu.memory_space<vmem>>, vector<1x1x4x4xbf16>
    %47 = vector.shape_cast %46 : vector<1x1x4x4xbf16> to vector<4x4xbf16>
    %cst_33 = arith.constant dense<0.000000e+00> : vector<256x4xf32>
    %48 = tpu.matmul %45, %47, %cst_33 {dimension_numbers = #tpu.dot_dimension_numbers<[1], [0], [0], [1], [0, 0, 1, 1], [], []>} : vector<256x4xbf16>, vector<4x4xbf16>, vector<256x4xf32> -> vector<256x4xf32>
    %49 = arith.addf %43, %48 : vector<256x4xf32>
    %c0_34 = arith.constant 0 : index
    %c2 = arith.constant 2 : index
    %c0_35 = arith.constant 0 : index
    %50 = vector.load %arg11[%c0_34, %c2, %c0_35] : memref<18x18x4xbf16, #tpu.memory_space<vmem>>, vector<16x16x4xbf16>
    %51 = vector.shape_cast %50 : vector<16x16x4xbf16> to vector<256x4xbf16>
    %c0_36 = arith.constant 0 : index
    %c2_37 = arith.constant 2 : index
    %c0_38 = arith.constant 0 : index
    %c0_39 = arith.constant 0 : index
    %52 = vector.load %arg5[%c0_36, %c2_37, %c0_38, %c0_39] : memref<3x3x4x4xbf16, #tpu.memory_space<vmem>>, vector<1x1x4x4xbf16>
    %53 = vector.shape_cast %52 : vector<1x1x4x4xbf16> to vector<4x4xbf16>
    %cst_40 = arith.constant dense<0.000000e+00> : vector<256x4xf32>
    %54 = tpu.matmul %51, %53, %cst_40 {dimension_numbers = #tpu.dot_dimension_numbers<[1], [0], [0], [1], [0, 0, 1, 1], [], []>} : vector<256x4xbf16>, vector<4x4xbf16>, vector<256x4xf32> -> vector<256x4xf32>
    %55 = arith.addf %49, %54 : vector<256x4xf32>
    %c1_41 = arith.constant 1 : index
    %c0_42 = arith.constant 0 : index
    %c0_43 = arith.constant 0 : index
    %56 = vector.load %arg11[%c1_41, %c0_42, %c0_43] : memref<18x18x4xbf16, #tpu.memory_space<vmem>>, vector<16x16x4xbf16>
    %57 = vector.shape_cast %56 : vector<16x16x4xbf16> to vector<256x4xbf16>
    %c1_44 = arith.constant 1 : index
    %c0_45 = arith.constant 0 : index
    %c0_46 = arith.constant 0 : index
    %c0_47 = arith.constant 0 : index
    %58 = vector.load %arg5[%c1_44, %c0_45, %c0_46, %c0_47] : memref<3x3x4x4xbf16, #tpu.memory_space<vmem>>, vector<1x1x4x4xbf16>
    %59 = vector.shape_cast %58 : vector<1x1x4x4xbf16> to vector<4x4xbf16>
    %cst_48 = arith.constant dense<0.000000e+00> : vector<256x4xf32>
    %60 = tpu.matmul %57, %59, %cst_48 {dimension_numbers = #tpu.dot_dimension_numbers<[1], [0], [0], [1], [0, 0, 1, 1], [], []>} : vector<256x4xbf16>, vector<4x4xbf16>, vector<256x4xf32> -> vector<256x4xf32>
    %61 = arith.addf %55, %60 : vector<256x4xf32>
    %c1_49 = arith.constant 1 : index
    %c1_50 = arith.constant 1 : index
    %c0_51 = arith.constant 0 : index
    %62 = vector.load %arg11[%c1_49, %c1_50, %c0_51] : memref<18x18x4xbf16, #tpu.memory_space<vmem>>, vector<16x16x4xbf16>
    %63 = vector.shape_cast %62 : vector<16x16x4xbf16> to vector<256x4xbf16>
    %c1_52 = arith.constant 1 : index
    %c1_53 = arith.constant 1 : index
    %c0_54 = arith.constant 0 : index
    %c0_55 = arith.constant 0 : index
    %64 = vector.load %arg5[%c1_52, %c1_53, %c0_54, %c0_55] : memref<3x3x4x4xbf16, #tpu.memory_space<vmem>>, vector<1x1x4x4xbf16>
    %65 = vector.shape_cast %64 : vector<1x1x4x4xbf16> to vector<4x4xbf16>
    %cst_56 = arith.constant dense<0.000000e+00> : vector<256x4xf32>
    %66 = tpu.matmul %63, %65, %cst_56 {dimension_numbers = #tpu.dot_dimension_numbers<[1], [0], [0], [1], [0, 0, 1, 1], [], []>} : vector<256x4xbf16>, vector<4x4xbf16>, vector<256x4xf32> -> vector<256x4xf32>
    %67 = arith.addf %61, %66 : vector<256x4xf32>
    %c1_57 = arith.constant 1 : index
    %c2_58 = arith.constant 2 : index
    %c0_59 = arith.constant 0 : index
    %68 = vector.load %arg11[%c1_57, %c2_58, %c0_59] : memref<18x18x4xbf16, #tpu.memory_space<vmem>>, vector<16x16x4xbf16>
    %69 = vector.shape_cast %68 : vector<16x16x4xbf16> to vector<256x4xbf16>
    %c1_60 = arith.constant 1 : index
    %c2_61 = arith.constant 2 : index
    %c0_62 = arith.constant 0 : index
    %c0_63 = arith.constant 0 : index
    %70 = vector.load %arg5[%c1_60, %c2_61, %c0_62, %c0_63] : memref<3x3x4x4xbf16, #tpu.memory_space<vmem>>, vector<1x1x4x4xbf16>
    %71 = vector.shape_cast %70 : vector<1x1x4x4xbf16> to vector<4x4xbf16>
    %cst_64 = arith.constant dense<0.000000e+00> : vector<256x4xf32>
    %72 = tpu.matmul %69, %71, %cst_64 {dimension_numbers = #tpu.dot_dimension_numbers<[1], [0], [0], [1], [0, 0, 1, 1], [], []>} : vector<256x4xbf16>, vector<4x4xbf16>, vector<256x4xf32> -> vector<256x4xf32>
    %73 = arith.addf %67, %72 : vector<256x4xf32>
    %c2_65 = arith.constant 2 : index
    %c0_66 = arith.constant 0 : index
    %c0_67 = arith.constant 0 : index
    %74 = vector.load %arg11[%c2_65, %c0_66, %c0_67] : memref<18x18x4xbf16, #tpu.memory_space<vmem>>, vector<16x16x4xbf16>
    %75 = vector.shape_cast %74 : vector<16x16x4xbf16> to vector<256x4xbf16>
    %c2_68 = arith.constant 2 : index
    %c0_69 = arith.constant 0 : index
    %c0_70 = arith.constant 0 : index
    %c0_71 = arith.constant 0 : index
    %76 = vector.load %arg5[%c2_68, %c0_69, %c0_70, %c0_71] : memref<3x3x4x4xbf16, #tpu.memory_space<vmem>>, vector<1x1x4x4xbf16>
    %77 = vector.shape_cast %76 : vector<1x1x4x4xbf16> to vector<4x4xbf16>
    %cst_72 = arith.constant dense<0.000000e+00> : vector<256x4xf32>
    %78 = tpu.matmul %75, %77, %cst_72 {dimension_numbers = #tpu.dot_dimension_numbers<[1], [0], [0], [1], [0, 0, 1, 1], [], []>} : vector<256x4xbf16>, vector<4x4xbf16>, vector<256x4xf32> -> vector<256x4xf32>
    %79 = arith.addf %73, %78 : vector<256x4xf32>
    %c2_73 = arith.constant 2 : index
    %c1_74 = arith.constant 1 : index
    %c0_75 = arith.constant 0 : index
    %80 = vector.load %arg11[%c2_73, %c1_74, %c0_75] : memref<18x18x4xbf16, #tpu.memory_space<vmem>>, vector<16x16x4xbf16>
    %81 = vector.shape_cast %80 : vector<16x16x4xbf16> to vector<256x4xbf16>
    %c2_76 = arith.constant 2 : index
    %c1_77 = arith.constant 1 : index
    %c0_78 = arith.constant 0 : index
    %c0_79 = arith.constant 0 : index
    %82 = vector.load %arg5[%c2_76, %c1_77, %c0_78, %c0_79] : memref<3x3x4x4xbf16, #tpu.memory_space<vmem>>, vector<1x1x4x4xbf16>
    %83 = vector.shape_cast %82 : vector<1x1x4x4xbf16> to vector<4x4xbf16>
    %cst_80 = arith.constant dense<0.000000e+00> : vector<256x4xf32>
    %84 = tpu.matmul %81, %83, %cst_80 {dimension_numbers = #tpu.dot_dimension_numbers<[1], [0], [0], [1], [0, 0, 1, 1], [], []>} : vector<256x4xbf16>, vector<4x4xbf16>, vector<256x4xf32> -> vector<256x4xf32>
    %85 = arith.addf %79, %84 : vector<256x4xf32>
    %c2_81 = arith.constant 2 : index
    %c2_82 = arith.constant 2 : index
    %c0_83 = arith.constant 0 : index
    %86 = vector.load %arg11[%c2_81, %c2_82, %c0_83] : memref<18x18x4xbf16, #tpu.memory_space<vmem>>, vector<16x16x4xbf16>
    %87 = vector.shape_cast %86 : vector<16x16x4xbf16> to vector<256x4xbf16>
    %c2_84 = arith.constant 2 : index
    %c2_85 = arith.constant 2 : index
    %c0_86 = arith.constant 0 : index
    %c0_87 = arith.constant 0 : index
    %88 = vector.load %arg5[%c2_84, %c2_85, %c0_86, %c0_87] : memref<3x3x4x4xbf16, #tpu.memory_space<vmem>>, vector<1x1x4x4xbf16>
    %89 = vector.shape_cast %88 : vector<1x1x4x4xbf16> to vector<4x4xbf16>
    %cst_88 = arith.constant dense<0.000000e+00> : vector<256x4xf32>
    %90 = tpu.matmul %87, %89, %cst_88 {dimension_numbers = #tpu.dot_dimension_numbers<[1], [0], [0], [1], [0, 0, 1, 1], [], []>} : vector<256x4xbf16>, vector<4x4xbf16>, vector<256x4xf32> -> vector<256x4xf32>
    %91 = arith.addf %85, %90 : vector<256x4xf32>
    %92 = vector.broadcast %3 : vector<1x4xf32> to vector<256x4xf32>
    %93 = arith.addf %91, %92 : vector<256x4xf32>
    %cst_89 = arith.constant 0.000000e+00 : f32
    %94 = vector.broadcast %cst_89 : f32 to vector<256x4xf32>
    %95 = arith.maximumf %93, %94 : vector<256x4xf32>
    %96 = arith.truncf %95 : vector<256x4xf32> to vector<256x4xbf16>
    %c0_90 = arith.constant 0 : index
    %c0_91 = arith.constant 0 : index
    %97 = vector.load %arg7[%c0_90, %c0_91] : memref<4x16xbf16, #tpu.memory_space<vmem>>, vector<4x16xbf16>
    %cst_92 = arith.constant dense<0.000000e+00> : vector<256x16xf32>
    %98 = tpu.matmul %96, %97, %cst_92 {dimension_numbers = #tpu.dot_dimension_numbers<[1], [0], [0], [1], [0, 0, 1, 1], [], []>} : vector<256x4xbf16>, vector<4x16xbf16>, vector<256x16xf32> -> vector<256x16xf32>
    %c1_i32_93 = arith.constant 1 : i32
    %99 = arith.addi %1, %c1_i32_93 : i32
    %c0_94 = arith.constant 0 : index
    %100 = arith.index_cast %99 : i32 to index
    %c1_95 = arith.constant 1 : index
    %c0_96 = arith.constant 0 : index
    %101 = vector.load %arg2[%c0_94, %100, %c1_95, %c0_96] : memref<1x18x18x4xbf16, #tpu.memory_space<vmem>>, vector<1x16x16x4xbf16>
    %102 = vector.shape_cast %101 : vector<1x16x16x4xbf16> to vector<16x16x4xbf16>
    %103 = vector.shape_cast %102 : vector<16x16x4xbf16> to vector<256x4xbf16>
    %c0_97 = arith.constant 0 : index
    %c0_98 = arith.constant 0 : index
    %104 = vector.load %arg9[%c0_97, %c0_98] : memref<4x16xbf16, #tpu.memory_space<vmem>>, vector<4x16xbf16>
    %cst_99 = arith.constant dense<0.000000e+00> : vector<256x16xf32>
    %105 = tpu.matmul %103, %104, %cst_99 {dimension_numbers = #tpu.dot_dimension_numbers<[1], [0], [0], [1], [0, 0, 1, 1], [], []>} : vector<256x4xbf16>, vector<4x16xbf16>, vector<256x16xf32> -> vector<256x16xf32>
    %106 = arith.addf %98, %105 : vector<256x16xf32>
    %107 = vector.broadcast %4 : vector<1x16xf32> to vector<256x16xf32>
    %108 = arith.addf %106, %107 : vector<256x16xf32>
    %cst_100 = arith.constant 0.000000e+00 : f32
    %109 = vector.broadcast %cst_100 : f32 to vector<256x16xf32>
    %110 = arith.maximumf %108, %109 : vector<256x16xf32>
    %111 = vector.shape_cast %110 : vector<256x16xf32> to vector<16x16x16xf32>
    %c0_101 = arith.constant 0 : index
    %c0_102 = arith.constant 0 : index
    %c0_103 = arith.constant 0 : index
    %c0_104 = arith.constant 0 : index
    %112 = vector.load %arg10[%c0_101, %c0_102, %c0_103, %c0_104] : memref<1x16x16x16xf32, #tpu.memory_space<vmem>>, vector<1x16x16x16xf32>
    %113 = vector.shape_cast %112 : vector<1x16x16x16xf32> to vector<16x16x16xf32>
    %114 = vector.shape_cast %111 : vector<16x16x16xf32> to vector<1x16x16x16xf32>
    tpu.vector_store %arg10[%c0_101, %c0_102, %c0_103, %c0_104], %114 {strides = array<i32>} : memref<1x16x16x16xf32, #tpu.memory_space<vmem>>, vector<1x16x16x16xf32>,
    return
  }
  func.func @transform_0(%arg0: i32, %arg1: i32) -> (i32, i32, i32, i32) {
    %c0_i32 = arith.constant 0 : i32
    %c0_i32_0 = arith.constant 0 : i32
    %c0_i32_1 = arith.constant 0 : i32
    %c0_i32_2 = arith.constant 0 : i32
    return %arg0, %c0_i32, %c0_i32_0, %c0_i32_1 : i32, i32, i32, i32
  }
  func.func @transform_1(%arg0: i32, %arg1: i32) -> (i32, i32) {
    %c0_i32 = arith.constant 0 : i32
    %c0_i32_0 = arith.constant 0 : i32
    %c0_i32_1 = arith.constant 0 : i32
    return %c0_i32, %c0_i32_0 : i32, i32
  }
  func.func @transform_2(%arg0: i32, %arg1: i32) -> (i32, i32) {
    %c0_i32 = arith.constant 0 : i32
    %c0_i32_0 = arith.constant 0 : i32
    %c0_i32_1 = arith.constant 0 : i32
    return %c0_i32, %c0_i32_0 : i32, i32
  }
  func.func @transform_3(%arg0: i32, %arg1: i32) -> (i32, i32, i32, i32) {
    %c0_i32 = arith.constant 0 : i32
    %c0_i32_0 = arith.constant 0 : i32
    %c0_i32_1 = arith.constant 0 : i32
    %c0_i32_2 = arith.constant 0 : i32
    %c0_i32_3 = arith.constant 0 : i32
    return %c0_i32, %c0_i32_0, %c0_i32_1, %c0_i32_2 : i32, i32, i32, i32
  }
  func.func @transform_4(%arg0: i32, %arg1: i32) -> (i32, i32) {
    %c0_i32 = arith.constant 0 : i32
    %c0_i32_0 = arith.constant 0 : i32
    %c0_i32_1 = arith.constant 0 : i32
    return %c0_i32, %c0_i32_0 : i32, i32
  }
  func.func @transform_5(%arg0: i32, %arg1: i32) -> (i32, i32) {
    %c0_i32 = arith.constant 0 : i32
    %c0_i32_0 = arith.constant 0 : i32
    %c0_i32_1 = arith.constant 0 : i32
    return %c0_i32, %c0_i32_0 : i32, i32
  }
  func.func @transform_6(%arg0: i32, %arg1: i32) -> (i32, i32) {
    %c0_i32 = arith.constant 0 : i32
    %c0_i32_0 = arith.constant 0 : i32
    %c0_i32_1 = arith.constant 0 : i32
    return %c0_i32, %c0_i32_0 : i32, i32
  }
  func.func @transform_7(%arg0: i32, %arg1: i32) -> (i32, i32) {
    %c0_i32 = arith.constant 0 : i32
    %c0_i32_0 = arith.constant 0 : i32
    %c0_i32_1 = arith.constant 0 : i32
    return %c0_i32, %c0_i32_0 : i32, i32
  }
  func.func @transform_8(%arg0: i32, %arg1: i32) -> (i32, i32, i32, i32) {
    %c0_i32 = arith.constant 0 : i32
    %c0_i32_0 = arith.constant 0 : i32
    %c0_i32_1 = arith.constant 0 : i32
    return %arg0, %arg1, %c0_i32, %c0_i32_0 : i32, i32, i32, i32
  }
}

</mosaic_0001>

<bundles_post_ra>
// kernel: bottleneck_forward.1
= control target key start
LH: loop header
LB: loop body
LE: loop exit
PB: predicated region body
PF: predicated region fallthrough
CT: control target
= control target key end

     0   :  { %s12358_s27 = smov 0   ;;  %s12360_s28 = smov 0   ;;  %s15331_s0 = inlined_call_operand.vmem [shape: bf16[2,18,18,4], index: 0, kind: input, shape index: {}]   ;;  %s15332_s1 = inlined_call_operand.vmem [shape: bf16[4,4], index: 1, kind: input, shape index: {}]   ;;  %s15333_s2 = inlined_call_operand.vmem [shape: f32[1,4], index: 2, kind: input, shape index: {}]   ;;  %s15334_s3 = inlined_call_operand.vmem [shape: bf16[3,3,4,4], index: 3, kind: input, shape index: {}]   ;;  %s15335_s4 = inlined_call_operand.vmem [shape: f32[1,4], index: 4, kind: input, shape index: {}]   ;;  %s15336_s5 = inlined_call_operand.vmem [shape: bf16[4,16], index: 5, kind: input, shape index: {}]   ;;  %s15337_s6 = inlined_call_operand.vmem [shape: f32[1,16], index: 6, kind: input, shape index: {}]   ;;  %s15338_s7 = inlined_call_operand.vmem [shape: bf16[4,16], index: 7, kind: input, shape index: {}]   ;;  %s15339_s8 = inlined_call_operand.vmem [shape: f32[2,16,16,16], index: 8, kind: output, shape index: {}]  }
   0x1   :  { %s12362_s29 = smov 0  }
   0x2 LB: > { %s30_s30 = sadd.s32 1, %s12302_s28  ;;  %p10790_p0 = scmp.ge.s32.totalorder %s12306_s29, 1  ;;  %s12306_s29 = sphi %s12362_s29, %s18_s29   ;;  %s12302_s28 = sphi %s12360_s28, %s15550_s28   ;;  %s12298_s27 = sphi %s12358_s27, %s15549_s27  }
   0x3   : > { %p32_p1 = scmp.ge.s32.totalorder %s30_s30, 2  ;;  %p276_p2 = scmp.lt.s32.totalorder %s12306_s29, 3 }
   0x5   : > { %s15552_s30 = smov (%p32_p1, %s30_s30), 0  ;;  %p277_p3 = pnand %p10790_p0, %p276_p2 }
   0x7   : > { %280 = sbr.rel (%p277_p3) target bundleno = 1180 (0x49c), region = 52 }
   0xc   : > { %v1563_v0 = vld [vmem:[%s15332_s1] sm:$0x3]  ;;  %vm2629_vm0 = vcmask 1041408   ;;  %p315_p4 = scmp.lt.s32.totalorder %s12298_s27, 1  ;;  %v458_v1 = vlaneseq  ;;  %v12308_v2 = vmov 0.0   ;;  %vm12309_vm1 = vmmov 0  }
   0xd   : > { %11644 = vmatprep.subr.bf16.mxu0 %v12308_v2  ;;  %v2631_v3 = vsel %vm2629_vm0, %v1563_v0, 0  ;;  %11646 = vmatprep.mubr.msk.bf16.mxu0 %vm12309_vm1, %v12308_v2  ;;  %v12310_v4 = vmov 1966171168   ;;  %vm2565_vm2 = vcmask 31744   ;;  %vm4981_vm3 = vcmask 27648  }
   0xe   : > { %11645 = vmatpush3.bf16.msra.mxu0 %v2631_v3  ;;  %s15554_s27 = smov (!%p315_p4, %s12298_s27), 1  ;;  %v456_v5 = vunpack.c.l.s4 %v12310_v4  ;;  %v12385_v6 = vshrl.u32 %v458_v1, 7  ;;  %vm4984_vm4 = vcmask 24576   ;;  %vm5086_vm5 = vsmask.f32 3328 }
   0xf   : > { %s12118_s11 = smul.u32 216, %s15554_s27  ;;  %vm5087_vm6 = vsmask.f32 7440  ;;  %vm6075_vm10 = vcmask 1042432   ;;  %vm6076_vm11 = vcmask 1046532   ;;  %s11386_s16 = sshll.u32 %s15554_s27, 8 }
  0x10   : > { %v457_v7 = vunpack.c.0.s8 %v456_v5  ;;  %vm12740_vm7 = vmor %vm5086_vm5, %vm5087_vm6  ;;  %vm3679_vm8 = vcmp.ge.s32.totalorder %v12385_v6, 1  ;;  %s15206_s19 = scalar_lea.vmem %s15339_s8, %s11386_s16  ;;  %vm10660_vm13 = vcmask 130048  }
  0x11   : > { %s12391_s14 = scalar_lea.vmem %s15331_s0, %s12118_s11  ;;  %vm13309_vm12 = vmor %vm6075_vm10, %vm6076_vm11 }
  0x12   : > { %v12394_v8 = vsub.s32 %v457_v7, %v12385_v6  ;;  %v10794_v9 = vld.sshfl [vmem:[%s12391_s14] sm:$0x33 pattern:$0x75316420] }
  0x13   : > { %v10795_v10 = vld.sshfl [vmem:[%s12391_s14 + $0x4] sm:$0x33 pattern:$0x75316420]  ;;  %v454_v11 = vcombine.high %v10794_v9, %v10794_v9 }
  0x14   : > { %v461_v12 = vrot.slane %v10794_v9, %v12394_v8  ;;  %v478_v13 = vcombine.high %v10795_v10, %v10795_v10  ;;  %v485_v14 = vrot.slane %v10795_v10, %v12394_v8  ;;  %v10796_v15 = vld.sshfl [vmem:[%s12391_s14 + $0x8] sm:$0x1 pattern:$0x75316420] }
  0x15   : > { %v468_v16 = vrot.slane %v454_v11, %v12394_v8  ;;  %v10797_v17 = vld.sshfl [vmem:[%s12391_s14 + $0xc] sm:$0x33 pattern:$0x75316420]  ;;  %v508_v20 = vrot.slane %v10796_v15, %v12394_v8 }
  0x16   : > { %v492_v18 = vrot.slane %v478_v13, %v12394_v8  ;;  %v10798_v19 = vld.sshfl [vmem:[%s12391_s14 + $0x10] sm:$0x33 pattern:$0x75316420]  ;;  %v516_v21 = vcombine.high %v10797_v17, %v10797_v17  ;;  %v523_v22 = vrot.slane %v10797_v17, %v12394_v8 }
  0x17   : > { %v1570_v23 = vcombine.low %v461_v12, %v468_v16  ;;  %v10849_v24 = vcombine.high %v461_v12, %v468_v16  ;;  %v540_v25 = vcombine.high %v10798_v19, %v10798_v19  ;;  %v547_v26 = vrot.slane %v10798_v19, %v12394_v8  ;;  %v10799_v35 = vld.sshfl [vmem:[%s12391_s14 + $0x14] sm:$0x1 pattern:$0x75316420] }
  0x18   : > { %v1572_v27 = vcombine.low %v485_v14, %v492_v18  ;;  %v10850_v28 = vcombine.high %v485_v14, %v492_v18  ;;  %v530_v29 = vrot.slane %v516_v21, %v12394_v8  ;;  %v531_v30 = vcombine.high %v523_v22, %v523_v22  ;;  %v10800_v40 = vld.sshfl [vmem:[%s12391_s14 + $0x18] sm:$0x33 pattern:$0x75316420] }
  0x19   : > { %v1580_v31 = vrot.slane %v1570_v23, %v12394_v8  ;;  %v1587_v32 = vrot.slane %v10849_v24, %v12394_v8  ;;  %v554_v33 = vrot.slane %v540_v25, %v12394_v8  ;;  %v555_v34 = vcombine.high %v547_v26, %v547_v26  ;;  %v10801_v44 = vld.sshfl [vmem:[%s12391_s14 + $0x1c] sm:$0x33 pattern:$0x75316420] }
  0x1a   : > { %v1594_v36 = vrot.slane %v1572_v27, %v12394_v8  ;;  %v1601_v37 = vrot.slane %v10850_v28, %v12394_v8  ;;  %v532_v38 = vcombine.high %v530_v29, %v530_v29  ;;  %v1619_v39 = vcombine.low %v508_v20, %v523_v22  ;;  %v10802_v54 = vld.sshfl [vmem:[%s12391_s14 + $0x20] sm:$0x1 pattern:$0x75316420] }
  0x1b   : > { %v1602_v41 = vcombine.low %v1580_v31, %v1587_v32  ;;  %v1620_v42 = vcombine.low %v530_v29, %v531_v30  ;;  %v1622_v43 = vcombine.low %v554_v33, %v555_v34  ;;  %v556_v45 = vcombine.high %v554_v33, %v554_v33  ;;  %v10803_v63 = vld.sshfl [vmem:[%s12391_s14 + $0x24] sm:$0x33 pattern:$0x75316420] }
  0x1c   : > { %v1603_v46 = vcombine.low %v1594_v36, %v1601_v37  ;;  %v1621_v47 = vcombine.low %v532_v38, %v547_v26  ;;  %v1629_v48 = vrot.slane %v1619_v39, %v12394_v8  ;;  %v570_v49 = vrot.slane %v10799_v35, %v12394_v8  ;;  %v10804_v4 = vld.sshfl [vmem:[%s12391_s14 + $0x28] sm:$0x33 pattern:$0x75316420] }
  0x1d   : > { %v1610_v50 = vrot.slane %v1602_v41, %v12394_v8  ;;  %v1636_v51 = vrot.slane %v1620_v42, %v12394_v8  ;;  %v1650_v52 = vrot.slane %v1622_v43, %v12394_v8  ;;  %v578_v53 = vcombine.high %v10800_v40, %v10800_v40  ;;  %v10805_v23 = vld.sshfl [vmem:[%s12391_s14 + $0x2c] sm:$0x1 pattern:$0x75316420] }
  0x1e   : > { %v1617_v55 = vrot.slane %v1603_v46, %v12394_v8  ;;  %v1643_v56 = vrot.slane %v1621_v47, %v12394_v8  ;;  %v585_v57 = vrot.slane %v10800_v40, %v12394_v8  ;;  %v602_v58 = vcombine.high %v10801_v44, %v10801_v44  ;;  %v10806_v26 = vld.sshfl [vmem:[%s12391_s14 + $0x30] sm:$0x33 pattern:$0x75316420] }
  0x1f   : > { %v1651_v59 = vcombine.low %v1629_v48, %v1636_v51  ;;  %v592_v60 = vrot.slane %v578_v53, %v12394_v8  ;;  %v609_v61 = vrot.slane %v10801_v44, %v12394_v8  ;;  %v1668_v62 = vcombine.low %v556_v45, %v570_v49  ;;  %v10807_v42 = vld.sshfl [vmem:[%s12391_s14 + $0x34] sm:$0x33 pattern:$0x75316420] }
  0x20   : > { %v1618_v0 = vcombine.low %v1610_v50, %v1617_v55  ;;  %v1652_v1 = vcombine.low %v1643_v56, %v1650_v52  ;;  %v616_v3 = vrot.slane %v602_v58, %v12394_v8  ;;  %v632_v5 = vrot.slane %v10802_v54, %v12394_v8  ;;  %v10809_v47 = vld.sshfl [vmem:[%s12391_s14 + $0x3c] sm:$0x33 pattern:$0x75316420] }
  0x21   : > { %v1659_v7 = vrot.slane %v1651_v59, %v12394_v8  ;;  %v1669_v9 = vcombine.low %v585_v57, %v592_v60  ;;  %v10851_v10 = vcombine.high %v585_v57, %v592_v60  ;;  %v1678_v11 = vrot.slane %v1668_v62, %v12394_v8  ;;  %v10808_v53 = vld.sshfl [vmem:[%s12391_s14 + $0x38] sm:$0x1 pattern:$0x75316420] }
  0x22   : > { %11647 = vmatmul.mubr.msk.bf16.vlgmr.msra.gmra.mxu0 %vm2565_vm2, %v1618_v0  ;;  %v1666_v12 = vrot.slane %v1652_v1, %v12394_v8  ;;  %v1671_v13 = vcombine.low %v609_v61, %v616_v3  ;;  %v640_v14 = vcombine.high %v10803_v63, %v10803_v63  ;;  %v647_v15 = vrot.slane %v10803_v63, %v12394_v8  ;;  %v10810_v60 = vld.sshfl [vmem:[%s12391_s14 + $0x40] sm:$0x33 pattern:$0x75316420] }
  0x23   : > { %11650 = vmatprep.mubr.msk.bf16.mxu0 %vm12309_vm1, %v12308_v2  ;;  %v1685_v16 = vrot.slane %v1669_v9, %v12394_v8  ;;  %v1692_v17 = vrot.slane %v10851_v10, %v12394_v8  ;;  %v671_v18 = vrot.slane %v10804_v4, %v12394_v8  ;;  %v10852_v22 = vcombine.high %v609_v61, %v616_v3 }
  0x24   : > { %v1699_v19 = vrot.slane %v1671_v13, %v12394_v8  ;;  %v654_v20 = vrot.slane %v640_v14, %v12394_v8  ;;  %v655_v21 = vcombine.high %v647_v15, %v647_v15  ;;  %v1718_v25 = vcombine.low %v632_v5, %v647_v15 }
  0x25   : > { %v1700_v24 = vcombine.low %v1678_v11, %v1685_v16  ;;  %v664_v27 = vcombine.high %v10804_v4, %v10804_v4  ;;  %v1667_v28 = vcombine.low %v1659_v7, %v1666_v12  ;;  %v679_v33 = vcombine.high %v671_v18, %v671_v18  ;;  %v10812_v11 = vld.sshfl [vmem:[%s12391_s14 + $0x48] sm:$0x33 pattern:$0x75316420] }
  0x26   : > { %v1701_v29 = vcombine.low %v1692_v17, %v1699_v19  ;;  %v656_v30 = vcombine.high %v654_v20, %v654_v20  ;;  %v1719_v31 = vcombine.low %v654_v20, %v655_v21  ;;  %v1727_v35 = vrot.slane %v10852_v22, %v12394_v8  ;;  %v10811_v22 = vld.sshfl [vmem:[%s12391_s14 + $0x44] sm:$0x1 pattern:$0x75316420] }
  0x27   : > { %v678_v32 = vrot.slane %v664_v27, %v12394_v8  ;;  %v694_v36 = vrot.slane %v10805_v23, %v12394_v8  ;;  %v702_v37 = vcombine.high %v10806_v26, %v10806_v26  ;;  %v1708_v38 = vrot.slane %v1700_v24, %v12394_v8 }
  0x28   : > { %v1720_v34 = vcombine.low %v656_v30, %v671_v18  ;;  %v1734_v39 = vrot.slane %v1718_v25, %v12394_v8  ;;  %v709_v41 = vrot.slane %v10806_v26, %v12394_v8  ;;  %v1715_v43 = vrot.slane %v1701_v29, %v12394_v8 }
  0x29   : > { %v680_v40 = vcombine.high %v678_v32, %v678_v32  ;;  %v1741_v44 = vrot.slane %v1719_v31, %v12394_v8  ;;  %v716_v46 = vrot.slane %v702_v37, %v12394_v8  ;;  %v1766_v48 = vcombine.low %v678_v32, %v679_v33 }
  0x2a   : > { %11651 = vmatmul.mubr.msk.bf16.gmra.mxu0 %vm2565_vm2, %v1667_v28  ;;  %v1748_v45 = vrot.slane %v1720_v34, %v12394_v8  ;;  %v726_v50 = vcombine.high %v10807_v42, %v10807_v42  ;;  %v764_v54 = vcombine.high %v10809_v47, %v10809_v47  ;;  %v771_v55 = vrot.slane %v10809_v47, %v12394_v8 }
  0x2b   : > { %11654 = vmatprep.mubr.msk.bf16.mxu0 %vm12309_vm1, %v12308_v2  ;;  %v1767_v49 = vcombine.low %v680_v40, %v694_v36  ;;  %v1768_v51 = vcombine.low %v709_v41, %v716_v46  ;;  %v10853_v52 = vcombine.high %v709_v41, %v716_v46  ;;  %v1716_v56 = vcombine.low %v1708_v38, %v1715_v43  ;;  %v10816_v46 = vld.sshfl [vmem:[%s12391_s14 + $0x58] sm:$0x33 pattern:$0x75316420] }
  0x2c   : > { %v1749_v57 = vcombine.low %v1727_v35, %v1734_v39  ;;  %v1750_v58 = vcombine.low %v1741_v44, %v1748_v45  ;;  %v1776_v59 = vrot.slane %v1766_v48, %v12394_v8  ;;  %v733_v62 = vrot.slane %v10807_v42, %v12394_v8  ;;  %v10813_v35 = vld.sshfl [vmem:[%s12391_s14 + $0x4c] sm:$0x33 pattern:$0x75316420] }
  0x2d   : > { %v1783_v61 = vrot.slane %v1767_v49, %v12394_v8  ;;  %v740_v63 = vrot.slane %v726_v50, %v12394_v8  ;;  %v756_v0 = vrot.slane %v10808_v53, %v12394_v8  ;;  %v1790_v1 = vrot.slane %v1768_v51, %v12394_v8  ;;  %v10814_v39 = vld.sshfl [vmem:[%s12391_s14 + $0x50] sm:$0x1 pattern:$0x75316420] }
  0x2e   : > { %v1797_v3 = vrot.slane %v10853_v52, %v12394_v8  ;;  %v778_v4 = vrot.slane %v764_v54, %v12394_v8  ;;  %v779_v5 = vcombine.high %v771_v55, %v771_v55  ;;  %v1757_v7 = vrot.slane %v1749_v57, %v12394_v8  ;;  %v10815_v45 = vld.sshfl [vmem:[%s12391_s14 + $0x54] sm:$0x33 pattern:$0x75316420] }
  0x2f   : > { %v1764_v9 = vrot.slane %v1750_v58, %v12394_v8  ;;  %v788_v10 = vcombine.high %v10810_v60, %v10810_v60  ;;  %v1815_v12 = vcombine.low %v733_v62, %v740_v63  ;;  %v10854_v13 = vcombine.high %v733_v62, %v740_v63 }
  0x30   : > { %v795_v14 = vrot.slane %v10810_v60, %v12394_v8  ;;  %v1798_v15 = vcombine.low %v1776_v59, %v1783_v61  ;;  %v1799_v16 = vcombine.low %v1790_v1, %v1797_v3  ;;  %v1817_v17 = vcombine.low %v756_v0, %v771_v55 }
  0x31   : > { %v1818_v18 = vcombine.low %v778_v4, %v779_v5  ;;  %v1765_v19 = vcombine.low %v1757_v7, %v1764_v9  ;;  %v802_v20 = vrot.slane %v788_v10, %v12394_v8  ;;  %v826_v21 = vcombine.high %v10812_v11, %v10812_v11  ;;  %v10817_v7 = vld.sshfl [vmem:[%s12391_s14 + $0x5c] sm:$0x1 pattern:$0x75316420] }
  0x32   : > { %11655 = vmatmul.mubr.msk.bf16.gmra.mxu0 %vm2565_vm2, %v1716_v56  ;;  %v1825_v23 = vrot.slane %v1815_v12, %v12394_v8  ;;  %v1832_v24 = vrot.slane %v10854_v13, %v12394_v8  ;;  %v780_v25 = vcombine.high %v778_v4, %v778_v4  ;;  %v803_v26 = vcombine.high %v795_v14, %v795_v14  ;;  %v10818_v12 = vld.sshfl [vmem:[%s12391_s14 + $0x60] sm:$0x33 pattern:$0x75316420] }
  0x33   : > { %11658 = vmatprep.mubr.msk.bf16.mxu0 %vm12309_vm1, %v12308_v2  ;;  %v1806_v27 = vrot.slane %v1798_v15, %v12394_v8  ;;  %v1813_v28 = vrot.slane %v1799_v16, %v12394_v8  ;;  %v1839_v29 = vrot.slane %v1817_v17, %v12394_v8  ;;  %v1846_v30 = vrot.slane %v1818_v18, %v12394_v8  ;;  %v10819_v17 = vld.sshfl [vmem:[%s12391_s14 + $0x64] sm:$0x33 pattern:$0x75316420] }
  0x34   : > { %v804_v31 = vcombine.high %v802_v20, %v802_v20  ;;  %v818_v32 = vrot.slane %v10811_v22, %v12394_v8  ;;  %v833_v33 = vrot.slane %v10812_v11, %v12394_v8  ;;  %v840_v34 = vrot.slane %v826_v21, %v12394_v8 }
  0x35   : > { %v1847_v36 = vcombine.low %v1825_v23, %v1832_v24  ;;  %v1864_v37 = vcombine.low %v780_v25, %v795_v14  ;;  %v1865_v38 = vcombine.low %v802_v20, %v803_v26  ;;  %v850_v40 = vcombine.high %v10813_v35, %v10813_v35 }
  0x36   : > { %v1814_v41 = vcombine.low %v1806_v27, %v1813_v28  ;;  %v1848_v42 = vcombine.low %v1839_v29, %v1846_v30  ;;  %v1866_v43 = vcombine.low %v804_v31, %v818_v32  ;;  %v1867_v44 = vcombine.low %v833_v33, %v840_v34  ;;  %v10821_v31 = vld.sshfl [vmem:[%s12391_s14 + $0x6c] sm:$0x33 pattern:$0x75316420] }
  0x37   : > { %v1855_v47 = vrot.slane %v1847_v36, %v12394_v8  ;;  %v1874_v48 = vrot.slane %v1864_v37, %v12394_v8  ;;  %v1881_v49 = vrot.slane %v1865_v38, %v12394_v8  ;;  %v857_v50 = vrot.slane %v10813_v35, %v12394_v8 }
  0x38   : > { %v864_v51 = vrot.slane %v850_v40, %v12394_v8  ;;  %v880_v52 = vrot.slane %v10814_v39, %v12394_v8  ;;  %v895_v53 = vrot.slane %v10815_v45, %v12394_v8  ;;  %v888_v54 = vcombine.high %v10815_v45, %v10815_v45  ;;  %v10822_v45 = vld.sshfl [vmem:[%s12391_s14 + $0x70] sm:$0x33 pattern:$0x75316420] }
  0x39   : > { %v1862_v55 = vrot.slane %v1848_v42, %v12394_v8  ;;  %v1888_v56 = vrot.slane %v1866_v43, %v12394_v8  ;;  %v1895_v57 = vrot.slane %v1867_v44, %v12394_v8  ;;  %v912_v58 = vcombine.high %v10816_v46, %v10816_v46 }
  0x3a   : > { %11659 = vmatmul.mubr.msk.bf16.gmra.mxu0 %vm2565_vm2, %v1765_v19  ;;  %v1896_v59 = vcombine.low %v1874_v48, %v1881_v49  ;;  %v10855_v60 = vcombine.high %v833_v33, %v840_v34  ;;  %v1914_v61 = vcombine.low %v857_v50, %v864_v51  ;;  %v10856_v62 = vcombine.high %v857_v50, %v864_v51  ;;  %v10820_v50 = vld.sshfl [vmem:[%s12391_s14 + $0x68] sm:$0x1 pattern:$0x75316420] }
  0x3b   : > { %11662 = vmatprep.mubr.msk.bf16.mxu0 %vm12309_vm1, %v12308_v2  ;;  %v1916_v63 = vcombine.low %v880_v52, %v895_v53  ;;  %v902_v0 = vrot.slane %v888_v54, %v12394_v8  ;;  %v1863_v1 = vcombine.low %v1855_v47, %v1862_v55  ;;  %v1897_v3 = vcombine.low %v1888_v56, %v1895_v57 }
  0x3c   : > { %v919_v4 = vrot.slane %v10816_v46, %v12394_v8  ;;  %v926_v5 = vrot.slane %v912_v58, %v12394_v8  ;;  %v1904_v9 = vrot.slane %v1896_v59, %v12394_v8  ;;  %v1923_v10 = vrot.slane %v10855_v60, %v12394_v8 }
  0x3d   : > { %v903_v11 = vcombine.high %v895_v53, %v895_v53  ;;  %v1930_v13 = vrot.slane %v1914_v61, %v12394_v8  ;;  %v1937_v14 = vrot.slane %v10856_v62, %v12394_v8  ;;  %v1944_v15 = vrot.slane %v1916_v63, %v12394_v8 }
  0x3e   : > { %v904_v16 = vcombine.high %v902_v0, %v902_v0  ;;  %v1911_v18 = vrot.slane %v1897_v3, %v12394_v8  ;;  %v927_v19 = vcombine.high %v919_v4, %v919_v4  ;;  %v928_v20 = vcombine.high %v926_v5, %v926_v5 }
  0x3f   : > { %v942_v21 = vrot.slane %v10817_v7, %v12394_v8  ;;  %v950_v22 = vcombine.high %v10818_v12, %v10818_v12  ;;  %v974_v23 = vcombine.high %v10819_v17, %v10819_v17  ;;  %v1945_v24 = vcombine.low %v1923_v10, %v1930_v13  ;;  %v10825_v7 = vld.sshfl [vmem:[%s12391_s14 + $0x7c] sm:$0x33 pattern:$0x75316420] }
  0x40   : > { %v1946_v25 = vcombine.low %v1937_v14, %v1944_v15  ;;  %v1962_v26 = vcombine.low %v902_v0, %v903_v11  ;;  %v1912_v27 = vcombine.low %v1904_v9, %v1911_v18  ;;  %v1963_v28 = vcombine.low %v904_v16, %v919_v4  ;;  %v10824_v4 = vld.sshfl [vmem:[%s12391_s14 + $0x78] sm:$0x33 pattern:$0x75316420] }
  0x41   : > { %v1964_v29 = vcombine.low %v926_v5, %v927_v19  ;;  %v1965_v30 = vcombine.low %v928_v20, %v942_v21  ;;  %v957_v32 = vrot.slane %v10818_v12, %v12394_v8  ;;  %v964_v33 = vrot.slane %v950_v22, %v12394_v8  ;;  %v10823_v13 = vld.sshfl [vmem:[%s12391_s14 + $0x74] sm:$0x1 pattern:$0x75316420] }
  0x42   : > { %11663 = vmatmul.mubr.msk.bf16.gmra.mxu0 %vm2565_vm2, %v1814_v41  ;;  %v981_v34 = vrot.slane %v10819_v17, %v12394_v8  ;;  %v988_v35 = vrot.slane %v974_v23, %v12394_v8  ;;  %v1953_v36 = vrot.slane %v1945_v24, %v12394_v8  ;;  %v1960_v37 = vrot.slane %v1946_v25, %v12394_v8  ;;  %v10827_v18 = vld.sshfl [vmem:[%s12391_s14 + $0x84] sm:$0x33 pattern:$0x75316420] }
  0x43   : > { %11666 = vmatprep.mubr.msk.bf16.mxu0 %vm12309_vm1, %v12308_v2  ;;  %v1012_v38 = vcombine.high %v10821_v31, %v10821_v31  ;;  %v1972_v39 = vrot.slane %v1962_v26, %v12394_v8  ;;  %v1979_v40 = vrot.slane %v1963_v28, %v12394_v8  ;;  %v1986_v41 = vrot.slane %v1964_v29, %v12394_v8 }
  0x44   : > { %v1993_v42 = vrot.slane %v1965_v30, %v12394_v8  ;;  %v2011_v43 = vcombine.low %v957_v32, %v964_v33  ;;  %v10857_v44 = vcombine.high %v957_v32, %v964_v33  ;;  %v2013_v46 = vcombine.low %v981_v34, %v988_v35 }
  0x45   : > { %v10858_v47 = vcombine.high %v981_v34, %v988_v35  ;;  %v1019_v48 = vrot.slane %v10821_v31, %v12394_v8  ;;  %v1961_v49 = vcombine.low %v1953_v36, %v1960_v37  ;;  %v1026_v51 = vrot.slane %v1012_v38, %v12394_v8  ;;  %v10826_v35 = vld.sshfl [vmem:[%s12391_s14 + $0x80] sm:$0x1 pattern:$0x75316420] }
  0x46   : > { %v1994_v52 = vcombine.low %v1972_v39, %v1979_v40  ;;  %v1995_v53 = vcombine.low %v1986_v41, %v1993_v42  ;;  %v1036_v54 = vcombine.high %v10822_v45, %v10822_v45  ;;  %v1043_v55 = vrot.slane %v10822_v45, %v12394_v8  ;;  %v10828_v42 = vld.sshfl [vmem:[%s12391_s14 + $0x88] sm:$0x33 pattern:$0x75316420] }
  0x47   : > { %v2021_v56 = vrot.slane %v2011_v43, %v12394_v8  ;;  %v2028_v57 = vrot.slane %v10857_v44, %v12394_v8  ;;  %v2035_v58 = vrot.slane %v2013_v46, %v12394_v8  ;;  %v2042_v59 = vrot.slane %v10858_v47, %v12394_v8 }
  0x48   : > { %v1004_v60 = vrot.slane %v10820_v50, %v12394_v8  ;;  %v1027_v61 = vcombine.high %v1019_v48, %v1019_v48  ;;  %v1028_v62 = vcombine.high %v1026_v51, %v1026_v51  ;;  %v2002_v63 = vrot.slane %v1994_v52, %v12394_v8  ;;  %v10830_v50 = vld.sshfl [vmem:[%s12391_s14 + $0x90] sm:$0x33 pattern:$0x75316420] }
  0x49   : > { %v2009_v0 = vrot.slane %v1995_v53, %v12394_v8  ;;  %v1051_v3 = vcombine.high %v1043_v55, %v1043_v55  ;;  %v2043_v5 = vcombine.low %v2021_v56, %v2028_v57  ;;  %v2044_v9 = vcombine.low %v2035_v58, %v2042_v59  ;;  %v10829_v56 = vld.sshfl [vmem:[%s12391_s14 + $0x8c] sm:$0x1 pattern:$0x75316420] }
  0x4a   : > { %11667 = vmatmul.mubr.msk.bf16.gmra.mxu0 %vm2565_vm2, %v1863_v1  ;;  %v1050_v1 = vrot.slane %v1036_v54, %v12394_v8  ;;  %v2060_v10 = vcombine.low %v1004_v60, %v1019_v48  ;;  %v2061_v11 = vcombine.low %v1026_v51, %v1027_v61  ;;  %v2062_v12 = vcombine.low %v1028_v62, %v1043_v55 }
  0x4b   : > { %11670 = vmatprep.mubr.msk.bf16.mxu0 %vm12309_vm1, %v12308_v2  ;;  %v2010_v14 = vcombine.low %v2002_v63, %v2009_v0  ;;  %v1074_v16 = vcombine.high %v10824_v4, %v10824_v4  ;;  %v1098_v17 = vcombine.high %v10825_v7, %v10825_v7  ;;  %v2051_v19 = vrot.slane %v2043_v5, %v12394_v8  ;;  %v10831_v5 = vld.sshfl [vmem:[%s12391_s14 + $0x94] sm:$0x33 pattern:$0x75316420] }
  0x4c   : > { %v2063_v15 = vcombine.low %v1050_v1, %v1051_v3  ;;  %v2058_v20 = vrot.slane %v2044_v9, %v12394_v8  ;;  %v2070_v21 = vrot.slane %v2060_v10, %v12394_v8  ;;  %v2077_v22 = vrot.slane %v2061_v11, %v12394_v8 }
  0x4d   : > { %v1052_v23 = vcombine.high %v1050_v1, %v1050_v1  ;;  %v2084_v24 = vrot.slane %v2062_v12, %v12394_v8  ;;  %v1066_v25 = vrot.slane %v10823_v13, %v12394_v8  ;;  %v1081_v26 = vrot.slane %v10824_v4, %v12394_v8 }
  0x4e   : > { %v2091_v28 = vrot.slane %v2063_v15, %v12394_v8  ;;  %v1088_v29 = vrot.slane %v1074_v16, %v12394_v8  ;;  %v1105_v30 = vrot.slane %v10825_v7, %v12394_v8  ;;  %v1112_v31 = vrot.slane %v1098_v17, %v12394_v8  ;;  %v10833_v16 = vld.sshfl [vmem:[%s12391_s14 + $0x9c] sm:$0x33 pattern:$0x75316420] }
  0x4f   : > { %v2092_v32 = vcombine.low %v2070_v21, %v2077_v22  ;;  %v2059_v33 = vcombine.low %v2051_v19, %v2058_v20  ;;  %v2109_v34 = vcombine.low %v1052_v23, %v1066_v25  ;;  %v1143_v36 = vrot.slane %v10827_v18, %v12394_v8 }
  0x50   : > { %v2093_v38 = vcombine.low %v2084_v24, %v2091_v28  ;;  %v2110_v39 = vcombine.low %v1081_v26, %v1088_v29  ;;  %v10859_v40 = vcombine.high %v1081_v26, %v1088_v29  ;;  %v2112_v41 = vcombine.low %v1105_v30, %v1112_v31  ;;  %v10832_v24 = vld.sshfl [vmem:[%s12391_s14 + $0x98] sm:$0x1 pattern:$0x75316420] }
  0x51   : > { %v1160_v43 = vcombine.high %v10828_v42, %v10828_v42  ;;  %v2100_v44 = vrot.slane %v2092_v32, %v12394_v8  ;;  %v1128_v45 = vrot.slane %v10826_v35, %v12394_v8  ;;  %v2119_v46 = vrot.slane %v2109_v34, %v12394_v8  ;;  %v10834_v32 = vld.sshfl [vmem:[%s12391_s14 + $0xa0] sm:$0x33 pattern:$0x75316420] }
  0x52   : > { %11671 = vmatmul.mubr.msk.bf16.gmra.mxu0 %vm2565_vm2, %v1912_v27  ;;  %v1136_v27 = vcombine.high %v10827_v18, %v10827_v18  ;;  %v1151_v47 = vcombine.high %v1143_v36, %v1143_v36  ;;  %v2107_v51 = vrot.slane %v2093_v38, %v12394_v8  ;;  %v2126_v52 = vrot.slane %v2110_v39, %v12394_v8 }
  0x53   : > { %11674 = vmatprep.mubr.msk.bf16.mxu0 %vm12309_vm1, %v12308_v2  ;;  %v2133_v53 = vrot.slane %v10859_v40, %v12394_v8  ;;  %v2140_v54 = vrot.slane %v2112_v41, %v12394_v8  ;;  %v1174_v55 = vrot.slane %v1160_v43, %v12394_v8  ;;  %v1198_v57 = vcombine.high %v10830_v50, %v10830_v50 }
  0x54   : > { %v1150_v37 = vrot.slane %v1136_v27, %v12394_v8  ;;  %v10860_v58 = vcombine.high %v1105_v30, %v1112_v31  ;;  %v2159_v59 = vcombine.low %v1128_v45, %v1143_v36  ;;  %v2108_v62 = vcombine.low %v2100_v44, %v2107_v51  ;;  %v10836_v44 = vld.sshfl [vmem:[%s12391_s14 + $0xa8] sm:$0x33 pattern:$0x75316420] }
  0x55   : > { %v2141_v63 = vcombine.low %v2119_v46, %v2126_v52  ;;  %v2142_v0 = vcombine.low %v2133_v53, %v2140_v54  ;;  %v1176_v3 = vcombine.high %v1174_v55, %v1174_v55  ;;  %v1190_v4 = vrot.slane %v10829_v56, %v12394_v8 }
  0x56   : > { %v1152_v48 = vcombine.high %v1150_v37, %v1150_v37  ;;  %v2160_v60 = vcombine.low %v1150_v37, %v1151_v47  ;;  %v1205_v7 = vrot.slane %v10830_v50, %v12394_v8  ;;  %v1212_v9 = vrot.slane %v1198_v57, %v12394_v8  ;;  %v10835_v50 = vld.sshfl [vmem:[%s12391_s14 + $0xa4] sm:$0x1 pattern:$0x75316420] }
  0x57   : > { %v2168_v10 = vrot.slane %v10860_v58, %v12394_v8  ;;  %v2175_v11 = vrot.slane %v2159_v59, %v12394_v8  ;;  %v2156_v15 = vrot.slane %v2142_v0, %v12394_v8  ;;  %v1222_v17 = vcombine.high %v10831_v5, %v10831_v5  ;;  %v10837_v59 = vld.sshfl [vmem:[%s12391_s14 + $0xac] sm:$0x33 pattern:$0x75316420] }
  0x58   : > { %v2182_v12 = vrot.slane %v2160_v60, %v12394_v8  ;;  %v2208_v19 = vcombine.low %v1176_v3, %v1190_v4  ;;  %v2209_v20 = vcombine.low %v1205_v7, %v1212_v9  ;;  %v10861_v21 = vcombine.high %v1205_v7, %v1212_v9  ;;  %v10838_v7 = vld.sshfl [vmem:[%s12391_s14 + $0xb0] sm:$0x1 pattern:$0x75316420] }
  0x59   : > { %v2190_v22 = vcombine.low %v2168_v10, %v2175_v11  ;;  %v1260_v25 = vcombine.high %v10833_v16, %v10833_v16  ;;  %v1267_v26 = vrot.slane %v10833_v16, %v12394_v8  ;;  %v1229_v28 = vrot.slane %v10831_v5, %v12394_v8  ;;  %v10839_v10 = vld.sshfl [vmem:[%s12391_s14 + $0xb4] sm:$0x33 pattern:$0x75316420] }
  0x5a   : > { %11675 = vmatmul.mubr.msk.bf16.gmra.mxu0 %vm2565_vm2, %v1961_v49  ;;  %v1167_v49 = vrot.slane %v10828_v42, %v12394_v8  ;;  %v1236_v29 = vrot.slane %v1222_v17, %v12394_v8  ;;  %v2224_v31 = vrot.slane %v2208_v19, %v12394_v8  ;;  %v2238_v34 = vrot.slane %v10861_v21, %v12394_v8 }
  0x5b   : > { %11678 = vmatprep.mubr.msk.bf16.mxu0 %vm12309_vm1, %v12308_v2  ;;  %v1252_v35 = vrot.slane %v10832_v24, %v12394_v8  ;;  %v2198_v36 = vrot.slane %v2190_v22, %v12394_v8  ;;  %v1274_v38 = vrot.slane %v1260_v25, %v12394_v8  ;;  %v1275_v39 = vcombine.high %v1267_v26, %v1267_v26 }
  0x5c   : > { %v2161_v61 = vcombine.low %v1152_v48, %v1167_v49  ;;  %v1175_v1 = vcombine.high %v1167_v49, %v1167_v49  ;;  %v2256_v40 = vcombine.low %v1229_v28, %v1236_v29  ;;  %v1284_v41 = vcombine.high %v10834_v32, %v10834_v32 }
  0x5d   : > { %v10862_v43 = vcombine.high %v1229_v28, %v1236_v29  ;;  %v2258_v46 = vcombine.low %v1252_v35, %v1267_v26  ;;  %v2259_v48 = vcombine.low %v1274_v38, %v1275_v39  ;;  %v1291_v51 = vrot.slane %v10834_v32, %v12394_v8 }
  0x5e   : > { %v2189_v13 = vrot.slane %v2161_v61, %v12394_v8  ;;  %v2207_v18 = vcombine.low %v1174_v55, %v1175_v1  ;;  %v2266_v49 = vrot.slane %v2256_v40, %v12394_v8  ;;  %v1298_v52 = vrot.slane %v1284_v41, %v12394_v8  ;;  %v10841_v41 = vld.sshfl [vmem:[%s12391_s14 + $0xbc] sm:$0x1 pattern:$0x75316420] }
  0x5f   : > { %v1322_v53 = vcombine.high %v10836_v44, %v10836_v44  ;;  %v2273_v55 = vrot.slane %v10862_v43, %v12394_v8  ;;  %v1276_v56 = vcombine.high %v1274_v38, %v1274_v38  ;;  %v2280_v58 = vrot.slane %v2258_v46, %v12394_v8 }
  0x60   : > { %v2191_v23 = vcombine.low %v2182_v12, %v2189_v13  ;;  %v2217_v30 = vrot.slane %v2207_v18, %v12394_v8  ;;  %v12311_v60 = vmov 0.0|0.0   ;;  %v1314_v0 = vrot.slane %v10835_v50, %v12394_v8  ;;  %v10840_v18 = vld.sshfl [vmem:[%s12391_s14 + $0xb8] sm:$0x33 pattern:$0x75316420] }
  0x61   : > { %v10888_v61 = vcombine.low %v12311_v60, %v12311_v60  ;;  %v1299_v1 = vcombine.high %v1291_v51, %v1291_v51  ;;  %v1300_v3 = vcombine.high %v1298_v52, %v1298_v52  ;;  %v1329_v4 = vrot.slane %v10836_v44, %v12394_v8 }
  0x62   : > { %11679 = vmatmul.mubr.msk.bf16.gmra.mxu0 %vm2565_vm2, %v2010_v14  ;;  %v2149_v14 = vrot.slane %v2141_v63, %v12394_v8  ;;  %v2205_v37 = vrot.slane %v2191_v23, %v12394_v8  ;;  %v2239_v42 = vcombine.low %v2217_v30, %v2224_v31  ;;  %v2287_v63 = vrot.slane %v2259_v48, %v12394_v8 }
  0x63   : > { %11682 = vmatprep.mubr.msk.bf16.mxu0 %vm12309_vm1, %v12308_v2  ;;  %v1336_v5 = vrot.slane %v1322_v53, %v12394_v8  ;;  %4982 = vst.msk [vmem:[#allocation2] sm:$0xf] %vm4981_vm3, %v10888_v61  ;;  %5034 = vst.msk [vmem:[#allocation2 + $0xcc] sm:$0xf] %vm4981_vm3, %v10888_v61  ;;  %v1346_v9 = vcombine.high %v10837_v59, %v10837_v59  ;;  %v2288_v12 = vcombine.low %v2266_v49, %v2273_v55 }
  0x64   : > { %v2157_v27 = vcombine.low %v2149_v14, %v2156_v15  ;;  %v2206_v47 = vcombine.low %v2198_v36, %v2205_v37  ;;  %v2247_v54 = vrot.slane %v2239_v42, %v12394_v8  ;;  %4985 = vst.msk [vmem:[#allocation2 + $0x8] sm:$0x1] %vm4984_vm4, %v10888_v61  ;;  %5036 = vst.msk [vmem:[#allocation2 + $0xd4] sm:$0x1] %vm4984_vm4, %v10888_v61 }
  0x65   : > { %v2305_v13 = vcombine.low %v1276_v56, %v1291_v51  ;;  %v2289_v14 = vcombine.low %v2280_v58, %v2287_v63  ;;  %v2306_v15 = vcombine.low %v1298_v52, %v1299_v1  ;;  %v2307_v16 = vcombine.low %v1300_v3, %v1314_v0  ;;  %v10842_v51 = vld.sshfl [vmem:[%s12391_s14 + $0xc0] sm:$0x33 pattern:$0x75316420] }
  0x66   : > { %v2308_v17 = vcombine.low %v1329_v4, %v1336_v5  ;;  %v1353_v19 = vrot.slane %v10837_v59, %v12394_v8  ;;  %v1376_v21 = vrot.slane %v10838_v7, %v12394_v8  ;;  %v1391_v22 = vrot.slane %v10839_v10, %v12394_v8  ;;  %v10942_v52 = vld [vmem:[%s15334_s3 + $0x2] sm:$0x3]  ;;  %v10843_v55 = vld.sshfl [vmem:[%s12391_s14 + $0xc4] sm:$0x33 pattern:$0x75316420] }
  0x67   : > { %v1384_v23 = vcombine.high %v10839_v10, %v10839_v10  ;;  %v2296_v24 = vrot.slane %v2288_v12, %v12394_v8  ;;  %v2315_v25 = vrot.slane %v2305_v13, %v12394_v8  ;;  %v1408_v26 = vcombine.high %v10840_v18, %v10840_v18  ;;  %12106 = vmatprep.subr.msk.bf16.mxu0 %vm2629_vm0, %v10942_v52 }
  0x68   : > { %v2322_v28 = vrot.slane %v2306_v15, %v12394_v8  ;;  %v2329_v29 = vrot.slane %v2307_v16, %v12394_v8  ;;  %v2336_v30 = vrot.slane %v2308_v17, %v12394_v8  ;;  %v10863_v31 = vcombine.high %v1329_v4, %v1336_v5  ;;  %12107 = vmatprep.subr.msk.bf16.mxu1 %vm2629_vm0, %v10942_v52  ;;  %v10845_v5 = vld.sshfl [vmem:[%s12391_s14 + $0xcc] sm:$0x33 pattern:$0x75316420] }
  0x69   : > { %v1398_v35 = vrot.slane %v1384_v23, %v12394_v8  ;;  %v1415_v36 = vrot.slane %v10840_v18, %v12394_v8  ;;  %v1422_v37 = vrot.slane %v1408_v26, %v12394_v8  ;;  %v1399_v46 = vcombine.high %v1391_v22, %v1391_v22  ;;  %v10846_v17 = vld.sshfl [vmem:[%s12391_s14 + $0xd0] sm:$0x33 pattern:$0x75316420] }
  0x6a   : > { %11683 = vmatmul.mubr.msk.bf16.gmra.mxu0 %vm2565_vm2, %v2059_v33  ;;  %v2231_v33 = vrot.slane %v2209_v20, %v12394_v8  ;;  %v1360_v20 = vrot.slane %v1346_v9, %v12394_v8  ;;  %v2337_v39 = vcombine.low %v2315_v25, %v2322_v28  ;;  %v2338_v40 = vcombine.low %v2329_v29, %v2336_v30  ;;  %v10844_v25 = vld.sshfl [vmem:[%s12391_s14 + $0xc8] sm:$0x1 pattern:$0x75316420] }
  0x6b   : > { %11686 = vmatprep.mubr.msk.bf16.mxu0 %vm12309_vm1, %v12308_v2  ;;  %v2364_v42 = vrot.slane %v10863_v31, %v12394_v8  ;;  %v1423_v48 = vcombine.high %v1415_v36, %v1415_v36  ;;  %v1424_v49 = vcombine.high %v1422_v37, %v1422_v37  ;;  %v1438_v50 = vrot.slane %v10841_v41, %v12394_v8 }
  0x6c   : > { %v2240_v45 = vcombine.low %v2231_v33, %v2238_v34  ;;  %v2355_v32 = vcombine.low %v1353_v19, %v1360_v20  ;;  %v10864_v33 = vcombine.high %v1353_v19, %v1360_v20  ;;  %v2357_v34 = vcombine.low %v1376_v21, %v1391_v22 }
  0x6d   : > { %v2345_v53 = vrot.slane %v2337_v39, %v12394_v8  ;;  %v5572_v56 = vsel %vm2629_vm0, %v10942_v52, 0  ;;  %v2403_v59 = vcombine.low %v1398_v35, %v1399_v46  ;;  %v1446_v61 = vcombine.high %v10842_v51, %v10842_v51 }
  0x6e   : > { %v2254_v57 = vrot.slane %v2240_v45, %v12394_v8  ;;  %v2371_v43 = vrot.slane %v2355_v32, %v12394_v8  ;;  %v2378_v44 = vrot.slane %v10864_v33, %v12394_v8  ;;  %v2385_v45 = vrot.slane %v2357_v34, %v12394_v8  ;;  %11731 = vmatpush3.bf16.msra.mxu0 %v5572_v56 }
  0x6f   : > { %v2406_v63 = vcombine.low %v1424_v49, %v1438_v50  ;;  %v1470_v0 = vcombine.high %v10843_v55, %v10843_v55  ;;  %12105 = vmatpush3.bf16.msra.mxu1 %v5572_v56  ;;  %v2413_v7 = vrot.slane %v2403_v59, %v12394_v8  ;;  %v1453_v10 = vrot.slane %v10842_v51, %v12394_v8  ;;  %v5037_v51 = vld [vmem:[#allocation2] sm:$0xf] }
  0x70   : > { %v2255_v11 = vcombine.low %v2247_v54, %v2254_v57  ;;  %v2352_v54 = vrot.slane %v2338_v40, %v12394_v8  ;;  %v2386_v57 = vcombine.low %v2364_v42, %v2371_v43  ;;  %v2387_v58 = vcombine.low %v2378_v44, %v2385_v45 }
  0x71   : > { %v2434_v13 = vrot.slane %v2406_v63, %v12394_v8  ;;  %v1484_v15 = vrot.slane %v1470_v0, %v12394_v8  ;;  %v1508_v16 = vcombine.high %v10845_v5, %v10845_v5  ;;  %v1515_v26 = vrot.slane %v10845_v5, %v12394_v8  ;;  %v10847_v0 = vld.sshfl [vmem:[%s12391_s14 + $0xd4] sm:$0x1 pattern:$0x75316420] }
  0x72   : > { %11687 = vmatmul.mubr.msk.bf16.gmra.mxu0 %vm2565_vm2, %v2108_v62  ;;  %v10889_v62 = vcombine.high %v12311_v60, %v12311_v60  ;;  %v2353_v1 = vcombine.low %v2345_v53, %v2352_v54  ;;  %v2394_v3 = vrot.slane %v2386_v57, %v12394_v8  ;;  %v2401_v4 = vrot.slane %v2387_v58, %v12394_v8  ;;  %v12719_v53 = vld [vmem:[%s15334_s3 + $0x6] sm:$0x3] }
  0x73   : > { %11690 = vmatprep.mubr.msk.bf16.mxu0 %vm12309_vm1, %v12308_v2  ;;  %v1532_v28 = vcombine.high %v10846_v17, %v10846_v17  ;;  %v1539_v29 = vrot.slane %v10846_v17, %v12394_v8  ;;  %v1500_v32 = vrot.slane %v10844_v25, %v12394_v8  ;;  %12110 = vmatprep.subr.msk.bf16.mxu0 %vm2629_vm0, %v12719_v53  ;;  %v5090_v57 = vshrl.u32 %v5037_v51, 16 }
  0x74   : > { %4983 = vst.msk [vmem:[#allocation2 + $0x4] sm:$0xf] %vm4981_vm3, %v10889_v62  ;;  %5035 = vst.msk [vmem:[#allocation2 + $0xd0] sm:$0xf] %vm4981_vm3, %v10889_v62  ;;  %v2405_v62 = vcombine.low %v1422_v37, %v1423_v48  ;;  %v2402_v18 = vcombine.low %v2394_v3, %v2401_v4  ;;  %v1523_v37 = vcombine.high %v1515_v26, %v1515_v26  ;;  %v5093_v58 = vshll.u32 %v5037_v51, 16 }
  0x75   : > { %v1546_v39 = vrot.slane %v1532_v28, %v12394_v8  ;;  %v1547_v40 = vcombine.high %v1539_v29, %v1539_v29  ;;  %v2501_v43 = vcombine.low %v1500_v32, %v1515_v26  ;;  %v12312_v28 = vmov 1983009808  }
  0x76   : > { %v2427_v12 = vrot.slane %v2405_v62, %v12394_v8  ;;  %v5095_v3 = vrot.slane %v5093_v58, 5 }
  0x77   : > { %v2511_v50 = vrot.slane %v2501_v43, %v12394_v8 }
  0x78   : > { %v2436_v21 = vcombine.low %v2427_v12, %v2434_v13  ;;  %v1562_v12 = vrot.slane %v10847_v0, %v12394_v8 }
  0x7a   : > { %11691 = vmatmul.mubr.msk.bf16.gmra.mxu0 %vm2565_vm2, %v2157_v27  ;;  %v2303_v27 = vrot.slane %v2289_v14, %v12394_v8  ;;  %v1477_v14 = vrot.slane %v10843_v55, %v12394_v8  ;;  %v2450_v33 = vrot.slane %v2436_v21, %v12394_v8 }
  0x7b   : > { %11694 = vmatprep.mubr.msk.bf16.mxu0 %vm12309_vm1, %v12308_v2  ;;  %v5038_v52 = vld [vmem:[#allocation2 + $0x4] sm:$0xf] }
  0x7c   : > { %v2304_v38 = vcombine.low %v2296_v24, %v2303_v27  ;;  %v2454_v23 = vcombine.low %v1477_v14, %v1484_v15  ;;  %v10866_v24 = vcombine.high %v1477_v14, %v1484_v15  ;;  %v1522_v27 = vrot.slane %v1508_v16, %v12394_v8 }
  0x7d   : > { %v5099_v59 = vshll.u32 %v5038_v52, 16 }
  0x7e   : > { %v2502_v45 = vcombine.low %v1522_v27, %v1523_v37 }
  0x7f   : > { %v5101_v4 = vrot.slane %v5099_v59, 5 }
  0x80   : > { %v2518_v54 = vrot.slane %v2502_v45, %v12394_v8 }
  0x82   : > { %11695 = vmatmul.mubr.msk.bf16.gmra.mxu0 %vm2565_vm2, %v2206_v47  ;;  %v1400_v47 = vcombine.high %v1398_v35, %v1398_v35  ;;  %v2476_v35 = vrot.slane %v2454_v23, %v12394_v8  ;;  %v2533_v62 = vcombine.low %v2511_v50, %v2518_v54 }
  0x83   : > { %11698 = vmatprep.mubr.msk.bf16.mxu0 %vm12309_vm1, %v12308_v2 }
  0x84   : > { %v2404_v60 = vcombine.low %v1400_v47, %v1415_v36  ;;  %v2483_v36 = vrot.slane %v10866_v24, %v12394_v8  ;;  %v2504_v47 = vcombine.low %v1546_v39, %v1547_v40 }
  0x86   : > { %v2420_v9 = vrot.slane %v2404_v60, %v12394_v8  ;;  %v2485_v42 = vcombine.low %v2476_v35, %v2483_v36  ;;  %v2532_v56 = vrot.slane %v2504_v47, %v12394_v8  ;;  %v5103_v60 = vshrl.u32 %v5038_v52, 16 }
  0x88   : > { %v2435_v19 = vcombine.low %v2413_v7, %v2420_v9  ;;  %v2499_v49 = vrot.slane %v2485_v42, %v12394_v8  ;;  %v5105_v5 = vrot.slane %v5103_v60, 4  ;;  %v5070_v7 = vld [vmem:[#allocation2 + $0x8] sm:$0x1]  ;;  %v2541_v9 = vrot.slane %v2533_v62, %v12394_v8 }
  0x89   : > { %v5109_v15 = vshll.u32 %v5070_v7, 16 }
  0x8a   : > { %11699 = vmatmul.mubr.msk.bf16.gmra.mxu0 %vm2565_vm2, %v2255_v11  ;;  %v1460_v11 = vrot.slane %v1446_v61, %v12394_v8  ;;  %v2443_v30 = vrot.slane %v2435_v19, %v12394_v8  ;;  %v5106_v14 = vor.u32 %v5105_v5, %v5101_v4 }
  0x8b   : > { %11702 = vmatprep.mubr.msk.bf16.mxu0 %vm12309_vm1, %v12308_v2 }
  0x8c   : > { %v2452_v20 = vcombine.low %v1453_v10, %v1460_v11  ;;  %v10865_v22 = vcombine.high %v1453_v10, %v1460_v11  ;;  %v2451_v44 = vcombine.low %v2443_v30, %v2450_v33  ;;  %v1548_v11 = vcombine.high %v1546_v39, %v1546_v39  ;;  %v12754_v33 = vld [vmem:[%s15333_s2] ss:$0 sm:$0xff] }
  0x8d   : > { %v5107_v19 = vrot.slane %v5106_v14, 4 }
  0x8e   : > { %v2462_v31 = vrot.slane %v2452_v20, %v12394_v8  ;;  %v2469_v34 = vrot.slane %v10865_v22, %v12394_v8  ;;  %v2550_v17 = vcombine.low %v1548_v11, %v1562_v12  ;;  %v5111_v20 = vrot.slane %v5109_v15, 5 }
  0x8f   : > { %v15347_v22 = vmov 0 }
  0x90   : > { %v2484_v41 = vcombine.low %v2462_v31, %v2469_v34  ;;  %v2557_v21 = vrot.slane %v2550_v17, %v12394_v8  ;;  %v15348_v22 = vsel %vm12740_vm7, 4294967295, %v15347_v22  ;;  %v5112_v24 = vsel %vm12740_vm7, %v5107_v19, %v5111_v20 }
  0x91   : > { %15349 = vst [vmem:[#allocation3_spill] sm:$0xff] %v15348_v22 }
  0x92   : > { %11703 = vmatmul.mubr.msk.bf16.gmra.mxu0 %vm2565_vm2, %v2304_v38  ;;  %v1524_v38 = vcombine.high %v1522_v27, %v1522_v27  ;;  %v2492_v48 = vrot.slane %v2484_v41, %v12394_v8  ;;  %v2564_v25 = vrot.slane %v2557_v21, %v12394_v8 }
  0x93   : > { %11706 = vmatprep.mubr.msk.bf16.mxu0 %vm12309_vm1, %v12308_v2 }
  0x94   : > { %v2503_v46 = vcombine.low %v1524_v38, %v1539_v29  ;;  %v2500_v61 = vcombine.low %v2492_v48, %v2499_v49 }
  0x96   : > { %v2525_v55 = vrot.slane %v2503_v46, %v12394_v8 }
  0x98   : > { %v2534_v63 = vcombine.low %v2525_v55, %v2532_v56 }
  0x9a   : > { %11707 = vmatmul.mubr.msk.bf16.gmra.mxu0 %vm2565_vm2, %v2353_v1  ;;  %v5092_v1 = vrot.slane %v5090_v57, 4  ;;  %v2548_v10 = vrot.slane %v2534_v63, %v12394_v8  ;;  %v12767_v57 = vadd.s32 16, %v12385_v6 }
  0x9b   : > { %11710 = vmatprep.mubr.msk.bf16.mxu0 %vm12309_vm1, %v12308_v2 }
  0x9c   : > { %v5096_v13 = vor.u32 %v5095_v3, %v5092_v1  ;;  %v2549_v16 = vcombine.low %v2541_v9, %v2548_v10  ;;  %vm3738_vm9 = vcmp.le.s32.totalorder %v12767_v57, 16 }
  0xa2   : > { %11711 = vmatmul.mubr.msk.bf16.gmra.mxu0 %vm2565_vm2, %v2402_v18  ;;  %v5097_v18 = vrot.slane %v5096_v13, 4 }
  0xa3   : > { %11714 = vmatprep.mubr.msk.bf16.mxu0 %vm12309_vm1, %v12308_v2 }
  0xa4   : > { %v5102_v23 = vsel %vm12740_vm7, %v5097_v18, %v5101_v4 }
  0xa5   : > { %v10943_v26 = vcombine.low %v5102_v23, %v5112_v24 }
  0xaa   : > { %11715 = vmatmul.mubr.msk.bf16.gmra.mxu0 %vm2565_vm2, %v2451_v44 }
  0xab   : > { %11718 = vmatprep.mubr.msk.bf16.mxu0 %vm12309_vm1, %v12308_v2 }
  0xb2   : > { %11719 = vmatmul.mubr.msk.bf16.gmra.mxu0 %vm2565_vm2, %v2500_v61 }
  0xb3   : > { %11722 = vmatprep.mubr.msk.bf16.mxu0 %vm12309_vm1, %v12308_v2 }
  0xba   : > { %11723 = vmatmul.mubr.msk.bf16.gmra.mxu0 %vm2565_vm2, %v2549_v16 }
  0xbb   : > { %11726 = vmatprep.mubr.msk.bf16.mxu0 %vm12309_vm1, %v12308_v2  ;;  %v2951_v2 = vunpack.c.l.s4 %v12312_v28 }
  0xbd   : > { %v2952_v31 = vunpack.c.0.s8 %v2951_v2 }
  0xbf   : > { %v12758_v35 = vsub.s32 %v2952_v31, %v12385_v6 }
  0xc2   : > { %11727 = vmatmul.mubr.msk.bf16.gmra.mxu0 %vm2565_vm2, %v2564_v25 }
  0xc3   : > { %11732 = vmatprep.mubr.msk.bf16.mxu0 %vm2565_vm2, %v10943_v26 }
  0xe2   : > { %v2667_v27 = vpop.f32.mrf.mxu0 }
  0xe4   : > { %v11648_v29 = vpop.f32.mrf.mxu0 }
  0xe6   : > { %v2670_v30 = vpop.f32.mrf.mxu0 }
  0xe8   : > { %v11649_v32 = vpop.f32.mrf.mxu0 }
  0xea   : > { %v2675_v34 = vpop.f32.mrf.mxu0 }
  0xeb   : > { %v2676_v8 = vadd.f32 %v12754_v33, %v2675_v34 }
  0xec   : > { %v11652_v36 = vpop.f32.mrf.mxu0 }
  0xed   : > { %v2835_v37 = vmax.f32 %v2676_v8, 0.0 }
  0xee   : > { %v2678_v38 = vpop.f32.mrf.mxu0 }
  0xef   : > { %v2949_v39 = vcombine.high %v2835_v37, %v2835_v37  ;;  %v2956_v40 = vrot.slane %v2835_v37, %v12758_v35  ;;  %v2679_v41 = vadd.f32 %v12754_v33, %v2678_v38 }
  0xf0   : > { %v11653_v42 = vpop.f32.mrf.mxu0 }
  0xf1   : > { %v2963_v43 = vrot.slane %v2949_v39, %v12758_v35  ;;  %v2964_v44 = vcombine.high %v2956_v40, %v2956_v40  ;;  %v2836_v45 = vmax.f32 %v2679_v41, 0.0 }
  0xf2   : > { %v2683_v46 = vpop.f32.mrf.mxu0 }
  0xf3   : > { %v3942_v47 = vcombine.low %v2964_v44, %v2963_v43  ;;  %v2965_v48 = vcombine.high %v2963_v43, %v2963_v43  ;;  %v2966_v49 = vcombine.high %v2836_v45, %v2836_v45  ;;  %v2973_v50 = vrot.slane %v2836_v45, %v12758_v35 }
  0xf4   : > { %v2684_v51 = vadd.f32 %v12754_v33, %v2683_v46  ;;  %v11656_v52 = vpop.f32.mrf.mxu0 }
  0xf5   : > { %v2980_v54 = vrot.slane %v2966_v49, %v12758_v35  ;;  %v2981_v55 = vcombine.high %v2973_v50, %v2973_v50  ;;  %v3943_v56 = vcombine.low %v2965_v48, %v2973_v50  ;;  %v3950_v58 = vrot.slane %v3942_v47, %v12758_v35 }
  0xf6   : > { %v2837_v59 = vmax.f32 %v2684_v51, 0.0  ;;  %v2686_v60 = vpop.f32.mrf.mxu0  ;;  %v12797_v49 = vsel %vm2629_vm0, %v12719_v53, 0 }
  0xf7   : > { %v3957_v61 = vrot.slane %v3943_v56, %v12758_v35  ;;  %v3959_v62 = vcombine.low %v2981_v55, %v2980_v54  ;;  %v2982_v63 = vcombine.high %v2980_v54, %v2980_v54  ;;  %v2687_v0 = vadd.f32 %v12754_v33, %v2686_v60 }
  0xf8   : > { %v2983_v1 = vcombine.high %v2837_v59, %v2837_v59  ;;  %v2990_v3 = vrot.slane %v2837_v59, %v12758_v35  ;;  %v11657_v4 = vpop.f32.mrf.mxu0 }
  0xf9   : > { %v3958_v5 = vcombine.low %v3950_v58, %v3957_v61  ;;  %v2838_v7 = vmax.f32 %v2687_v0, 0.0  ;;  %v3967_v9 = vrot.slane %v3959_v62, %v12758_v35 }
  0xfa   : > { %v2997_v10 = vrot.slane %v2983_v1, %v12758_v35  ;;  %v2998_v11 = vcombine.high %v2990_v3, %v2990_v3  ;;  %v3960_v12 = vcombine.low %v2982_v63, %v2990_v3  ;;  %v2691_v13 = vpop.f32.mrf.mxu0 }
  0xfb   : > { %v4696_v14 = vsel %vm3679_vm8, %v3958_v5, 0.0  ;;  %v3000_v15 = vcombine.high %v2838_v7, %v2838_v7  ;;  %v3007_v16 = vrot.slane %v2838_v7, %v12758_v35  ;;  %v2692_v17 = vadd.f32 %v12754_v33, %v2691_v13 }
  0xfc   : > { %v11387_v18 = vpack.c.bf16 %v4696_v14, %v4696_v14  ;;  %v2999_v19 = vcombine.high %v2997_v10, %v2997_v10  ;;  %v3974_v20 = vrot.slane %v3960_v12, %v12758_v35  ;;  %v3982_v21 = vrot.slane %v2998_v11, %v12758_v35  ;;  %v11660_v23 = vpop.f32.mrf.mxu0 }
  0xfd   : > { %v3014_v24 = vrot.slane %v3000_v15, %v12758_v35  ;;  %v3015_v25 = vcombine.high %v3007_v16, %v3007_v16  ;;  %v2839_v26 = vmax.f32 %v2692_v17, 0.0 }
  0xfe   : > { %4986 = vst.msk [vmem:[#allocation2 + $0xc] sm:$0xf] %vm4981_vm3, %v11387_v18  ;;  %v3975_v27 = vcombine.low %v3967_v9, %v3974_v20  ;;  %v3983_v28 = vcombine.low %v2997_v10, %v2999_v19  ;;  %v4698_v2 = vsel %vm3738_vm9, %v3982_v21, 0.0  ;;  %v2694_v29 = vpop.f32.mrf.mxu0 }
  0xff   : > { %v11389_v30 = vpack.c.bf16 %v4698_v2, %v4698_v2  ;;  %v3016_v31 = vcombine.high %v3014_v24, %v3014_v24  ;;  %v3984_v32 = vcombine.low %v3007_v16, %v3015_v25  ;;  %v3017_v34 = vcombine.high %v2839_v26, %v2839_v26 }
 0x100   : > { %v11388_v8 = vpack.c.bf16 %v3975_v27, %v3975_v27  ;;  %v3024_v36 = vrot.slane %v2839_v26, %v12758_v35  ;;  %v2695_v37 = vadd.f32 %v12754_v33, %v2694_v29  ;;  %v11661_v38 = vpop.f32.mrf.mxu0  ;;  %v3991_v39 = vrot.slane %v3983_v28, %v12758_v35 }
 0x101   : > { %4988 = vst.msk [vmem:[#allocation2 + $0x14] sm:$0x1] %vm4984_vm4, %v11389_v30  ;;  %v3998_v40 = vrot.slane %v3984_v32, %v12758_v35  ;;  %v4000_v41 = vcombine.low %v3014_v24, %v3016_v31  ;;  %v3031_v42 = vrot.slane %v3017_v34, %v12758_v35  ;;  %v5069_v31 = vld [vmem:[%s15334_s3] sm:$0x3] }
 0x102   : > { %4987 = vst.msk [vmem:[#allocation2 + $0x10] sm:$0xf] %vm4981_vm3, %v11388_v8  ;;  %v3032_v43 = vcombine.high %v3024_v36, %v3024_v36  ;;  %v2840_v44 = vmax.f32 %v2695_v37, 0.0  ;;  %v2699_v45 = vpop.f32.mrf.mxu0  ;;  %12108 = vmatprep.subr.msk.bf16.mxu1 %vm2629_vm0, %v5069_v31 }
 0x103   : > { %v3999_v46 = vcombine.low %v3991_v39, %v3998_v40  ;;  %v4023_v47 = vrot.slane %v3031_v42, %v12758_v35  ;;  %v3033_v48 = vcombine.high %v3031_v42, %v3031_v42  ;;  %v2700_v54 = vadd.f32 %v12754_v33, %v2699_v45 }
 0x104   : > { %v4001_v50 = vcombine.low %v3024_v36, %v3032_v43  ;;  %v3034_v51 = vcombine.high %v2840_v44, %v2840_v44  ;;  %v3041_v52 = vrot.slane %v2840_v44, %v12758_v35  ;;  %v11664_v55 = vpop.f32.mrf.mxu0  ;;  %v4008_v56 = vrot.slane %v4000_v41, %v12758_v35 }
 0x105   : > { %v4699_v58 = vsel %vm3679_vm8, %v3999_v46, 0.0  ;;  %v4701_v59 = vsel %vm3738_vm9, %v4023_v47, 0.0  ;;  %v5039_v60 = vld [vmem:[#allocation2 + $0xc] sm:$0xf]  ;;  %v2841_v4 = vmax.f32 %v2700_v54, 0.0 }
 0x106   : > { %v11390_v61 = vpack.c.bf16 %v4699_v58, %v4699_v58  ;;  %v4015_v53 = vrot.slane %v4001_v50, %v12758_v35  ;;  %v11392_v62 = vpack.c.bf16 %v4701_v59, %v4701_v59  ;;  %v3048_v63 = vrot.slane %v3034_v51, %v12758_v35  ;;  %v2702_v0 = vpop.f32.mrf.mxu0 }
 0x107   : > { %v3049_v1 = vcombine.high %v3041_v52, %v3041_v52  ;;  %v4024_v3 = vcombine.low %v3033_v48, %v3041_v52  ;;  %v2703_v5 = vadd.f32 %v12754_v33, %v2702_v0  ;;  %v5114_v11 = vshrl.u32 %v5039_v60, 16 }
 0x108   : > { %4989 = vst.msk [vmem:[#allocation2 + $0x18] sm:$0xf] %vm4981_vm3, %v11390_v61  ;;  %v4016_v7 = vcombine.low %v4008_v56, %v4015_v53  ;;  %v3050_v9 = vcombine.high %v3048_v63, %v3048_v63  ;;  %v11665_v10 = vpop.f32.mrf.mxu0  ;;  %v5117_v12 = vshll.u32 %v5039_v60, 16  ;;  %v3051_v15 = vcombine.high %v2841_v4, %v2841_v4 }
 0x109   : > { %4991 = vst.msk [vmem:[#allocation2 + $0x20] sm:$0x1] %vm4984_vm4, %v11392_v62  ;;  %v4025_v13 = vcombine.low %v3049_v1, %v3048_v63  ;;  %v4032_v14 = vrot.slane %v4024_v3, %v12758_v35  ;;  %v3058_v16 = vrot.slane %v2841_v4, %v12758_v35  ;;  %v2842_v18 = vmax.f32 %v2703_v5, 0.0  ;;  %v5040_v58 = vld [vmem:[#allocation2 + $0x10] sm:$0xf] }
 0x10a   : > { %v11391_v17 = vpack.c.bf16 %v4016_v7, %v4016_v7  ;;  %v2707_v19 = vpop.f32.mrf.mxu0  ;;  %v5116_v20 = vrot.slane %v5114_v11, 4  ;;  %v5119_v21 = vrot.slane %v5117_v12, 5  ;;  %v3065_v24 = vrot.slane %v3051_v15, %v12758_v35 }
 0x10b   : > { %v4039_v23 = vrot.slane %v4025_v13, %v12758_v35  ;;  %v3066_v25 = vcombine.high %v3058_v16, %v3058_v16  ;;  %v4041_v26 = vcombine.low %v3050_v9, %v3058_v16  ;;  %v3068_v27 = vcombine.high %v2842_v18, %v2842_v18 }
 0x10c   : > { %4990 = vst.msk [vmem:[#allocation2 + $0x1c] sm:$0xf] %vm4981_vm3, %v11391_v17  ;;  %v3075_v28 = vrot.slane %v2842_v18, %v12758_v35  ;;  %v2708_v2 = vadd.f32 %v12754_v33, %v2707_v19  ;;  %v11668_v29 = vpop.f32.mrf.mxu0  ;;  %v5120_v30 = vor.u32 %v5119_v21, %v5116_v20  ;;  %v3067_v34 = vcombine.high %v3065_v24, %v3065_v24 }
 0x10d   : > { %v4040_v32 = vcombine.low %v4032_v14, %v4039_v23  ;;  %v4042_v8 = vcombine.low %v3066_v25, %v3065_v24  ;;  %v4049_v36 = vrot.slane %v4041_v26, %v12758_v35  ;;  %v3082_v37 = vrot.slane %v3068_v27, %v12758_v35  ;;  %v5071_v25 = vld [vmem:[#allocation2 + $0x14] sm:$0x1] }
 0x10e   : > { %v3083_v38 = vcombine.high %v3075_v28, %v3075_v28  ;;  %v2843_v39 = vmax.f32 %v2708_v2, 0.0  ;;  %v2710_v40 = vpop.f32.mrf.mxu0  ;;  %v12824_v41 = vrot.slane %v5120_v30, 4  ;;  %v4064_v44 = vrot.slane %v3067_v34, %v12758_v35 }
 0x10f   : > { %v4702_v42 = vsel %vm3679_vm8, %v4040_v32, 0.0  ;;  %v4056_v43 = vrot.slane %v4042_v8, %v12758_v35  ;;  %v2711_v45 = vadd.f32 %v12754_v33, %v2710_v40  ;;  %v3084_v47 = vcombine.high %v3082_v37, %v3082_v37 }
 0x110   : > { %v11393_v46 = vpack.c.bf16 %v4702_v42, %v4702_v42  ;;  %v4065_v48 = vcombine.low %v3075_v28, %v3083_v38  ;;  %v3085_v50 = vcombine.high %v2843_v39, %v2843_v39  ;;  %v11669_v51 = vpop.f32.mrf.mxu0  ;;  %v4704_v54 = vsel %vm3738_vm9, %v4064_v44, 0.0 }
 0x111   : > { %v4057_v52 = vcombine.low %v4049_v36, %v4056_v43  ;;  %v3092_v55 = vrot.slane %v2843_v39, %v12758_v35  ;;  %v2844_v56 = vmax.f32 %v2711_v45, 0.0  ;;  %v11395_v59 = vpack.c.bf16 %v4704_v54, %v4704_v54  ;;  %v5041_v45 = vld [vmem:[#allocation2 + $0x18] sm:$0xf] }
 0x112   : > { %4992 = vst.msk [vmem:[#allocation2 + $0x24] sm:$0xf] %vm4981_vm3, %v11393_v46  ;;  %v4066_v60 = vcombine.low %v3082_v37, %v3084_v47  ;;  %v4073_v61 = vrot.slane %v4065_v48, %v12758_v35  ;;  %v3099_v53 = vrot.slane %v3085_v50, %v12758_v35  ;;  %v2715_v62 = vpop.f32.mrf.mxu0  ;;  %v5123_v10 = vshll.u32 %v5040_v58, 16 }
 0x113   : > { %v11394_v63 = vpack.c.bf16 %v4057_v52, %v4057_v52  ;;  %v3100_v0 = vcombine.high %v3092_v55, %v3092_v55  ;;  %v3102_v1 = vcombine.high %v2844_v56, %v2844_v56  ;;  %v3109_v3 = vrot.slane %v2844_v56, %v12758_v35  ;;  %4994 = vst.msk [vmem:[#allocation2 + $0x2c] sm:$0x1] %vm4984_vm4, %v11395_v59  ;;  %v12863_v46 = vld [vmem:[#allocation2 + $0x1c] sm:$0xf] }
 0x114   : > { %v4080_v4 = vrot.slane %v4066_v60, %v12758_v35  ;;  %v3101_v5 = vcombine.high %v3099_v53, %v3099_v53  ;;  %v2716_v7 = vadd.f32 %v12754_v33, %v2715_v62  ;;  %v11672_v9 = vpop.f32.mrf.mxu0  ;;  %v12844_v18 = vrot.slane %v5123_v10, 5 }
 0x115   : > { %4993 = vst.msk [vmem:[#allocation2 + $0x28] sm:$0xf] %vm4981_vm3, %v11394_v63  ;;  %v4082_v11 = vcombine.low %v3092_v55, %v3100_v0  ;;  %v3116_v12 = vrot.slane %v3102_v1, %v12758_v35  ;;  %v3117_v13 = vcombine.high %v3109_v3, %v3109_v3  ;;  %v4105_v14 = vrot.slane %v3109_v3, %v12758_v35 }
 0x116   : > { %v4081_v15 = vcombine.low %v4073_v61, %v4080_v4  ;;  %v4083_v16 = vcombine.low %v3099_v53, %v3101_v5  ;;  %v2845_v17 = vmax.f32 %v2716_v7, 0.0  ;;  %v2718_v19 = vpop.f32.mrf.mxu0  ;;  %v5126_v34 = vsel %vm12740_vm7, %v12824_v41, %v12844_v18 }
 0x117   : > { %v4090_v20 = vrot.slane %v4082_v11, %v12758_v35  ;;  %v4106_v21 = vcombine.low %v3117_v13, %v3116_v12  ;;  %v4707_v23 = vsel %vm3738_vm9, %v4105_v14, 0.0  ;;  %v3118_v24 = vcombine.high %v3116_v12, %v3116_v12 }
 0x118   : > { %v4705_v26 = vsel %vm3679_vm8, %v4081_v15, 0.0  ;;  %v4097_v27 = vrot.slane %v4083_v16, %v12758_v35  ;;  %v11398_v28 = vpack.c.bf16 %v4707_v23, %v4707_v23  ;;  %v3119_v2 = vcombine.high %v2845_v17, %v2845_v17  ;;  %v11673_v29 = vpop.f32.mrf.mxu0 }
 0x119   : > { %v11396_v30 = vpack.c.bf16 %v4705_v26, %v4705_v26  ;;  %v4114_v31 = vrot.slane %v4106_v21, %v12758_v35  ;;  %v3126_v32 = vrot.slane %v2845_v17, %v12758_v35  ;;  %v5127_v37 = vshrl.u32 %v5040_v58, 16 }
 0x11a   : > { %v4098_v8 = vcombine.low %v4090_v20, %v4097_v27  ;;  %4997 = vst.msk [vmem:[#allocation2 + $0x38] sm:$0x1] %vm4984_vm4, %v11398_v28  ;;  %v3133_v36 = vrot.slane %v3119_v2, %v12758_v35  ;;  %v5133_v38 = vshll.u32 %v5071_v25, 16  ;;  %v2723_v39 = vpop.f32.mrf.mxu0  ;;  %v2719_v43 = vadd.f32 %v12754_v33, %v2718_v19 }
 0x11b   : > { %4995 = vst.msk [vmem:[#allocation2 + $0x30] sm:$0xf] %vm4981_vm3, %v11396_v30  ;;  %v3134_v40 = vcombine.high %v3126_v32, %v3126_v32  ;;  %v4107_v42 = vcombine.low %v3118_v24, %v3126_v32  ;;  %v2724_v44 = vadd.f32 %v12754_v33, %v2723_v39  ;;  %v5129_v47 = vrot.slane %v5127_v37, 4  ;;  %v12148_v24 = vld [vmem:[#allocation2 + $0xc] sm:$0xff]   ;;  %v12885_v32 = vld [vmem:[#allocation2 + $0x20] sm:$0x1] }
 0x11c   : > { %v11397_v41 = vpack.c.bf16 %v4098_v8, %v4098_v8  ;;  %v5135_v48 = vrot.slane %v5133_v38, 5  ;;  %v3135_v50 = vcombine.high %v3133_v36, %v3133_v36  ;;  %v11676_v51 = vpop.f32.mrf.mxu0  ;;  %v2846_v55 = vmax.f32 %v2719_v43, 0.0 }
 0x11d   : > { %v4121_v52 = vrot.slane %v4107_v42, %v12758_v35  ;;  %v4123_v54 = vcombine.low %v3134_v40, %v3133_v36  ;;  %v2847_v56 = vmax.f32 %v2724_v44, 0.0  ;;  %v5130_v58 = vor.u32 %v5129_v47, %v12844_v18 }
 0x11e   : > { %4996 = vst.msk [vmem:[#allocation2 + $0x34] sm:$0xf] %vm4981_vm3, %v11397_v41  ;;  %v2726_v59 = vpop.f32.mrf.mxu0  ;;  %v5138_v60 = vshrl.u32 %v5041_v45, 16  ;;  %v5141_v61 = vshll.u32 %v5041_v45, 16  ;;  %v5147_v53 = vshll.u32 %v12863_v46, 16  ;;  %v3136_v0 = vcombine.high %v2846_v55, %v2846_v55 }
 0x11f   : > { %v4122_v62 = vcombine.low %v4114_v31, %v4121_v52  ;;  %v4131_v63 = vrot.slane %v4123_v54, %v12758_v35  ;;  %v3143_v1 = vrot.slane %v2846_v55, %v12758_v35  ;;  %v5131_v3 = vrot.slane %v5130_v58, 4  ;;  %v12150_v55 = vld [vmem:[#allocation2 + $0x24] sm:$0xff]  }
 0x120   : > { %v3153_v4 = vcombine.high %v2847_v56, %v2847_v56  ;;  %v3160_v5 = vrot.slane %v2847_v56, %v12758_v35  ;;  %v2727_v7 = vadd.f32 %v12754_v33, %v2726_v59  ;;  %v11677_v9 = vpop.f32.mrf.mxu0  ;;  %v3150_v11 = vrot.slane %v3136_v0, %v12758_v35 }
 0x121   : > { %v4708_v10 = vsel %vm3679_vm8, %v4122_v62, 0.0  ;;  %v3151_v12 = vcombine.high %v3143_v1, %v3143_v1  ;;  %v4124_v13 = vcombine.low %v3135_v50, %v3143_v1  ;;  %v5136_v15 = vsel %vm12740_vm7, %v5131_v3, %v5135_v48  ;;  %v12149_v62 = vld [vmem:[#allocation2 + $0x18] sm:$0xff]  }
 0x122   : > { %v11399_v14 = vpack.c.bf16 %v4708_v10, %v4708_v10  ;;  %v3167_v16 = vrot.slane %v3153_v4, %v12758_v35  ;;  %v3168_v17 = vcombine.high %v3160_v5, %v3160_v5  ;;  %v2731_v18 = vpop.f32.mrf.mxu0  ;;  %v10944_v19 = vcombine.low %v5126_v34, %v5136_v15 }
 0x123   : > { %v3152_v20 = vcombine.high %v3150_v11, %v3150_v11  ;;  %v4138_v21 = vrot.slane %v4124_v13, %v12758_v35  ;;  %v4146_v23 = vrot.slane %v3151_v12, %v12758_v35  ;;  %v2848_v27 = vmax.f32 %v2727_v7, 0.0 }
 0x124   : > { %4998 = vst.msk [vmem:[#allocation2 + $0x3c] sm:$0xf] %vm4981_vm3, %v11399_v14  ;;  %v3169_v25 = vcombine.high %v3167_v16, %v3167_v16  ;;  %v4148_v26 = vcombine.low %v3160_v5, %v3168_v17  ;;  %v5140_v28 = vrot.slane %v5138_v60, 4  ;;  %v11680_v2 = vpop.f32.mrf.mxu0  ;;  %11733 = vmatmul.mubr.msk.bf16.vlgmr.msra.gmra.mxu0 %vm2565_vm2, %v10944_v19  ;;  %v5143_v34 = vrot.slane %v5141_v61, 5  ;;  %v5043_v61 = vld [vmem:[#allocation2 + $0x24] sm:$0xf] }
 0x125   : > { %v4139_v29 = vcombine.low %v4131_v63, %v4138_v21  ;;  %v4147_v30 = vcombine.low %v3150_v11, %v3152_v20  ;;  %v4710_v31 = vsel %vm3738_vm9, %v4146_v23, 0.0  ;;  %11834 = vmatprep.mubr.msk.bf16.mxu0 %vm2565_vm2, %v12148_v24  ;;  %11833 = vmatpush3.bf16.msra.mxu0 %v12797_v49  ;;  %v5149_v38 = vrot.slane %v5147_v53, 5 }
 0x126   : > { %v11401_v8 = vpack.c.bf16 %v4710_v31, %v4710_v31  ;;  %v4162_v36 = vrot.slane %v4148_v26, %v12758_v35  ;;  %v4164_v37 = vcombine.low %v3167_v16, %v3169_v25  ;;  %v2734_v39 = vpop.f32.mrf.mxu0  ;;  %v3170_v43 = vcombine.high %v2848_v27, %v2848_v27 }
 0x127   : > { %v4155_v40 = vrot.slane %v4147_v30, %v12758_v35  ;;  %v11400_v42 = vpack.c.bf16 %v4139_v29, %v4139_v29  ;;  %v3177_v44 = vrot.slane %v2848_v27, %v12758_v35  ;;  %v5144_v41 = vor.u32 %v5143_v34, %v5140_v28  ;;  %v5044_v28 = vld [vmem:[#allocation2 + $0x28] sm:$0xf] }
 0x128   : > { %5000 = vst.msk [vmem:[#allocation2 + $0x44] sm:$0x1] %vm4984_vm4, %v11401_v8  ;;  %v4172_v45 = vrot.slane %v4164_v37, %v12758_v35  ;;  %v5151_v47 = vshrl.u32 %v12863_v46, 16  ;;  %v5157_v49 = vshll.u32 %v12885_v32, 16  ;;  %v11681_v48 = vpop.f32.mrf.mxu0  ;;  %v3184_v51 = vrot.slane %v3170_v43, %v12758_v35  ;;  %v5073_v8 = vld [vmem:[#allocation2 + $0x2c] sm:$0x1] }
 0x129   : > { %4999 = vst.msk [vmem:[#allocation2 + $0x40] sm:$0xf] %vm4981_vm3, %v11400_v42  ;;  %v4163_v50 = vcombine.low %v4155_v40, %v4162_v36  ;;  %v3185_v52 = vcombine.high %v3177_v44, %v3177_v44  ;;  %v5145_v56 = vrot.slane %v5144_v41, 4  ;;  %v2732_v60 = vadd.f32 %v12754_v33, %v2731_v18  ;;  %v12151_v36 = vld [vmem:[#allocation2 + $0x30] sm:$0xff]  }
 0x12a   : > { %v5153_v58 = vrot.slane %v5151_v47, 4  ;;  %v5159_v59 = vrot.slane %v5157_v49, 5  ;;  %v12900_v53 = vpop.f32.mrf.mxu0  ;;  %v4187_v0 = vrot.slane %v3184_v51, %v12758_v35  ;;  %v3186_v1 = vcombine.high %v3184_v51, %v3184_v51 }
 0x12b   : > { %v4711_v46 = vsel %vm3679_vm8, %v4163_v50, 0.0  ;;  %v4165_v63 = vcombine.low %v3177_v44, %v3185_v52  ;;  %v5150_v4 = vsel %vm12740_vm7, %v5145_v56, %v5149_v38  ;;  %v2849_v7 = vmax.f32 %v2732_v60, 0.0  ;;  %v5045_v60 = vld [vmem:[#allocation2 + $0x30] sm:$0xf]  ;;  %v13385_v54 = vld [vmem:[#allocation2 + $0x3c] sm:$0xf] }
 0x12c   : > { %v11402_v3 = vpack.c.bf16 %v4711_v46, %v4711_v46  ;;  %v5154_v5 = vor.u32 %v5153_v58, %v5149_v38  ;;  %v11684_v9 = vpop.f32.mrf.mxu0  ;;  %11835 = vmatmul.mubr.msk.bf16.vlgmr.msra.gmra.mxu0 %vm2565_vm2, %v12149_v62  ;;  %v4713_v11 = vsel %vm3738_vm9, %v4187_v0, 0.0  ;;  %v2735_v12 = vadd.f32 %v12754_v33, %v2734_v39 }
 0x12d   : > { %v4179_v10 = vrot.slane %v4165_v63, %v12758_v35  ;;  %v5162_v13 = vshrl.u32 %v5043_v61, 16  ;;  %11838 = vmatprep.mubr.msk.bf16.mxu0 %vm2565_vm2, %v12150_v55  ;;  %v11404_v14 = vpack.c.bf16 %v4713_v11, %v4713_v11  ;;  %v3187_v16 = vcombine.high %v2849_v7, %v2849_v7  ;;  %v5046_v11 = vld [vmem:[#allocation2 + $0x34] sm:$0xf] }
 0x12e   : > { %5001 = vst.msk [vmem:[#allocation2 + $0x48] sm:$0xf] %vm4981_vm3, %v11402_v3  ;;  %v5155_v15 = vrot.slane %v5154_v5, 4  ;;  %v3194_v17 = vrot.slane %v2849_v7, %v12758_v35  ;;  %v2742_v18 = vpop.f32.mrf.mxu0  ;;  %v2850_v20 = vmax.f32 %v2735_v12, 0.0  ;;  %v5165_v23 = vshll.u32 %v5043_v61, 16 }
 0x12f   : > { %v4180_v19 = vcombine.low %v4172_v45, %v4179_v10  ;;  %v5164_v21 = vrot.slane %v5162_v13, 4  ;;  %5003 = vst.msk [vmem:[#allocation2 + $0x50] sm:$0x1] %vm4984_vm4, %v11404_v14  ;;  %v3201_v25 = vrot.slane %v3187_v16, %v12758_v35  ;;  %v5171_v41 = vshll.u32 %v5044_v28, 16 }
 0x130   : > { %v5160_v24 = vsel %vm12740_vm7, %v5155_v15, %v5159_v59  ;;  %v3202_v26 = vcombine.high %v3194_v17, %v3194_v17  ;;  %v4188_v27 = vcombine.low %v3186_v1, %v3194_v17  ;;  %v11685_v2 = vpop.f32.mrf.mxu0  ;;  %v3204_v31 = vcombine.high %v2850_v20, %v2850_v20  ;;  %v12152_v42 = vld [vmem:[#allocation2 + $0x3c] sm:$0xff]  }
 0x131   : > { %v11403_v29 = vpack.c.bf16 %v4180_v19, %v4180_v19  ;;  %v10945_v30 = vcombine.low %v5150_v4, %v5160_v24  ;;  %v3211_v34 = vrot.slane %v2850_v20, %v12758_v35  ;;  %v3203_v39 = vcombine.high %v3201_v25, %v3201_v25 }
 0x132   : > { %v4189_v37 = vcombine.low %v3202_v26, %v3201_v25  ;;  %v4196_v38 = vrot.slane %v4188_v27, %v12758_v35  ;;  %v5167_v40 = vrot.slane %v5165_v23, 5  ;;  %v12921_v43 = vpop.f32.mrf.mxu0  ;;  %v3218_v44 = vrot.slane %v3204_v31, %v12758_v35  ;;  %v5074_v27 = vld [vmem:[#allocation2 + $0x38] sm:$0x1] }
 0x133   : > { %5002 = vst.msk [vmem:[#allocation2 + $0x4c] sm:$0xf] %vm4981_vm3, %v11403_v29  ;;  %11736 = vmatprep.mubr.msk.bf16.mxu1 %vm2565_vm2, %v10945_v30  ;;  %v3219_v45 = vcombine.high %v3211_v34, %v3211_v34  ;;  %v5175_v47 = vshrl.u32 %v5044_v28, 16  ;;  %v4205_v48 = vcombine.low %v3203_v39, %v3211_v34  ;;  %v5181_v51 = vshll.u32 %v5073_v8, 16 }
 0x134   : > { %v4203_v49 = vrot.slane %v4189_v37, %v12758_v35  ;;  %v5168_v50 = vor.u32 %v5167_v40, %v5164_v21  ;;  %v11688_v52 = vpop.f32.mrf.mxu0  ;;  %v3220_v55 = vcombine.high %v3218_v44, %v3218_v44  ;;  %v5173_v58 = vrot.slane %v5171_v41, 5  ;;  %11839 = vmatmul.mubr.msk.bf16.gmra.mxu0 %vm2565_vm2, %v12151_v36 }
 0x135   : > { %v4206_v56 = vcombine.low %v3219_v45, %v3218_v44  ;;  %v5177_v59 = vrot.slane %v5175_v47, 4  ;;  %v4213_v46 = vrot.slane %v4205_v48, %v12758_v35  ;;  %v5183_v63 = vrot.slane %v5181_v51, 5  ;;  %11842 = vmatprep.mubr.msk.bf16.mxu0 %vm2565_vm2, %v12152_v42 }
 0x136   : > { %v4204_v61 = vcombine.low %v4196_v38, %v4203_v49  ;;  %v5169_v62 = vrot.slane %v5168_v50, 4  ;;  %v12930_v0 = vpop.f32.mrf.mxu0  ;;  %v4228_v3 = vrot.slane %v3220_v55, %v12758_v35  ;;  %v2740_v5 = vadd.f32 %v12754_v33, %v12900_v53  ;;  %v11138_v53 = vld [vmem:[%s15334_s3 + $0xa] sm:$0x3] }
 0x137   : > { %v4220_v1 = vrot.slane %v4206_v56, %v12758_v35  ;;  %v5178_v4 = vor.u32 %v5177_v59, %v5173_v58  ;;  %v2743_v10 = vadd.f32 %v12754_v33, %v2742_v18  ;;  %v5186_v12 = vshrl.u32 %v5045_v60, 16  ;;  %12112 = vmatprep.subr.msk.bf16.mxu0 %vm2629_vm0, %v11138_v53 }
 0x138   : > { %v4714_v7 = vsel %vm3679_vm8, %v4204_v61, 0.0  ;;  %v5174_v9 = vsel %vm12740_vm7, %v5169_v62, %v5173_v58  ;;  %v11689_v13 = vpop.f32.mrf.mxu0  ;;  %v4716_v16 = vsel %vm3738_vm9, %v4228_v3, 0.0  ;;  %v2851_v20 = vmax.f32 %v2740_v5, 0.0 }
 0x139   : > { %v11405_v14 = vpack.c.bf16 %v4714_v7, %v4714_v7  ;;  %v4221_v15 = vcombine.low %v4213_v46, %v4220_v1  ;;  %v5179_v17 = vrot.slane %v5178_v4, 4  ;;  %v11407_v19 = vpack.c.bf16 %v4716_v16, %v4716_v16  ;;  %v5047_v4 = vld [vmem:[#allocation2 + $0x3c] sm:$0xf] }
 0x13a   : > { %v2852_v21 = vmax.f32 %v2743_v10, 0.0  ;;  %v5188_v23 = vrot.slane %v5186_v12, 4  ;;  %v12153_v24 = vld [vmem:[#allocation2 + $0x48] sm:$0xff]   ;;  %v12946_v25 = vpop.f32.mrf.mxu0  ;;  %v5189_v28 = vshll.u32 %v5045_v60, 16  ;;  %v5195_v2 = vshll.u32 %v5046_v11, 16 }
 0x13b   : > { %5004 = vst.msk [vmem:[#allocation2 + $0x54] sm:$0xf] %vm4981_vm3, %v11405_v14  ;;  %v11406_v18 = vpack.c.bf16 %v4221_v15, %v4221_v15  ;;  %v5184_v26 = vsel %vm12740_vm7, %v5179_v17, %v5183_v63  ;;  %v3221_v30 = vcombine.high %v2851_v20, %v2851_v20  ;;  %v3228_v31 = vrot.slane %v2851_v20, %v12758_v35 }
 0x13c   : > { %5006 = vst.msk [vmem:[#allocation2 + $0x5c] sm:$0x1] %vm4984_vm4, %v11407_v19  ;;  %v10946_v29 = vcombine.low %v5174_v9, %v5184_v26  ;;  %v3238_v34 = vcombine.high %v2852_v21, %v2852_v21  ;;  %v11692_v8 = vpop.f32.mrf.mxu0  ;;  %v3245_v36 = vrot.slane %v2852_v21, %v12758_v35  ;;  %v5191_v37 = vrot.slane %v5189_v28, 5  ;;  %11843 = vmatmul.mubr.msk.bf16.gmra.mxu0 %vm2565_vm2, %v12153_v24 }
 0x13d   : > { %5005 = vst.msk [vmem:[#allocation2 + $0x58] sm:$0xf] %vm4981_vm3, %v11406_v18  ;;  %v5197_v38 = vrot.slane %v5195_v2, 5  ;;  %v5199_v39 = vshrl.u32 %v5046_v11, 16  ;;  %v3235_v40 = vrot.slane %v3221_v30, %v12758_v35  ;;  %v3236_v42 = vcombine.high %v3228_v31, %v3228_v31  ;;  %v5075_v8 = vld [vmem:[#allocation2 + $0x44] sm:$0x1] }
 0x13e   : > { %11737 = vmatmul.mubr.msk.bf16.vlgmr.msra.gmra.mxu1 %vm2565_vm2, %v10946_v29  ;;  %v3252_v44 = vrot.slane %v3238_v34, %v12758_v35  ;;  %v5205_v45 = vshll.u32 %v5074_v27, 16  ;;  %v12960_v41 = vpop.f32.mrf.mxu0  ;;  %v3253_v47 = vcombine.high %v3245_v36, %v3245_v36  ;;  %v5192_v49 = vor.u32 %v5191_v37, %v5188_v23  ;;  %v5048_v34 = vld [vmem:[#allocation2 + $0x40] sm:$0xf] }
 0x13f   : > { %v5201_v48 = vrot.slane %v5199_v39, 4  ;;  %v2748_v50 = vadd.f32 %v12754_v33, %v12921_v43  ;;  %v3237_v51 = vcombine.high %v3235_v40, %v3235_v40  ;;  %v4229_v52 = vcombine.low %v3228_v31, %v3236_v42 }
 0x140   : > { %v3254_v55 = vcombine.high %v3252_v44, %v3252_v44  ;;  %v5207_v56 = vrot.slane %v5205_v45, 5  ;;  %v11693_v58 = vpop.f32.mrf.mxu0  ;;  %v4246_v59 = vcombine.low %v3245_v36, %v3253_v47  ;;  %v5193_v60 = vrot.slane %v5192_v49, 4 }
 0x141   : > { %v5202_v61 = vor.u32 %v5201_v48, %v5197_v38  ;;  %v2853_v46 = vmax.f32 %v2748_v50, 0.0  ;;  %v4230_v62 = vcombine.low %v3235_v40, %v3237_v51  ;;  %v4237_v63 = vrot.slane %v4229_v52, %v12758_v35 }
 0x142   : > { %v4247_v1 = vcombine.low %v3252_v44, %v3254_v55  ;;  %v2751_v3 = vadd.f32 %v12754_v33, %v12930_v0  ;;  %v12967_v5 = vpop.f32.mrf.mxu0  ;;  %v4254_v43 = vrot.slane %v4246_v59, %v12758_v35  ;;  %v5198_v7 = vsel %vm12740_vm7, %v5193_v60, %v5197_v38 }
 0x143   : > { %v5203_v9 = vrot.slane %v5202_v61, 4  ;;  %v3255_v10 = vcombine.high %v2853_v46, %v2853_v46  ;;  %v4244_v11 = vrot.slane %v4230_v62, %v12758_v35  ;;  %v3262_v13 = vrot.slane %v2853_v46, %v12758_v35  ;;  %v5049_v61 = vld [vmem:[#allocation2 + $0x48] sm:$0xf] }
 0x144   : > { %v4261_v12 = vrot.slane %v4247_v1, %v12758_v35  ;;  %v2854_v14 = vmax.f32 %v2751_v3, 0.0  ;;  %v12154_v15 = vld [vmem:[#allocation2 + $0x54] sm:$0xff]   ;;  %v11696_v16 = vpop.f32.mrf.mxu0  ;;  %v5210_v53 = vshrl.u32 %v5047_v4, 16  ;;  %v5213_v19 = vshll.u32 %v5047_v4, 16 }
 0x145   : > { %v5208_v0 = vsel %vm12740_vm7, %v5203_v9, %v5207_v56  ;;  %v3269_v17 = vrot.slane %v3255_v10, %v12758_v35  ;;  %v4245_v20 = vcombine.low %v4237_v63, %v4244_v11  ;;  %v3270_v24 = vcombine.high %v3262_v13, %v3262_v13  ;;  %11846 = vmatprep.mubr.msk.bf16.mxu0 %vm2565_vm2, %v12154_v15  ;;  %v12169_v22 = vld [vmem:[#allocation2 + $0x54] sm:$0xff]  }
 0x146   : > { %v4262_v21 = vcombine.low %v4254_v43, %v4261_v12  ;;  %v10947_v23 = vcombine.low %v5198_v7, %v5208_v0  ;;  %v12979_v18 = vpop.f32.mrf.mxu0  ;;  %v4269_v26 = vrot.slane %v3262_v13, %v12758_v35  ;;  %v3272_v28 = vcombine.high %v2854_v14, %v2854_v14 }
 0x147   : > { %v3271_v27 = vcombine.high %v3269_v17, %v3269_v17  ;;  %v3279_v2 = vrot.slane %v2854_v14, %v12758_v35  ;;  %v4717_v29 = vsel %vm3679_vm8, %v4245_v20, 0.0  ;;  %v4270_v31 = vcombine.low %v3270_v24, %v3269_v17 }
 0x148   : > { %v11409_v30 = vpack.c.bf16 %v4262_v21, %v4262_v21  ;;  %11740 = vmatprep.mubr.msk.bf16.mxu1 %vm2565_vm2, %v10947_v23  ;;  %v5212_v36 = vrot.slane %v5210_v53, 4  ;;  %v11697_v37 = vpop.f32.mrf.mxu0  ;;  %v11408_v38 = vpack.c.bf16 %v4717_v29, %v4717_v29  ;;  %v4719_v39 = vsel %vm3738_vm9, %v4269_v26, 0.0 }
 0x149   : > { %v3286_v40 = vrot.slane %v3272_v28, %v12758_v35  ;;  %v3287_v42 = vcombine.high %v3279_v2, %v3279_v2  ;;  %v4278_v44 = vrot.slane %v4270_v31, %v12758_v35  ;;  %v11410_v45 = vpack.c.bf16 %v4719_v39, %v4719_v39 }
 0x14a   : > { %5008 = vst.msk [vmem:[#allocation2 + $0x64] sm:$0xf] %vm4981_vm3, %v11409_v30  ;;  %v4271_v47 = vcombine.low %v3271_v27, %v3279_v2  ;;  %v5215_v49 = vrot.slane %v5213_v19, 5  ;;  %v12991_v48 = vpop.f32.mrf.mxu0  ;;  %5007 = vst.msk [vmem:[#allocation2 + $0x60] sm:$0xf] %vm4981_vm3, %v11408_v38  ;;  %v5219_v51 = vshll.u32 %v5048_v34, 16  ;;  %v2756_v59 = vadd.f32 %v12754_v33, %v12946_v25 }
 0x14b   : > { %v4287_v50 = vcombine.low %v3287_v42, %v3286_v40  ;;  %v5223_v52 = vshrl.u32 %v5048_v34, 16  ;;  %v5229_v55 = vshll.u32 %v5075_v8, 16  ;;  %5009 = vst.msk [vmem:[#allocation2 + $0x68] sm:$0x1] %vm4984_vm4, %v11410_v45  ;;  %v3288_v60 = vcombine.high %v3286_v40, %v3286_v40 }
 0x14c   : > { %v4285_v56 = vrot.slane %v4271_v47, %v12758_v35  ;;  %v5216_v58 = vor.u32 %v5215_v49, %v5212_v36  ;;  %v11700_v46 = vpop.f32.mrf.mxu0  ;;  %v5221_v63 = vrot.slane %v5219_v51, 5  ;;  %v2855_v7 = vmax.f32 %v2756_v59, 0.0  ;;  %v5050_v47 = vld [vmem:[#allocation2 + $0x4c] sm:$0xf] }
 0x14d   : > { %v4295_v62 = vrot.slane %v4287_v50, %v12758_v35  ;;  %v5225_v1 = vrot.slane %v5223_v52, 4  ;;  %v5231_v3 = vrot.slane %v5229_v55, 5  ;;  %v2759_v9 = vadd.f32 %v12754_v33, %v12960_v41 }
 0x14e   : > { %v4286_v4 = vcombine.low %v4278_v44, %v4285_v56  ;;  %v5217_v43 = vrot.slane %v5216_v58, 4  ;;  %v13001_v10 = vpop.f32.mrf.mxu0  ;;  %v2764_v25 = vadd.f32 %v12754_v33, %v12967_v5  ;;  %v5234_v12 = vshrl.u32 %v5049_v61, 16  ;;  %v5076_v58 = vld [vmem:[#allocation2 + $0x50] sm:$0x1] }
 0x14f   : > { %v5226_v11 = vor.u32 %v5225_v1, %v5221_v63  ;;  %v5237_v13 = vshll.u32 %v5049_v61, 16  ;;  %v3289_v16 = vcombine.high %v2855_v7, %v2855_v7  ;;  %v3296_v0 = vrot.slane %v2855_v7, %v12758_v35 }
 0x150   : > { %v4720_v14 = vsel %vm3679_vm8, %v4286_v4, 0.0  ;;  %v5222_v15 = vsel %vm12740_vm7, %v5217_v43, %v5221_v63  ;;  %v11701_v17 = vpop.f32.mrf.mxu0  ;;  %v2856_v19 = vmax.f32 %v2759_v9, 0.0  ;;  %v2857_v20 = vmax.f32 %v2764_v25, 0.0 }
 0x151   : > { %v11411_v53 = vpack.c.bf16 %v4720_v14, %v4720_v14  ;;  %v5227_v41 = vrot.slane %v5226_v11, 4  ;;  %v3303_v21 = vrot.slane %v3289_v16, %v12758_v35  ;;  %v3304_v23 = vcombine.high %v3296_v0, %v3296_v0  ;;  %v12155_v24 = vld [vmem:[#allocation2 + $0x60] sm:$0xff]  }
 0x152   : > { %v4288_v33 = vcombine.low %v3288_v60, %v3296_v0  ;;  %v5236_v5 = vrot.slane %v5234_v12, 4  ;;  %v13011_v26 = vpop.f32.mrf.mxu0  ;;  %v3306_v28 = vcombine.high %v2856_v19, %v2856_v19  ;;  %v3313_v2 = vrot.slane %v2856_v19, %v12758_v35  ;;  %11847 = vmatmul.mubr.msk.bf16.gmra.mxu0 %vm2565_vm2, %v12155_v24  ;;  %v5051_v19 = vld [vmem:[#allocation2 + $0x54] sm:$0xf]  ;;  %v5052_v24 = vld [vmem:[#allocation2 + $0x58] sm:$0xf] }
 0x153   : > { %5010 = vst.msk [vmem:[#allocation2 + $0x6c] sm:$0xf] %vm4981_vm3, %v11411_v53  ;;  %v5232_v27 = vsel %vm12740_vm7, %v5227_v41, %v5231_v3  ;;  %v3323_v29 = vcombine.high %v2857_v20, %v2857_v20  ;;  %v3305_v31 = vcombine.high %v3303_v21, %v3303_v21  ;;  %v4310_v8 = vrot.slane %v3304_v23, %v12758_v35  ;;  %v13045_v53 = vld [vmem:[%s15333_s2] ss:$0 sm:$0xff] }
 0x154   : > { %v10948_v30 = vcombine.low %v5222_v15, %v5232_v27  ;;  %v4302_v34 = vrot.slane %v4288_v33, %v12758_v35  ;;  %v11704_v36 = vpop.f32.mrf.mxu0  ;;  %v3320_v37 = vrot.slane %v3306_v28, %v12758_v35  ;;  %v3321_v38 = vcombine.high %v3313_v2, %v3313_v2 }
 0x155   : > { %v3330_v39 = vrot.slane %v2857_v20, %v12758_v35  ;;  %v13023_v40 = vrot.slane %v3323_v29, %v12758_v35  ;;  %v4311_v44 = vcombine.low %v3303_v21, %v3305_v31  ;;  %v4722_v45 = vsel %vm3738_vm9, %v4310_v8, 0.0 }
 0x156   : > { %11741 = vmatmul.mubr.msk.bf16.gmra.mxu1 %vm2565_vm2, %v10948_v30  ;;  %v4303_v42 = vcombine.low %v4295_v62, %v4302_v34  ;;  %v5239_v49 = vrot.slane %v5237_v13, 5  ;;  %v13028_v50 = vpop.f32.mrf.mxu0  ;;  %v11413_v51 = vpack.c.bf16 %v4722_v45, %v4722_v45  ;;  %v3322_v52 = vcombine.high %v3320_v37, %v3320_v37 }
 0x157   : > { %v4312_v55 = vcombine.low %v3313_v2, %v3321_v38  ;;  %v3338_v56 = vcombine.high %v3330_v39, %v3330_v39  ;;  %v4319_v59 = vrot.slane %v4311_v44, %v12758_v35  ;;  %v4351_v61 = vrot.slane %v13023_v40, %v12758_v35 }
 0x158   : > { %v11412_v60 = vpack.c.bf16 %v4303_v42, %v4303_v42  ;;  %v5240_v46 = vor.u32 %v5239_v49, %v5236_v5  ;;  %v11705_v62 = vpop.f32.mrf.mxu0  ;;  %5012 = vst.msk [vmem:[#allocation2 + $0x74] sm:$0x1] %vm4984_vm4, %v11413_v51  ;;  %v4328_v1 = vcombine.low %v3320_v37, %v3322_v52  ;;  %v5243_v4 = vshll.u32 %v5050_v47, 16 }
 0x159   : > { %v4326_v63 = vrot.slane %v4312_v55, %v12758_v35  ;;  %v4329_v3 = vcombine.low %v3330_v39, %v3338_v56  ;;  %v4725_v43 = vsel %vm3738_vm9, %v4351_v61, 0.0  ;;  %v5247_v9 = vshrl.u32 %v5050_v47, 16  ;;  %v5077_v61 = vld [vmem:[#allocation2 + $0x5c] sm:$0x1] }
 0x15a   : > { %5011 = vst.msk [vmem:[#allocation2 + $0x70] sm:$0xf] %vm4981_vm3, %v11412_v60  ;;  %v5241_v7 = vrot.slane %v5240_v46, 4  ;;  %v5253_v11 = vshll.u32 %v5076_v58, 16  ;;  %v13038_v25 = vpop.f32.mrf.mxu0  ;;  %v4336_v13 = vrot.slane %v4328_v1, %v12758_v35  ;;  %v11416_v15 = vpack.c.bf16 %v4725_v43, %v4725_v43 }
 0x15b   : > { %v4327_v12 = vcombine.low %v4319_v59, %v4326_v63  ;;  %v4343_v14 = vrot.slane %v4329_v3, %v12758_v35  ;;  %v5245_v16 = vrot.slane %v5243_v4, 5  ;;  %v5249_v0 = vrot.slane %v5247_v9, 4 }
 0x15c   : > { %v5255_v17 = vrot.slane %v5253_v11, 5  ;;  %v2767_v41 = vadd.f32 %v13045_v53, %v12979_v18  ;;  %v11708_v20 = vpop.f32.mrf.mxu0  ;;  %5015 = vst.msk [vmem:[#allocation2 + $0x80] sm:$0x1] %vm4984_vm4, %v11416_v15  ;;  %v3339_v33 = vcombine.high %v13023_v40, %v13023_v40  ;;  %v2772_v5 = vadd.f32 %v13045_v53, %v12991_v48 }
 0x15d   : > { %v4723_v21 = vsel %vm3679_vm8, %v4327_v12, 0.0  ;;  %v4344_v23 = vcombine.low %v4336_v13, %v4343_v14  ;;  %v5246_v28 = vsel %vm12740_vm7, %v5241_v7, %v5245_v16  ;;  %v5250_v18 = vor.u32 %v5249_v0, %v5245_v16  ;;  %v5053_v16 = vld [vmem:[#allocation2 + $0x60] sm:$0xf] }
 0x15e   : > { %v11414_v27 = vpack.c.bf16 %v4723_v21, %v4723_v21  ;;  %v2858_v2 = vmax.f32 %v2767_v41, 0.0  ;;  %v13058_v29 = vpop.f32.mrf.mxu0  ;;  %v2859_v31 = vmax.f32 %v2772_v5, 0.0  ;;  %v5258_v34 = vshrl.u32 %v5051_v19, 16 }
 0x15f   : > { %v11415_v30 = vpack.c.bf16 %v4344_v23, %v4344_v23  ;;  %v5261_v8 = vshll.u32 %v5051_v19, 16  ;;  %v5251_v36 = vrot.slane %v5250_v18, 4  ;;  %v5267_v48 = vshll.u32 %v5052_v24, 16 }
 0x160   : > { %5013 = vst.msk [vmem:[#allocation2 + $0x78] sm:$0xf] %vm4981_vm3, %v11414_v27  ;;  %v3340_v37 = vcombine.high %v2858_v2, %v2858_v2  ;;  %v3347_v38 = vrot.slane %v2858_v2, %v12758_v35  ;;  %v11709_v39 = vpop.f32.mrf.mxu0  ;;  %v3357_v40 = vcombine.high %v2859_v31, %v2859_v31  ;;  %v3364_v42 = vrot.slane %v2859_v31, %v12758_v35 }
 0x161   : > { %5014 = vst.msk [vmem:[#allocation2 + $0x7c] sm:$0xf] %vm4981_vm3, %v11415_v30  ;;  %v5260_v44 = vrot.slane %v5258_v34, 4  ;;  %v5263_v45 = vrot.slane %v5261_v8, 5  ;;  %v12156_v47 = vld [vmem:[#allocation2 + $0x6c] sm:$0xff]   ;;  %v5256_v49 = vsel %vm12740_vm7, %v5251_v36, %v5255_v17  ;;  %v5269_v3 = vrot.slane %v5267_v48, 5 }
 0x162   : > { %v3354_v51 = vrot.slane %v3340_v37, %v12758_v35  ;;  %v3355_v52 = vcombine.high %v3347_v38, %v3347_v38  ;;  %v4352_v55 = vcombine.low %v3339_v33, %v3347_v38  ;;  %v13067_v56 = vpop.f32.mrf.mxu0  ;;  %v10949_v58 = vcombine.low %v5246_v28, %v5256_v49  ;;  %11850 = vmatprep.mubr.msk.bf16.mxu0 %vm2565_vm2, %v12156_v47 }
 0x163   : > { %v3371_v59 = vrot.slane %v3357_v40, %v12758_v35  ;;  %v3372_v60 = vcombine.high %v3364_v42, %v3364_v42  ;;  %v5264_v46 = vor.u32 %v5263_v45, %v5260_v44  ;;  %v5271_v11 = vshrl.u32 %v5052_v24, 16  ;;  %v13093_v40 = vld [vmem:[#allocation2 + $0x64] sm:$0xf] }
 0x164   : > { %v4353_v62 = vcombine.low %v3355_v52, %v3354_v51  ;;  %v4360_v63 = vrot.slane %v4352_v55, %v12758_v35  ;;  %v3356_v1 = vcombine.high %v3354_v51, %v3354_v51  ;;  %v11712_v4 = vpop.f32.mrf.mxu0  ;;  %11744 = vmatprep.mubr.msk.bf16.mxu1 %vm2565_vm2, %v10949_v58  ;;  %v5277_v14 = vshll.u32 %v5077_v61, 16  ;;  %v5078_v58 = vld [vmem:[#allocation2 + $0x68] sm:$0x1] }
 0x165   : > { %v3373_v43 = vcombine.high %v3371_v59, %v3371_v59  ;;  %v4370_v7 = vcombine.low %v3372_v60, %v3371_v59  ;;  %v5265_v9 = vrot.slane %v5264_v46, 4  ;;  %v2775_v15 = vadd.f32 %v13045_v53, %v13001_v10 }
 0x166   : > { %v4367_v12 = vrot.slane %v4353_v62, %v12758_v35  ;;  %v4369_v13 = vcombine.low %v3356_v1, %v3364_v42  ;;  %v13076_v0 = vpop.f32.mrf.mxu0  ;;  %v5273_v20 = vrot.slane %v5271_v11, 4  ;;  %v5279_v33 = vrot.slane %v5277_v14, 5 }
 0x167   : > { %v4384_v17 = vrot.slane %v4370_v7, %v12758_v35  ;;  %v4392_v41 = vrot.slane %v3373_v43, %v12758_v35  ;;  %v5270_v19 = vsel %vm12740_vm7, %v5265_v9, %v5269_v3  ;;  %v2860_v5 = vmax.f32 %v2775_v15, 0.0 }
 0x168   : > { %v4368_v21 = vcombine.low %v4360_v63, %v4367_v12  ;;  %v4377_v23 = vrot.slane %v4369_v13, %v12758_v35  ;;  %v12157_v24 = vld [vmem:[#allocation2 + $0x78] sm:$0xff]   ;;  %v11713_v27 = vpop.f32.mrf.mxu0  ;;  %v5274_v28 = vor.u32 %v5273_v20, %v5269_v3  ;;  %v2780_v18 = vadd.f32 %v13045_v53, %v13011_v26 }
 0x169   : > { %v4728_v10 = vsel %vm3738_vm9, %v4392_v41, 0.0  ;;  %v5282_v2 = vshrl.u32 %v5053_v16, 16  ;;  %v3374_v8 = vcombine.high %v2860_v5, %v2860_v5  ;;  %11851 = vmatmul.mubr.msk.bf16.gmra.mxu0 %vm2565_vm2, %v12157_v24  ;;  %v3381_v48 = vrot.slane %v2860_v5, %v12758_v35 }
 0x16a   : > { %v4726_v30 = vsel %vm3679_vm8, %v4368_v21, 0.0  ;;  %v4385_v31 = vcombine.low %v4377_v23, %v4384_v17  ;;  %v11419_v34 = vpack.c.bf16 %v4728_v10, %v4728_v10  ;;  %v13090_v36 = vpop.f32.mrf.mxu0  ;;  %v5275_v38 = vrot.slane %v5274_v28, 4  ;;  %v13109_v17 = vld [vmem:[#allocation2 + $0x6c] sm:$0xf] }
 0x16b   : > { %v11417_v37 = vpack.c.bf16 %v4726_v30, %v4726_v30  ;;  %v2861_v39 = vmax.f32 %v2780_v18, 0.0  ;;  %v3388_v26 = vrot.slane %v3374_v8, %v12758_v35  ;;  %v5284_v44 = vrot.slane %v5282_v2, 4 }
 0x16c   : > { %v11418_v42 = vpack.c.bf16 %v4385_v31, %v4385_v31  ;;  %5018 = vst.msk [vmem:[#allocation2 + $0x8c] sm:$0x1] %vm4984_vm4, %v11419_v34  ;;  %v5285_v45 = vshll.u32 %v5053_v16, 16  ;;  %v11716_v47 = vpop.f32.mrf.mxu0  ;;  %v5280_v49 = vsel %vm12740_vm7, %v5275_v38, %v5279_v33  ;;  %v3389_v51 = vcombine.high %v3381_v48, %v3381_v48 }
 0x16d   : > { %5016 = vst.msk [vmem:[#allocation2 + $0x84] sm:$0xf] %vm4981_vm3, %v11417_v37  ;;  %v3391_v52 = vcombine.high %v2861_v39, %v2861_v39  ;;  %v3398_v55 = vrot.slane %v2861_v39, %v12758_v35  ;;  %v10950_v59 = vcombine.low %v5270_v19, %v5280_v49  ;;  %v3390_v60 = vcombine.high %v3388_v26, %v3388_v26  ;;  %v13131_v49 = vld [vmem:[#allocation2 + $0x70] sm:$0xf] }
 0x16e   : > { %5017 = vst.msk [vmem:[#allocation2 + $0x88] sm:$0xf] %vm4981_vm3, %v11418_v42  ;;  %v5287_v61 = vrot.slane %v5285_v45, 5  ;;  %v5291_v46 = vshll.u32 %v13093_v40, 16  ;;  %v13103_v62 = vpop.f32.mrf.mxu0  ;;  %v4393_v63 = vcombine.low %v3381_v48, %v3389_v51  ;;  %v5295_v4 = vshrl.u32 %v13093_v40, 16 }
 0x16f   : > { %v3405_v1 = vrot.slane %v3391_v52, %v12758_v35  ;;  %v3406_v3 = vcombine.high %v3398_v55, %v3398_v55  ;;  %11745 = vmatmul.mubr.msk.bf16.gmra.mxu1 %vm2565_vm2, %v10950_v59  ;;  %v4394_v43 = vcombine.low %v3388_v26, %v3390_v60  ;;  %v5301_v11 = vshll.u32 %v5078_v58, 16 }
 0x170   : > { %v5288_v7 = vor.u32 %v5287_v61, %v5284_v44  ;;  %v5293_v9 = vrot.slane %v5291_v46, 5  ;;  %v11717_v12 = vpop.f32.mrf.mxu0  ;;  %v4401_v13 = vrot.slane %v4393_v63, %v12758_v35  ;;  %v5297_v16 = vrot.slane %v5295_v4, 4  ;;  %v5079_v63 = vld [vmem:[#allocation2 + $0x74] sm:$0x1] }
 0x171   : > { %v3407_v14 = vcombine.high %v3405_v1, %v3405_v1  ;;  %v4410_v15 = vcombine.low %v3398_v55, %v3406_v3  ;;  %v4408_v41 = vrot.slane %v4394_v43, %v12758_v35  ;;  %v5303_v20 = vrot.slane %v5301_v11, 5 }
 0x172   : > { %v5289_v19 = vrot.slane %v5288_v7, 4  ;;  %v2783_v21 = vadd.f32 %v13045_v53, %v13028_v50  ;;  %v13114_v23 = vpop.f32.mrf.mxu0  ;;  %v5298_v24 = vor.u32 %v5297_v16, %v5293_v9  ;;  %v2788_v27 = vadd.f32 %v13045_v53, %v13038_v25 }
 0x173   : > { %v4411_v33 = vcombine.low %v3405_v1, %v3407_v14  ;;  %v4418_v5 = vrot.slane %v4410_v15, %v12758_v35  ;;  %v4409_v10 = vcombine.low %v4401_v13, %v4408_v41  ;;  %v5306_v2 = vshrl.u32 %v13109_v17, 16 }
 0x174   : > { %v5294_v28 = vsel %vm12740_vm7, %v5289_v19, %v5293_v9  ;;  %v2862_v18 = vmax.f32 %v2783_v21, 0.0  ;;  %v11720_v30 = vpop.f32.mrf.mxu0  ;;  %v5299_v50 = vrot.slane %v5298_v24, 4  ;;  %v2863_v34 = vmax.f32 %v2788_v27, 0.0 }
 0x175   : > { %v4425_v31 = vrot.slane %v4411_v33, %v12758_v35  ;;  %v5309_v8 = vshll.u32 %v13109_v17, 16  ;;  %v12158_v37 = vld [vmem:[#allocation2 + $0x84] sm:$0xff]   ;;  %v4729_v38 = vsel %vm3679_vm8, %v4409_v10, 0.0  ;;  %v5308_v39 = vrot.slane %v5306_v2, 4  ;;  %v13154_v2 = vld [vmem:[#allocation2 + $0x78] sm:$0xf] }
 0x176   : > { %v3408_v48 = vcombine.high %v2862_v18, %v2862_v18  ;;  %v3415_v25 = vrot.slane %v2862_v18, %v12758_v35  ;;  %v13127_v42 = vpop.f32.mrf.mxu0  ;;  %v11420_v26 = vpack.c.bf16 %v4729_v38, %v4729_v38  ;;  %v5304_v45 = vsel %vm12740_vm7, %v5299_v50, %v5303_v20  ;;  %11854 = vmatprep.mubr.msk.bf16.mxu0 %vm2565_vm2, %v12158_v37 }
 0x177   : > { %v4426_v44 = vcombine.low %v4418_v5, %v4425_v31  ;;  %v3425_v47 = vcombine.high %v2863_v34, %v2863_v34  ;;  %v10951_v51 = vcombine.low %v5294_v28, %v5304_v45  ;;  %v3432_v61 = vrot.slane %v2863_v34, %v12758_v35 }
 0x178   : > { %v3422_v52 = vrot.slane %v3408_v48, %v12758_v35  ;;  %v3423_v55 = vcombine.high %v3415_v25, %v3415_v25  ;;  %v4433_v58 = vrot.slane %v3415_v25, %v12758_v35  ;;  %v11721_v59 = vpop.f32.mrf.mxu0  ;;  %5019 = vst.msk [vmem:[#allocation2 + $0x90] sm:$0xf] %vm4981_vm3, %v11420_v26  ;;  %v5311_v1 = vrot.slane %v5309_v8, 5 }
 0x179   : > { %v11421_v60 = vpack.c.bf16 %v4426_v44, %v4426_v44  ;;  %v3439_v46 = vrot.slane %v3425_v47, %v12758_v35  ;;  %11748 = vmatprep.mubr.msk.bf16.mxu1 %vm2565_vm2, %v10951_v51  ;;  %v5315_v7 = vshll.u32 %v13131_v49, 16  ;;  %v3440_v12 = vcombine.high %v3432_v61, %v3432_v61 }
 0x17a   : > { %v4434_v3 = vcombine.low %v3423_v55, %v3422_v52  ;;  %v4731_v4 = vsel %vm3738_vm9, %v4433_v58, 0.0  ;;  %v3424_v43 = vcombine.high %v3422_v52, %v3422_v52  ;;  %v13143_v9 = vpop.f32.mrf.mxu0  ;;  %v5312_v13 = vor.u32 %v5311_v1, %v5308_v39 }
 0x17b   : > { %5020 = vst.msk [vmem:[#allocation2 + $0x94] sm:$0xf] %vm4981_vm3, %v11421_v60  ;;  %v11422_v11 = vpack.c.bf16 %v4731_v4, %v4731_v4  ;;  %v5319_v14 = vshrl.u32 %v13131_v49, 16  ;;  %v5317_v41 = vrot.slane %v5315_v7, 5  ;;  %v5325_v19 = vshll.u32 %v5079_v63, 16 }
 0x17c   : > { %v4442_v15 = vrot.slane %v4434_v3, %v12758_v35  ;;  %v4435_v16 = vcombine.low %v3424_v43, %v3432_v61  ;;  %v11724_v20 = vpop.f32.mrf.mxu0  ;;  %v4451_v21 = vcombine.low %v3440_v12, %v3439_v46  ;;  %v5313_v33 = vrot.slane %v5312_v13, 4 }
 0x17d   : > { %5021 = vst.msk [vmem:[#allocation2 + $0x98] sm:$0x1] %vm4984_vm4, %v11422_v11  ;;  %v5321_v5 = vrot.slane %v5319_v14, 4  ;;  %v2791_v24 = vadd.f32 %v13045_v53, %v13058_v29  ;;  %v5327_v10 = vrot.slane %v5325_v19, 5  ;;  %v3441_v28 = vcombine.high %v3439_v46, %v3439_v46  ;;  %v13162_v29 = vld [vmem:[%s15334_s3 + $0x4] sm:$0x3] }
 0x17e   : > { %v4449_v27 = vrot.slane %v4435_v16, %v12758_v35  ;;  %v2796_v18 = vadd.f32 %v13045_v53, %v13067_v56  ;;  %v2822_v30 = vpop.f32.mrf.mxu0  ;;  %v4459_v31 = vrot.slane %v4451_v21, %v12758_v35  ;;  %v5318_v50 = vsel %vm12740_vm7, %v5313_v33, %v5317_v41  ;;  %v12181_v56 = vld [vmem:[%s15334_s3] sm:$0x3] }
 0x17f   : > { %v5322_v34 = vor.u32 %v5321_v5, %v5317_v41  ;;  %v2864_v8 = vmax.f32 %v2791_v24, 0.0  ;;  %v5864_v48 = vsel %vm2629_vm0, %v12181_v56, 0  ;;  %v2799_v25 = vadd.f32 %v13045_v53, %v13076_v0 }
 0x180   : > { %v4450_v37 = vcombine.low %v4442_v15, %v4449_v27  ;;  %v2865_v38 = vmax.f32 %v2796_v18, 0.0  ;;  %v11725_v39 = vpop.f32.mrf.mxu0  ;;  %11765 = vmatpush3.bf16.msra.mxu1 %v5864_v48  ;;  %v5330_v47 = vshrl.u32 %v13154_v2, 16  ;;  %v13190_v27 = vld [vmem:[#allocation2 + $0x7c] sm:$0xf]  ;;  %v5333_v56 = vshll.u32 %v13154_v2, 16 }
 0x181   : > { %v5323_v26 = vrot.slane %v5322_v34, 4  ;;  %v3442_v44 = vcombine.high %v2864_v8, %v2864_v8  ;;  %v3449_v45 = vrot.slane %v2864_v8, %v12758_v35  ;;  %v2866_v58 = vmax.f32 %v2799_v25, 0.0  ;;  %12109 = vmatprep.subr.msk.bf16.mxu1 %vm2629_vm0, %v13162_v29 }
 0x182   : > { %v4732_v51 = vsel %vm3679_vm8, %v4450_v37, 0.0  ;;  %v3459_v52 = vcombine.high %v2865_v38, %v2865_v38  ;;  %v3466_v55 = vrot.slane %v2865_v38, %v12758_v35  ;;  %v12159_v59 = vld [vmem:[#allocation2 + $0x90] sm:$0xff]   ;;  %v2827_v0 = vpop.f32.mrf.mxu0  ;;  %v5332_v19 = vrot.slane %v5330_v47, 4  ;;  %v5080_v38 = vld [vmem:[#allocation2 + $0x80] sm:$0x1] }
 0x183   : > { %v11423_v60 = vpack.c.bf16 %v4732_v51, %v4732_v51  ;;  %v5328_v61 = vsel %vm12740_vm7, %v5323_v26, %v5327_v10  ;;  %v3456_v46 = vrot.slane %v3442_v44, %v12758_v35  ;;  %v3457_v63 = vcombine.high %v3449_v45, %v3449_v45  ;;  %11855 = vmatmul.mubr.msk.bf16.gmra.mxu0 %vm2565_vm2, %v12159_v59 }
 0x184   : > { %v10952_v1 = vcombine.low %v5318_v50, %v5328_v61  ;;  %v4452_v3 = vcombine.low %v3441_v28, %v3449_v45  ;;  %v3473_v4 = vrot.slane %v3459_v52, %v12758_v35  ;;  %v3474_v43 = vcombine.high %v3466_v55, %v3466_v55  ;;  %v11728_v7 = vpop.f32.mrf.mxu0 }
 0x185   : > { %5022 = vst.msk [vmem:[#allocation2 + $0x9c] sm:$0xf] %vm4981_vm3, %v11423_v60  ;;  %v3458_v11 = vcombine.high %v3456_v46, %v3456_v46  ;;  %v4474_v12 = vrot.slane %v3457_v63, %v12758_v35  ;;  %v3476_v13 = vcombine.high %v2866_v58, %v2866_v58  ;;  %v3483_v14 = vrot.slane %v2866_v58, %v12758_v35  ;;  %v13210_v63 = vld [vmem:[#allocation2 + $0x88] sm:$0xf] }
 0x186   : > { %11749 = vmatmul.mubr.msk.bf16.gmra.mxu1 %vm2565_vm2, %v10952_v1  ;;  %v4466_v15 = vrot.slane %v4452_v3, %v12758_v35  ;;  %v3475_v16 = vcombine.high %v3473_v4, %v3473_v4  ;;  %v4476_v41 = vcombine.low %v3466_v55, %v3474_v43  ;;  %v2830_v20 = vpop.f32.mrf.mxu0  ;;  %v5343_v39 = vshrl.u32 %v13190_v27, 16 }
 0x187   : > { %v4475_v21 = vcombine.low %v3456_v46, %v3458_v11  ;;  %v4734_v33 = vsel %vm3738_vm9, %v4474_v12, 0.0  ;;  %v3490_v5 = vrot.slane %v3476_v13, %v12758_v35  ;;  %v3491_v24 = vcombine.high %v3483_v14, %v3483_v14  ;;  %v13208_v46 = vld [vmem:[#allocation2 + $0x84] sm:$0xf] }
 0x188   : > { %v4467_v10 = vcombine.low %v4459_v31, %v4466_v15  ;;  %v11425_v28 = vpack.c.bf16 %v4734_v33, %v4734_v33  ;;  %v4490_v18 = vrot.slane %v4476_v41, %v12758_v35  ;;  %v4492_v30 = vcombine.low %v3473_v4, %v3475_v16  ;;  %v11729_v50 = vpop.f32.mrf.mxu0  ;;  %v5081_v33 = vld [vmem:[#allocation2 + $0x8c] sm:$0x1] }
 0x189   : > { %v4483_v34 = vrot.slane %v4475_v21, %v12758_v35  ;;  %v4493_v8 = vcombine.low %v3483_v14, %v3491_v24  ;;  %v4515_v37 = vrot.slane %v3490_v5, %v12758_v35  ;;  %v5339_v31 = vshll.u32 %v13190_v27, 16 }
 0x18a   : > { %v11424_v48 = vpack.c.bf16 %v4467_v10, %v4467_v10  ;;  %5024 = vst.msk [vmem:[#allocation2 + $0xa4] sm:$0x1] %vm4984_vm4, %v11425_v28  ;;  %v4500_v25 = vrot.slane %v4492_v30, %v12758_v35  ;;  %v5335_v47 = vrot.slane %v5333_v56, 5  ;;  %v5345_v55 = vrot.slane %v5343_v39, 4 }
 0x18b   : > { %v4491_v26 = vcombine.low %v4483_v34, %v4490_v18  ;;  %v4507_v44 = vrot.slane %v4493_v8, %v12758_v35  ;;  %v4737_v45 = vsel %vm3738_vm9, %v4515_v37, 0.0  ;;  %v5341_v52 = vrot.slane %v5339_v31, 5 }
 0x18c   : > { %5023 = vst.msk [vmem:[#allocation2 + $0xa0] sm:$0xf] %vm4981_vm3, %v11424_v48  ;;  %v11428_v51 = vpack.c.bf16 %v4737_v45, %v4737_v45  ;;  %v5349_v58 = vshll.u32 %v5080_v38, 16  ;;  %v5336_v60 = vor.u32 %v5335_v47, %v5332_v19  ;;  %v2804_v61 = vadd.f32 %v13045_v53, %v13090_v36 }
 0x18d   : > { %v4735_v59 = vsel %vm3679_vm8, %v4491_v26, 0.0  ;;  %v4508_v0 = vcombine.low %v4500_v25, %v4507_v44  ;;  %v5346_v3 = vor.u32 %v5345_v55, %v5341_v52  ;;  %v3492_v43 = vcombine.high %v3490_v5, %v3490_v5 }
 0x18e   : > { %v11426_v1 = vpack.c.bf16 %v4735_v59, %v4735_v59  ;;  %5027 = vst.msk [vmem:[#allocation2 + $0xb0] sm:$0x1] %vm4984_vm4, %v11428_v51  ;;  %v5351_v4 = vrot.slane %v5349_v58, 5  ;;  %v5337_v11 = vrot.slane %v5336_v60, 4  ;;  %v2867_v12 = vmax.f32 %v2804_v61, 0.0 }
 0x18f   : > { %v11427_v7 = vpack.c.bf16 %v4508_v0, %v4508_v0  ;;  %v2807_v13 = vadd.f32 %v13045_v53, %v13103_v62  ;;  %v5347_v14 = vrot.slane %v5346_v3, 4  ;;  %v5354_v36 = vshrl.u32 %v13208_v46, 16  ;;  %v13235_v59 = vld [vmem:[#allocation2 + $0x90] sm:$0xf] }
 0x190   : > { %5025 = vst.msk [vmem:[#allocation2 + $0xa8] sm:$0xf] %vm4981_vm3, %v11426_v1  ;;  %v5357_v15 = vshll.u32 %v13208_v46, 16  ;;  %v5363_v16 = vshll.u32 %v13210_v63, 16  ;;  %v5342_v41 = vsel %vm12740_vm7, %v5337_v11, %v5341_v52  ;;  %v3493_v19 = vcombine.high %v2867_v12, %v2867_v12 }
 0x191   : > { %5026 = vst.msk [vmem:[#allocation2 + $0xac] sm:$0xf] %vm4981_vm3, %v11427_v7  ;;  %v3500_v20 = vrot.slane %v2867_v12, %v12758_v35  ;;  %v2868_v21 = vmax.f32 %v2807_v13, 0.0  ;;  %v5352_v62 = vsel %vm12740_vm7, %v5347_v14, %v5351_v4  ;;  %v5356_v5 = vrot.slane %v5354_v36, 4 }
 0x192   : > { %v5359_v24 = vrot.slane %v5357_v15, 5  ;;  %v5365_v10 = vrot.slane %v5363_v16, 5  ;;  %v10953_v28 = vcombine.low %v5342_v41, %v5352_v62  ;;  %v3507_v18 = vrot.slane %v3493_v19, %v12758_v35 }
 0x193   : > { %v3508_v30 = vcombine.high %v3500_v20, %v3500_v20  ;;  %v4516_v50 = vcombine.low %v3492_v43, %v3500_v20  ;;  %v12160_v34 = vld [vmem:[#allocation2 + $0x9c] sm:$0xff]   ;;  %v3510_v8 = vcombine.high %v2868_v21, %v2868_v21  ;;  %v3517_v37 = vrot.slane %v2868_v21, %v12758_v35  ;;  %v13253_v21 = vld [vmem:[#allocation2 + $0x94] sm:$0xf] }
 0x194   : > { %v5360_v38 = vor.u32 %v5359_v24, %v5356_v5  ;;  %v5367_v56 = vshrl.u32 %v13210_v63, 16  ;;  %11752 = vmatprep.mubr.msk.bf16.mxu1 %vm2565_vm2, %v10953_v28  ;;  %v3509_v31 = vcombine.high %v3507_v18, %v3507_v18  ;;  %v5373_v39 = vshll.u32 %v5081_v33, 16  ;;  %11858 = vmatprep.mubr.msk.bf16.mxu0 %vm2565_vm2, %v12160_v34 }
 0x195   : > { %v4517_v48 = vcombine.low %v3508_v30, %v3507_v18  ;;  %v4524_v25 = vrot.slane %v4516_v50, %v12758_v35  ;;  %v3524_v26 = vrot.slane %v3510_v8, %v12758_v35  ;;  %v3525_v44 = vcombine.high %v3517_v37, %v3517_v37 }
 0x196   : > { %v5361_v45 = vrot.slane %v5360_v38, 4  ;;  %v5369_v47 = vrot.slane %v5367_v56, 4  ;;  %v4533_v52 = vcombine.low %v3509_v31, %v3517_v37  ;;  %v5375_v55 = vrot.slane %v5373_v39, 5  ;;  %v13265_v39 = vld [vmem:[#allocation2 + $0x9c] sm:$0xf] }
 0x197   : > { %v4531_v51 = vrot.slane %v4517_v48, %v12758_v35  ;;  %v2812_v58 = vadd.f32 %v13045_v53, %v13114_v23  ;;  %v3526_v0 = vcombine.high %v3524_v26, %v3524_v26  ;;  %v4534_v60 = vcombine.low %v3525_v44, %v3524_v26 }
 0x198   : > { %v5366_v61 = vsel %vm12740_vm7, %v5361_v45, %v5365_v10  ;;  %v5370_v1 = vor.u32 %v5369_v47, %v5365_v10  ;;  %v12161_v3 = vld [vmem:[#allocation2 + $0xa8] sm:$0xff]   ;;  %v4541_v43 = vrot.slane %v4533_v52, %v12758_v35  ;;  %v2815_v11 = vadd.f32 %v13045_v53, %v13127_v42  ;;  %v5082_v10 = vld [vmem:[#allocation2 + $0x98] sm:$0x1] }
 0x199   : > { %v4532_v4 = vcombine.low %v4524_v25, %v4531_v51  ;;  %v2869_v7 = vmax.f32 %v2812_v58, 0.0  ;;  %v4548_v12 = vrot.slane %v4534_v60, %v12758_v35  ;;  %v4556_v23 = vrot.slane %v3526_v0, %v12758_v35  ;;  %11859 = vmatmul.mubr.msk.bf16.gmra.mxu0 %vm2565_vm2, %v12161_v3  ;;  %v13268_v51 = vld [vmem:[#allocation2 + $0xa0] sm:$0xf] }
 0x19a   : > { %v5371_v13 = vrot.slane %v5370_v1, 4  ;;  %v5378_v14 = vshrl.u32 %v13235_v59, 16  ;;  %v2870_v41 = vmax.f32 %v2815_v11, 0.0  ;;  %v5381_v37 = vshll.u32 %v13235_v59, 16  ;;  %v5083_v11 = vld [vmem:[#allocation2 + $0xa4] sm:$0x1] }
 0x19b   : > { %v4738_v36 = vsel %vm3679_vm8, %v4532_v4, 0.0  ;;  %v3527_v15 = vcombine.high %v2869_v7, %v2869_v7  ;;  %v3534_v16 = vrot.slane %v2869_v7, %v12758_v35  ;;  %v4549_v20 = vcombine.low %v4541_v43, %v4548_v12 }
 0x19c   : > { %v11429_v19 = vpack.c.bf16 %v4738_v36, %v4738_v36  ;;  %v4740_v53 = vsel %vm3738_vm9, %v4556_v23, 0.0  ;;  %v5376_v42 = vsel %vm12740_vm7, %v5371_v13, %v5375_v55  ;;  %v3544_v18 = vcombine.high %v2870_v41, %v2870_v41  ;;  %v13275_v23 = vld [vmem:[#allocation2 + $0xa8] sm:$0xf] }
 0x19d   : > { %v11431_v62 = vpack.c.bf16 %v4740_v53, %v4740_v53  ;;  %v10954_v33 = vcombine.low %v5366_v61, %v5376_v42  ;;  %v3541_v5 = vrot.slane %v3527_v15, %v12758_v35  ;;  %v3542_v24 = vcombine.high %v3534_v16, %v3534_v16  ;;  %v13279_v53 = vld [vmem:[#allocation2 + $0xac] sm:$0xf] }
 0x19e   : > { %5028 = vst.msk [vmem:[#allocation2 + $0xb4] sm:$0xf] %vm4981_vm3, %v11429_v19  ;;  %v11430_v28 = vpack.c.bf16 %v4549_v20, %v4549_v20  ;;  %v3551_v30 = vrot.slane %v2870_v41, %v12758_v35  ;;  %v5380_v50 = vrot.slane %v5378_v14, 4  ;;  %v5387_v38 = vshll.u32 %v13253_v21, 16 }
 0x19f   : > { %5030 = vst.msk [vmem:[#allocation2 + $0xbc] sm:$0x1] %vm4984_vm4, %v11431_v62  ;;  %11753 = vmatmul.mubr.msk.bf16.gmra.mxu1 %vm2565_vm2, %v10954_v33  ;;  %v3543_v34 = vcombine.high %v3541_v5, %v3541_v5  ;;  %v4557_v8 = vcombine.low %v3534_v16, %v3542_v24  ;;  %v3558_v56 = vrot.slane %v3544_v18, %v12758_v35  ;;  %v5391_v25 = vshrl.u32 %v13253_v21, 16 }
 0x1a0   : > { %5029 = vst.msk [vmem:[#allocation2 + $0xb8] sm:$0xf] %vm4981_vm3, %v11430_v28  ;;  %v3559_v48 = vcombine.high %v3551_v30, %v3551_v30  ;;  %v5397_v31 = vshll.u32 %v5082_v10, 16  ;;  %v5383_v45 = vrot.slane %v5381_v37, 5  ;;  %v5389_v47 = vrot.slane %v5387_v38, 5 }
 0x1a1   : > { %v4558_v26 = vcombine.low %v3541_v5, %v3543_v34  ;;  %v4565_v44 = vrot.slane %v4557_v8, %v12758_v35  ;;  %v3560_v52 = vcombine.high %v3558_v56, %v3558_v56  ;;  %v5393_v58 = vrot.slane %v5391_v25, 4 }
 0x1a2   : > { %v4574_v55 = vcombine.low %v3551_v30, %v3559_v48  ;;  %v5399_v0 = vrot.slane %v5397_v31, 5  ;;  %v5384_v61 = vor.u32 %v5383_v45, %v5380_v50  ;;  %v5402_v1 = vshrl.u32 %v13265_v39, 16  ;;  %v5084_v50 = vld [vmem:[#allocation2 + $0xb0] sm:$0x1] }
 0x1a3   : > { %v4572_v60 = vrot.slane %v4558_v26, %v12758_v35  ;;  %v5405_v3 = vshll.u32 %v13265_v39, 16  ;;  %v4575_v4 = vcombine.low %v3558_v56, %v3560_v52  ;;  %v5394_v7 = vor.u32 %v5393_v58, %v5389_v47 }
 0x1a4   : > { %v4582_v43 = vrot.slane %v4574_v55, %v12758_v35  ;;  %v5411_v12 = vshll.u32 %v13268_v51, 16  ;;  %v5385_v14 = vrot.slane %v5384_v61, 4  ;;  %v5404_v36 = vrot.slane %v5402_v1, 4  ;;  %v7569_v61 = vld [vmem:[#allocation2 + $0xc] sm:$0xe] }
 0x1a5   : > { %v4573_v13 = vcombine.low %v4565_v44, %v4572_v60  ;;  %v5407_v15 = vrot.slane %v5405_v3, 5  ;;  %v4589_v16 = vrot.slane %v4575_v4, %v12758_v35  ;;  %v5395_v41 = vrot.slane %v5394_v7, 4  ;;  %v13289_v38 = vld [vmem:[#allocation2 + $0xb4] sm:$0xf] }
 0x1a6   : > { %v5413_v19 = vrot.slane %v5411_v12, 5  ;;  %v5415_v20 = vshrl.u32 %v13268_v51, 16  ;;  %v5390_v62 = vsel %vm12740_vm7, %v5385_v14, %v5389_v47  ;;  %v5421_v5 = vshll.u32 %v5083_v11, 16  ;;  %v5085_v4 = vld [vmem:[#allocation2 + $0xbc] sm:$0x1] }
 0x1a7   : > { %v4741_v42 = vsel %vm3679_vm8, %v4573_v13, 0.0  ;;  %v5408_v33 = vor.u32 %v5407_v15, %v5404_v36  ;;  %v12162_v24 = vld [vmem:[#allocation2 + $0xb4] sm:$0xff]   ;;  %v4590_v28 = vcombine.low %v4582_v43, %v4589_v16  ;;  %v5400_v18 = vsel %vm12740_vm7, %v5395_v41, %v5399_v0  ;;  %v6844_v36 = vld [vmem:[#allocation2 + $0x10] sm:$0xf] }
 0x1a8   : > { %v11432_v10 = vpack.c.bf16 %v4741_v42, %v4741_v42  ;;  %v5417_v30 = vrot.slane %v5415_v20, 4  ;;  %v10955_v34 = vcombine.low %v5390_v62, %v5400_v18  ;;  %v5423_v37 = vrot.slane %v5421_v5, 5  ;;  %11862 = vmatprep.mubr.msk.bf16.mxu0 %vm2565_vm2, %v12162_v24  ;;  %v13294_v26 = vld [vmem:[#allocation2 + $0xb8] sm:$0xf]  ;;  %v6845_v15 = vld [vmem:[#allocation2 + $0x14] sm:$0x1] }
 0x1a9   : > { %v5409_v8 = vrot.slane %v5408_v33, 4  ;;  %v5426_v6 = vshrl.u32 %v13275_v23, 16  ;;  %v11433_v56 = vpack.c.bf16 %v4590_v28, %v4590_v28  ;;  %v5429_v25 = vshll.u32 %v13275_v23, 16  ;;  %15350 = vst [vmem:[#allocation4_spill] sm:$0xff] %v13294_v26 }
 0x1aa   : > { %5031 = vst.msk [vmem:[#allocation2 + $0xc0] sm:$0xf] %vm4981_vm3, %v11432_v10  ;;  %v5418_v48 = vor.u32 %v5417_v30, %v5413_v19  ;;  %v5435_v31 = vshll.u32 %v13279_v53, 16  ;;  %11756 = vmatprep.mubr.msk.bf16.mxu1 %vm2565_vm2, %v10955_v34  ;;  %v5439_v47 = vshrl.u32 %v13279_v53, 16  ;;  %v5445_v52 = vshll.u32 %v5084_v50, 16 }
 0x1ab   : > { %v5414_v44 = vsel %vm12740_vm7, %v5409_v8, %v5413_v19  ;;  %v5428_v45 = vrot.slane %v5426_v6, 4  ;;  %5032 = vst.msk [vmem:[#allocation2 + $0xc4] sm:$0xf] %vm4981_vm3, %v11433_v56  ;;  %v5431_v58 = vrot.slane %v5429_v25, 5  ;;  %v5450_v60 = vshrl.u32 %v13289_v38, 16 }
 0x1ac   : > { %v5419_v55 = vrot.slane %v5418_v48, 4  ;;  %v5437_v0 = vrot.slane %v5435_v31, 5  ;;  %v5441_v1 = vrot.slane %v5439_v47, 4  ;;  %v5447_v3 = vrot.slane %v5445_v52, 5  ;;  %v13316_v10 = vld [vmem:[%s15334_s3 + $0xe] sm:$0x3] }
 0x1ad   : > { %v5453_v43 = vshll.u32 %v13289_v38, 16  ;;  %v5459_v7 = vshll.u32 %v13294_v26, 16  ;;  %v5432_v12 = vor.u32 %v5431_v58, %v5428_v45  ;;  %v5452_v13 = vrot.slane %v5450_v60, 4  ;;  %v7570_v34 = vld [vmem:[#allocation2 + $0x18] sm:$0xe] }
 0x1ae   : > { %v5424_v11 = vsel %vm12740_vm7, %v5419_v55, %v5423_v37  ;;  %v5463_v14 = vshrl.u32 %v13294_v26, 16  ;;  %v5442_v41 = vor.u32 %v5441_v1, %v5437_v0  ;;  %v5469_v33 = vshll.u32 %v5085_v4, 16  ;;  %v12182_v56 = vld [vmem:[%s15334_s3 + $0xa] sm:$0x3]  ;;  %v6847_v25 = vld [vmem:[#allocation2 + $0x1c] sm:$0xf] }
 0x1af   : > { %v10956_v16 = vcombine.low %v5414_v44, %v5424_v11  ;;  %v5455_v19 = vrot.slane %v5453_v43, 5  ;;  %v5461_v20 = vrot.slane %v5459_v7, 5  ;;  %v5433_v42 = vrot.slane %v5432_v12, 4  ;;  %v6848_v31 = vld [vmem:[#allocation2 + $0x20] sm:$0x1] }
 0x1b0   : > { %v5465_v62 = vrot.slane %v5463_v14, 4  ;;  %v11122_v24 = vrot.slane %v7569_v61, 9  ;;  %v5443_v28 = vrot.slane %v5442_v41, 4  ;;  %v7635_v30 = vrot.slane %v6844_v36, 5  ;;  %v6850_v44 = vld [vmem:[#allocation2 + $0x28] sm:$0xf] }
 0x1b1   : > { %11757 = vmatmul.mubr.msk.bf16.gmra.mxu1 %vm2565_vm2, %v10956_v16  ;;  %v5456_v18 = vor.u32 %v5455_v19, %v5452_v13  ;;  %v7638_v50 = vrot.slane %v6845_v15, 5  ;;  %v5438_v8 = vsel %vm12740_vm7, %v5433_v42, %v5437_v0  ;;  %v5471_v6 = vrot.slane %v5469_v33, 5  ;;  %v12183_v61 = vld [vmem:[#allocation2] sm:$0xf]  ;;  %v13329_v1 = vld [vmem:[#allocation2 + $0x4] sm:$0xf] }
 0x1b2   : > { %v5466_v37 = vor.u32 %v5465_v62, %v5461_v20  ;;  %v7844_v48 = vsel %vm2629_vm0, %v12182_v56, 0  ;;  %v5448_v45 = vsel %vm12740_vm7, %v5443_v28, %v5447_v3  ;;  %v12163_v52 = vld [vmem:[#allocation2 + $0xc0] sm:$0xff]   ;;  %v7636_v55 = vsel %vm13309_vm12, %v11122_v24, %v7635_v30  ;;  %v13332_v43 = vld [vmem:[#allocation2 + $0xc] sm:$0xf]  ;;  %v13334_v7 = vld [vmem:[#allocation2 + $0x10] sm:$0xf] }
 0x1b3   : > { %v5457_v47 = vrot.slane %v5456_v18, 4  ;;  %v7637_v58 = vrot.slane %v7635_v30, 4  ;;  %11901 = vmatpush3.bf16.msra.mxu0 %v7844_v48  ;;  %v10957_v0 = vcombine.low %v5438_v8, %v5448_v45  ;;  %v10975_v4 = vcombine.low %v12183_v61, %v13329_v1  ;;  %v6851_v11 = vld [vmem:[#allocation2 + $0x2c] sm:$0x1]  ;;  %v7571_v12 = vld [vmem:[#allocation2 + $0x24] sm:$0xe] }
 0x1b4   : > { %v5467_v60 = vrot.slane %v5466_v37, 4  ;;  %12114 = vmatprep.subr.msk.bf16.mxu0 %vm2629_vm0, %v13316_v10  ;;  %11863 = vmatmul.mubr.msk.bf16.gmra.mxu0 %vm2565_vm2, %v12163_v52  ;;  %v13347_v36 = vsel %vm2629_vm0, %v13162_v29, 0  ;;  %v13349_v15 = vld [vmem:[#allocation2 + $0x18] sm:$0xf]  ;;  %v13351_v16 = vld [vmem:[#allocation2 + $0x1c] sm:$0xf] }
 0x1b5   : > { %v5462_v13 = vsel %vm12740_vm7, %v5457_v47, %v5461_v20  ;;  %v7639_v14 = vsel %vm13309_vm12, %v7637_v58, %v7638_v50  ;;  %v6853_v19 = vld [vmem:[#allocation2 + $0x34] sm:$0xf]  ;;  %v6854_v42 = vld [vmem:[#allocation2 + $0x38] sm:$0x1]  ;;  %11760 = vmatprep.mubr.msk.bf16.mxu1 %vm2565_vm2, %v10957_v0  ;;  %v11123_v33 = vrot.slane %v7570_v34, 9  ;;  %v7642_v24 = vrot.slane %v6847_v25, 5 }
 0x1b6   : > { %v5472_v20 = vsel %vm12740_vm7, %v5467_v60, %v5471_v6  ;;  %v11139_v62 = vcombine.low %v7636_v55, %v7639_v14  ;;  %v7572_v28 = vld [vmem:[#allocation2 + $0x30] sm:$0xe]  ;;  %v6856_v29 = vld [vmem:[#allocation2 + $0x40] sm:$0xf]  ;;  %v7645_v30 = vrot.slane %v6848_v31, 5  ;;  %v11124_v50 = vrot.slane %v7571_v12, 9 }
 0x1b7   : > { %v10958_v18 = vcombine.low %v5462_v13, %v5472_v20  ;;  %v7649_v8 = vrot.slane %v6850_v44, 5  ;;  %v7573_v37 = vld [vmem:[#allocation2 + $0x3c] sm:$0xe]  ;;  %v7643_v56 = vsel %vm13309_vm12, %v11123_v33, %v7642_v24  ;;  %v7644_v48 = vrot.slane %v7642_v24, 4  ;;  %v13361_v47 = vld [vmem:[#allocation2 + $0x24] sm:$0xf] }
 0x1b8   : > { %11902 = vmatprep.mubr.msk.bf16.mxu0 %vm2565_vm2, %v11139_v62  ;;  %v7652_v45 = vrot.slane %v6851_v11, 5  ;;  %v13363_v6 = vld [vmem:[#allocation2 + $0x28] sm:$0xf]  ;;  %v6857_v25 = vld [vmem:[#allocation2 + $0x44] sm:$0x1]  ;;  %v11125_v0 = vrot.slane %v7572_v28, 9 }
 0x1b9   : > { %11761 = vmatmul.mubr.msk.bf16.gmra.mxu1 %vm2565_vm2, %v10958_v18  ;;  %v7650_v31 = vsel %vm13309_vm12, %v11124_v50, %v7649_v8  ;;  %v7651_v44 = vrot.slane %v7649_v8, 4  ;;  %v13370_v52 = vld [vmem:[#allocation2 + $0x30] sm:$0xf]  ;;  %v13372_v55 = vld [vmem:[#allocation2 + $0x34] sm:$0xf]  ;;  %v7646_v11 = vsel %vm13309_vm12, %v7644_v48, %v7645_v30  ;;  %v7656_v12 = vrot.slane %v6853_v19, 5 }
 0x1ba   : > { %v6859_v60 = vld [vmem:[#allocation2 + $0x4c] sm:$0xf]  ;;  %v6860_v61 = vld [vmem:[#allocation2 + $0x50] sm:$0x1]  ;;  %11766 = vmatprep.mubr.msk.bf16.mxu1 %vm2565_vm2, %v10975_v4  ;;  %v7659_v13 = vrot.slane %v6854_v42, 5  ;;  %v11126_v14 = vrot.slane %v7573_v37, 9  ;;  %v11140_v62 = vcombine.low %v7643_v56, %v7646_v11 }
 0x1bb   : > { %v7574_v20 = vld [vmem:[#allocation2 + $0x48] sm:$0xe]  ;;  %v7653_v33 = vsel %vm13309_vm12, %v7651_v44, %v7652_v45  ;;  %v7663_v24 = vrot.slane %v6856_v29, 5  ;;  %v7666_v18 = vrot.slane %v6857_v25, 5  ;;  %v7575_v50 = vld [vmem:[#allocation2 + $0x54] sm:$0xe]  ;;  %v13383_v28 = vsel %vm13309_vm12, %v11125_v0, %v7656_v12 }
 0x1bc   : > { %v11141_v8 = vcombine.low %v7650_v31, %v7653_v33  ;;  %v7658_v4 = vrot.slane %v7656_v12, 4  ;;  %v13387_v30 = vld [vmem:[#allocation2 + $0x40] sm:$0xf]  ;;  %v6862_v42 = vld [vmem:[#allocation2 + $0x58] sm:$0xf]  ;;  %11903 = vmatmul.mubr.msk.bf16.vlgmr.msra.gmra.mxu0 %vm2565_vm2, %v11140_v62  ;;  %v11127_v31 = vrot.slane %v7574_v20, 9 }
 0x1bd   : > { %v6863_v37 = vld [vmem:[#allocation2 + $0x5c] sm:$0x1]  ;;  %v7664_v29 = vsel %vm13309_vm12, %v11126_v14, %v7663_v24  ;;  %v7665_v56 = vrot.slane %v7663_v24, 4  ;;  %v13394_v48 = vld [vmem:[#allocation2 + $0x48] sm:$0xf]  ;;  %v7670_v12 = vrot.slane %v6859_v60, 5 }
 0x1be   : > { %v13396_v45 = vld [vmem:[#allocation2 + $0x4c] sm:$0xf]  ;;  %v6865_v44 = vld [vmem:[#allocation2 + $0x64] sm:$0xf]  ;;  %v6866_v0 = vld [vmem:[#allocation2 + $0x68] sm:$0x1]  ;;  %11906 = vmatprep.mubr.msk.bf16.mxu0 %vm2565_vm2, %v11141_v8  ;;  %v7660_v11 = vsel %vm13309_vm12, %v7658_v4, %v7659_v13 }
 0x1bf   : > { %v7673_v62 = vrot.slane %v6860_v61, 5  ;;  %v11128_v33 = vrot.slane %v7575_v50, 9  ;;  %v7576_v14 = vld [vmem:[#allocation2 + $0x60] sm:$0xe]  ;;  %v11142_v24 = vcombine.low %v13383_v28, %v7660_v11  ;;  %v7667_v19 = vsel %vm13309_vm12, %v7665_v56, %v7666_v18  ;;  %v6869_v25 = vld [vmem:[#allocation2 + $0x74] sm:$0x1] }
 0x1c0   : > { %v7677_v58 = vrot.slane %v6862_v42, 5  ;;  %v7680_v34 = vrot.slane %v6863_v37, 5  ;;  %v7577_v20 = vld [vmem:[#allocation2 + $0x6c] sm:$0xe]  ;;  %v11143_v41 = vcombine.low %v7664_v29, %v7667_v19  ;;  %v13408_v8 = vsel %vm13309_vm12, %v11127_v31, %v7670_v12  ;;  %v13410_v13 = vld [vmem:[#allocation2 + $0x54] sm:$0xf] }
 0x1c1   : > { %v7672_v3 = vrot.slane %v7670_v12, 4  ;;  %v13412_v60 = vld [vmem:[#allocation2 + $0x58] sm:$0xf]  ;;  %v6868_v50 = vld [vmem:[#allocation2 + $0x70] sm:$0xf]  ;;  %v15353_v28 = vcombine.low %v13332_v43, %v13334_v7  ;;  %v11129_v29 = vrot.slane %v7576_v14, 9  ;;  %v15354_v56 = vcombine.low %v13349_v15, %v13351_v16 }
 0x1c2   : > { %v13419_v18 = vld [vmem:[%s15334_s3 + $0x8] sm:$0x3]  ;;  %v13427_v4 = vsel %vm13309_vm12, %v11128_v33, %v7677_v58  ;;  %v7679_v19 = vrot.slane %v7677_v58, 4  ;;  %v13429_v42 = vld [vmem:[#allocation2 + $0x60] sm:$0xf]  ;;  %v7684_v31 = vrot.slane %v6865_v44, 5 }
 0x1c3   : > { %11767 = vmatmul.mubr.msk.bf16.vlgmr.msra.gmra.mxu1 %vm2565_vm2, %v15353_v28  ;;  %v13440_v43 = vsel %vm13309_vm12, %v7672_v3, %v7673_v62  ;;  %v7687_v11 = vrot.slane %v6866_v0, 5  ;;  %v11130_v58 = vrot.slane %v7577_v20, 9  ;;  %v7694_v14 = vrot.slane %v6869_v25, 5  ;;  %v6871_v28 = vld [vmem:[#allocation2 + $0x7c] sm:$0xf] }
 0x1c4   : > { %11799 = vmatpush3.bf16.msra.mxu1 %v13347_v36  ;;  %11770 = vmatprep.mubr.msk.bf16.mxu1 %vm2565_vm2, %v15354_v56  ;;  %v11144_v12 = vcombine.low %v13408_v8, %v13440_v43  ;;  %v13446_v33 = vsel %vm13309_vm12, %v7679_v19, %v7680_v34  ;;  %v7691_v36 = vrot.slane %v6868_v50, 5  ;;  %v7578_v15 = vld [vmem:[#allocation2 + $0x78] sm:$0xe]  ;;  %v13454_v44 = vsel %vm13309_vm12, %v11129_v29, %v7684_v31  ;;  %v12200_v34 = vld [vmem:[%s15333_s2] ss:$0 sm:$0xff] }
 0x1c5   : > { %12111 = vmatprep.subr.msk.bf16.mxu1 %vm2629_vm0, %v13419_v18  ;;  %v11145_v3 = vcombine.low %v13427_v4, %v13446_v33  ;;  %v7686_v0 = vrot.slane %v7684_v31, 4  ;;  %v2820_v62 = vadd.f32 %v12200_v34, %v13143_v9  ;;  %v6872_v25 = vld [vmem:[#allocation2 + $0x80] sm:$0x1]  ;;  %v7579_v20 = vld [vmem:[#allocation2 + $0x84] sm:$0xe]  ;;  %11907 = vmatmul.mubr.msk.bf16.gmra.mxu0 %vm2565_vm2, %v11142_v24  ;;  %v11131_v24 = vrot.slane %v7578_v15, 9 }
 0x1c6   : > { %v13463_v8 = vsel %vm13309_vm12, %v11130_v58, %v7691_v36  ;;  %v7693_v50 = vrot.slane %v7691_v36, 4  ;;  %v6875_v29 = vld [vmem:[#allocation2 + $0x8c] sm:$0x1]  ;;  %11910 = vmatprep.mubr.msk.bf16.mxu0 %vm2565_vm2, %v11143_v41  ;;  %v7698_v43 = vrot.slane %v6871_v28, 5  ;;  %v6874_v31 = vld [vmem:[#allocation2 + $0x88] sm:$0xf] }
 0x1c7   : > { %v13472_v9 = vsel %vm13309_vm12, %v7686_v0, %v7687_v11  ;;  %v2871_v56 = vmax.f32 %v2820_v62, 0.0  ;;  %v7701_v36 = vrot.slane %v6872_v25, 5  ;;  %v11132_v34 = vrot.slane %v7579_v20, 9  ;;  %v6877_v19 = vld [vmem:[#allocation2 + $0x94] sm:$0xf] }
 0x1c8   : > { %v13478_v33 = vsel %vm13309_vm12, %v7693_v50, %v7694_v14  ;;  %v7580_v4 = vld [vmem:[#allocation2 + $0x90] sm:$0xe]  ;;  %v13485_v28 = vsel %vm13309_vm12, %v11131_v24, %v7698_v43  ;;  %v7700_v15 = vrot.slane %v7698_v43, 4  ;;  %v6878_v0 = vld [vmem:[#allocation2 + $0x98] sm:$0x1]  ;;  %v15355_v62 = vcombine.low %v13361_v47, %v13363_v6 }
 0x1c9   : > { %v3568_v11 = vrot.slane %v2871_v56, %v12758_v35  ;;  %v7705_v14 = vrot.slane %v6874_v31, 5  ;;  %v7708_v25 = vrot.slane %v6875_v29, 5  ;;  %v7581_v56 = vld [vmem:[#allocation2 + $0x9c] sm:$0xe]  ;;  %v15356_v24 = vcombine.low %v13370_v52, %v13372_v55  ;;  %v6881_v37 = vld [vmem:[#allocation2 + $0xa4] sm:$0x1] }
 0x1ca   : > { %v13502_v47 = vsel %vm13309_vm12, %v7700_v15, %v7701_v36  ;;  %v11133_v31 = vrot.slane %v7580_v4, 9  ;;  %v7712_v29 = vrot.slane %v6877_v19, 5  ;;  %v7715_v61 = vrot.slane %v6878_v0, 5  ;;  %v6884_v41 = vld [vmem:[#allocation2 + $0xb0] sm:$0x1] }
 0x1cb   : > { %11771 = vmatmul.mubr.msk.bf16.gmra.mxu1 %vm2565_vm2, %v15355_v62  ;;  %v4597_v43 = vrot.slane %v3568_v11, %v12758_v35  ;;  %v6880_v62 = vld [vmem:[#allocation2 + $0xa0] sm:$0xf]  ;;  %v13508_v50 = vsel %vm13309_vm12, %v11132_v34, %v7705_v14  ;;  %v7707_v52 = vrot.slane %v7705_v14, 4  ;;  %v11134_v36 = vrot.slane %v7581_v56, 9  ;;  %v7582_v11 = vld [vmem:[#allocation2 + $0xa8] sm:$0xe] }
 0x1cc   : > { %11774 = vmatprep.mubr.msk.bf16.mxu1 %vm2565_vm2, %v15356_v24  ;;  %v6883_v24 = vld [vmem:[#allocation2 + $0xac] sm:$0xf]  ;;  %v13514_v4 = vsel %vm13309_vm12, %v11133_v31, %v7712_v29  ;;  %v7714_v19 = vrot.slane %v7712_v29, 4  ;;  %v7719_v0 = vrot.slane %v6880_v62, 5  ;;  %v7722_v14 = vrot.slane %v6881_v37, 5 }
 0x1cd   : > { %v4743_v35 = vsel %vm3738_vm9, %v4597_v43, 0.0  ;;  %11911 = vmatmul.mubr.msk.bf16.gmra.mxu0 %vm2565_vm2, %v11144_v12  ;;  %v13519_v34 = vsel %vm13309_vm12, %v7707_v52, %v7708_v25  ;;  %v6886_v20 = vld [vmem:[#allocation2 + $0xb8] sm:$0xf]  ;;  %v7583_v58 = vld [vmem:[#allocation2 + $0xb4] sm:$0xe]  ;;  %v7726_v52 = vrot.slane %v6883_v24, 5  ;;  %v15357_v25 = vcombine.low %v13385_v54, %v13387_v30 }
 0x1ce   : > { %v11434_v15 = vpack.c.bf16 %v4743_v35, %v4743_v35  ;;  %11914 = vmatprep.mubr.msk.bf16.mxu0 %vm2565_vm2, %v11145_v3  ;;  %v13526_v56 = vsel %vm13309_vm12, %v7714_v19, %v7715_v61  ;;  %v6887_v43 = vld [vmem:[#allocation2 + $0xbc] sm:$0x1]  ;;  %v7584_v31 = vld [vmem:[#allocation2 + $0xc0] sm:$0xe]  ;;  %v13537_v3 = vsel %vm13309_vm12, %v11134_v36, %v7719_v0  ;;  %v7721_v29 = vrot.slane %v7719_v0, 4 }
 0x1cf   : > { %v11135_v61 = vrot.slane %v7582_v11, 9  ;;  %v8398_v62 = vld [vmem:[#allocation2 + $0x18] sm:$0xf]  ;;  %v7729_v35 = vrot.slane %v6884_v41, 5  ;;  %v11136_v19 = vrot.slane %v7583_v58, 9  ;;  %v7733_v12 = vrot.slane %v6886_v20, 5 }
 0x1d0   : > { %5033 = vst.msk [vmem:[#allocation2 + $0xc8] sm:$0x1] %vm4984_vm4, %v11434_v15  ;;  %v6889_v57 = vld [vmem:[#allocation2 + $0xc4] sm:$0xf]  ;;  %v13545_v15 = vsel %vm13309_vm12, %v7721_v29, %v7722_v14  ;;  %v7736_v37 = vrot.slane %v6887_v43, 5  ;;  %v11137_v11 = vrot.slane %v7584_v31, 9  ;;  %v15358_v58 = vcombine.low %v13394_v48, %v13396_v45 }
 0x1d1   : > { %v8399_v0 = vld [vmem:[#allocation2 + $0x1c] sm:$0xf]  ;;  %v8400_v24 = vld [vmem:[#allocation2 + $0x20] sm:$0x1]  ;;  %v13557_v41 = vsel %vm13309_vm12, %v11135_v61, %v7726_v52  ;;  %v7728_v20 = vrot.slane %v7726_v52, 4  ;;  %v13561_v14 = vsel %vm13309_vm12, %v11136_v19, %v7733_v12  ;;  %v7740_v43 = vrot.slane %v6889_v57, 5 }
 0x1d2   : > { %v8447_v31 = vshrl.u32 %v8398_v62, 16  ;;  %v8450_v29 = vshll.u32 %v8398_v62, 16  ;;  %v8460_v36 = vshrl.u32 %v8399_v0, 16  ;;  %v8466_v54 = vshll.u32 %v8400_v24, 16  ;;  %v6028_v19 = vld [vmem:[#allocation2 + $0xc] sm:$0xe] }
 0x1d3   : > { %11775 = vmatmul.mubr.msk.bf16.gmra.mxu1 %vm2565_vm2, %v15357_v25  ;;  %v7735_v25 = vrot.slane %v7733_v12, 4  ;;  %v13565_v48 = vsel %vm13309_vm12, %v7728_v20, %v7729_v35  ;;  %v15359_v61 = vcombine.low %v13454_v44, %v13472_v9  ;;  %v13579_v12 = vsel %vm13309_vm12, %v11137_v11, %v7740_v43  ;;  %v6027_v35 = vld [vmem:[#allocation2] sm:$0xe] }
 0x1d4   : > { %11778 = vmatprep.mubr.msk.bf16.mxu1 %vm2565_vm2, %v15358_v58  ;;  %v8456_v58 = vshll.u32 %v8399_v0, 16  ;;  %v7742_v62 = vrot.slane %v7740_v43, 4  ;;  %v15360_v0 = vcombine.low %v13463_v8, %v13478_v33  ;;  %v8449_v24 = vrot.slane %v8447_v31, 4  ;;  %v12201_v33 = vld [vmem:[#allocation2 + $0x8] sm:$0x1] }
 0x1d5   : > { %11915 = vmatmul.mubr.msk.bf16.gmra.mxu0 %vm2565_vm2, %v15359_v61  ;;  %v13575_v57 = vsel %vm13309_vm12, %v7735_v25, %v7736_v37  ;;  %v8452_v20 = vrot.slane %v8450_v29, 5  ;;  %v8462_v61 = vrot.slane %v8460_v36, 4  ;;  %v8468_v52 = vrot.slane %v8466_v54, 5  ;;  %v6029_v29 = vld [vmem:[#allocation2 + $0x18] sm:$0xe] }
 0x1d6   : > { %11918 = vmatprep.mubr.msk.bf16.mxu0 %vm2565_vm2, %v15360_v0  ;;  %v8458_v37 = vrot.slane %v8456_v58, 5  ;;  %v8929_v11 = vsel %vm2629_vm0, %v13316_v10, 0  ;;  %v11007_v26 = vrot.slane %v6027_v35, 9  ;;  %v6080_v8 = vrot.slane %v13329_v1, 5 }
 0x1d7   : > { %v6890_v9 = vld [vmem:[#allocation2 + $0xc8] sm:$0x1]  ;;  %v8453_v43 = vor.u32 %v8452_v20, %v8449_v24  ;;  %11969 = vmatpush3.bf16.msra.mxu0 %v8929_v11  ;;  %v6083_v0 = vrot.slane %v12201_v33, 5  ;;  %v15361_v44 = vcombine.low %v13410_v13, %v13412_v60  ;;  %v11008_v54 = vrot.slane %v6028_v19, 9  ;;  %v8403_v33 = vld [vmem:[#allocation2 + $0x2c] sm:$0x1] }
 0x1d8   : > { %v7743_v25 = vrot.slane %v6890_v9, 5  ;;  %v8463_v36 = vor.u32 %v8462_v61, %v8458_v37  ;;  %v6087_v10 = vrot.slane %v13334_v7, 5  ;;  %v15362_v58 = vcombine.low %v13429_v42, %v13093_v40  ;;  %v12202_v9 = vld [vmem:[#allocation2 + $0x14] sm:$0x1]  ;;  %v8401_v40 = vld [vmem:[#allocation2 + $0x24] sm:$0xf] }
 0x1d9   : > { %v8454_v13 = vrot.slane %v8453_v43, 4  ;;  %v13607_v35 = vsel %vm13309_vm12, %v11007_v26, %v6080_v8  ;;  %v6090_v24 = vrot.slane %v12202_v9, 5  ;;  %v13621_v26 = vsel %vm2629_vm0, %v13419_v18, 0  ;;  %v8402_v61 = vld [vmem:[#allocation2 + $0x28] sm:$0xf] }
 0x1da   : > { %v13596_v31 = vsel %vm13309_vm12, %v7742_v62, %v7743_v25  ;;  %v6082_v62 = vrot.slane %v6080_v8, 4  ;;  %v13611_v19 = vsel %vm13309_vm12, %v11008_v54, %v6087_v10  ;;  %v6089_v7 = vrot.slane %v6087_v10, 4 }
 0x1db   : > { %11779 = vmatmul.mubr.msk.bf16.gmra.mxu1 %vm2565_vm2, %v15361_v44  ;;  %v11154_v1 = vcombine.low %v13579_v12, %v13596_v31  ;;  %v8464_v44 = vrot.slane %v8463_v36, 4  ;;  %v8459_v42 = vsel %vm12740_vm7, %v8454_v13, %v8458_v37  ;;  %v11009_v25 = vrot.slane %v6029_v29, 9  ;;  %v6030_v13 = vld [vmem:[#allocation2 + $0x24] sm:$0xe] }
 0x1dc   : > { %11782 = vmatprep.mubr.msk.bf16.mxu1 %vm2565_vm2, %v15362_v58  ;;  %v13617_v20 = vsel %vm13309_vm12, %v6082_v62, %v6083_v0  ;;  %v15363_v11 = vcombine.low %v13485_v28, %v13502_v47  ;;  %v13633_v8 = vsel %vm13309_vm12, %v6089_v7, %v6090_v24  ;;  %v6094_v18 = vrot.slane %v13351_v16, 5  ;;  %v8404_v0 = vld [vmem:[#allocation2 + $0x30] sm:$0xf] }
 0x1dd   : > { %v8469_v43 = vsel %vm12740_vm7, %v8464_v44, %v8468_v52  ;;  %v11024_v37 = vcombine.low %v13607_v35, %v13617_v20  ;;  %v15364_v36 = vcombine.low %v13508_v50, %v13519_v34  ;;  %v11025_v47 = vcombine.low %v13611_v19, %v13633_v8  ;;  %v8405_v34 = vld [vmem:[#allocation2 + $0x34] sm:$0xf] }
 0x1de   : > { %11919 = vmatmul.mubr.msk.bf16.gmra.mxu0 %vm2565_vm2, %v15363_v11  ;;  %v13640_v28 = vcombine.low %v8459_v42, %v8469_v43  ;;  %v8471_v52 = vshrl.u32 %v8401_v40, 16  ;;  %v8474_v54 = vshll.u32 %v8401_v40, 16  ;;  %v13646_v10 = vsel %vm13309_vm12, %v11009_v25, %v6094_v18 }
 0x1df   : > { %11922 = vmatprep.mubr.msk.bf16.mxu0 %vm2565_vm2, %v15364_v36  ;;  %v6096_v29 = vrot.slane %v6094_v18, 4  ;;  %v8480_v16 = vshll.u32 %v8402_v61, 16  ;;  %v8484_v58 = vshrl.u32 %v8402_v61, 16  ;;  %v8490_v50 = vshll.u32 %v8403_v33, 16  ;;  %v8406_v61 = vld [vmem:[#allocation2 + $0x38] sm:$0x1] }
 0x1e0   : > { %v8473_v62 = vrot.slane %v8471_v52, 4  ;;  %v8476_v44 = vrot.slane %v8474_v54, 5  ;;  %v8495_v7 = vshrl.u32 %v8404_v0, 16  ;;  %v15365_v9 = vcombine.low %v13109_v17, %v13131_v49 }
 0x1e1   : > { %v15366_v24 = vrot.slane %v12885_v32, 5  ;;  %v8482_v42 = vrot.slane %v8480_v16, 5  ;;  %v8486_v25 = vrot.slane %v8484_v58, 4  ;;  %v8498_v11 = vshll.u32 %v8404_v0, 16 }
 0x1e2   : > { %v15367_v43 = vcombine.low %v13154_v2, %v13190_v27  ;;  %v8477_v49 = vor.u32 %v8476_v44, %v8473_v62  ;;  %v8492_v18 = vrot.slane %v8490_v50, 5  ;;  %v8497_v33 = vrot.slane %v8495_v7, 4  ;;  %v6031_v44 = vld [vmem:[#allocation2 + $0x30] sm:$0xe] }
 0x1e3   : > { %11783 = vmatmul.mubr.msk.bf16.gmra.mxu1 %vm2565_vm2, %v15365_v9  ;;  %v13656_v40 = vsel %vm13309_vm12, %v6096_v29, %v15366_v24  ;;  %v8487_v32 = vor.u32 %v8486_v25, %v8482_v42  ;;  %v8500_v36 = vrot.slane %v8498_v11, 5  ;;  %v8504_v52 = vshll.u32 %v8405_v34, 16  ;;  %v12203_v11 = vld [vmem:[#allocation2 + $0x2c] sm:$0x1] }
 0x1e4   : > { %11786 = vmatprep.mubr.msk.bf16.mxu1 %vm2565_vm2, %v15367_v43  ;;  %v11026_v17 = vcombine.low %v13646_v10, %v13656_v40  ;;  %v8508_v54 = vshrl.u32 %v8405_v34, 16  ;;  %v8478_v29 = vrot.slane %v8477_v49, 4  ;;  %v8514_v16 = vshll.u32 %v8406_v61, 16 }
 0x1e5   : > { %v11010_v58 = vrot.slane %v6030_v13, 9  ;;  %v6101_v0 = vrot.slane %v13363_v6, 5  ;;  %v15368_v2 = vcombine.low %v13514_v4, %v13526_v56  ;;  %v8488_v27 = vrot.slane %v8487_v32, 4  ;;  %v8407_v56 = vld [vmem:[#allocation2 + $0x3c] sm:$0xf] }
 0x1e6   : > { %v8501_v9 = vor.u32 %v8500_v36, %v8497_v33  ;;  %v8506_v24 = vrot.slane %v8504_v52, 5  ;;  %v8510_v62 = vrot.slane %v8508_v54, 4  ;;  %v15369_v50 = vcombine.low %v13537_v3, %v13545_v15  ;;  %v8408_v32 = vld [vmem:[#allocation2 + $0x40] sm:$0xf] }
 0x1e7   : > { %11923 = vmatmul.mubr.msk.bf16.gmra.mxu0 %vm2565_vm2, %v15368_v2  ;;  %v8483_v13 = vsel %vm12740_vm7, %v8478_v29, %v8482_v42  ;;  %v8516_v34 = vrot.slane %v8514_v16, 5  ;;  %v13677_v6 = vsel %vm13309_vm12, %v11010_v58, %v6101_v0  ;;  %v6103_v4 = vrot.slane %v6101_v0, 4  ;;  %v12204_v42 = vld [vmem:[#allocation2 + $0x38] sm:$0x1]  ;;  %v8409_v29 = vld [vmem:[#allocation2 + $0x44] sm:$0x1] }
 0x1e8   : > { %11926 = vmatprep.mubr.msk.bf16.mxu0 %vm2565_vm2, %v15369_v50  ;;  %v8493_v7 = vsel %vm12740_vm7, %v8488_v27, %v8492_v18  ;;  %v8502_v25 = vrot.slane %v8501_v9, 4  ;;  %v8511_v61 = vor.u32 %v8510_v62, %v8506_v24  ;;  %v6104_v43 = vrot.slane %v12203_v11, 5  ;;  %v8410_v2 = vld [vmem:[#allocation2 + $0x48] sm:$0xf]  ;;  %v6032_v11 = vld [vmem:[#allocation2 + $0x3c] sm:$0xe] }
 0x1e9   : > { %v13681_v3 = vcombine.low %v8483_v13, %v8493_v7  ;;  %v11011_v15 = vrot.slane %v6031_v44, 9  ;;  %v6108_v49 = vrot.slane %v13372_v55, 5  ;;  %v6111_v33 = vrot.slane %v12204_v42, 5  ;;  %v8411_v44 = vld [vmem:[#allocation2 + $0x4c] sm:$0xf] }
 0x1ea   : > { %v15370_v36 = vcombine.low %v13208_v46, %v13210_v63  ;;  %v8507_v18 = vsel %vm12740_vm7, %v8502_v25, %v8506_v24  ;;  %v8512_v52 = vrot.slane %v8511_v61, 4  ;;  %v13692_v54 = vsel %vm13309_vm12, %v6103_v4, %v6104_v43  ;;  %v8412_v4 = vld [vmem:[#allocation2 + $0x50] sm:$0x1] }
 0x1eb   : > { %v8519_v16 = vshrl.u32 %v8407_v56, 16  ;;  %v15371_v55 = vcombine.low %v13235_v59, %v13253_v21  ;;  %v11027_v46 = vcombine.low %v13677_v6, %v13692_v54  ;;  %v13702_v63 = vsel %vm13309_vm12, %v11011_v15, %v6108_v49  ;;  %v8425_v6 = vld [vmem:[#allocation2 + $0x84] sm:$0xf] }
 0x1ec   : > { %11787 = vmatmul.mubr.msk.bf16.gmra.mxu1 %vm2565_vm2, %v15370_v36  ;;  %v6110_v58 = vrot.slane %v6108_v49, 4  ;;  %v8522_v0 = vshll.u32 %v8407_v56, 16  ;;  %v8517_v27 = vsel %vm12740_vm7, %v8512_v52, %v8516_v34  ;;  %v8528_v24 = vshll.u32 %v8408_v32, 16 }
 0x1ed   : > { %11790 = vmatprep.mubr.msk.bf16.mxu1 %vm2565_vm2, %v15371_v55  ;;  %v8521_v9 = vrot.slane %v8519_v16, 4  ;;  %v8532_v62 = vshrl.u32 %v8408_v32, 16  ;;  %v13706_v59 = vcombine.low %v8507_v18, %v8517_v27  ;;  %v8538_v13 = vshll.u32 %v8409_v29, 16  ;;  %v6033_v18 = vld [vmem:[#allocation2 + $0x48] sm:$0xe] }
 0x1ee   : > { %v13710_v21 = vsel %vm13309_vm12, %v6110_v58, %v6111_v33  ;;  %v8524_v50 = vrot.slane %v8522_v0, 5  ;;  %v15372_v56 = vcombine.low %v13557_v41, %v13565_v48  ;;  %v8530_v7 = vrot.slane %v8528_v24, 5 }
 0x1ef   : > { %v11028_v34 = vcombine.low %v13702_v63, %v13710_v21  ;;  %v8534_v25 = vrot.slane %v8532_v62, 4  ;;  %v8543_v61 = vshrl.u32 %v8410_v2, 16  ;;  %v15373_v43 = vcombine.low %v13561_v14, %v13575_v57  ;;  %v12205_v62 = vld [vmem:[#allocation2 + $0x44] sm:$0x1] }
 0x1f0   : > { %11927 = vmatmul.mubr.msk.bf16.gmra.mxu0 %vm2565_vm2, %v15372_v56  ;;  %v8525_v15 = vor.u32 %v8524_v50, %v8521_v9  ;;  %v8540_v49 = vrot.slane %v8538_v13, 5  ;;  %v8546_v42 = vshll.u32 %v8410_v2, 16  ;;  %v8552_v33 = vshll.u32 %v8411_v44, 16 }
 0x1f1   : > { %11930 = vmatprep.mubr.msk.bf16.mxu0 %vm2565_vm2, %v15373_v43  ;;  %v8535_v32 = vor.u32 %v8534_v25, %v8530_v7  ;;  %v8545_v41 = vrot.slane %v8543_v61, 4  ;;  %v8556_v48 = vshrl.u32 %v8411_v44, 16  ;;  %v8562_v36 = vshll.u32 %v8412_v4, 16  ;;  %v8414_v61 = vld [vmem:[#allocation2 + $0x58] sm:$0xf] }
 0x1f2   : > { %v8526_v52 = vrot.slane %v8525_v15, 4  ;;  %v8548_v29 = vrot.slane %v8546_v42, 5  ;;  %v8554_v16 = vrot.slane %v8552_v33, 5  ;;  %v11012_v55 = vrot.slane %v6032_v11, 9  ;;  %v8415_v15 = vld [vmem:[#allocation2 + $0x5c] sm:$0x1] }
 0x1f3   : > { %v15374_v58 = vcombine.low %v13265_v39, %v13268_v51  ;;  %v8536_v14 = vrot.slane %v8535_v32, 4  ;;  %v8558_v57 = vrot.slane %v8556_v48, 4  ;;  %v8564_v0 = vrot.slane %v8562_v36, 5  ;;  %v8413_v39 = vld [vmem:[#allocation2 + $0x54] sm:$0xf] }
 0x1f4   : > { %v6115_v2 = vrot.slane %v13387_v30, 5  ;;  %v15375_v27 = vcombine.low %v13275_v23, %v13279_v53  ;;  %v8531_v9 = vsel %vm12740_vm7, %v8526_v52, %v8530_v7  ;;  %v8549_v24 = vor.u32 %v8548_v29, %v8545_v41  ;;  %v12206_v7 = vld [vmem:[#allocation2 + $0x50] sm:$0x1] }
 0x1f5   : > { %11791 = vmatmul.mubr.msk.bf16.gmra.mxu1 %vm2565_vm2, %v15374_v58  ;;  %v6118_v44 = vrot.slane %v12205_v62, 5  ;;  %v11013_v50 = vrot.slane %v6033_v18, 9  ;;  %v8541_v51 = vsel %vm12740_vm7, %v8536_v14, %v8540_v49  ;;  %v8559_v13 = vor.u32 %v8558_v57, %v8554_v16  ;;  %v8417_v18 = vld [vmem:[#allocation2 + $0x64] sm:$0xf] }
 0x1f6   : > { %11794 = vmatprep.mubr.msk.bf16.mxu1 %vm2565_vm2, %v15375_v27  ;;  %v13737_v30 = vsel %vm13309_vm12, %v11012_v55, %v6115_v2  ;;  %v6117_v4 = vrot.slane %v6115_v2, 4  ;;  %v13739_v23 = vcombine.low %v8531_v9, %v8541_v51  ;;  %v8550_v53 = vrot.slane %v8549_v24, 4  ;;  %v8418_v55 = vld [vmem:[#allocation2 + $0x68] sm:$0x1]  ;;  %v15376_v58 = vld [vmem:[#allocation4_spill] sm:$0xff] }
 0x1f7   : > { %v6122_v56 = vrot.slane %v13396_v45, 5  ;;  %v6125_v25 = vrot.slane %v12206_v7, 5  ;;  %v8560_v11 = vrot.slane %v8559_v13, 4  ;;  %v8567_v49 = vshrl.u32 %v8413_v39, 16  ;;  %v6034_v9 = vld [vmem:[#allocation2 + $0x54] sm:$0xe] }
 0x1f8   : > { %11931 = vmatmul.mubr.msk.bf16.gmra.mxu0 %vm2565_vm2, %v11154_v1  ;;  %v13748_v43 = vsel %vm13309_vm12, %v6117_v4, %v6118_v44  ;;  %v8570_v42 = vshll.u32 %v8413_v39, 16  ;;  %v8555_v45 = vsel %vm12740_vm7, %v8550_v53, %v8554_v16  ;;  %v8416_v1 = vld [vmem:[#allocation2 + $0x60] sm:$0xf]  ;;  %v8576_v36 = vshll.u32 %v8414_v61, 16 }
 0x1f9   : > { %11970 = vmatprep.mubr.msk.bf16.mxu0 %vm2565_vm2, %v13640_v28  ;;  %v11029_v33 = vcombine.low %v13737_v30, %v13748_v43  ;;  %v13758_v12 = vsel %vm13309_vm12, %v11013_v50, %v6122_v56  ;;  %v6124_v31 = vrot.slane %v6122_v56, 4  ;;  %v8565_v32 = vsel %vm12740_vm7, %v8560_v11, %v8564_v0  ;;  %v6035_v4 = vld [vmem:[#allocation2 + $0x60] sm:$0xe]  ;;  %v8419_v11 = vld [vmem:[#allocation2 + $0x6c] sm:$0xf] }
 0x1fa   : > { %v8569_v41 = vrot.slane %v8567_v49, 4  ;;  %v8572_v48 = vrot.slane %v8570_v42, 5  ;;  %v13762_v28 = vcombine.low %v8555_v45, %v8565_v32  ;;  %v8580_v29 = vshrl.u32 %v8414_v61, 16  ;;  %v12207_v42 = vld [vmem:[#allocation2 + $0x5c] sm:$0x1] }
 0x1fb   : > { %v13766_v52 = vsel %vm13309_vm12, %v6124_v31, %v6125_v25  ;;  %v8586_v16 = vshll.u32 %v8415_v15, 16  ;;  %v15377_v14 = vcombine.low %v13289_v38, %v15376_v58  ;;  %v8578_v2 = vrot.slane %v8576_v36, 5  ;;  %v8420_v36 = vld [vmem:[#allocation2 + $0x70] sm:$0xf] }
 0x1fc   : > { %v11030_v57 = vcombine.low %v13758_v12, %v13766_v52  ;;  %v8573_v0 = vor.u32 %v8572_v48, %v8569_v41  ;;  %v8591_v27 = vshrl.u32 %v8416_v1, 16  ;;  %v8582_v24 = vrot.slane %v8580_v29, 4  ;;  %v12208_v41 = vld [vmem:[#allocation2 + $0x64] sm:$0xf]  ;;  %v12209_v29 = vld [vmem:[#allocation2 + $0x68] sm:$0x1] }
 0x1fd   : > { %11795 = vmatmul.mubr.msk.bf16.gmra.mxu1 %vm2565_vm2, %v15377_v14  ;;  %v8588_v62 = vrot.slane %v8586_v16, 5  ;;  %v8594_v44 = vshll.u32 %v8416_v1, 16  ;;  %v8600_v50 = vshll.u32 %v8417_v18, 16  ;;  %v8604_v51 = vshrl.u32 %v8417_v18, 16  ;;  %v12214_v52 = vld [vmem:[#allocation2 + $0x88] sm:$0xf] }
 0x1fe   : > { %11800 = vmatprep.mubr.msk.bf16.mxu1 %vm2565_vm2, %v11024_v37  ;;  %v8574_v39 = vrot.slane %v8573_v0, 4  ;;  %v8593_v38 = vrot.slane %v8591_v27, 4  ;;  %v8610_v13 = vshll.u32 %v8418_v55, 16  ;;  %v8583_v53 = vor.u32 %v8582_v24, %v8578_v2  ;;  %v13794_v55 = vld [vmem:[%s15334_s3 + $0xc] sm:$0x3] }
 0x1ff   : > { %v8596_v56 = vrot.slane %v8594_v44, 5  ;;  %v8602_v7 = vrot.slane %v8600_v50, 5  ;;  %v11014_v25 = vrot.slane %v6034_v9, 9  ;;  %v8606_v20 = vrot.slane %v8604_v51, 4  ;;  %v8421_v27 = vld [vmem:[#allocation2 + $0x74] sm:$0x1] }
 0x200   : > { %11971 = vmatmul.mubr.msk.bf16.vlgmr.msra.gmra.mxu0 %vm2565_vm2, %v13681_v3  ;;  %v8579_v35 = vsel %vm12740_vm7, %v8574_v39, %v8578_v2  ;;  %v8612_v37 = vrot.slane %v8610_v13, 5  ;;  %v6129_v61 = vrot.slane %v13412_v60, 5  ;;  %v8584_v15 = vrot.slane %v8583_v53, 4  ;;  %v8422_v9 = vld [vmem:[#allocation2 + $0x78] sm:$0xf] }
 0x201   : > { %11974 = vmatprep.mubr.msk.bf16.mxu0 %vm2565_vm2, %v13706_v59  ;;  %v8597_v49 = vor.u32 %v8596_v56, %v8593_v38  ;;  %v6132_v45 = vrot.slane %v12207_v42, 5  ;;  %v11015_v31 = vrot.slane %v6035_v4, 9  ;;  %v8607_v1 = vor.u32 %v8606_v20, %v8602_v7  ;;  %v8424_v38 = vld [vmem:[#allocation2 + $0x80] sm:$0x1] }
 0x202   : > { %v13787_v3 = vsel %vm13309_vm12, %v11014_v25, %v6129_v61  ;;  %v6131_v32 = vrot.slane %v6129_v61, 4  ;;  %v6136_v48 = vrot.slane %v12208_v41, 5  ;;  %v8589_v60 = vsel %vm12740_vm7, %v8584_v15, %v8588_v62 }
 0x203   : > { %v8598_v18 = vrot.slane %v8597_v49, 4  ;;  %v6139_v59 = vrot.slane %v12209_v29, 5  ;;  %v8615_v16 = vshrl.u32 %v8419_v11, 16  ;;  %v13800_v58 = vcombine.low %v8579_v35, %v8589_v60 }
 0x204   : > { %v8608_v14 = vrot.slane %v8607_v1, 4  ;;  %v13804_v0 = vsel %vm13309_vm12, %v6131_v32, %v6132_v45  ;;  %v13808_v2 = vsel %vm13309_vm12, %v11015_v31, %v6136_v48  ;;  %v8618_v44 = vshll.u32 %v8419_v11, 16  ;;  %v12210_v31 = vld [vmem:[#allocation2 + $0x70] sm:$0xf]  ;;  %v6037_v32 = vld [vmem:[#allocation2 + $0x78] sm:$0xe] }
 0x205   : > { %11801 = vmatmul.mubr.msk.bf16.vlgmr.msra.gmra.mxu1 %vm2565_vm2, %v11025_v47  ;;  %v8603_v19 = vsel %vm12740_vm7, %v8598_v18, %v8602_v7  ;;  %v11031_v8 = vcombine.low %v13787_v3, %v13804_v0  ;;  %v6138_v47 = vrot.slane %v6136_v48, 4  ;;  %v8617_v24 = vrot.slane %v8615_v16, 4  ;;  %v6036_v7 = vld [vmem:[#allocation2 + $0x6c] sm:$0xe] }
 0x206   : > { %11867 = vmatpush3.bf16.msra.mxu1 %v13621_v26  ;;  %11804 = vmatprep.mubr.msk.bf16.mxu1 %vm2565_vm2, %v11026_v17  ;;  %v8613_v62 = vsel %vm12740_vm7, %v8608_v14, %v8612_v37  ;;  %v8624_v50 = vshll.u32 %v8420_v36, 16  ;;  %v8628_v39 = vshrl.u32 %v8420_v36, 16  ;;  %v8423_v26 = vld [vmem:[#allocation2 + $0x7c] sm:$0xf]  ;;  %v8634_v17 = vshll.u32 %v8421_v27, 16 }
 0x207   : > { %12113 = vmatprep.subr.msk.bf16.mxu1 %vm2629_vm0, %v13794_v55  ;;  %v11211_v10 = vcombine.low %v8603_v19, %v8613_v62  ;;  %v13825_v40 = vsel %vm13309_vm12, %v6138_v47, %v6139_v59  ;;  %v8639_v51 = vshrl.u32 %v8422_v9, 16  ;;  %v8620_v4 = vrot.slane %v8618_v44, 5  ;;  %v12211_v59 = vld [vmem:[#allocation2 + $0x74] sm:$0x1]  ;;  %v8426_v47 = vld [vmem:[#allocation2 + $0x88] sm:$0xf] }
 0x208   : > { %11975 = vmatmul.mubr.msk.bf16.gmra.mxu0 %vm2565_vm2, %v13739_v23  ;;  %v11032_v13 = vcombine.low %v13808_v2, %v13825_v40  ;;  %v8626_v53 = vrot.slane %v8624_v50, 5  ;;  %v8630_v56 = vrot.slane %v8628_v39, 4  ;;  %v8636_v25 = vrot.slane %v8634_v17, 5  ;;  %v12213_v44 = vld [vmem:[#allocation2 + $0x80] sm:$0x1] }
 0x209   : > { %11978 = vmatprep.mubr.msk.bf16.mxu0 %vm2565_vm2, %v13762_v28  ;;  %v8641_v35 = vrot.slane %v8639_v51, 4  ;;  %v8642_v20 = vshll.u32 %v8422_v9, 16  ;;  %v8648_v37 = vshll.u32 %v8423_v26, 16  ;;  %v8621_v61 = vor.u32 %v8620_v4, %v8617_v24  ;;  %v12212_v9 = vld [vmem:[#allocation2 + $0x7c] sm:$0xf] }
 0x20a   : > { %v8631_v11 = vor.u32 %v8630_v56, %v8626_v53  ;;  %v8652_v15 = vshrl.u32 %v8423_v26, 16  ;;  %v8658_v49 = vshll.u32 %v8424_v38, 16  ;;  %v11016_v45 = vrot.slane %v6036_v7, 9  ;;  %v8427_v39 = vld [vmem:[#allocation2 + $0x8c] sm:$0x1] }
 0x20b   : > { %v8644_v42 = vrot.slane %v8642_v20, 5  ;;  %v8650_v23 = vrot.slane %v8648_v37, 5  ;;  %v6143_v1 = vrot.slane %v12210_v31, 5  ;;  %v8622_v28 = vrot.slane %v8621_v61, 4  ;;  %v8435_v40 = vld [vmem:[#allocation2 + $0xac] sm:$0xf] }
 0x20c   : > { %v8632_v41 = vrot.slane %v8631_v11, 4  ;;  %v8654_v48 = vrot.slane %v8652_v15, 4  ;;  %v8660_v36 = vrot.slane %v8658_v49, 5  ;;  %v6146_v16 = vrot.slane %v12211_v59, 5  ;;  %v8430_v11 = vld [vmem:[#allocation2 + $0x98] sm:$0x1] }
 0x20d   : > { %11805 = vmatmul.mubr.msk.bf16.gmra.mxu1 %vm2565_vm2, %v11027_v46  ;;  %v8645_v60 = vor.u32 %v8644_v42, %v8641_v35  ;;  %v13843_v18 = vsel %vm13309_vm12, %v11016_v45, %v6143_v1  ;;  %v6145_v29 = vrot.slane %v6143_v1, 4  ;;  %v8627_v54 = vsel %vm12740_vm7, %v8622_v28, %v8626_v53  ;;  %v8429_v35 = vld [vmem:[#allocation2 + $0x94] sm:$0xf]  ;;  %v6038_v45 = vld [vmem:[#allocation2 + $0x84] sm:$0xe] }
 0x20e   : > { %11808 = vmatprep.mubr.msk.bf16.mxu1 %vm2565_vm2, %v11028_v34  ;;  %v8637_v46 = vsel %vm12740_vm7, %v8632_v41, %v8636_v25  ;;  %v8655_v14 = vor.u32 %v8654_v48, %v8650_v23  ;;  %v11017_v27 = vrot.slane %v6037_v32, 9  ;;  %v6150_v19 = vrot.slane %v12212_v9, 5  ;;  %v6039_v48 = vld [vmem:[#allocation2 + $0x90] sm:$0xe]  ;;  %v8431_v9 = vld [vmem:[#allocation2 + $0x9c] sm:$0xf] }
 0x20f   : > { %v11212_v63 = vcombine.low %v8627_v54, %v8637_v46  ;;  %v8646_v21 = vrot.slane %v8645_v60, 4  ;;  %v13851_v34 = vsel %vm13309_vm12, %v6145_v29, %v6146_v16  ;;  %v6153_v50 = vrot.slane %v12213_v44, 5 }
 0x210   : > { %11979 = vmatmul.mubr.msk.bf16.gmra.mxu0 %vm2565_vm2, %v13800_v58  ;;  %v8656_v24 = vrot.slane %v8655_v14, 4  ;;  %v11033_v62 = vcombine.low %v13843_v18, %v13851_v34  ;;  %v8663_v26 = vshrl.u32 %v8425_v6, 16  ;;  %v13862_v38 = vsel %vm13309_vm12, %v11017_v27, %v6150_v19  ;;  %v8428_v58 = vld [vmem:[#allocation2 + $0x90] sm:$0xf]  ;;  %v12215_v14 = vld [vmem:[#allocation2 + $0x8c] sm:$0x1] }
 0x211   : > { %11982 = vmatprep.mubr.msk.bf16.mxu0 %vm2565_vm2, %v11211_v10  ;;  %v8651_v17 = vsel %vm12740_vm7, %v8646_v21, %v8650_v23  ;;  %v6152_v51 = vrot.slane %v6150_v19, 4  ;;  %v8666_v4 = vshll.u32 %v8425_v6, 16  ;;  %v8672_v7 = vshll.u32 %v8426_v47, 16 }
 0x212   : > { %v8661_v53 = vsel %vm12740_vm7, %v8656_v24, %v8660_v36  ;;  %v8665_v56 = vrot.slane %v8663_v26, 4  ;;  %v8676_v25 = vshrl.u32 %v8426_v47, 16  ;;  %v8682_v61 = vshll.u32 %v8427_v39, 16  ;;  %v12216_v39 = vld [vmem:[#allocation2 + $0x94] sm:$0xf] }
 0x213   : > { %v11213_v20 = vcombine.low %v8651_v17, %v8661_v53  ;;  %v13868_v10 = vsel %vm13309_vm12, %v6152_v51, %v6153_v50  ;;  %v8668_v37 = vrot.slane %v8666_v4, 5  ;;  %v8674_v49 = vrot.slane %v8672_v7, 5  ;;  %v12217_v17 = vld [vmem:[#allocation2 + $0x98] sm:$0x1]  ;;  %v8432_v4 = vld [vmem:[#allocation2 + $0xa0] sm:$0xf] }
 0x214   : > { %v11034_v15 = vcombine.low %v13862_v38, %v13868_v10  ;;  %v8678_v42 = vrot.slane %v8676_v25, 4  ;;  %v8687_v23 = vshrl.u32 %v8428_v58, 16  ;;  %v8684_v1 = vrot.slane %v8682_v61, 5  ;;  %v12221_v38 = vld [vmem:[#allocation2 + $0xb0] sm:$0x1] }
 0x215   : > { %11809 = vmatmul.mubr.msk.bf16.gmra.mxu1 %vm2565_vm2, %v11029_v33  ;;  %v8669_v31 = vor.u32 %v8668_v37, %v8665_v56  ;;  %v8690_v32 = vshll.u32 %v8428_v58, 16  ;;  %v8696_v28 = vshll.u32 %v8429_v35, 16  ;;  %v8700_v43 = vshrl.u32 %v8429_v35, 16  ;;  %v8433_v56 = vld [vmem:[#allocation2 + $0xa4] sm:$0x1] }
 0x216   : > { %11812 = vmatprep.mubr.msk.bf16.mxu1 %vm2565_vm2, %v11030_v57  ;;  %v8679_v41 = vor.u32 %v8678_v42, %v8674_v49  ;;  %v8689_v30 = vrot.slane %v8687_v23, 4  ;;  %v8706_v33 = vshll.u32 %v8430_v11, 16  ;;  %v11018_v59 = vrot.slane %v6038_v45, 9  ;;  %v8436_v45 = vld [vmem:[#allocation2 + $0xb0] sm:$0x1] }
 0x217   : > { %v8670_v36 = vrot.slane %v8669_v31, 4  ;;  %v8692_v60 = vrot.slane %v8690_v32, 5  ;;  %v8698_v29 = vrot.slane %v8696_v28, 5  ;;  %v8702_v6 = vrot.slane %v8700_v43, 4 }
 0x218   : > { %11983 = vmatmul.mubr.msk.bf16.gmra.mxu0 %vm2565_vm2, %v11212_v63  ;;  %v8680_v16 = vrot.slane %v8679_v41, 4  ;;  %v8708_v12 = vrot.slane %v8706_v33, 5  ;;  %v6157_v57 = vrot.slane %v12214_v52, 5  ;;  %v6160_v27 = vrot.slane %v12215_v14, 5  ;;  %v6040_v41 = vld [vmem:[#allocation2 + $0x9c] sm:$0xe] }
 0x219   : > { %11986 = vmatprep.mubr.msk.bf16.mxu0 %vm2565_vm2, %v11213_v20  ;;  %v8675_v54 = vsel %vm12740_vm7, %v8670_v36, %v8674_v49  ;;  %v8693_v46 = vor.u32 %v8692_v60, %v8689_v30  ;;  %v11019_v21 = vrot.slane %v6039_v48, 9  ;;  %v8703_v47 = vor.u32 %v8702_v6, %v8698_v29  ;;  %v8434_v20 = vld [vmem:[#allocation2 + $0xa8] sm:$0xf] }
 0x21a   : > { %v8685_v19 = vsel %vm12740_vm7, %v8680_v16, %v8684_v1  ;;  %v13888_v63 = vsel %vm13309_vm12, %v11018_v59, %v6157_v57  ;;  %v6159_v24 = vrot.slane %v6157_v57, 4  ;;  %v6164_v26 = vrot.slane %v12216_v39, 5  ;;  %v6041_v16 = vld [vmem:[#allocation2 + $0xa8] sm:$0xe]  ;;  %v12220_v39 = vld [vmem:[#allocation2 + $0xac] sm:$0xf] }
 0x21b   : > { %v11214_v44 = vcombine.low %v8675_v54, %v8685_v19  ;;  %v8694_v50 = vrot.slane %v8693_v46, 4  ;;  %v6167_v51 = vrot.slane %v12217_v17, 5  ;;  %v8704_v58 = vrot.slane %v8703_v47, 4 }
 0x21c   : > { %v13896_v53 = vsel %vm13309_vm12, %v6159_v24, %v6160_v27  ;;  %v8711_v7 = vshrl.u32 %v8431_v9, 16  ;;  %v8714_v25 = vshll.u32 %v8431_v9, 16  ;;  %v13908_v0 = vsel %vm13309_vm12, %v11019_v21, %v6164_v26  ;;  %v12218_v27 = vld [vmem:[#allocation2 + $0xa0] sm:$0xf]  ;;  %v8437_v9 = vld [vmem:[#allocation2 + $0xb4] sm:$0xf] }
 0x21d   : > { %11813 = vmatmul.mubr.msk.bf16.gmra.mxu1 %vm2565_vm2, %v11031_v8  ;;  %v8699_v35 = vsel %vm12740_vm7, %v8694_v50, %v8698_v29  ;;  %v11035_v3 = vcombine.low %v13888_v63, %v13896_v53  ;;  %v6166_v8 = vrot.slane %v6164_v26, 4  ;;  %v8709_v37 = vsel %vm12740_vm7, %v8704_v58, %v8708_v12  ;;  %v12219_v24 = vld [vmem:[#allocation2 + $0xa4] sm:$0x1]  ;;  %v13960_v53 = vpop.f32.mrf.mxu1 }
 0x21e   : > { %11816 = vmatprep.mubr.msk.bf16.mxu1 %vm2565_vm2, %v11032_v13  ;;  %v8713_v61 = vrot.slane %v8711_v7, 4  ;;  %v8716_v11 = vrot.slane %v8714_v25, 5  ;;  %v8720_v2 = vshll.u32 %v8432_v4, 16  ;;  %v11215_v13 = vcombine.low %v8699_v35, %v8709_v37  ;;  %v8439_v35 = vld [vmem:[#allocation2 + $0xbc] sm:$0x1] }
 0x21f   : > { %v13914_v49 = vsel %vm13309_vm12, %v6166_v8, %v6167_v51  ;;  %v8724_v42 = vshrl.u32 %v8432_v4, 16  ;;  %v8730_v23 = vshll.u32 %v8433_v56, 16  ;;  %v8735_v28 = vshrl.u32 %v8434_v20, 16  ;;  %v6042_v8 = vld [vmem:[#allocation2 + $0xb4] sm:$0xe] }
 0x220   : > { %11987 = vmatmul.mubr.msk.bf16.gmra.mxu0 %vm2565_vm2, %v11214_v44  ;;  %v11036_v31 = vcombine.low %v13908_v0, %v13914_v49  ;;  %v8717_v1 = vor.u32 %v8716_v11, %v8713_v61  ;;  %v8722_v32 = vrot.slane %v8720_v2, 5  ;;  %v8738_v33 = vshll.u32 %v8434_v20, 16 }
 0x221   : > { %11990 = vmatprep.mubr.msk.bf16.mxu0 %vm2565_vm2, %v11215_v13  ;;  %v8726_v30 = vrot.slane %v8724_v42, 4  ;;  %v8732_v43 = vrot.slane %v8730_v23, 5  ;;  %v8744_v48 = vshll.u32 %v8435_v40, 16  ;;  %v8737_v60 = vrot.slane %v8735_v28, 4  ;;  %v6843_v23 = vld [vmem:[#allocation2 + $0xc] sm:$0xf] }
 0x222   : > { %v8718_v36 = vrot.slane %v8717_v1, 4  ;;  %v8748_v29 = vshrl.u32 %v8435_v40, 16  ;;  %v8754_v59 = vshll.u32 %v8436_v45, 16  ;;  %v8740_v12 = vrot.slane %v8738_v33, 5 }
 0x223   : > { %v8727_v6 = vor.u32 %v8726_v30, %v8722_v32  ;;  %v8746_v52 = vrot.slane %v8744_v48, 5  ;;  %v11020_v57 = vrot.slane %v6040_v41, 9  ;;  %v6171_v21 = vrot.slane %v12218_v27, 5 }
 0x224   : > { %v8723_v54 = vsel %vm12740_vm7, %v8718_v36, %v8722_v32  ;;  %v8750_v46 = vrot.slane %v8748_v29, 4  ;;  %v8756_v14 = vrot.slane %v8754_v59, 5  ;;  %v8741_v47 = vor.u32 %v8740_v12, %v8737_v60  ;;  %v12222_v36 = vld [vmem:[#allocation2 + $0xb8] sm:$0xf]  ;;  %v12223_v29 = vld [vmem:[#allocation2 + $0xbc] sm:$0x1] }
 0x225   : > { %11817 = vmatmul.mubr.msk.bf16.gmra.mxu1 %vm2565_vm2, %v11033_v62  ;;  %v8728_v19 = vrot.slane %v8727_v6, 4  ;;  %v6174_v44 = vrot.slane %v12219_v24, 5  ;;  %v11021_v18 = vrot.slane %v6041_v16, 9  ;;  %v13932_v62 = vsel %vm13309_vm12, %v11020_v57, %v6171_v21  ;;  %v12224_v12 = vld [vmem:[#allocation2 + $0x10] sm:$0xf] }
 0x226   : > { %11820 = vmatprep.mubr.msk.bf16.mxu1 %vm2565_vm2, %v11034_v15  ;;  %v8751_v34 = vor.u32 %v8750_v46, %v8746_v52  ;;  %v6173_v50 = vrot.slane %v6171_v21, 4  ;;  %v6178_v26 = vrot.slane %v12220_v39, 5  ;;  %v8742_v51 = vrot.slane %v8741_v47, 4  ;;  %v8438_v15 = vld [vmem:[#allocation2 + $0xb8] sm:$0xf] }
 0x227   : > { %v8733_v17 = vsel %vm12740_vm7, %v8728_v19, %v8732_v43  ;;  %v6181_v10 = vrot.slane %v12221_v38, 5  ;;  %v8759_v4 = vshrl.u32 %v8437_v9, 16  ;;  %v8762_v40 = vshll.u32 %v8437_v9, 16  ;;  %v6846_v57 = vld [vmem:[#allocation2 + $0x18] sm:$0xf] }
 0x228   : > { %v11216_v58 = vcombine.low %v8723_v54, %v8733_v17  ;;  %v8752_v56 = vrot.slane %v8751_v34, 4  ;;  %v6175_v7 = vsel %vm13309_vm12, %v6173_v50, %v6174_v44  ;;  %v13940_v25 = vsel %vm13309_vm12, %v11021_v18, %v6178_v26  ;;  %v12225_v47 = vld [vmem:[#allocation2 + $0x14] sm:$0x1]  ;;  %v13968_v18 = vpop.f32.mrf.mxu1 }
 0x229   : > { %v8747_v20 = vsel %vm12740_vm7, %v8742_v51, %v8746_v52  ;;  %v11037_v37 = vcombine.low %v13932_v62, %v6175_v7  ;;  %v6180_v61 = vrot.slane %v6178_v26, 4  ;;  %v8761_v11 = vrot.slane %v8759_v4, 4  ;;  %v6849_v26 = vld [vmem:[#allocation2 + $0x24] sm:$0xf] }
 0x22a   : > { %11991 = vmatmul.mubr.msk.bf16.gmra.mxu0 %vm2565_vm2, %v11216_v58  ;;  %v8757_v2 = vsel %vm12740_vm7, %v8752_v56, %v8756_v14  ;;  %v8768_v13 = vshll.u32 %v8438_v15, 16  ;;  %v8772_v42 = vshrl.u32 %v8438_v15, 16  ;;  %v8778_v32 = vshll.u32 %v8439_v35, 16  ;;  %v12226_v58 = vld [vmem:[#allocation2 + $0x1c] sm:$0xf] }
 0x22b   : > { %v11217_v45 = vcombine.low %v8747_v20, %v8757_v2  ;;  %v6182_v1 = vsel %vm13309_vm12, %v6180_v61, %v6181_v10  ;;  %v11022_v28 = vrot.slane %v6042_v8, 9  ;;  %v8764_v30 = vrot.slane %v8762_v40, 5  ;;  %v12227_v35 = vld [vmem:[#allocation2 + $0x20] sm:$0x1] }
 0x22c   : > { %v11038_v41 = vcombine.low %v13940_v25, %v6182_v1  ;;  %v8770_v43 = vrot.slane %v8768_v13, 5  ;;  %v8774_v33 = vrot.slane %v8772_v42, 4  ;;  %v8780_v48 = vrot.slane %v8778_v32, 5  ;;  %v6852_v42 = vld [vmem:[#allocation2 + $0x30] sm:$0xf] }
 0x22d   : > { %11821 = vmatmul.mubr.msk.bf16.gmra.mxu1 %vm2565_vm2, %v11035_v3  ;;  %11994 = vmatprep.mubr.msk.bf16.mxu0 %vm2565_vm2, %v11217_v45  ;;  %v6185_v60 = vrot.slane %v12222_v36, 5  ;;  %v6188_v59 = vrot.slane %v12223_v29, 5  ;;  %v6892_v63 = vshrl.u32 %v6843_v23, 16  ;;  %v8765_v3 = vor.u32 %v8764_v30, %v8761_v11  ;;  %v13982_v11 = vpop.f32.mrf.mxu1  ;;  %v12228_v30 = vld [vmem:[#allocation2 + $0x28] sm:$0xf] }
 0x22e   : > { %11824 = vmatprep.mubr.msk.bf16.mxu1 %vm2565_vm2, %v11036_v31  ;;  %v8775_v16 = vor.u32 %v8774_v33, %v8770_v43  ;;  %v6895_v6 = vshll.u32 %v6843_v23, 16  ;;  %v6901_v52 = vshll.u32 %v12224_v12, 16  ;;  %v6905_v54 = vshrl.u32 %v12224_v12, 16  ;;  %v12229_v36 = vld [vmem:[#allocation2 + $0x2c] sm:$0x1] }
 0x22f   : > { %v13964_v0 = vsel %vm13309_vm12, %v11022_v28, %v6185_v60  ;;  %v6187_v49 = vrot.slane %v6185_v60, 4  ;;  %v6894_v31 = vrot.slane %v6892_v63, 4  ;;  %v8766_v46 = vrot.slane %v8765_v3, 4 }
 0x230   : > { %v8776_v14 = vrot.slane %v8775_v16, 4  ;;  %v6897_v27 = vrot.slane %v6895_v6, 5  ;;  %v6903_v21 = vrot.slane %v6901_v52, 5  ;;  %v6907_v19 = vrot.slane %v6905_v54, 4 }
 0x231   : > { %v6189_v9 = vsel %vm13309_vm12, %v6187_v49, %v6188_v59  ;;  %v6911_v24 = vshll.u32 %v12225_v47, 16  ;;  %v6916_v44 = vshrl.u32 %v6846_v57, 16  ;;  %v8771_v34 = vsel %vm12740_vm7, %v8766_v46, %v8770_v43  ;;  %v13988_v59 = vpop.f32.mrf.mxu1  ;;  %v6855_v49 = vld [vmem:[#allocation2 + $0x3c] sm:$0xf] }
 0x232   : > { %v8781_v62 = vsel %vm12740_vm7, %v8776_v14, %v8780_v48  ;;  %v11039_v50 = vcombine.low %v13964_v0, %v6189_v9  ;;  %v6898_v39 = vor.u32 %v6897_v27, %v6894_v31  ;;  %v6908_v51 = vor.u32 %v6907_v19, %v6903_v21  ;;  %v12230_v27 = vld [vmem:[#allocation2 + $0x34] sm:$0xf] }
 0x233   : > { %v11218_v17 = vcombine.low %v8771_v34, %v8781_v62  ;;  %v6913_v38 = vrot.slane %v6911_v24, 5  ;;  %v6918_v10 = vrot.slane %v6916_v44, 4  ;;  %v6919_v4 = vshll.u32 %v6846_v57, 16  ;;  %v13990_v31 = vpop.f32.mrf.mxu1  ;;  %v12231_v62 = vld [vmem:[#allocation2 + $0x38] sm:$0x1] }
 0x234   : > { %v6899_v15 = vrot.slane %v6898_v39, 4  ;;  %v6925_v56 = vshll.u32 %v12226_v58, 16  ;;  %v6929_v7 = vshrl.u32 %v12226_v58, 16  ;;  %v6909_v25 = vrot.slane %v6908_v51, 4 }
 0x235   : > { %11825 = vmatmul.mubr.msk.bf16.gmra.mxu1 %vm2565_vm2, %v11037_v37  ;;  %11995 = vmatmul.mubr.msk.bf16.gmra.mxu0 %vm2565_vm2, %v11218_v17  ;;  %v6935_v8 = vshll.u32 %v12227_v35, 16  ;;  %v13980_v20 = vsel %vm2629_vm0, %v13794_v55, 0  ;;  %v6940_v61 = vshrl.u32 %v6849_v26, 16  ;;  %v6921_v2 = vrot.slane %v6919_v4, 5 }
 0x236   : > { %11828 = vmatprep.mubr.msk.bf16.mxu1 %vm2565_vm2, %v11038_v41  ;;  %v6904_v37 = vsel %vm12740_vm7, %v6899_v15, %v6903_v21  ;;  %v6927_v40 = vrot.slane %v6925_v56, 5  ;;  %v6931_v13 = vrot.slane %v6929_v7, 4  ;;  %v6914_v23 = vsel %vm12740_vm7, %v6909_v25, %v6913_v38  ;;  %v12232_v56 = vld [vmem:[#allocation2 + $0x40] sm:$0xf]  ;;  %v6858_v25 = vld [vmem:[#allocation2 + $0x48] sm:$0xf] }
 0x237   : > { %v6937_v45 = vrot.slane %v6935_v8, 5  ;;  %v6942_v1 = vrot.slane %v6940_v61, 4  ;;  %v6943_v32 = vshll.u32 %v6849_v26, 16  ;;  %v11090_v28 = vcombine.low %v6904_v37, %v6914_v23 }
 0x238   : > { %v6922_v41 = vor.u32 %v6921_v2, %v6918_v10  ;;  %v6932_v55 = vor.u32 %v6931_v13, %v6927_v40  ;;  %v6949_v43 = vshll.u32 %v12228_v30, 16  ;;  %v6953_v48 = vshrl.u32 %v12228_v30, 16  ;;  %v14000_v10 = vpop.f32.mrf.mxu1 }
 0x239   : > { %v6945_v33 = vrot.slane %v6943_v32, 5  ;;  %v6959_v60 = vshll.u32 %v12229_v36, 16  ;;  %v6964_v29 = vshrl.u32 %v6852_v42, 16  ;;  %v6967_v6 = vshll.u32 %v6852_v42, 16  ;;  %v12233_v42 = vld [vmem:[#allocation2 + $0x44] sm:$0x1] }
 0x23a   : > { %v6923_v63 = vrot.slane %v6922_v41, 4  ;;  %v6933_v3 = vrot.slane %v6932_v55, 4  ;;  %v6951_v16 = vrot.slane %v6949_v43, 5  ;;  %v6955_v52 = vrot.slane %v6953_v48, 4  ;;  %v14009_v41 = vld [vmem:[%s15334_s3 + $0x10] sm:$0x3]  ;;  %v14011_v55 = vpop.f32.mrf.mxu0  ;;  %v14013_v30 = vpop.f32.mrf.mxu1 }
 0x23b   : > { %v6946_v12 = vor.u32 %v6945_v33, %v6942_v1  ;;  %v6961_v57 = vrot.slane %v6959_v60, 5  ;;  %v6966_v0 = vrot.slane %v6964_v29, 4  ;;  %v6969_v14 = vrot.slane %v6967_v6, 5  ;;  %v12234_v48 = vld [vmem:[#allocation2 + $0x4c] sm:$0xf] }
 0x23c   : > { %v6928_v54 = vsel %vm12740_vm7, %v6923_v63, %v6927_v40  ;;  %v6938_v46 = vsel %vm12740_vm7, %v6933_v3, %v6937_v45  ;;  %v6973_v21 = vshll.u32 %v12230_v27, 16  ;;  %v6956_v47 = vor.u32 %v6955_v52, %v6951_v16  ;;  %v6861_v29 = vld [vmem:[#allocation2 + $0x54] sm:$0xf] }
 0x23d   : > { %11829 = vmatmul.mubr.msk.bf16.gmra.mxu1 %vm2565_vm2, %v11039_v50  ;;  %v11091_v9 = vcombine.low %v6928_v54, %v6938_v46  ;;  %v6947_v19 = vrot.slane %v6946_v12, 4  ;;  %v6977_v24 = vshrl.u32 %v12230_v27, 16  ;;  %v6970_v44 = vor.u32 %v6969_v14, %v6966_v0  ;;  %v14024_v27 = vpop.f32.mrf.mxu0 }
 0x23e   : > { %11868 = vmatprep.mubr.msk.bf16.mxu1 %vm2565_vm2, %v11090_v28  ;;  %v6975_v34 = vrot.slane %v6973_v21, 5  ;;  %v6983_v39 = vshll.u32 %v12231_v62, 16  ;;  %v6988_v50 = vshrl.u32 %v6855_v49, 16  ;;  %v6957_v17 = vrot.slane %v6956_v47, 4  ;;  %v14026_v21 = vpop.f32.mrf.mxu1 }
 0x23f   : > { %v6952_v26 = vsel %vm12740_vm7, %v6947_v19, %v6951_v16  ;;  %v6979_v51 = vrot.slane %v6977_v24, 4  ;;  %v6991_v38 = vshll.u32 %v6855_v49, 16  ;;  %v6971_v15 = vrot.slane %v6970_v44, 4  ;;  %v12236_v24 = vld [vmem:[#allocation2 + $0x58] sm:$0xf] }
 0x240   : > { %v6985_v4 = vrot.slane %v6983_v39, 5  ;;  %v6990_v58 = vrot.slane %v6988_v50, 4  ;;  %v6997_v7 = vshll.u32 %v12232_v56, 16  ;;  %v6962_v35 = vsel %vm12740_vm7, %v6957_v17, %v6961_v57  ;;  %v14030_v17 = vpop.f32.mrf.mxu1 }
 0x241   : > { %v6980_v8 = vor.u32 %v6979_v51, %v6975_v34  ;;  %v6993_v61 = vrot.slane %v6991_v38, 5  ;;  %v7001_v37 = vshrl.u32 %v12232_v56, 16  ;;  %v11092_v2 = vcombine.low %v6952_v26, %v6962_v35 }
 0x242   : > { %v6976_v40 = vsel %vm12740_vm7, %v6971_v15, %v6975_v34  ;;  %v6999_v13 = vrot.slane %v6997_v7, 5  ;;  %v7007_v23 = vshll.u32 %v12233_v42, 16  ;;  %v7012_v28 = vshrl.u32 %v6858_v25, 16  ;;  %v6864_v34 = vld [vmem:[#allocation2 + $0x60] sm:$0xf] }
 0x243   : > { %v6981_v45 = vrot.slane %v6980_v8, 4  ;;  %v6994_v1 = vor.u32 %v6993_v61, %v6990_v58  ;;  %v7003_v32 = vrot.slane %v7001_v37, 4  ;;  %v7015_v33 = vshll.u32 %v6858_v25, 16  ;;  %v12237_v7 = vld [vmem:[#allocation2 + $0x5c] sm:$0x1]  ;;  %v14032_v8 = vpop.f32.mrf.mxu0 }
 0x244   : > { %v7009_v43 = vrot.slane %v7007_v23, 5  ;;  %v7021_v36 = vshll.u32 %v12234_v48, 16  ;;  %v7025_v60 = vshrl.u32 %v12234_v48, 16  ;;  %v7014_v6 = vrot.slane %v7012_v28, 4 }
 0x245   : > { %11869 = vmatmul.mubr.msk.bf16.vlgmr.msra.gmra.mxu1 %vm2565_vm2, %v11091_v9  ;;  %v6986_v63 = vsel %vm12740_vm7, %v6981_v45, %v6985_v4  ;;  %v6995_v3 = vrot.slane %v6994_v1, 4  ;;  %v7004_v16 = vor.u32 %v7003_v32, %v6999_v13  ;;  %v7017_v52 = vrot.slane %v7015_v33, 5  ;;  %v14040_v32 = vpop.f32.mrf.mxu1  ;;  %v12238_v33 = vld [vmem:[#allocation2 + $0x64] sm:$0xf] }
 0x246   : > { %11935 = vmatpush3.bf16.msra.mxu1 %v13980_v20  ;;  %11872 = vmatprep.mubr.msk.bf16.mxu1 %vm2565_vm2, %v11092_v2  ;;  %v11093_v12 = vcombine.low %v6976_v40, %v6986_v63  ;;  %v7023_v57 = vrot.slane %v7021_v36, 5  ;;  %v7027_v0 = vrot.slane %v7025_v60, 4  ;;  %v12235_v20 = vld [vmem:[#allocation2 + $0x50] sm:$0x1]  ;;  %v7036_v14 = vshrl.u32 %v6861_v29, 16 }
 0x247   : > { %12115 = vmatprep.subr.msk.bf16.mxu1 %vm2629_vm0, %v14009_v41  ;;  %v7000_v49 = vsel %vm12740_vm7, %v6995_v3, %v6999_v13  ;;  %v7005_v54 = vrot.slane %v7004_v16, 4  ;;  %v7031_v46 = vshll.u32 %v12235_v20, 16  ;;  %v7018_v9 = vor.u32 %v7017_v52, %v7014_v6  ;;  %v6867_v13 = vld [vmem:[#allocation2 + $0x6c] sm:$0xf]  ;;  %v14042_v6 = vpop.f32.mrf.mxu0 }
 0x248   : > { %v7028_v19 = vor.u32 %v7027_v0, %v7023_v57  ;;  %v7039_v47 = vshll.u32 %v6861_v29, 16  ;;  %v7045_v44 = vshll.u32 %v12236_v24, 16  ;;  %v7038_v50 = vrot.slane %v7036_v14, 4  ;;  %v12239_v29 = vld [vmem:[#allocation2 + $0x68] sm:$0x1] }
 0x249   : > { %v7010_v62 = vsel %vm12740_vm7, %v7005_v54, %v7009_v43  ;;  %v7033_v39 = vrot.slane %v7031_v46, 5  ;;  %v7049_v26 = vshrl.u32 %v12236_v24, 16  ;;  %v7019_v38 = vrot.slane %v7018_v9, 4  ;;  %v14048_v9 = vpop.f32.mrf.mxu1 }
 0x24a   : > { %v11094_v51 = vcombine.low %v7000_v49, %v7010_v62  ;;  %v7029_v15 = vrot.slane %v7028_v19, 4  ;;  %v7041_v4 = vrot.slane %v7039_v47, 5  ;;  %v7047_v58 = vrot.slane %v7045_v44, 5  ;;  %v6870_v49 = vld [vmem:[#allocation2 + $0x78] sm:$0xf] }
 0x24b   : > { %v7051_v56 = vrot.slane %v7049_v26, 4  ;;  %v7055_v25 = vshll.u32 %v12237_v7, 16  ;;  %v7060_v35 = vshrl.u32 %v6864_v34, 16  ;;  %v7024_v61 = vsel %vm12740_vm7, %v7019_v38, %v7023_v57  ;;  %v12240_v44 = vld [vmem:[#allocation2 + $0x70] sm:$0xf]  ;;  %v14050_v38 = vpop.f32.mrf.mxu0 }
 0x24c   : > { %v7034_v37 = vsel %vm12740_vm7, %v7029_v15, %v7033_v39  ;;  %v7042_v2 = vor.u32 %v7041_v4, %v7038_v50  ;;  %v7063_v40 = vshll.u32 %v6864_v34, 16  ;;  %v7069_v48 = vshll.u32 %v12238_v33, 16  ;;  %v12241_v50 = vld [vmem:[#allocation2 + $0x74] sm:$0x1]  ;;  %15378 = vst [vmem:[#allocation4_spill] sm:$0xff] %v14050_v38  ;;  %v12176_v38 = vld [vmem:[#allocation2 + $0xa8] sm:$0xff]  }
 0x24d   : > { %11873 = vmatmul.mubr.msk.bf16.gmra.mxu1 %vm2565_vm2, %v11093_v12  ;;  %v11095_v42 = vcombine.low %v7024_v61, %v7034_v37  ;;  %v7052_v23 = vor.u32 %v7051_v56, %v7047_v58  ;;  %v7057_v45 = vrot.slane %v7055_v25, 5  ;;  %v7062_v1 = vrot.slane %v7060_v35, 4  ;;  %v6873_v37 = vld [vmem:[#allocation2 + $0x84] sm:$0xf] }
 0x24e   : > { %11876 = vmatprep.mubr.msk.bf16.mxu1 %vm2565_vm2, %v11094_v51  ;;  %v7043_v28 = vrot.slane %v7042_v2, 4  ;;  %v7065_v43 = vrot.slane %v7063_v40, 5  ;;  %v7073_v36 = vshrl.u32 %v12238_v33, 16  ;;  %v7079_v63 = vshll.u32 %v12239_v29, 16  ;;  %v14056_v2 = vpop.f32.mrf.mxu1  ;;  %v12243_v33 = vld [vmem:[#allocation2 + $0x80] sm:$0x1] }
 0x24f   : > { %v7053_v60 = vrot.slane %v7052_v23, 4  ;;  %v7084_v3 = vshrl.u32 %v6867_v13, 16  ;;  %v7087_v16 = vshll.u32 %v6867_v13, 16  ;;  %v7071_v57 = vrot.slane %v7069_v48, 5 }
 0x250   : > { %v7048_v12 = vsel %vm12740_vm7, %v7043_v28, %v7047_v58  ;;  %v7066_v52 = vor.u32 %v7065_v43, %v7062_v1  ;;  %v7075_v0 = vrot.slane %v7073_v36, 4  ;;  %v7081_v20 = vrot.slane %v7079_v63, 5  ;;  %v14062_v36 = vpop.f32.mrf.mxu0 }
 0x251   : > { %v7058_v54 = vsel %vm12740_vm7, %v7053_v60, %v7057_v45  ;;  %v7086_v46 = vrot.slane %v7084_v3, 4  ;;  %v7089_v14 = vrot.slane %v7087_v16, 5  ;;  %v7093_v34 = vshll.u32 %v12240_v44, 16  ;;  %15379 = vst [vmem:[#allocation5_spill] sm:$0xff] %v14062_v36  ;;  %v14064_v60 = vpop.f32.mrf.mxu1  ;;  %v12175_v36 = vld [vmem:[#allocation2 + $0x9c] sm:$0xff]  }
 0x252   : > { %v11096_v19 = vcombine.low %v7048_v12, %v7058_v54  ;;  %v7067_v47 = vrot.slane %v7066_v52, 4  ;;  %v7076_v24 = vor.u32 %v7075_v0, %v7071_v57  ;;  %v7097_v39 = vshrl.u32 %v12240_v44, 16  ;;  %v12244_v0 = vld [vmem:[#allocation2 + $0x88] sm:$0xf] }
 0x253   : > { %v7090_v62 = vor.u32 %v7089_v14, %v7086_v46  ;;  %v7103_v26 = vshll.u32 %v12241_v50, 16  ;;  %v7108_v51 = vshrl.u32 %v6870_v49, 16  ;;  %v7095_v58 = vrot.slane %v7093_v34, 5  ;;  %v12245_v34 = vld [vmem:[#allocation2 + $0x8c] sm:$0x1]  ;;  %v14070_v50 = vpop.f32.mrf.mxu1 }
 0x254   : > { %v7072_v15 = vsel %vm12740_vm7, %v7067_v47, %v7071_v57  ;;  %v7077_v4 = vrot.slane %v7076_v24, 4  ;;  %v7111_v56 = vshll.u32 %v6870_v49, 16  ;;  %v7099_v25 = vrot.slane %v7097_v39, 4  ;;  %v14068_v39 = vpop.f32.mrf.mxu0 }
 0x255   : > { %11877 = vmatmul.mubr.msk.bf16.gmra.mxu1 %vm2565_vm2, %v11095_v42  ;;  %v7091_v7 = vrot.slane %v7090_v62, 4  ;;  %v7105_v35 = vrot.slane %v7103_v26, 5  ;;  %v7110_v61 = vrot.slane %v7108_v51, 4  ;;  %v12242_v42 = vld [vmem:[#allocation2 + $0x7c] sm:$0xf]  ;;  %v7127_v48 = vshll.u32 %v12243_v33, 16  ;;  %v14080_v33 = vpop.f32.mrf.mxu1 }
 0x256   : > { %11880 = vmatprep.mubr.msk.bf16.mxu1 %vm2565_vm2, %v11096_v19  ;;  %v7082_v40 = vsel %vm12740_vm7, %v7077_v4, %v7081_v20  ;;  %v7113_v13 = vrot.slane %v7111_v56, 5  ;;  %v7117_v23 = vshll.u32 %v12242_v42, 16  ;;  %v7121_v45 = vshrl.u32 %v12242_v42, 16  ;;  %v6876_v19 = vld [vmem:[#allocation2 + $0x90] sm:$0xf]  ;;  %15380 = vst [vmem:[#allocation6_spill] sm:$0xff] %v14068_v39 }
 0x257   : > { %v11097_v1 = vcombine.low %v7072_v15, %v7082_v40  ;;  %v7096_v28 = vsel %vm12740_vm7, %v7091_v7, %v7095_v58  ;;  %v7100_v43 = vor.u32 %v7099_v25, %v7095_v58  ;;  %v7132_v16 = vshrl.u32 %v6873_v37, 16  ;;  %v6879_v42 = vld [vmem:[#allocation2 + $0x9c] sm:$0xf] }
 0x258   : > { %v7114_v29 = vor.u32 %v7113_v13, %v7110_v61  ;;  %v7119_v63 = vrot.slane %v7117_v23, 5  ;;  %v7123_v3 = vrot.slane %v7121_v45, 4  ;;  %v7129_v52 = vrot.slane %v7127_v48, 5 }
 0x259   : > { %v7101_v12 = vrot.slane %v7100_v43, 4  ;;  %v7135_v57 = vshll.u32 %v6873_v37, 16  ;;  %v7141_v49 = vshll.u32 %v12244_v0, 16  ;;  %v7134_v46 = vrot.slane %v7132_v16, 4  ;;  %v12246_v37 = vld [vmem:[#allocation2 + $0x94] sm:$0xf]  ;;  %v14078_v43 = vpop.f32.mrf.mxu0 }
 0x25a   : > { %v7115_v54 = vrot.slane %v7114_v29, 4  ;;  %v7124_v20 = vor.u32 %v7123_v3, %v7119_v63  ;;  %v7145_v14 = vshrl.u32 %v12244_v0, 16  ;;  %v7151_v62 = vshll.u32 %v12245_v34, 16  ;;  %15381 = vst [vmem:[#allocation7_spill] sm:$0xff] %v14078_v43  ;;  %v12247_v3 = vld [vmem:[#allocation2 + $0x98] sm:$0x1] }
 0x25b   : > { %v7106_v47 = vsel %vm12740_vm7, %v7101_v12, %v7105_v35  ;;  %v7137_v24 = vrot.slane %v7135_v57, 5  ;;  %v7143_v44 = vrot.slane %v7141_v49, 5  ;;  %v7156_v7 = vshrl.u32 %v6876_v19, 16  ;;  %v14084_v49 = vpop.f32.mrf.mxu0 }
 0x25c   : > { %v11098_v26 = vcombine.low %v7096_v28, %v7106_v47  ;;  %v7120_v51 = vsel %vm12740_vm7, %v7115_v54, %v7119_v63  ;;  %v7125_v15 = vrot.slane %v7124_v20, 4  ;;  %v7147_v4 = vrot.slane %v7145_v14, 4  ;;  %15382 = vst [vmem:[#allocation8_spill] sm:$0xff] %v14084_v49  ;;  %v12248_v14 = vld [vmem:[#allocation2 + $0xa0] sm:$0xf] }
 0x25d   : > { %11881 = vmatmul.mubr.msk.bf16.gmra.mxu1 %vm2565_vm2, %v11097_v1  ;;  %v7138_v58 = vor.u32 %v7137_v24, %v7134_v46  ;;  %v7153_v56 = vrot.slane %v7151_v62, 5  ;;  %v7159_v25 = vshll.u32 %v6876_v19, 16  ;;  %v7165_v40 = vshll.u32 %v12246_v37, 16  ;;  %v8440_v47 = vld [vmem:[#allocation2 + $0xc0] sm:$0xf] }
 0x25e   : > { %11884 = vmatprep.mubr.msk.bf16.mxu1 %vm2565_vm2, %v11098_v26  ;;  %v7130_v35 = vsel %vm12740_vm7, %v7125_v15, %v7129_v52  ;;  %v7148_v61 = vor.u32 %v7147_v4, %v7143_v44  ;;  %v7169_v13 = vshrl.u32 %v12246_v37, 16  ;;  %v7158_v1 = vrot.slane %v7156_v7, 4  ;;  %v12249_v7 = vld [vmem:[#allocation2 + $0xa4] sm:$0x1] }
 0x25f   : > { %v11099_v23 = vcombine.low %v7120_v51, %v7130_v35  ;;  %v7139_v45 = vrot.slane %v7138_v58, 4  ;;  %v7161_v28 = vrot.slane %v7159_v25, 5  ;;  %v7167_v29 = vrot.slane %v7165_v40, 5  ;;  %v14088_v51 = vld [vmem:[#allocation2 + $0xc4] sm:$0xf] }
 0x260   : > { %v7149_v48 = vrot.slane %v7148_v61, 4  ;;  %v7171_v63 = vrot.slane %v7169_v13, 4  ;;  %v7175_v16 = vshll.u32 %v12247_v3, 16  ;;  %v7180_v57 = vshrl.u32 %v6879_v42, 16  ;;  %v14096_v61 = vld [vmem:[#allocation2 + $0xc8] sm:$0x1]  ;;  %v14098_v13 = vpop.f32.mrf.mxu0 }
 0x261   : > { %v7144_v12 = vsel %vm12740_vm7, %v7139_v45, %v7143_v44  ;;  %v7162_v52 = vor.u32 %v7161_v28, %v7158_v1  ;;  %v7183_v0 = vshll.u32 %v6879_v42, 16  ;;  %v7189_v19 = vshll.u32 %v12248_v14, 16  ;;  %v14090_v44 = vpop.f32.mrf.mxu1  ;;  %15384 = vst [vmem:[#allocation10_spill] sm:$0xff] %v14098_v13  ;;  %v12171_v13 = vld [vmem:[#allocation2 + $0x6c] sm:$0xff]  }
 0x262   : > { %v7154_v54 = vsel %vm12740_vm7, %v7149_v48, %v7153_v56  ;;  %v7172_v20 = vor.u32 %v7171_v63, %v7167_v29  ;;  %v7177_v46 = vrot.slane %v7175_v16, 5  ;;  %v7182_v62 = vrot.slane %v7180_v57, 4  ;;  %15383 = vst [vmem:[#allocation9_spill] sm:$0xff] %v14090_v44  ;;  %v6882_v48 = vld [vmem:[#allocation2 + $0xa8] sm:$0xf] }
 0x263   : > { %v11100_v24 = vcombine.low %v7144_v12, %v7154_v54  ;;  %v7163_v34 = vrot.slane %v7162_v52, 4  ;;  %v7185_v26 = vrot.slane %v7183_v0, 5  ;;  %v7191_v4 = vrot.slane %v7189_v19, 5  ;;  %v14100_v42 = vpop.f32.mrf.mxu1  ;;  %v14109_v19 = vpop.f32.mrf.mxu0 }
 0x264   : > { %v7173_v15 = vrot.slane %v7172_v20, 4  ;;  %v7193_v58 = vshrl.u32 %v12248_v14, 16  ;;  %v7199_v56 = vshll.u32 %v12249_v7, 16  ;;  %v8783_v37 = vshrl.u32 %v8440_v47, 16  ;;  %15385 = vst [vmem:[#allocation11_spill] sm:$0xff] %v14109_v19 }
 0x265   : > { %11885 = vmatmul.mubr.msk.bf16.gmra.mxu1 %vm2565_vm2, %v11099_v23  ;;  %v7168_v25 = vsel %vm12740_vm7, %v7163_v34, %v7167_v29  ;;  %v7186_v35 = vor.u32 %v7185_v26, %v7182_v62  ;;  %v8786_v40 = vshll.u32 %v8440_v47, 16  ;;  %v8792_v28 = vshll.u32 %v14088_v51, 16  ;;  %v14111_v47 = vpop.f32.mrf.mxu1  ;;  %v12250_v26 = vld [vmem:[#allocation2 + $0xac] sm:$0xf] }
 0x266   : > { %11888 = vmatprep.mubr.msk.bf16.mxu1 %vm2565_vm2, %v11100_v24  ;;  %v7178_v23 = vsel %vm12740_vm7, %v7173_v15, %v7177_v46  ;;  %v7195_v45 = vrot.slane %v7193_v58, 4  ;;  %v7201_v1 = vrot.slane %v7199_v56, 5  ;;  %v8785_v29 = vrot.slane %v8783_v37, 4  ;;  %15386 = vst [vmem:[#allocation12_spill] sm:$0xff] %v14111_v47 }
 0x267   : > { %v11101_v63 = vcombine.low %v7168_v25, %v7178_v23  ;;  %v7187_v3 = vrot.slane %v7186_v35, 4  ;;  %v8788_v16 = vrot.slane %v8786_v40, 5  ;;  %v8794_v52 = vrot.slane %v8792_v28, 5  ;;  %v6885_v35 = vld [vmem:[#allocation2 + $0xb4] sm:$0xf] }
 0x268   : > { %v7196_v12 = vor.u32 %v7195_v45, %v7191_v4  ;;  %v8796_v57 = vshrl.u32 %v14088_v51, 16  ;;  %v8802_v0 = vshll.u32 %v14096_v61, 16  ;;  %v7204_v46 = vshrl.u32 %v6882_v48, 16  ;;  %v12251_v23 = vld [vmem:[#allocation2 + $0xb0] sm:$0x1] }
 0x269   : > { %v7192_v54 = vsel %vm12740_vm7, %v7187_v3, %v7191_v4  ;;  %v8789_v20 = vor.u32 %v8788_v16, %v8785_v29  ;;  %v7207_v14 = vshll.u32 %v6882_v48, 16  ;;  %v7213_v15 = vshll.u32 %v12250_v26, 16  ;;  %v14116_v29 = vpop.f32.mrf.mxu0  ;;  %v14118_v16 = vpop.f32.mrf.mxu1 }
 0x26a   : > { %v7197_v24 = vrot.slane %v7196_v12, 4  ;;  %v8798_v34 = vrot.slane %v8796_v57, 4  ;;  %v8804_v62 = vrot.slane %v8802_v0, 5  ;;  %v7206_v7 = vrot.slane %v7204_v46, 4  ;;  %15387 = vst [vmem:[#allocation13_spill] sm:$0xff] %v14116_v29  ;;  %15388 = vst [vmem:[#allocation14_spill] sm:$0xff] %v14118_v16 }
 0x26b   : > { %v8790_v58 = vrot.slane %v8789_v20, 4  ;;  %v7209_v56 = vrot.slane %v7207_v14, 5  ;;  %v7217_v25 = vshrl.u32 %v12250_v26, 16  ;;  %v7215_v40 = vrot.slane %v7213_v15, 5  ;;  %v12252_v46 = vld [vmem:[#allocation2 + $0xb8] sm:$0xf] }
 0x26c   : > { %v7202_v4 = vsel %vm12740_vm7, %v7197_v24, %v7201_v1  ;;  %v8799_v37 = vor.u32 %v8798_v34, %v8794_v52  ;;  %v7223_v45 = vshll.u32 %v12251_v23, 16  ;;  %v7228_v0 = vshrl.u32 %v6885_v35, 16  ;;  %v14123_v34 = vpop.f32.mrf.mxu0  ;;  %v12178_v16 = vld [vmem:[#allocation2 + $0xc0] sm:$0xff]  }
 0x26d   : > { %11889 = vmatmul.mubr.msk.bf16.gmra.mxu1 %vm2565_vm2, %v11101_v63  ;;  %v11102_v28 = vcombine.low %v7192_v54, %v7202_v4  ;;  %v7210_v48 = vor.u32 %v7209_v56, %v7206_v7  ;;  %v7219_v3 = vrot.slane %v7217_v25, 4  ;;  %v8795_v12 = vsel %vm12740_vm7, %v8790_v58, %v8794_v52  ;;  %v6888_v54 = vld [vmem:[#allocation2 + $0xc0] sm:$0xf]  ;;  %15389 = vst [vmem:[#allocation15_spill] sm:$0xff] %v14123_v34 }
 0x26e   : > { %v8800_v57 = vrot.slane %v8799_v37, 4  ;;  %v7231_v63 = vshll.u32 %v6885_v35, 16  ;;  %v7237_v14 = vshll.u32 %v12252_v46, 16  ;;  %v7241_v24 = vshrl.u32 %v12252_v46, 16  ;;  %v12253_v35 = vld [vmem:[#allocation2 + $0xbc] sm:$0x1]  ;;  %v14127_v37 = vpop.f32.mrf.mxu1 }
 0x26f   : > { %11892 = vmatprep.mubr.msk.bf16.mxu1 %vm2565_vm2, %v11102_v28  ;;  %v7211_v1 = vrot.slane %v7210_v48, 4  ;;  %v7220_v20 = vor.u32 %v7219_v3, %v7215_v40  ;;  %v7225_v15 = vrot.slane %v7223_v45, 5  ;;  %v7230_v7 = vrot.slane %v7228_v0, 4 }
 0x270   : > { %v8805_v26 = vsel %vm12740_vm7, %v8800_v57, %v8804_v62  ;;  %v7233_v56 = vrot.slane %v7231_v63, 5  ;;  %v7239_v25 = vrot.slane %v7237_v14, 5  ;;  %v7247_v4 = vshll.u32 %v12253_v35, 16  ;;  %v12254_v57 = vld [vmem:[#allocation2 + $0xc4] sm:$0xf]  ;;  %v14134_v63 = vpop.f32.mrf.mxu0 }
 0x271   : > { %v11219_v52 = vcombine.low %v8795_v12, %v8805_v26  ;;  %v7221_v58 = vrot.slane %v7220_v20, 4  ;;  %v7216_v23 = vsel %vm12740_vm7, %v7211_v1, %v7215_v40  ;;  %v7243_v48 = vrot.slane %v7241_v24, 4  ;;  %15390 = vst [vmem:[#allocation16_spill] sm:$0xff] %v14134_v63  ;;  %v14136_v20 = vpop.f32.mrf.mxu1  ;;  %v8443_v35 = vld [vmem:[#allocation2 + $0xcc] sm:$0xf] }
 0x272   : > { %v7234_v28 = vor.u32 %v7233_v56, %v7230_v7  ;;  %v7252_v3 = vshrl.u32 %v6888_v54, 16  ;;  %v7255_v45 = vshll.u32 %v6888_v54, 16  ;;  %v7261_v12 = vshll.u32 %v12254_v57, 16  ;;  %v12255_v56 = vld [vmem:[#allocation2 + $0xc8] sm:$0x1] }
 0x273   : > { %11998 = vmatprep.mubr.msk.bf16.mxu0 %vm2565_vm2, %v11219_v52  ;;  %v7226_v62 = vsel %vm12740_vm7, %v7221_v58, %v7225_v15  ;;  %v7265_v0 = vshrl.u32 %v12254_v57, 16  ;;  %v7244_v26 = vor.u32 %v7243_v48, %v7239_v25  ;;  %v7271_v52 = vshll.u32 %v12255_v56, 16  ;;  %v14138_v29 = vpop.f32.mrf.mxu1  ;;  %v14141_v63 = vld [vmem:[#allocation2 + $0xd0] sm:$0xf] }
 0x274   : > { %v11103_v46 = vcombine.low %v7216_v23, %v7226_v62  ;;  %v7235_v14 = vrot.slane %v7234_v28, 4  ;;  %v7254_v40 = vrot.slane %v7252_v3, 4  ;;  %v7257_v1 = vrot.slane %v7255_v45, 5  ;;  %v14143_v23 = vpop.f32.mrf.mxu0  ;;  %v14151_v62 = vld [vmem:[#allocation2 + $0xd4] sm:$0x1] }
 0x275   : > { %v7263_v24 = vrot.slane %v7261_v12, 5  ;;  %v7267_v7 = vrot.slane %v7265_v0, 4  ;;  %v7245_v54 = vrot.slane %v7244_v26, 4  ;;  %v7249_v15 = vrot.slane %v7247_v4, 5  ;;  %15391 = vst [vmem:[#allocation17_spill] sm:$0xff] %v14143_v23  ;;  %v14145_v28 = vpop.f32.mrf.mxu1 }
 0x276   : > { %11893 = vmatmul.mubr.msk.bf16.gmra.mxu1 %vm2565_vm2, %v11103_v46  ;;  %v7258_v58 = vor.u32 %v7257_v1, %v7254_v40  ;;  %v7273_v43 = vrot.slane %v7271_v52, 5  ;;  %v7240_v48 = vsel %vm12740_vm7, %v7235_v14, %v7239_v25  ;;  %v8807_v45 = vshrl.u32 %v8443_v35, 16 }
 0x277   : > { %v7268_v57 = vor.u32 %v7267_v7, %v7263_v24  ;;  %v7250_v3 = vsel %vm12740_vm7, %v7245_v54, %v7249_v15  ;;  %v8810_v12 = vshll.u32 %v8443_v35, 16  ;;  %v14153_v26 = vpop.f32.mrf.mxu1  ;;  %v8816_v7 = vshll.u32 %v14141_v63, 16  ;;  %v14163_v35 = vpop.f32.mrf.mxu0 }
 0x278   : > { %v11104_v4 = vcombine.low %v7240_v48, %v7250_v3  ;;  %v7259_v0 = vrot.slane %v7258_v58, 4  ;;  %v8809_v40 = vrot.slane %v8807_v45, 4  ;;  %v8820_v56 = vshrl.u32 %v14141_v63, 16  ;;  %15392 = vst [vmem:[#allocation18_spill] sm:$0xff] %v14163_v35  ;;  %v12164_v48 = vld [vmem:[#allocation2 + $0x18] sm:$0xff]  }
 0x279   : > { %v7269_v46 = vrot.slane %v7268_v57, 4  ;;  %v8812_v1 = vrot.slane %v8810_v12, 5  ;;  %v8826_v52 = vshll.u32 %v14151_v62, 16  ;;  %v14165_v54 = vpop.f32.mrf.mxu1  ;;  %v8818_v57 = vrot.slane %v8816_v7, 5  ;;  %v14167_v45 = vpop.f32.mrf.mxu0 }
 0x27a   : > { %11896 = vmatprep.mubr.msk.bf16.mxu1 %vm2565_vm2, %v11104_v4  ;;  %v7264_v25 = vsel %vm12740_vm7, %v7259_v0, %v7263_v24  ;;  %v8822_v3 = vrot.slane %v8820_v56, 4  ;;  %15393 = vst [vmem:[#allocation19_spill] sm:$0xff] %v14167_v45  ;;  %v12165_v56 = vld [vmem:[#allocation2 + $0x24] sm:$0xff]   ;;  %v9291_v34 = vrot.slane %v14096_v61, 5  ;;  %v9295_v44 = vrot.slane %v14141_v63, 5 }
 0x27b   : > { %v7274_v14 = vsel %vm12740_vm7, %v7269_v46, %v7273_v43  ;;  %v8813_v58 = vor.u32 %v8812_v1, %v8809_v40  ;;  %v14170_v24 = vpop.f32.mrf.mxu1  ;;  %v8828_v4 = vrot.slane %v8826_v52, 5  ;;  %v14177_v1 = vpop.f32.mrf.mxu0 }
 0x27c   : > { %v11105_v15 = vcombine.low %v7264_v25, %v7274_v14  ;;  %v8823_v12 = vor.u32 %v8822_v3, %v8818_v57  ;;  %15394 = vst [vmem:[#allocation20_spill] sm:$0xff] %v14177_v1  ;;  %v9139_v1 = vld [vmem:[#allocation2 + $0xcc] sm:$0xe]  ;;  %v9297_v63 = vrot.slane %v9295_v44, 4 }
 0x27d   : > { %v8814_v43 = vrot.slane %v8813_v58, 4  ;;  %v14173_v0 = vpop.f32.mrf.mxu1  ;;  %v12166_v58 = vld [vmem:[#allocation2 + $0x30] sm:$0xff]  }
 0x27e   : > { %11897 = vmatmul.mubr.msk.bf16.gmra.mxu1 %vm2565_vm2, %v11105_v15  ;;  %v8824_v40 = vrot.slane %v8823_v12, 4  ;;  %v9399_v15 = vsel %vm2629_vm0, %v14009_v41, 0 }
 0x27f   : > { %11936 = vmatprep.mubr.msk.bf16.mxu1 %vm2565_vm2, %v12164_v48  ;;  %v8819_v46 = vsel %vm12740_vm7, %v8814_v43, %v8818_v57  ;;  %v14179_v7 = vpop.f32.mrf.mxu1  ;;  %v14187_v48 = vpop.f32.mrf.mxu0 }
 0x280   : > { %v8829_v25 = vsel %vm12740_vm7, %v8824_v40, %v8828_v4  ;;  %15395 = vst [vmem:[#allocation21_spill] sm:$0xff] %v14187_v48  ;;  %v12168_v40 = vld [vmem:[#allocation2 + $0x48] sm:$0xff]  }
 0x281   : > { %v11220_v52 = vcombine.low %v8819_v46, %v8829_v25  ;;  %v14196_v43 = vpop.f32.mrf.mxu0  ;;  %v12167_v46 = vld [vmem:[#allocation2 + $0x3c] sm:$0xff]  }
 0x282   : > { %15396 = vst [vmem:[#allocation22_spill] sm:$0xff] %v14196_v43 }
 0x283   : > { %v14183_v14 = vpop.f32.mrf.mxu1  ;;  %11999 = vmatmul.mubr.msk.bf16.gmra.mxu0 %vm2565_vm2, %v11220_v52  ;;  %v14200_v41 = vpop.f32.mrf.mxu0 }
 0x284   : > { %15397 = vst [vmem:[#allocation23_spill] sm:$0xff] %v14200_v41  ;;  %v12170_v41 = vld [vmem:[#allocation2 + $0x60] sm:$0xff]  }
 0x285   : > { %v14190_v57 = vpop.f32.mrf.mxu1 }
 0x286   : > { %11937 = vmatmul.mubr.msk.bf16.vlgmr.msra.gmra.mxu1 %vm2565_vm2, %v12165_v56  ;;  %v14208_v56 = vpop.f32.mrf.mxu0 }
 0x287   : > { %12003 = vmatpush3.bf16.msra.mxu1 %v9399_v15  ;;  %11940 = vmatprep.mubr.msk.bf16.mxu1 %vm2565_vm2, %v12166_v58  ;;  %v14194_v3 = vpop.f32.mrf.mxu1  ;;  %15398 = vst [vmem:[#allocation24_spill] sm:$0xff] %v14208_v56  ;;  %v9138_v58 = vld [vmem:[#allocation2 + $0xc0] sm:$0xe] }
 0x288   : > { %v14214_v43 = vpop.f32.mrf.mxu0  ;;  %v11251_v48 = vrot.slane %v9138_v58, 9 }
 0x289   : > { %v14198_v12 = vpop.f32.mrf.mxu1  ;;  %15399 = vst [vmem:[#allocation25_spill] sm:$0xff] %v14214_v43 }
 0x28a   : > { %v14223_v56 = vpop.f32.mrf.mxu0 }
 0x28b   : > { %v14202_v4 = vpop.f32.mrf.mxu1  ;;  %15400 = vst [vmem:[#allocation26_spill] sm:$0xff] %v14223_v56 }
 0x28c   : > { %v14233_v58 = vpop.f32.mrf.mxu0 }
 0x28d   : > { %v14205_v25 = vpop.f32.mrf.mxu1  ;;  %15402 = vst [vmem:[#allocation28_spill] sm:$0xff] %v14233_v58  ;;  %v12174_v58 = vld [vmem:[#allocation2 + $0x90] sm:$0xff]  }
 0x28e   : > { %11941 = vmatmul.mubr.msk.bf16.gmra.mxu1 %vm2565_vm2, %v12167_v46 }
 0x28f   : > { %11944 = vmatprep.mubr.msk.bf16.mxu1 %vm2565_vm2, %v12168_v40  ;;  %v14210_v15 = vpop.f32.mrf.mxu1  ;;  %v9288_v40 = vrot.slane %v14088_v51, 5 }
 0x291   : > { %v14212_v52 = vpop.f32.mrf.mxu1  ;;  %v9290_v23 = vrot.slane %v9288_v40, 4  ;;  %v14229_v43 = vsel %vm13309_vm12, %v11251_v48, %v9288_v40  ;;  %v14250_v40 = vpop.f32.mrf.mxu0 }
 0x292   : > { %15401 = vst [vmem:[#allocation27_spill] sm:$0xff] %v14229_v43  ;;  %15405 = vst [vmem:[#allocation31_spill] sm:$0xff] %v14250_v40  ;;  %v12177_v43 = vld [vmem:[#allocation2 + $0xb4] sm:$0xff]  }
 0x293   : > { %v14216_v35 = vpop.f32.mrf.mxu1  ;;  %v14240_v56 = vsel %vm13309_vm12, %v9290_v23, %v9291_v34 }
 0x294   : > { %15403 = vst [vmem:[#allocation29_spill] sm:$0xff] %v14240_v56 }
 0x295   : > { %v14219_v46 = vpop.f32.mrf.mxu1 }
 0x296   : > { %11945 = vmatmul.mubr.msk.bf16.gmra.mxu1 %vm2565_vm2, %v12169_v22  ;;  %v11252_v22 = vrot.slane %v9139_v1, 9  ;;  %v12172_v1 = vld [vmem:[#allocation2 + $0x78] sm:$0xff]  }
 0x297   : > { %11948 = vmatprep.mubr.msk.bf16.mxu1 %vm2565_vm2, %v12170_v41  ;;  %v14225_v45 = vpop.f32.mrf.mxu1  ;;  %v9298_v41 = vrot.slane %v14151_v62, 5 }
 0x298   : > { %v14248_v61 = vsel %vm13309_vm12, %v11252_v22, %v9295_v44  ;;  %v14264_v22 = vpop.f32.mrf.mxu0 }
 0x299   : > { %v14235_v51 = vpop.f32.mrf.mxu1  ;;  %15404 = vst [vmem:[#allocation30_spill] sm:$0xff] %v14248_v61  ;;  %v14257_v34 = vsel %vm13309_vm12, %v9297_v63, %v9298_v41  ;;  %15407 = vst [vmem:[#allocation33_spill] sm:$0xff] %v14264_v22 }
 0x29a   : > { %15406 = vst [vmem:[#allocation32_spill] sm:$0xff] %v14257_v34  ;;  %v14270_v49 = vpop.f32.mrf.mxu0  ;;  %v12256_v34 = vld [vmem:[#allocation2 + $0x1c] sm:$0xf] }
 0x29b   : > { %v14242_v19 = vpop.f32.mrf.mxu1  ;;  %15408 = vst [vmem:[#allocation34_spill] sm:$0xff] %v14270_v49  ;;  %v9190_v61 = vrot.slane %v12256_v34, 5 }
 0x29c   : > { %v14276_v63 = vpop.f32.mrf.mxu0 }
 0x29d   : > { %v14253_v62 = vpop.f32.mrf.mxu1  ;;  %15409 = vst [vmem:[#allocation35_spill] sm:$0xff] %v14276_v63 }
 0x29e   : > { %11949 = vmatmul.mubr.msk.bf16.gmra.mxu1 %vm2565_vm2, %v12171_v13  ;;  %v12173_v13 = vld [vmem:[#allocation2 + $0x84] sm:$0xff]   ;;  %v14282_v22 = vpop.f32.mrf.mxu0 }
 0x29f   : > { %11952 = vmatprep.mubr.msk.bf16.mxu1 %vm2565_vm2, %v12172_v1  ;;  %v14262_v48 = vpop.f32.mrf.mxu1  ;;  %15411 = vst [vmem:[#allocation37_spill] sm:$0xff] %v14282_v22 }
 0x2a1   : > { %v14266_v44 = vpop.f32.mrf.mxu1 }
 0x2a3   : > { %v14268_v40 = vpop.f32.mrf.mxu1 }
 0x2a5   : > { %v14273_v41 = vpop.f32.mrf.mxu1 }
 0x2a6   : > { %11953 = vmatmul.mubr.msk.bf16.gmra.mxu1 %vm2565_vm2, %v12173_v13  ;;  %v14290_v13 = vpop.f32.mrf.mxu0 }
 0x2a7   : > { %11956 = vmatprep.mubr.msk.bf16.mxu1 %vm2565_vm2, %v12174_v58  ;;  %v14278_v1 = vpop.f32.mrf.mxu1  ;;  %15414 = vst [vmem:[#allocation40_spill] sm:$0xff] %v14290_v13  ;;  %v9192_v13 = vrot.slane %v9190_v61, 4 }
 0x2a8   : > { %v14297_v22 = vpop.f32.mrf.mxu0 }
 0x2a9   : > { %v14280_v23 = vpop.f32.mrf.mxu1  ;;  %15417 = vst [vmem:[#allocation43_spill] sm:$0xff] %v14297_v22  ;;  %v12257_v22 = vld [vmem:[#allocation2 + $0x20] sm:$0x1] }
 0x2aa   : > { %15410 = vst [vmem:[#allocation36_spill] sm:$0xff] %v14280_v23 }
 0x2ac   : > { %v14284_v39 = vpop.f32.mrf.mxu1 }
 0x2ad   : > { %15412 = vst [vmem:[#allocation38_spill] sm:$0xff] %v14284_v39  ;;  %v12259_v39 = vld [vmem:[#allocation2 + $0x34] sm:$0xf] }
 0x2ae   : > { %11957 = vmatmul.mubr.msk.bf16.gmra.mxu1 %vm2565_vm2, %v12175_v36  ;;  %v14287_v49 = vpop.f32.mrf.mxu1 }
 0x2af   : > { %15413 = vst [vmem:[#allocation39_spill] sm:$0xff] %v14287_v49  ;;  %11960 = vmatprep.mubr.msk.bf16.mxu1 %vm2565_vm2, %v12176_v38  ;;  %v14302_v49 = vpop.f32.mrf.mxu0 }
 0x2b0   : > { %v14292_v58 = vpop.f32.mrf.mxu1  ;;  %15419 = vst [vmem:[#allocation45_spill] sm:$0xff] %v14302_v49 }
 0x2b1   : > { %15415 = vst [vmem:[#allocation41_spill] sm:$0xff] %v14292_v58 }
 0x2b2   : > { %v5983_v63 = vpop.f32.mrf.mxu1 }
 0x2b3   : > { %v14295_v23 = vadd.f32 %v5983_v63, %v14127_v37  ;;  %v9124_v37 = vld [vmem:[#allocation2 + $0x18] sm:$0xe] }
 0x2b4   : > { %v11237_v47 = vrot.slane %v9124_v37, 9 }
 0x2b5   : > { %15416 = vst [vmem:[#allocation42_spill] sm:$0xff] %v14295_v23  ;;  %v11792_v56 = vpop.f32.mrf.mxu1  ;;  %v9193_v23 = vrot.slane %v12257_v22, 5 }
 0x2b6   : > { %v14300_v36 = vadd.f32 %v11792_v56, %v14136_v20  ;;  %11961 = vmatmul.mubr.msk.bf16.gmra.mxu1 %vm2565_vm2, %v12177_v43  ;;  %v12258_v20 = vld [vmem:[#allocation2 + $0x28] sm:$0xf]  ;;  %v12179_v43 = vld [vmem:[#allocation2 + $0xcc] sm:$0xff]  }
 0x2b7   : > { %v5996_v38 = vpop.f32.mrf.mxu1  ;;  %11964 = vmatprep.mubr.msk.bf16.mxu1 %vm2565_vm2, %v12178_v16  ;;  %v9197_v56 = vrot.slane %v12258_v20, 5  ;;  %v9194_v16 = vsel %vm13309_vm12, %v9192_v13, %v9193_v23  ;;  %v9125_v23 = vld [vmem:[#allocation2 + $0x24] sm:$0xe] }
 0x2b8   : > { %15418 = vst [vmem:[#allocation44_spill] sm:$0xff] %v14300_v36  ;;  %v14307_v34 = vadd.f32 %v5996_v38, %v14138_v29  ;;  %v14312_v36 = vpop.f32.mrf.mxu0  ;;  %v9204_v29 = vrot.slane %v12259_v39, 5 }
 0x2b9   : > { %v11793_v63 = vpop.f32.mrf.mxu1  ;;  %15421 = vst [vmem:[#allocation47_spill] sm:$0xff] %v14312_v36  ;;  %v9199_v20 = vrot.slane %v9197_v56, 4 }
 0x2ba   : > { %15420 = vst [vmem:[#allocation46_spill] sm:$0xff] %v14307_v34  ;;  %v14310_v58 = vadd.f32 %v11793_v63, %v14145_v28  ;;  %v9191_v28 = vsel %vm13309_vm12, %v11237_v47, %v9190_v61  ;;  %v14324_v36 = vpop.f32.mrf.mxu0  ;;  %v9206_v13 = vrot.slane %v9204_v29, 4  ;;  %v9126_v47 = vld [vmem:[#allocation2 + $0x30] sm:$0xe] }
 0x2bb   : > { %v5999_v49 = vpop.f32.mrf.mxu1  ;;  %v11254_v63 = vcombine.low %v9191_v28, %v9194_v16  ;;  %15424 = vst [vmem:[#allocation50_spill] sm:$0xff] %v14324_v36  ;;  %v11238_v28 = vrot.slane %v9125_v23, 9  ;;  %v12262_v36 = vld [vmem:[#allocation2 + $0x40] sm:$0xf] }
 0x2bc   : > { %v14317_v38 = vadd.f32 %v5999_v49, %v14153_v26  ;;  %v12260_v49 = vld [vmem:[#allocation2 + $0x2c] sm:$0x1] }
 0x2bd   : > { %v11796_v34 = vpop.f32.mrf.mxu1  ;;  %v9200_v26 = vrot.slane %v12260_v49, 5  ;;  %v12263_v49 = vld [vmem:[#allocation2 + $0x4c] sm:$0xf] }
 0x2be   : > { %15422 = vst [vmem:[#allocation48_spill] sm:$0xff] %v14317_v38  ;;  %v14322_v22 = vadd.f32 %v11796_v34, %v14165_v54  ;;  %11965 = vmatmul.mubr.msk.bf16.gmra.mxu1 %vm2565_vm2, %v12179_v43  ;;  %v12261_v54 = vld [vmem:[#allocation2 + $0x38] sm:$0x1]  ;;  %v9211_v38 = vrot.slane %v12262_v36, 5 }
 0x2bf   : > { %v6012_v37 = vpop.f32.mrf.mxu1  ;;  %12004 = vmatprep.mubr.msk.bf16.mxu1 %vm2565_vm2, %v11254_v63  ;;  %v9207_v34 = vrot.slane %v12261_v54, 5  ;;  %v9201_v43 = vsel %vm13309_vm12, %v9199_v20, %v9200_v26  ;;  %v5909_v54 = vadd.f32 %v14183_v14, %v14011_v55  ;;  %v9198_v20 = vsel %vm13309_vm12, %v11238_v28, %v9197_v56  ;;  %v12264_v28 = vld [vmem:[#allocation2 + $0x44] sm:$0x1] }
 0x2c0   : > { %15423 = vst [vmem:[#allocation49_spill] sm:$0xff] %v14322_v22  ;;  %v14329_v39 = vadd.f32 %v6012_v37, %v14170_v24  ;;  %v14336_v22 = vpop.f32.mrf.mxu0  ;;  %v11239_v24 = vrot.slane %v9126_v47, 9  ;;  %v11255_v36 = vcombine.low %v9198_v20, %v9201_v43  ;;  %v5901_v47 = vadd.f32 %v14190_v57, %v14024_v27  ;;  %v9128_v57 = vld [vmem:[#allocation2 + $0x48] sm:$0xe] }
 0x2c1   : > { %v11797_v61 = vpop.f32.mrf.mxu1  ;;  %v9208_v37 = vsel %vm13309_vm12, %v9206_v13, %v9207_v34  ;;  %v9127_v34 = vld [vmem:[#allocation2 + $0x3c] sm:$0xe]  ;;  %v5912_v56 = vadd.f32 %v14194_v3, %v14032_v8  ;;  %v9214_v27 = vrot.slane %v12264_v28, 5  ;;  %v12266_v8 = vld [vmem:[#allocation2 + $0x58] sm:$0xf]  ;;  %v5925_v28 = vadd.f32 %v14202_v4, %v13960_v53 }
 0x2c2   : > { %15425 = vst [vmem:[#allocation51_spill] sm:$0xff] %v14329_v39  ;;  %v14332_v16 = vadd.f32 %v11797_v61, %v14173_v0  ;;  %v9218_v39 = vrot.slane %v12263_v49, 5  ;;  %v9205_v26 = vsel %vm13309_vm12, %v11239_v24, %v9204_v29  ;;  %v9213_v49 = vrot.slane %v9211_v38, 4  ;;  %v14353_v55 = vpop.f32.mrf.mxu0  ;;  %v12265_v24 = vld [vmem:[#allocation2 + $0x50] sm:$0x1] }
 0x2c3   : > { %v6015_v63 = vpop.f32.mrf.mxu1  ;;  %v11256_v61 = vcombine.low %v9205_v26, %v9208_v37  ;;  %v9221_v37 = vrot.slane %v12265_v24, 5  ;;  %v9225_v3 = vrot.slane %v12266_v8, 5  ;;  %v9129_v24 = vld [vmem:[#allocation2 + $0x54] sm:$0xe] }
 0x2c4   : > { %v14343_v0 = vadd.f32 %v6015_v63, %v14179_v7  ;;  %v9220_v14 = vrot.slane %v9218_v39, 4  ;;  %v11240_v63 = vrot.slane %v9127_v34, 9  ;;  %v12267_v34 = vld [vmem:[#allocation2 + $0x64] sm:$0xf] }
 0x2c5   : > { %v11802_v23 = vpop.f32.mrf.mxu1 }
 0x2c6   : > { %v14351_v13 = vadd.f32 %v11802_v23, %v5909_v54  ;;  %12005 = vmatmul.mubr.msk.bf16.vlgmr.msra.gmra.mxu1 %vm2565_vm2, %v11255_v36  ;;  %v5904_v54 = vadd.f32 %v14198_v12, %v14042_v6  ;;  %v9215_v23 = vsel %vm13309_vm12, %v9213_v49, %v9214_v27  ;;  %v14367_v36 = vpop.f32.mrf.mxu0  ;;  %v9212_v12 = vsel %vm13309_vm12, %v11240_v63, %v9211_v38  ;;  %v12268_v63 = vld [vmem:[#allocation2 + $0x5c] sm:$0x1] }
 0x2c7   : > { %v6325_v7 = vpop.f32.mrf.mxu1  ;;  %12008 = vmatprep.mubr.msk.bf16.mxu1 %vm2565_vm2, %v11256_v61  ;;  %v9222_v61 = vsel %vm13309_vm12, %v9220_v14, %v9221_v37  ;;  %v9227_v37 = vrot.slane %v9225_v3, 4  ;;  %v5928_v38 = vadd.f32 %v14210_v15, %v13982_v11  ;;  %v12270_v11 = vld [vmem:[#allocation2 + $0x70] sm:$0xf] }
 0x2c8   : > { %v14359_v29 = vadd.f32 %v6325_v7, %v5901_v47  ;;  %v11241_v47 = vrot.slane %v9128_v57, 9  ;;  %v9232_v7 = vrot.slane %v12267_v34, 5  ;;  %v5917_v57 = vadd.f32 %v14205_v25, %v13968_v18  ;;  %v14383_v8 = vpop.f32.mrf.mxu0  ;;  %v9130_v25 = vld [vmem:[#allocation2 + $0x60] sm:$0xe] }
 0x2c9   : > { %v11803_v43 = vpop.f32.mrf.mxu1  ;;  %15426 = vst [vmem:[#allocation52_spill] sm:$0xff] %v14383_v8  ;;  %v9228_v18 = vrot.slane %v12268_v63, 5  ;;  %v9239_v15 = vrot.slane %v12270_v11, 5  ;;  %v9131_v63 = vld [vmem:[#allocation2 + $0x6c] sm:$0xe] }
 0x2ca   : > { %v14363_v20 = vadd.f32 %v11803_v43, %v5912_v56  ;;  %v11257_v56 = vcombine.low %v9212_v12, %v9215_v23  ;;  %v9219_v27 = vsel %vm13309_vm12, %v11241_v47, %v9218_v39  ;;  %v9234_v4 = vrot.slane %v9232_v7, 4  ;;  %v14397_v12 = vpop.f32.mrf.mxu0 }
 0x2cb   : > { %v6328_v26 = vpop.f32.mrf.mxu1  ;;  %v11258_v14 = vcombine.low %v9219_v27, %v9222_v61  ;;  %v11242_v23 = vrot.slane %v9129_v24, 9  ;;  %v5920_v61 = vadd.f32 %v14212_v52, %v13988_v59  ;;  %15427 = vst [vmem:[#allocation53_spill] sm:$0xff] %v14397_v12  ;;  %v5941_v24 = vadd.f32 %v14216_v35, %v13990_v31  ;;  %v10117_v31 = vld [vmem:[%s15338_s7] sm:$0x3] }
 0x2cc   : > { %v14373_v6 = vadd.f32 %v6328_v26, %v5904_v54  ;;  %v12269_v26 = vld [vmem:[#allocation2 + $0x68] sm:$0x1]  ;;  %v9680_v35 = vld [vmem:[%s15336_s5] sm:$0x3]  ;;  %12116 = vmatprep.subr.msk.bf16.mxu0 %vm2629_vm0, %v10117_v31 }
 0x2cd   : > { %v11806_v49 = vpop.f32.mrf.mxu1  ;;  %v9235_v47 = vrot.slane %v12269_v26, 5  ;;  %v9226_v52 = vsel %vm13309_vm12, %v11242_v23, %v9225_v3  ;;  %v14419_v3 = vpop.f32.mrf.mxu0  ;;  %v12272_v23 = vld [vmem:[#allocation2 + $0x74] sm:$0x1]  ;;  %12117 = vmatprep.subr.msk.bf16.mxu1 %vm2629_vm0, %v9680_v35  ;;  %v10427_v11 = vsel %vm2629_vm0, %v9680_v35, 0  ;;  %v5957_v35 = vadd.f32 %v14242_v19, %v14030_v17 }
 0x2ce   : > { %v14381_v43 = vadd.f32 %v11806_v49, %v5925_v28  ;;  %12009 = vmatmul.mubr.msk.bf16.gmra.mxu1 %vm2565_vm2, %v11257_v56  ;;  %v9229_v28 = vsel %vm13309_vm12, %v9227_v37, %v9228_v18  ;;  %v11243_v56 = vrot.slane %v9130_v25, 9  ;;  %v5933_v18 = vadd.f32 %v14219_v46, %v14000_v10 }
 0x2cf   : > { %v6341_v53 = vpop.f32.mrf.mxu1  ;;  %12012 = vmatprep.mubr.msk.bf16.mxu1 %vm2565_vm2, %v11258_v14  ;;  %v9236_v27 = vsel %vm13309_vm12, %v9234_v4, %v9235_v47  ;;  %v9242_v26 = vrot.slane %v12272_v23, 5  ;;  %v5944_v46 = vadd.f32 %v14225_v45, %v14013_v30  ;;  %12071 = vmatpush3.bf16.msra.mxu1 %v10427_v11  ;;  %v5936_v30 = vadd.f32 %v14235_v51, %v14026_v21 }
 0x2d0   : > { %v14389_v39 = vadd.f32 %v6341_v53, %v5917_v57  ;;  %v12271_v57 = vld [vmem:[#allocation2 + $0x7c] sm:$0xf]  ;;  %v11259_v53 = vcombine.low %v9226_v52, %v9229_v28  ;;  %v10215_v28 = vsel %vm2629_vm0, %v10117_v31, 0  ;;  %v12274_v52 = vld [vmem:[#allocation2 + $0x88] sm:$0xf] }
 0x2d1   : > { %v11807_v54 = vpop.f32.mrf.mxu1  ;;  %v9246_v14 = vrot.slane %v12271_v57, 5  ;;  %12037 = vmatpush3.bf16.msra.mxu0 %v10215_v28 }
 0x2d2   : > { %v14393_v34 = vadd.f32 %v11807_v54, %v5928_v38  ;;  %v9233_v38 = vsel %vm13309_vm12, %v11243_v56, %v9232_v7  ;;  %v9241_v54 = vrot.slane %v9239_v15, 4  ;;  %v11244_v56 = vrot.slane %v9131_v63, 9 }
 0x2d3   : > { %v6344_v49 = vpop.f32.mrf.mxu1  ;;  %v11260_v25 = vcombine.low %v9233_v38, %v9236_v27  ;;  %v9248_v10 = vrot.slane %v9246_v14, 4  ;;  %v12273_v27 = vld [vmem:[#allocation2 + $0x80] sm:$0x1] }
 0x2d4   : > { %v14403_v59 = vadd.f32 %v6344_v49, %v5920_v61  ;;  %v9132_v61 = vld [vmem:[#allocation2 + $0x78] sm:$0xe]  ;;  %v9249_v57 = vrot.slane %v12273_v27, 5  ;;  %v9240_v51 = vsel %vm13309_vm12, %v11244_v56, %v9239_v15  ;;  %v5960_v15 = vadd.f32 %v14262_v48, %v14048_v9  ;;  %v12278_v9 = vld [vmem:[#allocation2 + $0xa0] sm:$0xf] }
 0x2d5   : > { %v11810_v37 = vpop.f32.mrf.mxu1  ;;  %v9267_v48 = vrot.slane %v12278_v9, 5 }
 0x2d6   : > { %15428 = vst [vmem:[#allocation54_spill] sm:$0xff] %v14403_v59  ;;  %v14411_v4 = vadd.f32 %v11810_v37, %v5941_v24  ;;  %12013 = vmatmul.mubr.msk.bf16.gmra.mxu1 %vm2565_vm2, %v11259_v53  ;;  %v9243_v24 = vsel %vm13309_vm12, %v9241_v54, %v9242_v26  ;;  %v9253_v37 = vrot.slane %v12274_v52, 5  ;;  %v14437_v53 = vpop.f32.mrf.mxu0  ;;  %v9250_v63 = vsel %vm13309_vm12, %v9248_v10, %v9249_v57  ;;  %v12277_v57 = vld [vmem:[#allocation2 + $0x98] sm:$0x1] }
 0x2d7   : > { %v6357_v7 = vpop.f32.mrf.mxu1  ;;  %12016 = vmatprep.mubr.msk.bf16.mxu1 %vm2565_vm2, %v11260_v25  ;;  %v12275_v25 = vld [vmem:[#allocation2 + $0x94] sm:$0xf]  ;;  %v5949_v26 = vadd.f32 %v14253_v62, %v14040_v32  ;;  %v9134_v62 = vld [vmem:[#allocation2 + $0x90] sm:$0xe] }
 0x2d8   : > { %v14426_v47 = vadd.f32 %v6357_v7, %v5933_v18  ;;  %v11245_v18 = vrot.slane %v9132_v61, 9  ;;  %v9260_v31 = vrot.slane %v12275_v25, 5  ;;  %v11261_v7 = vcombine.low %v9240_v51, %v9243_v24  ;;  %v9133_v61 = vld [vmem:[#allocation2 + $0x84] sm:$0xe]  ;;  %v14453_v11 = vpop.f32.mrf.mxu0  ;;  %v12279_v51 = vld [vmem:[#allocation2 + $0xac] sm:$0xf] }
 0x2d9   : > { %v11811_v49 = vpop.f32.mrf.mxu1  ;;  %v9255_v28 = vrot.slane %v9253_v37, 4  ;;  %15430 = vst [vmem:[#allocation56_spill] sm:$0xff] %v14453_v11  ;;  %v11246_v27 = vrot.slane %v9133_v61, 9  ;;  %v5952_v24 = vadd.f32 %v14266_v44, %v14056_v2  ;;  %v11247_v25 = vrot.slane %v9134_v62, 9 }
 0x2da   : > { %v14433_v45 = vadd.f32 %v11811_v49, %v5944_v46  ;;  %v9247_v23 = vsel %vm13309_vm12, %v11245_v18, %v9246_v14  ;;  %v9262_v19 = vrot.slane %v9260_v31, 4  ;;  %v12276_v49 = vld [vmem:[#allocation2 + $0x8c] sm:$0x1]  ;;  %v14467_v18 = vpop.f32.mrf.mxu0  ;;  %v5965_v61 = vadd.f32 %v14273_v41, %v14070_v50  ;;  %v9136_v41 = vld [vmem:[#allocation2 + $0xa8] sm:$0xe] }
 0x2db   : > { %v6360_v38 = vpop.f32.mrf.mxu1  ;;  %v11262_v10 = vcombine.low %v9247_v23, %v9250_v63  ;;  %v9256_v32 = vrot.slane %v12276_v49, 5  ;;  %15431 = vst [vmem:[#allocation57_spill] sm:$0xff] %v14467_v18  ;;  %v9254_v44 = vsel %vm13309_vm12, %v11246_v27, %v9253_v37  ;;  %v5976_v37 = vadd.f32 %v14278_v1, %v14080_v33 }
 0x2dc   : > { %v14443_v21 = vadd.f32 %v6360_v38, %v5936_v30  ;;  %v9263_v30 = vrot.slane %v12277_v57, 5  ;;  %v11249_v1 = vrot.slane %v9136_v41, 9 }
 0x2dd   : > { %v11814_v54 = vpop.f32.mrf.mxu1  ;;  %v9257_v38 = vsel %vm13309_vm12, %v9255_v28, %v9256_v32  ;;  %v12280_v32 = vld [vmem:[#allocation2 + $0xa4] sm:$0x1] }
 0x2de   : > { %15429 = vst [vmem:[#allocation55_spill] sm:$0xff] %v14443_v21  ;;  %v14451_v46 = vadd.f32 %v11814_v54, %v5957_v35  ;;  %12017 = vmatmul.mubr.msk.bf16.gmra.mxu1 %vm2565_vm2, %v11261_v7  ;;  %v9264_v35 = vsel %vm13309_vm12, %v9262_v19, %v9263_v30  ;;  %v9274_v54 = vrot.slane %v12279_v51, 5  ;;  %v5973_v7 = vadd.f32 %v14268_v40, %v14064_v60  ;;  %v9135_v40 = vld [vmem:[#allocation2 + $0x9c] sm:$0xe] }
 0x2df   : > { %v6373_v17 = vpop.f32.mrf.mxu1  ;;  %12020 = vmatprep.mubr.msk.bf16.mxu1 %vm2565_vm2, %v11262_v10  ;;  %v9261_v10 = vsel %vm13309_vm12, %v11247_v25, %v9260_v31  ;;  %v9269_v19 = vrot.slane %v9267_v48, 4  ;;  %v9270_v50 = vrot.slane %v12280_v32, 5  ;;  %v11248_v30 = vrot.slane %v9135_v40, 9  ;;  %v15437_v32 = vld [vmem:[#allocation14_spill] sm:$0xff] }
 0x2e0   : > { %v14459_v14 = vadd.f32 %v6373_v17, %v5949_v26  ;;  %v11263_v26 = vcombine.low %v9254_v44, %v9257_v38  ;;  %v11264_v17 = vcombine.low %v9261_v10, %v9264_v35  ;;  %v9276_v49 = vrot.slane %v9274_v54, 4  ;;  %v12282_v38 = vld [vmem:[#allocation2 + $0xb8] sm:$0xf]  ;;  %v15433_v35 = vld [vmem:[#allocation38_spill] sm:$0xff]  ;;  %v15434_v10 = vld [vmem:[#allocation12_spill] sm:$0xff] }
 0x2e1   : > { %v11815_v56 = vpop.f32.mrf.mxu1  ;;  %v9281_v9 = vrot.slane %v12282_v38, 5  ;;  %v5989_v51 = vadd.f32 %v15433_v35, %v14100_v42 }
 0x2e2   : > { %v14463_v52 = vadd.f32 %v11815_v56, %v5960_v15  ;;  %v14483_v15 = vpop.f32.mrf.mxu0  ;;  %v12281_v56 = vld [vmem:[#allocation2 + $0xb0] sm:$0x1] }
 0x2e3   : > { %v6376_v63 = vpop.f32.mrf.mxu1  ;;  %v9277_v27 = vrot.slane %v12281_v56, 5  ;;  %v9283_v40 = vrot.slane %v9281_v9, 4 }
 0x2e4   : > { %v14473_v2 = vadd.f32 %v6376_v63, %v5952_v24  ;;  %v9271_v24 = vsel %vm13309_vm12, %v9269_v19, %v9270_v50  ;;  %v14495_v63 = vpop.f32.mrf.mxu0 }
 0x2e5   : > { %v11818_v23 = vpop.f32.mrf.mxu1  ;;  %v9278_v25 = vsel %vm13309_vm12, %v9276_v49, %v9277_v27  ;;  %v9137_v49 = vld [vmem:[#allocation2 + $0xb4] sm:$0xe] }
 0x2e6   : > { %15432 = vst [vmem:[#allocation58_spill] sm:$0xff] %v14473_v2  ;;  %v14481_v28 = vadd.f32 %v11818_v23, %v5973_v7  ;;  %12021 = vmatmul.mubr.msk.bf16.gmra.mxu1 %vm2565_vm2, %v11263_v26  ;;  %v9268_v7 = vsel %vm13309_vm12, %v11248_v30, %v9267_v48  ;;  %v9275_v26 = vsel %vm13309_vm12, %v11249_v1, %v9274_v54  ;;  %v15438_v48 = vld [vmem:[#allocation41_spill] sm:$0xff]  ;;  %v12283_v54 = vld [vmem:[#allocation2 + $0xbc] sm:$0x1]  ;;  %v11250_v30 = vrot.slane %v9137_v49, 9 }
 0x2e7   : > { %v6389_v60 = vpop.f32.mrf.mxu1  ;;  %12024 = vmatprep.mubr.msk.bf16.mxu1 %vm2565_vm2, %v11264_v17  ;;  %v11265_v23 = vcombine.low %v9268_v7, %v9271_v24  ;;  %v5992_v50 = vadd.f32 %v15438_v48, %v15437_v32  ;;  %v15440_v7 = vld [vmem:[#allocation44_spill] sm:$0xff]  ;;  %v15445_v48 = vld [vmem:[#allocation49_spill] sm:$0xff] }
 0x2e8   : > { %v14489_v31 = vadd.f32 %v6389_v60, %v5965_v61  ;;  %v15435_v61 = vld [vmem:[#allocation39_spill] sm:$0xff]  ;;  %v11266_v60 = vcombine.low %v9275_v26, %v9278_v25  ;;  %v9282_v25 = vsel %vm13309_vm12, %v11250_v30, %v9281_v9 }
 0x2e9   : > { %v11819_v62 = vpop.f32.mrf.mxu1  ;;  %v5981_v17 = vadd.f32 %v15435_v61, %v15434_v10  ;;  %v15441_v10 = vld [vmem:[#allocation27_spill] sm:$0xff]  ;;  %v15442_v61 = vld [vmem:[#allocation29_spill] sm:$0xff] }
 0x2ea   : > { %v14491_v57 = vadd.f32 %v11819_v62, %v5976_v37  ;;  %v14511_v37 = vpop.f32.mrf.mxu0  ;;  %v9284_v62 = vrot.slane %v12283_v54, 5 }
 0x2eb   : > { %v14497_v33 = vpop.f32.mrf.mxu1  ;;  %15436 = vst [vmem:[#allocation38_spill] sm:$0xff] %v14511_v37  ;;  %v11291_v37 = vld [vmem:[%s12391_s14 + $0x1c] sm:$0xf] }
 0x2ec   : > { %v9285_v24 = vsel %vm13309_vm12, %v9283_v40, %v9284_v62  ;;  %v14523_v38 = vpop.f32.mrf.mxu0  ;;  %v15447_v62 = vld [vmem:[#allocation30_spill] sm:$0xff]  ;;  %v9767_v12 = vshll.u32 %v11291_v37, 16 }
 0x2ed   : > { %v11822_v44 = vpop.f32.mrf.mxu1  ;;  %15439 = vst [vmem:[#allocation12_spill] sm:$0xff] %v14523_v38 }
 0x2ee   : > { %v14509_v19 = vadd.f32 %v11822_v44, %v5989_v51  ;;  %12025 = vmatmul.mubr.msk.bf16.gmra.mxu1 %vm2565_vm2, %v11265_v23  ;;  %v11267_v51 = vcombine.low %v9282_v25, %v9285_v24  ;;  %v14532_v23 = vpop.f32.mrf.mxu0  ;;  %v15450_v25 = vld [vmem:[#allocation51_spill] sm:$0xff] }
 0x2ef   : > { %v6405_v42 = vpop.f32.mrf.mxu1  ;;  %12028 = vmatprep.mubr.msk.bf16.mxu1 %vm2565_vm2, %v11266_v60  ;;  %v15444_v60 = vld [vmem:[#allocation46_spill] sm:$0xff] }
 0x2f0   : > { %v14517_v41 = vadd.f32 %v6405_v42, %v5981_v17  ;;  %v15443_v17 = vcombine.low %v15441_v10, %v15442_v61  ;;  %v14545_v42 = vpop.f32.mrf.mxu0  ;;  %v15452_v10 = vld [vmem:[#allocation4_spill] sm:$0xff] }
 0x2f1   : > { %v11823_v56 = vpop.f32.mrf.mxu1  ;;  %v6813_v61 = vadd.f32 %v15452_v10, %v14351_v13 }
 0x2f2   : > { %v14519_v27 = vadd.f32 %v11823_v56, %v5992_v50  ;;  %v14552_v54 = vpop.f32.mrf.mxu0  ;;  %v15448_v56 = vld [vmem:[#allocation32_spill] sm:$0xff] }
 0x2f3   : > { %v14525_v1 = vpop.f32.mrf.mxu1  ;;  %15446 = vst [vmem:[#allocation39_spill] sm:$0xff] %v14552_v54  ;;  %v15449_v30 = vcombine.low %v15447_v62, %v15448_v56 }
 0x2f5   : > { %v11826_v35 = vpop.f32.mrf.mxu1 }
 0x2f6   : > { %v14530_v44 = vadd.f32 %v11826_v35, %v15440_v7  ;;  %12029 = vmatmul.mubr.msk.bf16.gmra.mxu1 %vm2565_vm2, %v11267_v51  ;;  %v14564_v7 = vpop.f32.mrf.mxu0 }
 0x2f7   : > { %v6421_v26 = vpop.f32.mrf.mxu1  ;;  %12032 = vmatprep.mubr.msk.bf16.mxu1 %vm2565_vm2, %v15443_v17  ;;  %15451 = vst [vmem:[#allocation14_spill] sm:$0xff] %v14564_v7 }
 0x2f8   : > { %v14540_v40 = vadd.f32 %v6421_v26, %v15444_v60 }
 0x2f9   : > { %v11827_v5 = vpop.f32.mrf.mxu1 }
 0x2fa   : > { %v14543_v9 = vadd.f32 %v11827_v5, %v14310_v58  ;;  %v15453_v5 = vld [vmem:[#allocation5_spill] sm:$0xff] }
 0x2fb   : > { %v14547_v49 = vpop.f32.mrf.mxu1 }
 0x2fd   : > { %v11830_v32 = vpop.f32.mrf.mxu1 }
 0x2fe   : > { %v14550_v50 = vadd.f32 %v11830_v32, %v15445_v48  ;;  %12033 = vmatmul.mubr.msk.bf16.gmra.mxu1 %vm2565_vm2, %v15449_v30  ;;  %v6811_v32 = vadd.f32 %v15453_v5, %v14359_v29  ;;  %v14574_v48 = vpop.f32.mrf.mxu0 }
 0x2ff   : > { %v6437_v24 = vpop.f32.mrf.mxu1 }
 0x300   : > { %v14559_v35 = vadd.f32 %v6437_v24, %v15450_v25  ;;  %v14583_v13 = vpop.f32.mrf.mxu0 }
 0x301   : > { %v11831_v58 = vpop.f32.mrf.mxu1 }
 0x302   : > { %v14562_v51 = vadd.f32 %v11831_v58, %v14332_v16  ;;  %v15454_v16 = vld [vmem:[#allocation6_spill] sm:$0xff] }
 0x303   : > { %v14566_v26 = vpop.f32.mrf.mxu1  ;;  %v6814_v30 = vadd.f32 %v15454_v16, %v14363_v20  ;;  %v14593_v20 = vpop.f32.mrf.mxu0 }
 0x304   : > { %15458 = vst [vmem:[#allocation44_spill] sm:$0xff] %v14593_v20  ;;  %v15465_v20 = vld [vmem:[#allocation15_spill] sm:$0xff] }
 0x305   : > { %v11870_v17 = vpop.f32.mrf.mxu1 }
 0x306   : > { %v14570_v60 = vadd.f32 %v11870_v17, %v6813_v61  ;;  %v15456_v61 = vld [vmem:[#allocation8_spill] sm:$0xff] }
 0x307   : > { %v7410_v62 = vpop.f32.mrf.mxu1  ;;  %v6817_v29 = vadd.f32 %v15456_v61, %v14381_v43  ;;  %v15461_v61 = vld [vmem:[#allocation9_spill] sm:$0xff] }
 0x308   : > { %v7537_v56 = vadd.f32 %v7410_v62, %v6811_v32  ;;  %v15457_v32 = vld [vmem:[#allocation10_spill] sm:$0xff] }
 0x309   : > { %v11871_v24 = vpop.f32.mrf.mxu1  ;;  %v6815_v62 = vadd.f32 %v15457_v32, %v14389_v39  ;;  %v14604_v39 = vpop.f32.mrf.mxu0 }
 0x30a   : > { %v14578_v25 = vadd.f32 %v11871_v24, %v6814_v30  ;;  %v14581_v58 = vadd.f32 %v14367_v36, %v7537_v56  ;;  %v15459_v56 = vld [vmem:[#allocation11_spill] sm:$0xff]  ;;  %15463 = vst [vmem:[#allocation29_spill] sm:$0xff] %v14604_v39  ;;  %v11289_v39 = vld [vmem:[%s12391_s14 + $0x14] sm:$0x1] }
 0x30b   : > { %v14585_v10 = vpop.f32.mrf.mxu1  ;;  %v6818_v30 = vadd.f32 %v15459_v56, %v14393_v34  ;;  %v15467_v34 = vld [vmem:[#allocation17_spill] sm:$0xff]  ;;  %v14639_v21 = vpop.f32.mrf.mxu0 }
 0x30c   : > { %15455 = vst [vmem:[#allocation41_spill] sm:$0xff] %v14578_v25  ;;  %v6822_v56 = vadd.f32 %v15467_v34, %v14433_v45 }
 0x30d   : > { %v11874_v17 = vpop.f32.mrf.mxu1 }
 0x30e   : > { %v14589_v5 = vadd.f32 %v11874_v17, %v6817_v29  ;;  %v15462_v29 = vld [vmem:[#allocation36_spill] sm:$0xff] }
 0x30f   : > { %v7426_v16 = vpop.f32.mrf.mxu1  ;;  %v5968_v17 = vadd.f32 %v15462_v29, %v15461_v61  ;;  %v15470_v61 = vld [vmem:[#allocation21_spill] sm:$0xff] }
 0x310   : > { %v7541_v36 = vadd.f32 %v7426_v16, %v6815_v62  ;;  %v6821_v62 = vadd.f32 %v15465_v20, %v14411_v4  ;;  %v15466_v16 = vld [vmem:[#allocation16_spill] sm:$0xff]  ;;  %v14622_v29 = vadd.f32 %v15470_v61, %v14463_v52  ;;  %v11287_v4 = vld [vmem:[%s12391_s14 + $0xc] sm:$0xf]  ;;  %v11288_v20 = vld [vmem:[%s12391_s14 + $0x10] sm:$0xf]  ;;  %v9753_v52 = vshll.u32 %v11289_v39, 16 }
 0x311   : > { %v11875_v24 = vpop.f32.mrf.mxu1  ;;  %v6819_v54 = vadd.f32 %v15466_v16, %v14426_v47  ;;  %v9734_v16 = vshrl.u32 %v11287_v4, 16  ;;  %v9737_v2 = vshll.u32 %v11287_v4, 16  ;;  %v9743_v45 = vshll.u32 %v11288_v20, 16  ;;  %v11290_v61 = vld [vmem:[%s12391_s14 + $0x18] sm:$0xf] }
 0x312   : > { %v14597_v7 = vadd.f32 %v11875_v24, %v6818_v30  ;;  %v14600_v43 = vadd.f32 %v14437_v53, %v7541_v36  ;;  %v15468_v30 = vld [vmem:[#allocation19_spill] sm:$0xff]  ;;  %v15469_v36 = vld [vmem:[#allocation20_spill] sm:$0xff]  ;;  %v9747_v34 = vshrl.u32 %v11288_v20, 16  ;;  %v9761_v39 = vshll.u32 %v11290_v61, 16 }
 0x313   : > { %v14606_v32 = vpop.f32.mrf.mxu1  ;;  %v6825_v53 = vadd.f32 %v15468_v30, %v14451_v46  ;;  %v14618_v24 = vadd.f32 %v15469_v36, %v14459_v14  ;;  %v15471_v46 = vld [vmem:[#allocation23_spill] sm:$0xff]  ;;  %v15472_v14 = vld [vmem:[#allocation24_spill] sm:$0xff]  ;;  %v9736_v4 = vrot.slane %v9734_v16, 4  ;;  %v9739_v11 = vrot.slane %v9737_v2, 5 }
 0x314   : > { %15460 = vst [vmem:[#allocation27_spill] sm:$0xff] %v14597_v7  ;;  %15464 = vst [vmem:[#allocation46_spill] sm:$0xff] %v14606_v32  ;;  %v14631_v30 = vadd.f32 %v15471_v46, %v14481_v28  ;;  %v14635_v36 = vadd.f32 %v15472_v14, %v14489_v31  ;;  %v9745_v20 = vrot.slane %v9743_v45, 5  ;;  %v9755_v28 = vrot.slane %v9753_v52, 5  ;;  %v11292_v14 = vld [vmem:[%s12391_s14 + $0x20] sm:$0x1]  ;;  %v14648_v45 = vpop.f32.mrf.mxu0 }
 0x315   : > { %v11878_v47 = vpop.f32.mrf.mxu1  ;;  %v9758_v46 = vshrl.u32 %v11290_v61, 16  ;;  %v9740_v59 = vor.u32 %v9739_v11, %v9736_v4  ;;  %v9771_v16 = vshrl.u32 %v11291_v37, 16  ;;  %v9763_v11 = vrot.slane %v9761_v39, 5  ;;  %v11293_v37 = vld [vmem:[%s12391_s14 + $0x24] sm:$0xf] }
 0x316   : > { %v14627_v38 = vadd.f32 %v11878_v47, %v6821_v62  ;;  %v9749_v62 = vrot.slane %v9747_v34, 4  ;;  %v6469_v47 = vadd.f32 %v14497_v33, %v5968_v17  ;;  %v9769_v17 = vrot.slane %v9767_v12, 5  ;;  %v15475_v34 = vld [vmem:[#allocation25_spill] sm:$0xff] }
 0x317   : > { %v7442_v18 = vpop.f32.mrf.mxu1  ;;  %v9760_v2 = vrot.slane %v9758_v46, 4  ;;  %v9741_v33 = vrot.slane %v9740_v59, 4  ;;  %v14654_v52 = vadd.f32 %v15475_v34, %v14491_v57  ;;  %v11294_v12 = vld [vmem:[%s12391_s14 + $0x28] sm:$0xf]  ;;  %v15478_v57 = vld [vmem:[#allocation28_spill] sm:$0xff] }
 0x318   : > { %v7545_v7 = vadd.f32 %v7442_v18, %v6819_v54  ;;  %v9750_v31 = vor.u32 %v9749_v62, %v9745_v20  ;;  %v14669_v34 = vadd.f32 %v15478_v57, %v14509_v19 }
 0x319   : > { %v11879_v32 = vpop.f32.mrf.mxu1  ;;  %v9746_v62 = vsel %vm12740_vm7, %v9741_v33, %v9745_v20  ;;  %v9764_v46 = vor.u32 %v9763_v11, %v9760_v2  ;;  %v15480_v2 = vld [vmem:[#allocation42_spill] sm:$0xff]  ;;  %v9791_v11 = vshll.u32 %v11294_v12, 16 }
 0x31a   : > { %v14643_v8 = vadd.f32 %v11879_v32, %v6822_v56  ;;  %v14646_v25 = vadd.f32 %v14495_v63, %v7545_v7  ;;  %v9751_v54 = vrot.slane %v9750_v31, 4  ;;  %v15476_v32 = vld [vmem:[#allocation26_spill] sm:$0xff]  ;;  %v9773_v63 = vrot.slane %v9771_v16, 4 }
 0x31b   : > { %v14650_v18 = vpop.f32.mrf.mxu1  ;;  %v14657_v56 = vadd.f32 %v15476_v32, %v6469_v47  ;;  %v9777_v7 = vshll.u32 %v11292_v14, 16  ;;  %v9782_v31 = vshrl.u32 %v11293_v37, 16  ;;  %v11295_v14 = vld [vmem:[%s12391_s14 + $0x2c] sm:$0x1]  ;;  %v14672_v32 = vpop.f32.mrf.mxu0  ;;  %v9765_v20 = vrot.slane %v9764_v46, 4 }
 0x31c   : > { %15473 = vst [vmem:[#allocation49_spill] sm:$0xff] %v14643_v8  ;;  %15474 = vst [vmem:[#allocation30_spill] sm:$0xff] %v14650_v18  ;;  %v9756_v59 = vsel %vm12740_vm7, %v9751_v54, %v9755_v28  ;;  %v9774_v16 = vor.u32 %v9773_v63, %v9769_v17  ;;  %v9785_v28 = vshll.u32 %v11293_v37, 16  ;;  %v9801_v46 = vshll.u32 %v11295_v14, 16 }
 0x31d   : > { %v11882_v61 = vpop.f32.mrf.mxu1  ;;  %v11335_v47 = vcombine.low %v9746_v62, %v9756_v59  ;;  %15479 = vst [vmem:[#allocation32_spill] sm:$0xff] %v14672_v32  ;;  %v9779_v33 = vrot.slane %v9777_v7, 5  ;;  %v9784_v18 = vrot.slane %v9782_v31, 4  ;;  %v9795_v59 = vshrl.u32 %v11294_v12, 16  ;;  %v11296_v7 = vld [vmem:[%s12391_s14 + $0x30] sm:$0xf]  ;;  %v14690_v57 = vpop.f32.mrf.mxu0 }
 0x31e   : > { %v14665_v39 = vadd.f32 %v11882_v61, %v6825_v53  ;;  %v6473_v53 = vadd.f32 %v14525_v1, %v15480_v2  ;;  %v9775_v19 = vrot.slane %v9774_v16, 4  ;;  %v9770_v61 = vsel %vm12740_vm7, %v9765_v20, %v9769_v17  ;;  %15482 = vst [vmem:[#allocation4_spill] sm:$0xff] %v14690_v57  ;;  %v15483_v17 = vld [vmem:[#allocation31_spill] sm:$0xff]  ;;  %v11300_v32 = vld [vmem:[%s12391_s14 + $0x40] sm:$0xf] }
 0x31f   : > { %v7458_v8 = vpop.f32.mrf.mxu1  ;;  %12038 = vmatprep.mubr.msk.bf16.mxu0 %vm2565_vm2, %v11335_v47  ;;  %v9787_v62 = vrot.slane %v9785_v28, 5  ;;  %v9793_v1 = vrot.slane %v9791_v11, 5  ;;  %v14696_v12 = vadd.f32 %v15483_v17, %v14517_v41  ;;  %v9797_v14 = vrot.slane %v9795_v59, 4 }
 0x320   : > { %v7549_v54 = vadd.f32 %v7458_v8, %v14618_v24  ;;  %v9780_v8 = vsel %vm12740_vm7, %v9775_v19, %v9779_v33  ;;  %v11297_v24 = vld [vmem:[%s12391_s14 + $0x34] sm:$0xf]  ;;  %v9803_v33 = vrot.slane %v9801_v46, 5  ;;  %v9806_v28 = vshrl.u32 %v11296_v7, 16  ;;  %v11299_v46 = vld [vmem:[%s12391_s14 + $0x3c] sm:$0xf] }
 0x321   : > { %v11883_v63 = vpop.f32.mrf.mxu1  ;;  %v11336_v16 = vcombine.low %v9770_v61, %v9780_v8  ;;  %v9809_v2 = vshll.u32 %v11296_v7, 16  ;;  %v9798_v11 = vor.u32 %v9797_v14, %v9793_v1  ;;  %v9815_v57 = vshll.u32 %v11297_v24, 16  ;;  %v14711_v8 = vpop.f32.mrf.mxu0  ;;  %v15486_v14 = vld [vmem:[#allocation35_spill] sm:$0xff] }
 0x322   : > { %v14682_v37 = vadd.f32 %v11883_v63, %v14622_v29  ;;  %v14685_v31 = vadd.f32 %v14545_v42, %v7549_v54  ;;  %v9788_v29 = vor.u32 %v9787_v62, %v9784_v18  ;;  %v15484_v42 = vld [vmem:[#allocation33_spill] sm:$0xff]  ;;  %v11298_v63 = vld [vmem:[%s12391_s14 + $0x38] sm:$0x1]  ;;  %v9819_v41 = vshrl.u32 %v11297_v24, 16  ;;  %v15485_v18 = vld [vmem:[#allocation34_spill] sm:$0xff] }
 0x323   : > { %v14692_v47 = vpop.f32.mrf.mxu1  ;;  %v14700_v20 = vadd.f32 %v15484_v42, %v14519_v27  ;;  %12039 = vmatmul.mubr.msk.bf16.vlgmr.msra.gmra.mxu0 %vm2565_vm2, %v11336_v16  ;;  %v14708_v62 = vadd.f32 %v15485_v18, %v6473_v53  ;;  %v9808_v59 = vrot.slane %v9806_v28, 4  ;;  %v9811_v27 = vrot.slane %v9809_v2, 5 }
 0x324   : > { %15481 = vst [vmem:[#allocation51_spill] sm:$0xff] %v14682_v37  ;;  %v9789_v19 = vrot.slane %v9788_v29, 4  ;;  %v9799_v16 = vrot.slane %v9798_v11, 4  ;;  %v9817_v29 = vrot.slane %v9815_v57, 5  ;;  %v9821_v24 = vrot.slane %v9819_v41, 4  ;;  %v14730_v41 = vpop.f32.mrf.mxu0 }
 0x325   : > { %v11886_v54 = vpop.f32.mrf.mxu1  ;;  %v14718_v53 = vadd.f32 %v15486_v14, %v14530_v44  ;;  %v9812_v42 = vor.u32 %v9811_v27, %v9808_v59  ;;  %v9825_v28 = vshll.u32 %v11298_v63, 16  ;;  %v9830_v37 = vshrl.u32 %v11299_v46, 16  ;;  %v11301_v11 = vld [vmem:[%s12391_s14 + $0x44] sm:$0x1] }
 0x326   : > { %v14705_v61 = vadd.f32 %v11886_v54, %v14631_v30  ;;  %v9794_v17 = vsel %vm12740_vm7, %v9789_v19, %v9793_v1  ;;  %v9804_v54 = vsel %vm12740_vm7, %v9799_v16, %v9803_v33  ;;  %v9822_v18 = vor.u32 %v9821_v24, %v9817_v29  ;;  %v11302_v24 = vld [vmem:[%s12391_s14 + $0x48] sm:$0xf] }
 0x327   : > { %v7474_v7 = vpop.f32.mrf.mxu1  ;;  %v9833_v1 = vshll.u32 %v11299_v46, 16  ;;  %v11337_v19 = vcombine.low %v9794_v17, %v9804_v54  ;;  %v9813_v44 = vrot.slane %v9812_v42, 4  ;;  %v9827_v33 = vrot.slane %v9825_v28, 5  ;;  %v11303_v28 = vld [vmem:[%s12391_s14 + $0x4c] sm:$0xf] }
 0x328   : > { %v7553_v30 = vadd.f32 %v7474_v7, %v14635_v36  ;;  %v9823_v59 = vrot.slane %v9822_v18, 4  ;;  %v9832_v27 = vrot.slane %v9830_v37, 4  ;;  %v9839_v17 = vshll.u32 %v11300_v32, 16 }
 0x329   : > { %v11887_v2 = vpop.f32.mrf.mxu1  ;;  %v9835_v7 = vrot.slane %v9833_v1, 5  ;;  %12042 = vmatprep.mubr.msk.bf16.mxu0 %vm2565_vm2, %v11337_v19  ;;  %v9843_v42 = vshrl.u32 %v11300_v32, 16  ;;  %v14751_v1 = vpop.f32.mrf.mxu0 }
 0x32a   : > { %v14724_v57 = vadd.f32 %v11887_v2, %v14654_v52  ;;  %v14727_v36 = vadd.f32 %v14583_v13, %v7553_v30  ;;  %v15489_v52 = vld [vmem:[#allocation37_spill] sm:$0xff]  ;;  %v9818_v13 = vsel %vm12740_vm7, %v9813_v44, %v9817_v29  ;;  %v9828_v37 = vsel %vm12740_vm7, %v9823_v59, %v9827_v33  ;;  %v15490_v2 = vld [vmem:[#allocation48_spill] sm:$0xff]  ;;  %15491 = vst [vmem:[#allocation8_spill] sm:$0xff] %v14751_v1 }
 0x32b   : > { %v7477_v63 = vpop.f32.mrf.mxu1  ;;  %v14737_v16 = vadd.f32 %v15489_v52, %v14540_v40  ;;  %v9836_v14 = vor.u32 %v9835_v7, %v9832_v27  ;;  %v6477_v40 = vadd.f32 %v14547_v49, %v15490_v2  ;;  %v11338_v18 = vcombine.low %v9818_v13, %v9828_v37  ;;  %v15492_v44 = vld [vmem:[#allocation40_spill] sm:$0xff]  ;;  %v11305_v52 = vld [vmem:[%s12391_s14 + $0x54] sm:$0xf] }
 0x32c   : > { %15487 = vst [vmem:[#allocation5_spill] sm:$0xff] %v14724_v57  ;;  %v14733_v46 = vadd.f32 %v7477_v63, %v14657_v56  ;;  %v9849_v56 = vshll.u32 %v11301_v11, 16  ;;  %v9841_v29 = vrot.slane %v9839_v17, 5  ;;  %v14755_v63 = vadd.f32 %v15492_v44, %v14543_v9  ;;  %v11304_v11 = vld [vmem:[%s12391_s14 + $0x50] sm:$0x1] }
 0x32d   : > { %v11890_v30 = vpop.f32.mrf.mxu1  ;;  %v9837_v59 = vrot.slane %v9836_v14, 4  ;;  %v9845_v32 = vrot.slane %v9843_v42, 4  ;;  %v9854_v33 = vshrl.u32 %v11302_v24, 16  ;;  %12043 = vmatmul.mubr.msk.bf16.gmra.mxu0 %vm2565_vm2, %v11338_v18  ;;  %v9863_v7 = vshll.u32 %v11303_v28, 16 }
 0x32e   : > { %15488 = vst [vmem:[#allocation6_spill] sm:$0xff] %v14733_v46  ;;  %v14749_v54 = vadd.f32 %v11890_v30, %v14669_v34  ;;  %v9851_v49 = vrot.slane %v9849_v56, 5  ;;  %v9857_v34 = vshll.u32 %v11302_v24, 16  ;;  %v9867_v37 = vshrl.u32 %v11303_v28, 16  ;;  %v14769_v24 = vpop.f32.mrf.mxu0  ;;  %v15496_v28 = vld [vmem:[#allocation43_spill] sm:$0xff] }
 0x32f   : > { %v7490_v19 = vpop.f32.mrf.mxu1  ;;  %v9842_v17 = vsel %vm12740_vm7, %v9837_v59, %v9841_v29  ;;  %v9846_v30 = vor.u32 %v9845_v32, %v9841_v29  ;;  %v9856_v9 = vrot.slane %v9854_v33, 4  ;;  %v9865_v56 = vrot.slane %v9863_v7, 5  ;;  %15494 = vst [vmem:[#allocation11_spill] sm:$0xff] %v14769_v24  ;;  %v11306_v33 = vld [vmem:[%s12391_s14 + $0x58] sm:$0xf] }
 0x330   : > { %v7557_v27 = vadd.f32 %v7490_v19, %v14696_v12  ;;  %v9859_v42 = vrot.slane %v9857_v34, 5  ;;  %v9869_v19 = vrot.slane %v9867_v37, 4  ;;  %v9873_v44 = vshll.u32 %v11304_v11, 16  ;;  %v15497_v11 = vld [vmem:[#allocation45_spill] sm:$0xff] }
 0x331   : > { %v11891_v13 = vpop.f32.mrf.mxu1  ;;  %v9847_v18 = vrot.slane %v9846_v30, 4  ;;  %v9878_v29 = vshrl.u32 %v11305_v52, 16  ;;  %v6836_v32 = vadd.f32 %v15496_v28, %v6477_v40  ;;  %v11308_v30 = vld [vmem:[%s12391_s14 + $0x60] sm:$0xf]  ;;  %v6841_v37 = vadd.f32 %v15497_v11, %v14550_v50  ;;  %v11310_v11 = vld [vmem:[%s12391_s14 + $0x68] sm:$0x1] }
 0x332   : > { %v14764_v14 = vadd.f32 %v11891_v13, %v14700_v20  ;;  %v14767_v12 = vadd.f32 %v14648_v45, %v7557_v27  ;;  %v9860_v20 = vor.u32 %v9859_v42, %v9856_v9  ;;  %v11307_v13 = vld [vmem:[%s12391_s14 + $0x5c] sm:$0x1]  ;;  %v9881_v45 = vshll.u32 %v11305_v52, 16  ;;  %v11311_v46 = vld [vmem:[%s12391_s14 + $0x6c] sm:$0xf] }
 0x333   : > { %v7493_v2 = vpop.f32.mrf.mxu1  ;;  %v9852_v27 = vsel %vm12740_vm7, %v9847_v18, %v9851_v49  ;;  %v9870_v34 = vor.u32 %v9869_v19, %v9865_v56  ;;  %v9875_v7 = vrot.slane %v9873_v44, 5  ;;  %v9880_v24 = vrot.slane %v9878_v29, 4  ;;  %v15498_v29 = vld [vmem:[#allocation47_spill] sm:$0xff] }
 0x334   : > { %15493 = vst [vmem:[#allocation10_spill] sm:$0xff] %v14764_v14  ;;  %v14772_v59 = vadd.f32 %v7493_v2, %v14708_v62  ;;  %v11339_v1 = vcombine.low %v9842_v17, %v9852_v27  ;;  %v9861_v62 = vrot.slane %v9860_v20, 4  ;;  %v9883_v2 = vrot.slane %v9881_v45, 5  ;;  %v11309_v17 = vld [vmem:[%s12391_s14 + $0x64] sm:$0xf] }
 0x335   : > { %v9871_v9 = vrot.slane %v9870_v34, 4  ;;  %v9887_v42 = vshll.u32 %v11306_v33, 16  ;;  %v9891_v52 = vshrl.u32 %v11306_v33, 16  ;;  %v9897_v28 = vshll.u32 %v11307_v13, 16 }
 0x336   : > { %15495 = vst [vmem:[#allocation9_spill] sm:$0xff] %v14772_v59  ;;  %v14782_v59 = vpop.f32.mrf.mxu0  ;;  %v11894_v40 = vpop.f32.mrf.mxu1  ;;  %12046 = vmatprep.mubr.msk.bf16.mxu0 %vm2565_vm2, %v11339_v1  ;;  %v9866_v18 = vsel %vm12740_vm7, %v9861_v62, %v9865_v56  ;;  %v9884_v50 = vor.u32 %v9883_v2, %v9880_v24  ;;  %v9902_v19 = vshrl.u32 %v11308_v30, 16  ;;  %v6839_v20 = vadd.f32 %v15498_v29, %v14559_v35 }
 0x337   : > { %v14785_v49 = vadd.f32 %v11894_v40, %v14718_v53  ;;  %v9876_v33 = vsel %vm12740_vm7, %v9871_v9, %v9875_v7  ;;  %v9889_v13 = vrot.slane %v9887_v42, 5  ;;  %v9893_v45 = vrot.slane %v9891_v52, 4 }
 0x338   : > { %v7506_v44 = vpop.f32.mrf.mxu1  ;;  %v11340_v27 = vcombine.low %v9866_v18, %v9876_v33  ;;  %v9885_v1 = vrot.slane %v9884_v50, 4  ;;  %v9899_v34 = vrot.slane %v9897_v28, 5  ;;  %v7992_v56 = vpop.f32.mrf.mxu0  ;;  %v9904_v2 = vrot.slane %v9902_v19, 4 }
 0x339   : > { %v7561_v53 = vadd.f32 %v7506_v44, %v14737_v16  ;;  %v9894_v62 = vor.u32 %v9893_v45, %v9889_v13  ;;  %v9905_v40 = vshll.u32 %v11308_v30, 16  ;;  %v9911_v14 = vshll.u32 %v11309_v17, 16 }
 0x33a   : > { %v11895_v24 = vpop.f32.mrf.mxu1  ;;  %12047 = vmatmul.mubr.msk.bf16.gmra.mxu0 %vm2565_vm2, %v11340_v27  ;;  %v9890_v16 = vsel %vm12740_vm7, %v9885_v1, %v9889_v13  ;;  %v9915_v9 = vshrl.u32 %v11309_v17, 16  ;;  %v9921_v30 = vshll.u32 %v11310_v11, 16  ;;  %v6481_v50 = vadd.f32 %v14566_v26, %v14343_v0  ;;  %v14812_v29 = vpop.f32.mrf.mxu0  ;;  %v15502_v13 = vld [vmem:[#allocation50_spill] sm:$0xff] }
 0x33b   : > { %v14799_v35 = vadd.f32 %v11895_v24, %v14755_v63  ;;  %v14802_v7 = vadd.f32 %v14730_v41, %v7561_v53  ;;  %v9895_v52 = vrot.slane %v9894_v62, 4  ;;  %v9907_v28 = vrot.slane %v9905_v40, 5  ;;  %v11312_v41 = vld [vmem:[%s12391_s14 + $0x70] sm:$0xf]  ;;  %15501 = vst [vmem:[#allocation16_spill] sm:$0xff] %v14812_v29 }
 0x33c   : > { %v7509_v42 = vpop.f32.mrf.mxu1  ;;  %v9913_v18 = vrot.slane %v9911_v14, 5  ;;  %v9917_v19 = vrot.slane %v9915_v9, 4  ;;  %v9926_v44 = vshrl.u32 %v11311_v46, 16  ;;  %v6842_v17 = vadd.f32 %v15502_v13, %v14562_v51  ;;  %v11313_v1 = vld [vmem:[%s12391_s14 + $0x74] sm:$0x1] }
 0x33d   : > { %15499 = vst [vmem:[#allocation36_spill] sm:$0xff] %v14799_v35  ;;  %v14809_v63 = vadd.f32 %v7509_v42, %v6836_v32  ;;  %v9900_v45 = vsel %vm12740_vm7, %v9895_v52, %v9899_v34  ;;  %v9908_v14 = vor.u32 %v9907_v28, %v9904_v2  ;;  %v9929_v53 = vshll.u32 %v11311_v46, 16  ;;  %v11314_v2 = vld [vmem:[%s12391_s14 + $0x78] sm:$0xf] }
 0x33e   : > { %v11898_v33 = vpop.f32.mrf.mxu1  ;;  %v11341_v0 = vcombine.low %v9890_v16, %v9900_v45  ;;  %v9918_v26 = vor.u32 %v9917_v19, %v9913_v18  ;;  %v9923_v32 = vrot.slane %v9921_v30, 5  ;;  %v9928_v62 = vrot.slane %v9926_v44, 4 }
 0x33f   : > { %15500 = vst [vmem:[#allocation15_spill] sm:$0xff] %v14809_v63  ;;  %v14818_v27 = vadd.f32 %v11898_v33, %v6841_v37  ;;  %v9909_v24 = vrot.slane %v9908_v14, 4  ;;  %v9931_v40 = vrot.slane %v9929_v53, 5  ;;  %v9935_v9 = vshll.u32 %v11312_v41, 16  ;;  %v14824_v37 = vpop.f32.mrf.mxu0 }
 0x340   : > { %v7522_v11 = vpop.f32.mrf.mxu1  ;;  %v6840_v51 = vadd.f32 %v14336_v22, %v6481_v50  ;;  %12050 = vmatprep.mubr.msk.bf16.mxu0 %vm2565_vm2, %v11341_v0  ;;  %v9919_v34 = vrot.slane %v9918_v26, 4  ;;  %v9939_v46 = vshrl.u32 %v11312_v41, 16  ;;  %15503 = vst [vmem:[#allocation17_spill] sm:$0xff] %v14824_v37  ;;  %v9945_v19 = vshll.u32 %v11313_v1, 16  ;;  %v11315_v41 = vld [vmem:[%s12391_s14 + $0x7c] sm:$0xf] }
 0x341   : > { %v7565_v42 = vadd.f32 %v7522_v11, %v6839_v20  ;;  %v9914_v52 = vsel %vm12740_vm7, %v9909_v24, %v9913_v18  ;;  %v9932_v28 = vor.u32 %v9931_v40, %v9928_v62  ;;  %v9937_v30 = vrot.slane %v9935_v9, 5  ;;  %v14841_v11 = vpop.f32.mrf.mxu0 }
 0x342   : > { %v11899_v16 = vpop.f32.mrf.mxu1  ;;  %v9924_v22 = vsel %vm12740_vm7, %v9919_v34, %v9923_v32  ;;  %v9941_v50 = vrot.slane %v9939_v46, 4  ;;  %v8009_v13 = vadd.f32 %v14353_v55, %v14570_v60  ;;  %v9950_v14 = vshrl.u32 %v11314_v2, 16 }
 0x343   : > { %v14828_v20 = vadd.f32 %v11899_v16, %v6842_v17  ;;  %v14830_v44 = vadd.f32 %v7992_v56, %v7565_v42  ;;  %v11342_v45 = vcombine.low %v9914_v52, %v9924_v22  ;;  %v9933_v18 = vrot.slane %v9932_v28, 4  ;;  %v11316_v17 = vld [vmem:[%s12391_s14 + $0x80] sm:$0x1]  ;;  %v11317_v56 = vld [vmem:[%s12391_s14 + $0x84] sm:$0xf] }
 0x344   : > { %v7525_v33 = vpop.f32.mrf.mxu1  ;;  %v9942_v0 = vor.u32 %v9941_v50, %v9937_v30  ;;  %v9947_v26 = vrot.slane %v9945_v19, 5  ;;  %v9953_v1 = vshll.u32 %v11314_v2, 16  ;;  %v9952_v32 = vrot.slane %v9950_v14, 4  ;;  %v11318_v22 = vld [vmem:[%s12391_s14 + $0x88] sm:$0xf] }
 0x345   : > { %15504 = vst [vmem:[#allocation19_spill] sm:$0xff] %v14828_v20  ;;  %v14837_v53 = vadd.f32 %v7525_v33, %v6840_v51  ;;  %12051 = vmatmul.mubr.msk.bf16.gmra.mxu0 %vm2565_vm2, %v11342_v45  ;;  %v9959_v62 = vshll.u32 %v11315_v41, 16  ;;  %v9963_v55 = vshrl.u32 %v11315_v41, 16  ;;  %v9938_v40 = vsel %vm12740_vm7, %v9933_v18, %v9937_v30  ;;  %v11319_v50 = vld [vmem:[%s12391_s14 + $0x8c] sm:$0x1]  ;;  %v14855_v41 = vpop.f32.mrf.mxu0 }
 0x346   : > { %v11938_v24 = vpop.f32.mrf.mxu1  ;;  %v9943_v9 = vrot.slane %v9942_v0, 4  ;;  %v9955_v42 = vrot.slane %v9953_v1, 5  ;;  %v9969_v2 = vshll.u32 %v11316_v17, 16  ;;  %v9974_v16 = vshrl.u32 %v11317_v56, 16 }
 0x347   : > { %15505 = vst [vmem:[#allocation20_spill] sm:$0xff] %v14837_v53  ;;  %v14844_v60 = vadd.f32 %v11938_v24, %v8009_v13  ;;  %v9961_v34 = vrot.slane %v9959_v62, 5  ;;  %v9965_v46 = vrot.slane %v9963_v55, 4  ;;  %v9977_v0 = vshll.u32 %v11317_v56, 16 }
 0x348   : > { %v8239_v51 = vpop.f32.mrf.mxu1  ;;  %v9948_v28 = vsel %vm12740_vm7, %v9943_v9, %v9947_v26  ;;  %v9956_v19 = vor.u32 %v9955_v42, %v9952_v32  ;;  %v9971_v45 = vrot.slane %v9969_v2, 5  ;;  %v9976_v14 = vrot.slane %v9974_v16, 4  ;;  %v11321_v9 = vld [vmem:[%s12391_s14 + $0x94] sm:$0xf]  ;;  %v14868_v42 = vpop.f32.mrf.mxu0 }
 0x349   : > { %v14849_v52 = vadd.f32 %v8239_v51, %v14581_v58  ;;  %v11343_v30 = vcombine.low %v9938_v40, %v9948_v28  ;;  %v9966_v13 = vor.u32 %v9965_v46, %v9961_v34  ;;  %v9983_v17 = vshll.u32 %v11318_v22, 16  ;;  %v11320_v40 = vld [vmem:[%s12391_s14 + $0x90] sm:$0xf] }
 0x34a   : > { %v14857_v33 = vpop.f32.mrf.mxu1  ;;  %v9957_v18 = vrot.slane %v9956_v19, 4  ;;  %v9987_v1 = vshrl.u32 %v11318_v22, 16  ;;  %v9993_v24 = vshll.u32 %v11319_v50, 16  ;;  %v8013_v32 = vadd.f32 %v14419_v3, %v14589_v5 }
 0x34b   : > { %12054 = vmatprep.mubr.msk.bf16.mxu0 %vm2565_vm2, %v11343_v30  ;;  %v9967_v26 = vrot.slane %v9966_v13, 4  ;;  %v9979_v55 = vrot.slane %v9977_v0, 5  ;;  %v9985_v46 = vrot.slane %v9983_v17, 5  ;;  %v9998_v22 = vshrl.u32 %v11320_v40, 16  ;;  %v14880_v17 = vpop.f32.mrf.mxu0 }
 0x34c   : > { %v14859_v58 = vpop.f32.mrf.mxu1  ;;  %v9962_v62 = vsel %vm12740_vm7, %v9957_v18, %v9961_v34  ;;  %v9989_v2 = vrot.slane %v9987_v1, 4  ;;  %v9995_v5 = vrot.slane %v9993_v24, 5  ;;  %v10001_v50 = vshll.u32 %v11320_v40, 16 }
 0x34d   : > { %v9972_v51 = vsel %vm12740_vm7, %v9967_v26, %v9971_v45  ;;  %v9980_v3 = vor.u32 %v9979_v55, %v9976_v14  ;;  %v10007_v30 = vshll.u32 %v11321_v9, 16  ;;  %v11322_v45 = vld [vmem:[%s12391_s14 + $0x98] sm:$0x1]  ;;  %v10011_v0 = vshrl.u32 %v11321_v9, 16  ;;  %v11323_v26 = vld [vmem:[%s12391_s14 + $0x9c] sm:$0xf] }
 0x34e   : > { %v11942_v56 = vpop.f32.mrf.mxu1  ;;  %v11344_v28 = vcombine.low %v9962_v62, %v9972_v51  ;;  %v9990_v34 = vor.u32 %v9989_v2, %v9985_v46  ;;  %v10000_v24 = vrot.slane %v9998_v22, 4  ;;  %v10017_v51 = vshll.u32 %v11322_v45, 16  ;;  %v11324_v2 = vld [vmem:[%s12391_s14 + $0xa0] sm:$0xf]  ;;  %v11325_v22 = vld [vmem:[%s12391_s14 + $0xa4] sm:$0x1] }
 0x34f   : > { %v14872_v16 = vadd.f32 %v11942_v56, %v8013_v32  ;;  %v9981_v18 = vrot.slane %v9980_v3, 4  ;;  %v10003_v32 = vrot.slane %v10001_v50, 5  ;;  %v10009_v62 = vrot.slane %v10007_v30, 5  ;;  %v14894_v50 = vpop.f32.mrf.mxu0 }
 0x350   : > { %v8255_v19 = vpop.f32.mrf.mxu1  ;;  %12055 = vmatmul.mubr.msk.bf16.gmra.mxu0 %vm2565_vm2, %v11344_v28  ;;  %v9991_v14 = vrot.slane %v9990_v34, 4  ;;  %v10013_v55 = vrot.slane %v10011_v0, 4  ;;  %v10022_v28 = vshrl.u32 %v11323_v26, 16  ;;  %v8017_v3 = vadd.f32 %v14483_v15, %v14627_v38 }
 0x351   : > { %v14875_v13 = vadd.f32 %v8255_v19, %v14600_v43  ;;  %v9986_v43 = vsel %vm12740_vm7, %v9981_v18, %v9985_v46  ;;  %v10004_v9 = vor.u32 %v10003_v32, %v10000_v24  ;;  %v10019_v18 = vrot.slane %v10017_v51, 5  ;;  %v11327_v51 = vld [vmem:[%s12391_s14 + $0xac] sm:$0xf] }
 0x352   : > { %v14882_v1 = vpop.f32.mrf.mxu1  ;;  %v9996_v56 = vsel %vm12740_vm7, %v9991_v14, %v9995_v5  ;;  %v10014_v34 = vor.u32 %v10013_v55, %v10009_v62  ;;  %v10024_v0 = vrot.slane %v10022_v28, 4  ;;  %v10025_v37 = vshll.u32 %v11323_v26, 16  ;;  %v11326_v55 = vld [vmem:[%s12391_s14 + $0xa8] sm:$0xf]  ;;  %v14908_v28 = vpop.f32.mrf.mxu0 }
 0x353   : > { %v11345_v19 = vcombine.low %v9986_v43, %v9996_v56  ;;  %v10005_v30 = vrot.slane %v10004_v9, 4  ;;  %v10031_v14 = vshll.u32 %v11324_v2, 16  ;;  %v10035_v32 = vshrl.u32 %v11324_v2, 16 }
 0x354   : > { %v14886_v40 = vpop.f32.mrf.mxu1  ;;  %v10015_v45 = vrot.slane %v10014_v34, 4  ;;  %v10027_v38 = vrot.slane %v10025_v37, 5  ;;  %v10041_v43 = vshll.u32 %v11325_v22, 16  ;;  %v10046_v34 = vshrl.u32 %v11326_v55, 16 }
 0x355   : > { %12058 = vmatprep.mubr.msk.bf16.mxu0 %vm2565_vm2, %v11345_v19  ;;  %v10010_v15 = vsel %vm12740_vm7, %v10005_v30, %v10009_v62  ;;  %v10033_v9 = vrot.slane %v10031_v14, 5  ;;  %v10037_v37 = vrot.slane %v10035_v32, 4  ;;  %v10049_v22 = vshll.u32 %v11326_v55, 16 }
 0x356   : > { %v11946_v46 = vpop.f32.mrf.mxu1  ;;  %v10020_v26 = vsel %vm12740_vm7, %v10015_v45, %v10019_v18  ;;  %v10028_v62 = vor.u32 %v10027_v38, %v10024_v0  ;;  %v10043_v2 = vrot.slane %v10041_v43, 5  ;;  %v11328_v18 = vld [vmem:[%s12391_s14 + $0xb0] sm:$0x1]  ;;  %v10055_v45 = vshll.u32 %v11327_v51, 16  ;;  %v11329_v0 = vld [vmem:[%s12391_s14 + $0xb4] sm:$0xf]  ;;  %v14919_v38 = vpop.f32.mrf.mxu0 }
 0x357   : > { %v14896_v5 = vadd.f32 %v11946_v46, %v8017_v3  ;;  %v11346_v19 = vcombine.low %v10010_v15, %v10020_v26  ;;  %v10038_v30 = vor.u32 %v10037_v37, %v10033_v9  ;;  %v10059_v14 = vshrl.u32 %v11327_v51, 16 }
 0x358   : > { %v8271_v24 = vpop.f32.mrf.mxu1  ;;  %v10048_v15 = vrot.slane %v10046_v34, 4  ;;  %v10051_v26 = vrot.slane %v10049_v22, 5  ;;  %v10065_v53 = vshll.u32 %v11328_v18, 16  ;;  %v11330_v34 = vld [vmem:[%s12391_s14 + $0xb8] sm:$0xf]  ;;  %v10070_v22 = vshrl.u32 %v11329_v0, 16 }
 0x359   : > { %v14903_v56 = vadd.f32 %v8271_v24, %v14646_v25  ;;  %12059 = vmatmul.mubr.msk.bf16.gmra.mxu0 %vm2565_vm2, %v11346_v19  ;;  %v10029_v25 = vrot.slane %v10028_v62, 4  ;;  %v8021_v24 = vadd.f32 %v14532_v23, %v14665_v39  ;;  %v10039_v55 = vrot.slane %v10038_v30, 4  ;;  %v11331_v30 = vld [vmem:[%s12391_s14 + $0xbc] sm:$0x1] }
 0x35a   : > { %v14910_v3 = vpop.f32.mrf.mxu1  ;;  %v10057_v19 = vrot.slane %v10055_v45, 5  ;;  %v10061_v62 = vrot.slane %v10059_v14, 4  ;;  %v10052_v51 = vor.u32 %v10051_v26, %v10048_v15  ;;  %v10073_v20 = vshll.u32 %v11329_v0, 16  ;;  %v14932_v45 = vpop.f32.mrf.mxu0 }
 0x35b   : > { %v10034_v43 = vsel %vm12740_vm7, %v10029_v25, %v10033_v9  ;;  %v10044_v23 = vsel %vm12740_vm7, %v10039_v55, %v10043_v2  ;;  %v10072_v15 = vrot.slane %v10070_v22, 4  ;;  %v10079_v0 = vshll.u32 %v11330_v34, 16 }
 0x35c   : > { %v14912_v46 = vpop.f32.mrf.mxu1  ;;  %v10062_v39 = vor.u32 %v10061_v62, %v10057_v19  ;;  %v11347_v9 = vcombine.low %v10034_v43, %v10044_v23  ;;  %v10053_v25 = vrot.slane %v10052_v51, 4  ;;  %v10075_v2 = vrot.slane %v10073_v20, 5  ;;  %v11333_v51 = vld [vmem:[%s12391_s14 + $0xc4] sm:$0xf] }
 0x35d   : > { %v10083_v55 = vshrl.u32 %v11330_v34, 16  ;;  %v10089_v62 = vshll.u32 %v11331_v30, 16  ;;  %v8025_v20 = vadd.f32 %v14574_v48, %v14705_v61  ;;  %v10081_v23 = vrot.slane %v10079_v0, 5 }
 0x35e   : > { %v11950_v32 = vpop.f32.mrf.mxu1  ;;  %v10063_v18 = vrot.slane %v10062_v39, 4  ;;  %12062 = vmatprep.mubr.msk.bf16.mxu0 %vm2565_vm2, %v11347_v9  ;;  %v10058_v26 = vsel %vm12740_vm7, %v10053_v25, %v10057_v19  ;;  %v10076_v43 = vor.u32 %v10075_v2, %v10072_v15  ;;  %v14947_v39 = vpop.f32.mrf.mxu0  ;;  %v10103_v34 = vshll.u32 %v11333_v51, 16 }
 0x35f   : > { %v14923_v37 = vadd.f32 %v11950_v32, %v8021_v24  ;;  %v10067_v24 = vrot.slane %v10065_v53, 5  ;;  %v10085_v9 = vrot.slane %v10083_v55, 4  ;;  %v10091_v2 = vrot.slane %v10089_v62, 5 }
 0x360   : > { %v8287_v29 = vpop.f32.mrf.mxu1  ;;  %v10077_v22 = vrot.slane %v10076_v43, 4  ;;  %v10107_v48 = vshrl.u32 %v11333_v51, 16  ;;  %v10105_v0 = vrot.slane %v10103_v34, 5 }
 0x361   : > { %v14929_v63 = vadd.f32 %v8287_v29, %v14685_v31  ;;  %v11332_v31 = vld [vmem:[%s12391_s14 + $0xc0] sm:$0xf]  ;;  %v10068_v32 = vsel %vm12740_vm7, %v10063_v18, %v10067_v24  ;;  %v11334_v18 = vld [vmem:[%s12391_s14 + $0xc8] sm:$0x1]  ;;  %v10086_v15 = vor.u32 %v10085_v9, %v10081_v23 }
 0x362   : > { %v14934_v14 = vpop.f32.mrf.mxu1  ;;  %v11348_v53 = vcombine.low %v10058_v26, %v10068_v32  ;;  %v10094_v25 = vshrl.u32 %v11332_v31, 16  ;;  %v10097_v24 = vshll.u32 %v11332_v31, 16  ;;  %v14956_v32 = vpop.f32.mrf.mxu0  ;;  %v10082_v55 = vsel %vm12740_vm7, %v10077_v22, %v10081_v23 }
 0x363   : > { %v10109_v31 = vrot.slane %v10107_v48, 4 }
 0x364   : > { %v14940_v29 = vpop.f32.mrf.mxu1  ;;  %12063 = vmatmul.mubr.msk.bf16.gmra.mxu0 %vm2565_vm2, %v11348_v53  ;;  %v10096_v57 = vrot.slane %v10094_v25, 4  ;;  %v10099_v26 = vrot.slane %v10097_v24, 5  ;;  %v10113_v53 = vshll.u32 %v11334_v18, 16  ;;  %v8029_v25 = vadd.f32 %v14639_v21, %v14749_v54 }
 0x366   : > { %v11954_v19 = vpop.f32.mrf.mxu1  ;;  %v10115_v51 = vrot.slane %v10113_v53, 5 }
 0x367   : > { %v14949_v35 = vadd.f32 %v11954_v19, %v8025_v20  ;;  %v10087_v20 = vrot.slane %v10086_v15, 4  ;;  %v10100_v19 = vor.u32 %v10099_v26, %v10096_v57  ;;  %v8033_v26 = vadd.f32 %v14711_v8, %v14785_v49  ;;  %v15507_v49 = vld [vmem:[#allocation7_spill] sm:$0xff] }
 0x368   : > { %v8303_v30 = vpop.f32.mrf.mxu1 }
 0x369   : > { %v14954_v61 = vadd.f32 %v8303_v30, %v14727_v36  ;;  %v10092_v62 = vsel %vm12740_vm7, %v10087_v20, %v10091_v2  ;;  %v10110_v36 = vor.u32 %v10109_v31, %v10105_v0  ;;  %v10101_v34 = vrot.slane %v10100_v19, 4  ;;  %v14968_v30 = vpop.f32.mrf.mxu0 }
 0x36a   : > { %v14958_v43 = vpop.f32.mrf.mxu1  ;;  %v11349_v24 = vcombine.low %v10082_v55, %v10092_v62  ;;  %v8037_v62 = vadd.f32 %v14782_v59, %v14818_v27  ;;  %v15510_v59 = vld [vmem:[#allocation52_spill] sm:$0xff] }
 0x36b   : > { %15506 = vst [vmem:[#allocation21_spill] sm:$0xff] %v14954_v61  ;;  %v10111_v23 = vrot.slane %v10110_v36, 4  ;;  %v10106_v57 = vsel %vm12740_vm7, %v10101_v34, %v10105_v0  ;;  %v14980_v54 = vpop.f32.mrf.mxu0 }
 0x36c   : > { %v14962_v9 = vpop.f32.mrf.mxu1  ;;  %12066 = vmatprep.mubr.msk.bf16.mxu0 %vm2565_vm2, %v11349_v24 }
 0x36d   : > { %v10116_v15 = vsel %vm12740_vm7, %v10111_v23, %v10115_v51  ;;  %v14989_v0 = vpop.f32.mrf.mxu0  ;;  %v6812_v51 = vadd.f32 %v15507_v49, %v14373_v6  ;;  %v15512_v6 = vld [vmem:[#allocation53_spill] sm:$0xff] }
 0x36e   : > { %v11958_v61 = vpop.f32.mrf.mxu1  ;;  %v11350_v21 = vcombine.low %v10106_v57, %v10116_v15 }
 0x36f   : > { %v14970_v22 = vadd.f32 %v11958_v61, %v8029_v25  ;;  %v14996_v31 = vpop.f32.mrf.mxu0 }
 0x370   : > { %v8319_v18 = vpop.f32.mrf.mxu1  ;;  %12067 = vmatmul.mubr.msk.bf16.gmra.mxu0 %vm2565_vm2, %v11350_v21 }
 0x371   : > { %v14978_v2 = vadd.f32 %v8319_v18, %v14767_v12  ;;  %v15004_v36 = vpop.f32.mrf.mxu0  ;;  %v15509_v18 = vld [vmem:[#allocation41_spill] sm:$0xff] }
 0x372   : > { %v14982_v48 = vpop.f32.mrf.mxu1  ;;  %v8010_v27 = vadd.f32 %v15510_v59, %v15509_v18  ;;  %v15515_v18 = vld [vmem:[#allocation46_spill] sm:$0xff] }
 0x373   : > { %v15014_v23 = vpop.f32.mrf.mxu0 }
 0x374   : > { %v14985_v61 = vpop.f32.mrf.mxu1  ;;  %v8369_v21 = vadd.f32 %v14857_v33, %v8010_v27  ;;  %v15037_v33 = vld [vmem:[%s15335_s4] ss:$0 sm:$0xff] }
 0x376   : > { %v11962_v55 = vpop.f32.mrf.mxu1 }
 0x377   : > { %v14991_v4 = vadd.f32 %v11962_v55, %v8033_v26  ;;  %v9094_v55 = vadd.f32 %v14841_v11, %v14844_v60 }
 0x378   : > { %v8335_v20 = vpop.f32.mrf.mxu1 }
 0x379   : > { %v14994_v12 = vadd.f32 %v8335_v20, %v14802_v7  ;;  %v7538_v7 = vadd.f32 %v14585_v10, %v6812_v51  ;;  %v15026_v10 = vpop.f32.mrf.mxu0  ;;  %v15514_v20 = vld [vmem:[#allocation13_spill] sm:$0xff] }
 0x37a   : > { %v14998_v53 = vpop.f32.mrf.mxu1 }
 0x37b   : > { %v8008_v26 = vadd.f32 %v15512_v6, %v7538_v7  ;;  %v9095_v7 = vadd.f32 %v14868_v42, %v8369_v21  ;;  %v15040_v27 = vpop.f32.mrf.mxu0  ;;  %v15516_v6 = vld [vmem:[#allocation27_spill] sm:$0xff] }
 0x37c   : > { %v15000_v19 = vpop.f32.mrf.mxu1 }
 0x37d   : > { %v8367_v49 = vadd.f32 %v14859_v58, %v8008_v26 }
 0x37e   : > { %v11966_v8 = vpop.f32.mrf.mxu1 }
 0x37f   : > { %v15008_v25 = vadd.f32 %v11966_v8, %v8037_v62 }
 0x380   : > { %v8351_v24 = vpop.f32.mrf.mxu1 }
 0x381   : > { %v15012_v34 = vadd.f32 %v8351_v24, %v14830_v44  ;;  %v15513_v44 = vld [vmem:[#allocation54_spill] sm:$0xff]  ;;  %v9092_v24 = vadd.f32 %v14855_v41, %v14849_v52  ;;  %v9093_v41 = vadd.f32 %v14880_v17, %v8367_v49 }
 0x382   : > { %v15016_v57 = vpop.f32.mrf.mxu1  ;;  %v6816_v62 = vadd.f32 %v15514_v20, %v15513_v44  ;;  %v15517_v44 = vld [vmem:[#allocation56_spill] sm:$0xff] }
 0x383   : > { %15508 = vst [vmem:[#allocation23_spill] sm:$0xff] %v15012_v34  ;;  %v8014_v58 = vadd.f32 %v15517_v44, %v15516_v6  ;;  %v15052_v6 = vpop.f32.mrf.mxu0  ;;  %v15519_v44 = vld [vmem:[#allocation55_spill] sm:$0xff] }
 0x384   : > { %v15020_v15 = vpop.f32.mrf.mxu1  ;;  %v7542_v59 = vadd.f32 %v15515_v18, %v6816_v62  ;;  %v15518_v62 = vld [vmem:[#allocation57_spill] sm:$0xff] }
 0x385   : > { %15511 = vst [vmem:[#allocation24_spill] sm:$0xff] %v15020_v15  ;;  %v8373_v20 = vadd.f32 %v14882_v1, %v8014_v58  ;;  %v9096_v1 = vadd.f32 %v14908_v28, %v14875_v13 }
 0x386   : > { %v12006_v8 = vpop.f32.mrf.mxu1 }
 0x387   : > { %v9564_v51 = vadd.f32 %v12006_v8, %v9094_v55  ;;  %v8012_v8 = vadd.f32 %v15518_v62, %v7542_v59 }
 0x388   : > { %v9435_v11 = vpop.f32.mrf.mxu1 }
 0x389   : > { %v9562_v60 = vadd.f32 %v9435_v11, %v9092_v24  ;;  %v9602_v55 = vadd.f32 %v15037_v33, %v9564_v51  ;;  %v9098_v11 = vadd.f32 %v14894_v50, %v14872_v16  ;;  %v15520_v51 = vld [vmem:[#allocation18_spill] sm:$0xff]  ;;  %v8371_v17 = vadd.f32 %v14886_v40, %v8012_v8  ;;  %v15522_v40 = vld [vmem:[#allocation49_spill] sm:$0xff] }
 0x38a   : > { %v12007_v26 = vpop.f32.mrf.mxu1  ;;  %v9099_v16 = vadd.f32 %v14919_v38, %v8373_v20  ;;  %v15523_v8 = vld [vmem:[#allocation38_spill] sm:$0xff] }
 0x38b   : > { %v9565_v52 = vadd.f32 %v12007_v26, %v9095_v7  ;;  %v9600_v24 = vadd.f32 %v15037_v33, %v9562_v60  ;;  %v6820_v7 = vadd.f32 %v15520_v51, %v15519_v44  ;;  %v9634_v59 = vmax.f32 %v9602_v55, 0.0  ;;  %v15062_v51 = vpop.f32.mrf.mxu0 }
 0x38c   : > { %v9438_v18 = vpop.f32.mrf.mxu1  ;;  %v8018_v34 = vadd.f32 %v15523_v8, %v15522_v40 }
 0x38d   : > { %v9603_v42 = vadd.f32 %v15037_v33, %v9565_v52  ;;  %v9563_v21 = vadd.f32 %v9438_v18, %v9093_v41  ;;  %v15521_v52 = vld [vmem:[#allocation30_spill] sm:$0xff]  ;;  %v9632_v50 = vmax.f32 %v9600_v24, 0.0 }
 0x38e   : > { %v12010_v49 = vpop.f32.mrf.mxu1  ;;  %v7546_v41 = vadd.f32 %v15521_v52, %v6820_v7  ;;  %v15524_v7 = vld [vmem:[#allocation12_spill] sm:$0xff] }
 0x38f   : > { %v9635_v58 = vmax.f32 %v9603_v42, 0.0  ;;  %v9601_v60 = vadd.f32 %v15037_v33, %v9563_v21  ;;  %v9568_v26 = vadd.f32 %v12010_v49, %v9098_v11  ;;  %v9097_v21 = vadd.f32 %v14932_v45, %v8371_v17 }
 0x390   : > { %v9451_v62 = vpop.f32.mrf.mxu1  ;;  %v8377_v11 = vadd.f32 %v14910_v3, %v8018_v34  ;;  %v8016_v38 = vadd.f32 %v15524_v7, %v7546_v41  ;;  %v9100_v17 = vadd.f32 %v14956_v32, %v14903_v56  ;;  %v15529_v7 = vld [vmem:[#allocation14_spill] sm:$0xff] }
 0x391   : > { %v9665_v18 = vpack.c.bf16 %v9635_v58, %v9634_v59  ;;  %v9633_v15 = vmax.f32 %v9601_v60, 0.0  ;;  %v9566_v44 = vadd.f32 %v9451_v62, %v9096_v1  ;;  %v9606_v55 = vadd.f32 %v15037_v33, %v9568_v26  ;;  %v15075_v59 = vpop.f32.mrf.mxu0  ;;  %v15525_v58 = vld [vmem:[#allocation58_spill] sm:$0xff] }
 0x392   : > { %v12011_v13 = vpop.f32.mrf.mxu1  ;;  %v15526_v60 = vld [vmem:[#allocation22_spill] sm:$0xff]  ;;  %v8375_v3 = vadd.f32 %v14912_v46, %v8016_v38 }
 0x393   : > { %v9664_v28 = vpack.c.bf16 %v9633_v15, %v9632_v50  ;;  %v9569_v42 = vadd.f32 %v12011_v13, %v9099_v16  ;;  %v9604_v24 = vadd.f32 %v15037_v33, %v9566_v44  ;;  %v9102_v15 = vadd.f32 %v14947_v39, %v14896_v5  ;;  %v15086_v8 = vpop.f32.mrf.mxu0  ;;  %v15528_v13 = vld [vmem:[#allocation39_spill] sm:$0xff] }
 0x394   : > { %v9454_v20 = vpop.f32.mrf.mxu1  ;;  %v6824_v45 = vadd.f32 %v15526_v60, %v15525_v58  ;;  %v9638_v26 = vmax.f32 %v9606_v55, 0.0  ;;  %v9103_v16 = vadd.f32 %v14968_v30, %v8377_v11 }
 0x395   : > { %v9607_v49 = vadd.f32 %v15037_v33, %v9569_v42  ;;  %v9567_v1 = vadd.f32 %v9454_v20, %v9097_v21  ;;  %12072 = vmatprep.mubr.msk.bf16.mxu1 %vm2565_vm2, %v9664_v28  ;;  %v9636_v50 = vmax.f32 %v9604_v24, 0.0  ;;  %v9101_v21 = vadd.f32 %v14980_v54, %v8375_v3 }
 0x396   : > { %v12014_v34 = vpop.f32.mrf.mxu1  ;;  %12073 = vmatmul.mubr.msk.bf16.vlgmr.msra.gmra.mxu1 %vm2565_vm2, %v9665_v18  ;;  %v7550_v5 = vadd.f32 %v14692_v47, %v6824_v45  ;;  %v15527_v18 = vld [vmem:[#allocation51_spill] sm:$0xff] }
 0x397   : > { %v9639_v52 = vmax.f32 %v9607_v49, 0.0  ;;  %v9605_v41 = vadd.f32 %v15037_v33, %v9567_v1  ;;  %v9572_v62 = vadd.f32 %v12014_v34, %v9102_v15  ;;  %v8022_v28 = vadd.f32 %v15528_v13, %v15527_v18  ;;  %v15099_v1 = vpop.f32.mrf.mxu0 }
 0x398   : > { %v9467_v39 = vpop.f32.mrf.mxu1  ;;  %v8020_v30 = vadd.f32 %v15529_v7, %v7550_v5  ;;  %v9106_v49 = vadd.f32 %v14989_v0, %v14923_v37 }
 0x399   : > { %v9667_v44 = vpack.c.bf16 %v9639_v52, %v9638_v26  ;;  %v9637_v40 = vmax.f32 %v9605_v41, 0.0  ;;  %v9570_v46 = vadd.f32 %v9467_v39, %v9100_v17  ;;  %v9610_v55 = vadd.f32 %v15037_v33, %v9572_v62  ;;  %v15107_v41 = vpop.f32.mrf.mxu0  ;;  %v15531_v62 = vld [vmem:[#allocation44_spill] sm:$0xff] }
 0x39a   : > { %v12015_v56 = vpop.f32.mrf.mxu1  ;;  %v8381_v47 = vadd.f32 %v14934_v14, %v8022_v28  ;;  %v8379_v15 = vadd.f32 %v14940_v29, %v8020_v30  ;;  %v9104_v14 = vadd.f32 %v14996_v31, %v14929_v63  ;;  %v15530_v29 = vld [vmem:[#allocation5_spill] sm:$0xff] }
 0x39b   : > { %v9666_v32 = vpack.c.bf16 %v9637_v40, %v9636_v50  ;;  %v9573_v42 = vadd.f32 %v12015_v56, %v9103_v16  ;;  %v9608_v38 = vadd.f32 %v15037_v33, %v9570_v46  ;;  %v9642_v58 = vmax.f32 %v9610_v55, 0.0  ;;  %v15532_v40 = vld [vmem:[#allocation6_spill] sm:$0xff]  ;;  %v11996_v55 = vpop.f32.mrf.mxu0 }
 0x39c   : > { %v9470_v11 = vpop.f32.mrf.mxu1  ;;  %v9107_v17 = vadd.f32 %v15004_v36, %v8381_v47  ;;  %v8026_v5 = vadd.f32 %v15531_v62, %v15530_v29  ;;  %v9105_v50 = vadd.f32 %v15014_v23, %v8379_v15  ;;  %v15533_v36 = vld [vmem:[#allocation29_spill] sm:$0xff]  ;;  %v9114_v62 = vadd.f32 %v15075_v59, %v14970_v22 }
 0x39d   : > { %v9611_v20 = vadd.f32 %v15037_v33, %v9573_v42  ;;  %v9571_v24 = vadd.f32 %v9470_v11, %v9101_v21  ;;  %12076 = vmatprep.mubr.msk.bf16.mxu1 %vm2565_vm2, %v9666_v32  ;;  %v9640_v26 = vmax.f32 %v9608_v38, 0.0  ;;  %v8024_v46 = vadd.f32 %v15533_v36, %v15532_v40  ;;  %v9061_v15 = vpop.f32.mrf.mxu0 }
 0x39e   : > { %v12018_v54 = vpop.f32.mrf.mxu1  ;;  %12077 = vmatmul.mubr.msk.bf16.gmra.mxu1 %vm2565_vm2, %v9667_v44  ;;  %v8385_v44 = vadd.f32 %v14958_v43, %v8026_v5  ;;  %v9110_v32 = vadd.f32 %v15026_v10, %v14949_v35  ;;  %v15534_v43 = vld [vmem:[#allocation21_spill] sm:$0xff] }
 0x39f   : > { %v9643_v60 = vmax.f32 %v9611_v20, 0.0  ;;  %v9609_v45 = vadd.f32 %v15037_v33, %v9571_v24  ;;  %v9576_v3 = vadd.f32 %v12018_v54, %v9106_v49  ;;  %v8383_v42 = vadd.f32 %v14962_v9, %v8024_v46  ;;  %v15535_v9 = vld [vmem:[#allocation10_spill] sm:$0xff]  ;;  %v15536_v54 = vld [vmem:[#allocation32_spill] sm:$0xff]  ;;  %v11997_v5 = vpop.f32.mrf.mxu0 }
 0x3a0   : > { %v9483_v34 = vpop.f32.mrf.mxu1  ;;  %v9108_v21 = vadd.f32 %v15040_v27, %v15534_v43  ;;  %v9111_v20 = vadd.f32 %v15052_v6, %v8385_v44  ;;  %v15541_v43 = vld [vmem:[#allocation15_spill] sm:$0xff] }
 0x3a1   : > { %v9669_v37 = vpack.c.bf16 %v9643_v60, %v9642_v58  ;;  %v9641_v0 = vmax.f32 %v9609_v45, 0.0  ;;  %v9574_v52 = vadd.f32 %v9483_v34, %v9104_v14  ;;  %v9614_v63 = vadd.f32 %v15037_v33, %v9576_v3 }
 0x3a2   : > { %v12019_v39 = vpop.f32.mrf.mxu1  ;;  %v8030_v14 = vadd.f32 %v15536_v54, %v15535_v9  ;;  %v9109_v3 = vadd.f32 %v15062_v51, %v8383_v42 }
 0x3a3   : > { %v9668_v16 = vpack.c.bf16 %v9641_v0, %v9640_v26  ;;  %v9577_v31 = vadd.f32 %v12019_v39, %v9107_v17  ;;  %v9612_v13 = vadd.f32 %v15037_v33, %v9574_v52  ;;  %v9646_v47 = vmax.f32 %v9614_v63, 0.0  ;;  %v15537_v17 = vld [vmem:[#allocation9_spill] sm:$0xff]  ;;  %v15538_v26 = vld [vmem:[#allocation4_spill] sm:$0xff] }
 0x3a4   : > { %v9486_v18 = vpop.f32.mrf.mxu1  ;;  %v8389_v34 = vadd.f32 %v14982_v48, %v8030_v14  ;;  %v8028_v6 = vadd.f32 %v15538_v26, %v15537_v17  ;;  %v9112_v48 = vadd.f32 %v15086_v8, %v14978_v2 }
 0x3a5   : > { %v9615_v28 = vadd.f32 %v15037_v33, %v9577_v31  ;;  %v9575_v56 = vadd.f32 %v9486_v18, %v9105_v50  ;;  %12080 = vmatprep.mubr.msk.bf16.mxu1 %vm2565_vm2, %v9668_v16  ;;  %v9644_v24 = vmax.f32 %v9612_v13, 0.0  ;;  %v9064_v18 = vpop.f32.mrf.mxu0  ;;  %v15540_v13 = vld [vmem:[#allocation8_spill] sm:$0xff] }
 0x3a6   : > { %v12022_v23 = vpop.f32.mrf.mxu1  ;;  %12081 = vmatmul.mubr.msk.bf16.gmra.mxu1 %vm2565_vm2, %v9669_v37  ;;  %v8387_v39 = vadd.f32 %v14985_v61, %v8028_v6  ;;  %v9115_v40 = vadd.f32 %v15099_v1, %v8389_v34  ;;  %v15539_v61 = vld [vmem:[#allocation36_spill] sm:$0xff] }
 0x3a7   : > { %v9647_v7 = vmax.f32 %v9615_v28, 0.0  ;;  %v9613_v30 = vadd.f32 %v15037_v33, %v9575_v56  ;;  %v9580_v11 = vadd.f32 %v12022_v23, %v9110_v32  ;;  %v8034_v28 = vadd.f32 %v15540_v13, %v15539_v61 }
 0x3a8   : > { %v9499_v38 = vpop.f32.mrf.mxu1  ;;  %v9113_v42 = vadd.f32 %v15107_v41, %v8387_v39 }
 0x3a9   : > { %v9671_v49 = vpack.c.bf16 %v9647_v7, %v9646_v47  ;;  %v9645_v35 = vmax.f32 %v9613_v30, 0.0  ;;  %v9578_v10 = vadd.f32 %v9499_v38, %v9108_v21  ;;  %v9618_v27 = vadd.f32 %v15037_v33, %v9580_v11  ;;  %v15542_v21 = vld [vmem:[#allocation11_spill] sm:$0xff]  ;;  %v12000_v47 = vpop.f32.mrf.mxu0 }
 0x3aa   : > { %v12023_v58 = vpop.f32.mrf.mxu1  ;;  %v8393_v23 = vadd.f32 %v14998_v53, %v8034_v28  ;;  %v8032_v1 = vadd.f32 %v15542_v21, %v15541_v43  ;;  %v9116_v53 = vadd.f32 %v9061_v15, %v14994_v12 }
 0x3ab   : > { %v9670_v60 = vpack.c.bf16 %v9645_v35, %v9644_v24  ;;  %v9581_v45 = vadd.f32 %v12023_v58, %v9111_v20  ;;  %v9616_v0 = vadd.f32 %v15037_v33, %v9578_v10  ;;  %v9650_v16 = vmax.f32 %v9618_v27, 0.0  ;;  %v9077_v54 = vpop.f32.mrf.mxu0 }
 0x3ac   : > { %v9502_v37 = vpop.f32.mrf.mxu1  ;;  %v9118_v20 = vadd.f32 %v11996_v55, %v14991_v4  ;;  %v8391_v24 = vadd.f32 %v15000_v19, %v8032_v1  ;;  %v9119_v58 = vadd.f32 %v11997_v5, %v8393_v23  ;;  %v15543_v4 = vld [vmem:[#allocation19_spill] sm:$0xff]  ;;  %v15544_v55 = vld [vmem:[#allocation16_spill] sm:$0xff]  ;;  %v9122_v5 = vadd.f32 %v12000_v47, %v15008_v25 }
 0x3ad   : > { %v9619_v52 = vadd.f32 %v15037_v33, %v9581_v45  ;;  %v9579_v29 = vadd.f32 %v9502_v37, %v9109_v3  ;;  %12084 = vmatprep.mubr.msk.bf16.mxu1 %vm2565_vm2, %v9670_v60  ;;  %v9648_v36 = vmax.f32 %v9616_v0, 0.0  ;;  %v8038_v19 = vadd.f32 %v15544_v55, %v15543_v4  ;;  %v15545_v37 = vld [vmem:[#allocation20_spill] sm:$0xff]  ;;  %v15546_v0 = vld [vmem:[#allocation17_spill] sm:$0xff] }
 0x3ae   : > { %v12026_v51 = vpop.f32.mrf.mxu1  ;;  %12085 = vmatmul.mubr.msk.bf16.gmra.mxu1 %vm2565_vm2, %v9671_v49  ;;  %v9117_v15 = vadd.f32 %v9064_v18, %v8391_v24 }
 0x3af   : > { %v9651_v63 = vmax.f32 %v9619_v52, 0.0  ;;  %v9617_v31 = vadd.f32 %v15037_v33, %v9579_v29  ;;  %v9584_v50 = vadd.f32 %v12026_v51, %v9114_v62  ;;  %v8397_v6 = vadd.f32 %v15016_v57, %v8038_v19  ;;  %v12001_v29 = vpop.f32.mrf.mxu0  ;;  %v15197_v19 = vld [vmem:[%s15337_s6] ss:$0 sm:$0xff] }
 0x3b0   : > { %v9515_v44 = vpop.f32.mrf.mxu1  ;;  %v8036_v52 = vadd.f32 %v15546_v0, %v15545_v37 }
 0x3b1   : > { %v9673_v46 = vpack.c.bf16 %v9651_v63, %v9650_v16  ;;  %v9649_v22 = vmax.f32 %v9617_v31, 0.0  ;;  %v9582_v59 = vadd.f32 %v9515_v44, %v9112_v48  ;;  %v9622_v2 = vadd.f32 %v15037_v33, %v9584_v50  ;;  %v15547_v16 = vld [vmem:[#allocation23_spill] sm:$0xff]  ;;  %v15548_v31 = vld [vmem:[#allocation24_spill] sm:$0xff] }
 0x3b2   : > { %v12027_v56 = vpop.f32.mrf.mxu1  ;;  %v9120_v63 = vadd.f32 %v9077_v54, %v15547_v16  ;;  %v8395_v50 = vadd.f32 %v15548_v31, %v8036_v52  ;;  %v9123_v25 = vadd.f32 %v12001_v29, %v8397_v6 }
 0x3b3   : > { %v9672_v32 = vpack.c.bf16 %v9649_v22, %v9648_v36  ;;  %v9585_v8 = vadd.f32 %v12027_v56, %v9115_v40  ;;  %v9620_v30 = vadd.f32 %v15037_v33, %v9582_v59  ;;  %v9654_v41 = vmax.f32 %v9622_v2, 0.0  ;;  %v9080_v22 = vpop.f32.mrf.mxu0 }
 0x3b4   : > { %v9518_v7 = vpop.f32.mrf.mxu1 }
 0x3b5   : > { %v9623_v11 = vadd.f32 %v15037_v33, %v9585_v8  ;;  %v9583_v38 = vadd.f32 %v9518_v7, %v9113_v42  ;;  %12088 = vmatprep.mubr.msk.bf16.mxu1 %vm2565_vm2, %v9672_v32  ;;  %v9652_v60 = vmax.f32 %v9620_v30, 0.0  ;;  %v9121_v32 = vadd.f32 %v9080_v22, %v8395_v50 }
 0x3b6   : > { %v12030_v49 = vpop.f32.mrf.mxu1  ;;  %12089 = vmatmul.mubr.msk.bf16.gmra.mxu1 %vm2565_vm2, %v9673_v46 }
 0x3b7   : > { %v9655_v35 = vmax.f32 %v9623_v11, 0.0  ;;  %v9621_v10 = vadd.f32 %v15037_v33, %v9583_v38  ;;  %v9588_v9 = vadd.f32 %v12030_v49, %v9118_v20 }
 0x3b8   : > { %v9531_v14 = vpop.f32.mrf.mxu1 }
 0x3b9   : > { %v9675_v27 = vpack.c.bf16 %v9655_v35, %v9654_v41  ;;  %v9653_v45 = vmax.f32 %v9621_v10, 0.0  ;;  %v9586_v3 = vadd.f32 %v9531_v14, %v9116_v53  ;;  %v9626_v26 = vadd.f32 %v15037_v33, %v9588_v9 }
 0x3ba   : > { %v12031_v34 = vpop.f32.mrf.mxu1 }
 0x3bb   : > { %v9674_v17 = vpack.c.bf16 %v9653_v45, %v9652_v60  ;;  %v9589_v12 = vadd.f32 %v12031_v34, %v9119_v58  ;;  %v9624_v39 = vadd.f32 %v15037_v33, %v9586_v3  ;;  %v9658_v57 = vmax.f32 %v9626_v26, 0.0 }
 0x3bc   : > { %v9534_v62 = vpop.f32.mrf.mxu1 }
 0x3bd   : > { %v9627_v51 = vadd.f32 %v15037_v33, %v9589_v12  ;;  %v9587_v48 = vadd.f32 %v9534_v62, %v9117_v15  ;;  %12092 = vmatprep.mubr.msk.bf16.mxu1 %vm2565_vm2, %v9674_v17  ;;  %v9656_v18 = vmax.f32 %v9624_v39, 0.0 }
 0x3be   : > { %v12034_v44 = vpop.f32.mrf.mxu1  ;;  %12093 = vmatmul.mubr.msk.bf16.gmra.mxu1 %vm2565_vm2, %v9675_v27 }
 0x3bf   : > { %v9659_v40 = vmax.f32 %v9627_v51, 0.0  ;;  %v9625_v36 = vadd.f32 %v15037_v33, %v9587_v48  ;;  %v9592_v46 = vadd.f32 %v12034_v44, %v9122_v5 }
 0x3c0   : > { %v9547_v59 = vpop.f32.mrf.mxu1 }
 0x3c1   : > { %v9677_v61 = vpack.c.bf16 %v9659_v40, %v9658_v57  ;;  %v9657_v13 = vmax.f32 %v9625_v36, 0.0  ;;  %v9590_v28 = vadd.f32 %v9547_v59, %v9120_v63  ;;  %v9630_v8 = vadd.f32 %v15037_v33, %v9592_v46 }
 0x3c2   : > { %v12035_v56 = vpop.f32.mrf.mxu1 }
 0x3c3   : > { %v9676_v2 = vpack.c.bf16 %v9657_v13, %v9656_v18  ;;  %v9593_v42 = vadd.f32 %v12035_v56, %v9123_v25  ;;  %v9628_v43 = vadd.f32 %v15037_v33, %v9590_v28  ;;  %v9662_v47 = vmax.f32 %v9630_v8, 0.0 }
 0x3c4   : > { %v9550_v23 = vpop.f32.mrf.mxu1 }
 0x3c5   : > { %v9631_v21 = vadd.f32 %v15037_v33, %v9593_v42  ;;  %v9591_v1 = vadd.f32 %v9550_v23, %v9121_v32  ;;  %12096 = vmatprep.mubr.msk.bf16.mxu1 %vm2565_vm2, %v9676_v2  ;;  %v9660_v11 = vmax.f32 %v9628_v43, 0.0 }
 0x3c6   : > { %12097 = vmatmul.mubr.msk.bf16.gmra.mxu1 %vm2565_vm2, %v9677_v61 }
 0x3c7   : > { %v9663_v7 = vmax.f32 %v9631_v21, 0.0  ;;  %v9629_v30 = vadd.f32 %v15037_v33, %v9591_v1 }
 0x3c9   : > { %v9679_v38 = vpack.c.bf16 %v9663_v7, %v9662_v47  ;;  %v9661_v20 = vmax.f32 %v9629_v30, 0.0 }
 0x3cb   : > { %v9678_v24 = vpack.c.bf16 %v9661_v20, %v9660_v11 }
 0x3cd   : > { %12100 = vmatprep.mubr.msk.bf16.mxu1 %vm2565_vm2, %v9678_v24 }
 0x3ce   : > { %12101 = vmatmul.mubr.msk.bf16.gmra.mxu1 %vm2565_vm2, %v9679_v38 }
 0x3e3   : > { %v12040_v49 = vpop.f32.mrf.mxu0 }
 0x3e5   : > { %v10251_v53 = vpop.f32.mrf.mxu0 }
 0x3e7   : > { %v12041_v41 = vpop.f32.mrf.mxu0 }
 0x3e9   : > { %v10254_v35 = vpop.f32.mrf.mxu0 }
 0x3ed   : > { %v12044_v10 = vpop.f32.mrf.mxu0 }
 0x3ef   : > { %v10267_v9 = vpop.f32.mrf.mxu0 }
 0x3f1   : > { %v12045_v54 = vpop.f32.mrf.mxu0 }
 0x3f3   : > { %v10270_v14 = vpop.f32.mrf.mxu0 }
 0x3fa   : > { %v12048_v58 = vpop.f32.mrf.mxu0 }
 0x3fc   : > { %v10283_v60 = vpop.f32.mrf.mxu0 }
 0x3fe   : > { %v15182_v33 = vpop.f32.mrf.mxu0 }
 0x400   : > { %v15184_v27 = vpop.f32.mrf.mxu0 }
 0x405   : > { %v15186_v45 = vpop.f32.mrf.mxu0 }
 0x407   : > { %v15188_v3 = vpop.f32.mrf.mxu0 }
 0x409   : > { %v15190_v4 = vpop.f32.mrf.mxu0 }
 0x40b   : > { %v15192_v55 = vpop.f32.mrf.mxu0 }
 0x410   : > { %v15200_v12 = vpop.f32.mrf.mxu0 }
 0x412   : > { %v15209_v5 = vpop.f32.mrf.mxu0 }
 0x414   : > { %v15217_v57 = vpop.f32.mrf.mxu0 }
 0x416   : > { %v15225_v13 = vpop.f32.mrf.mxu0 }
 0x419   : > { %v15233_v21 = vpop.f32.mrf.mxu0 }
 0x456   : > { %v12074_v34 = vpop.f32.mrf.mxu1 }
 0x457   : > { %v10472_v17 = vadd.f32 %v12074_v34, %v12040_v49  ;;  %v10331_v49 = vpop.f32.mrf.mxu0 }
 0x458   : > { %v10463_v26 = vpop.f32.mrf.mxu1 }
 0x459   : > { %v10598_v15 = vadd.f32 %v15197_v19, %v10472_v17  ;;  %v10464_v6 = vadd.f32 %v10463_v26, %v10251_v53 }
 0x45a   : > { %v12075_v37 = vpop.f32.mrf.mxu1 }
 0x45b   : > { %v10630_v0 = vmax.f32 %v10598_v15, 0.0  ;;  %v10596_v52 = vadd.f32 %v15197_v19, %v10464_v6  ;;  %v10475_v29 = vadd.f32 %v12075_v37, %v12041_v41 }
 0x45c   : > { %v10466_v62 = vpop.f32.mrf.mxu1 }
 0x45d   : > { %10663 = vst.msk [vmem:[%s15206_s19 + $0x10] sm:$0xff] %vm10660_vm13, %v10630_v0  ;;  %v10628_v39 = vmax.f32 %v10596_v52, 0.0  ;;  %v10599_v51 = vadd.f32 %v15197_v19, %v10475_v29  ;;  %v10467_v48 = vadd.f32 %v10466_v62, %v10254_v35 }
 0x45e   : > { %v12078_v16 = vpop.f32.mrf.mxu1 }
 0x45f   : > { %10661 = vst.msk [vmem:[%s15206_s19] sm:$0xff] %vm10660_vm13, %v10628_v39  ;;  %v10631_v63 = vmax.f32 %v10599_v51, 0.0  ;;  %v10597_v31 = vadd.f32 %v15197_v19, %v10467_v48  ;;  %v10488_v50 = vadd.f32 %v12078_v16, %v12044_v10 }
 0x460   : > { %v10479_v44 = vpop.f32.mrf.mxu1 }
 0x461   : > { %10664 = vst.msk [vmem:[%s15206_s19 + $0x18] sm:$0xff] %vm10660_vm13, %v10631_v63  ;;  %v10629_v40 = vmax.f32 %v10597_v31, 0.0  ;;  %v10602_v36 = vadd.f32 %v15197_v19, %v10488_v50  ;;  %v10480_v46 = vadd.f32 %v10479_v44, %v10267_v9 }
 0x462   : > { %v12079_v25 = vpop.f32.mrf.mxu1 }
 0x463   : > { %10662 = vst.msk [vmem:[%s15206_s19 + $0x8] sm:$0xff] %vm10660_vm13, %v10629_v40  ;;  %v10634_v22 = vmax.f32 %v10602_v36, 0.0  ;;  %v10600_v59 = vadd.f32 %v15197_v19, %v10480_v46  ;;  %v10491_v18 = vadd.f32 %v12079_v25, %v12045_v54 }
 0x464   : > { %v10482_v61 = vpop.f32.mrf.mxu1 }
 0x465   : > { %10667 = vst.msk [vmem:[%s15206_s19 + $0x30] sm:$0xff] %vm10660_vm13, %v10634_v22  ;;  %v10632_v28 = vmax.f32 %v10600_v59, 0.0  ;;  %v10603_v56 = vadd.f32 %v15197_v19, %v10491_v18  ;;  %v10483_v32 = vadd.f32 %v10482_v61, %v10270_v14 }
 0x466   : > { %v12082_v2 = vpop.f32.mrf.mxu1 }
 0x467   : > { %10665 = vst.msk [vmem:[%s15206_s19 + $0x20] sm:$0xff] %vm10660_vm13, %v10632_v28  ;;  %v10635_v8 = vmax.f32 %v10603_v56, 0.0  ;;  %v10601_v42 = vadd.f32 %v15197_v19, %v10483_v32  ;;  %v10504_v23 = vadd.f32 %v12082_v2, %v12048_v58 }
 0x468   : > { %v10495_v43 = vpop.f32.mrf.mxu1 }
 0x469   : > { %10668 = vst.msk [vmem:[%s15206_s19 + $0x38] sm:$0xff] %vm10660_vm13, %v10635_v8  ;;  %v10633_v1 = vmax.f32 %v10601_v42, 0.0  ;;  %v10606_v47 = vadd.f32 %v15197_v19, %v10504_v23  ;;  %v10496_v7 = vadd.f32 %v10495_v43, %v10283_v60  ;;  %v12061_v60 = vpop.f32.mrf.mxu0 }
 0x46a   : > { %v12083_v30 = vpop.f32.mrf.mxu1 }
 0x46b   : > { %10666 = vst.msk [vmem:[%s15206_s19 + $0x28] sm:$0xff] %vm10660_vm13, %v10633_v1  ;;  %v10638_v11 = vmax.f32 %v10606_v47, 0.0  ;;  %v10604_v38 = vadd.f32 %v15197_v19, %v10496_v7  ;;  %v10507_v20 = vadd.f32 %v12083_v30, %v15182_v33  ;;  %v10334_v37 = vpop.f32.mrf.mxu0 }
 0x46c   : > { %v10498_v24 = vpop.f32.mrf.mxu1 }
 0x46d   : > { %10671 = vst.msk [vmem:[%s15206_s19 + $0x50] sm:$0xff] %vm10660_vm13, %v10638_v11  ;;  %v10636_v53 = vmax.f32 %v10604_v38, 0.0  ;;  %v10607_v41 = vadd.f32 %v15197_v19, %v10507_v20  ;;  %v10499_v35 = vadd.f32 %v10498_v24, %v15184_v27  ;;  %v12064_v48 = vpop.f32.mrf.mxu0 }
 0x46e   : > { %v12086_v10 = vpop.f32.mrf.mxu1 }
 0x46f   : > { %10669 = vst.msk [vmem:[%s15206_s19 + $0x40] sm:$0xff] %vm10660_vm13, %v10636_v53  ;;  %v10639_v9 = vmax.f32 %v10607_v41, 0.0  ;;  %v10605_v54 = vadd.f32 %v15197_v19, %v10499_v35  ;;  %v10520_v14 = vadd.f32 %v12086_v10, %v15186_v45  ;;  %v10347_v36 = vpop.f32.mrf.mxu0 }
 0x470   : > { %v10511_v58 = vpop.f32.mrf.mxu1 }
 0x471   : > { %10672 = vst.msk [vmem:[%s15206_s19 + $0x58] sm:$0xff] %vm10660_vm13, %v10639_v9  ;;  %v10637_v33 = vmax.f32 %v10605_v54, 0.0  ;;  %v10610_v34 = vadd.f32 %v15197_v19, %v10520_v14  ;;  %v10512_v17 = vadd.f32 %v10511_v58, %v15188_v3  ;;  %v12065_v28 = vpop.f32.mrf.mxu0 }
 0x472   : > { %v12087_v27 = vpop.f32.mrf.mxu1 }
 0x473   : > { %10670 = vst.msk [vmem:[%s15206_s19 + $0x48] sm:$0xff] %vm10660_vm13, %v10637_v33  ;;  %v10642_v26 = vmax.f32 %v10610_v34, 0.0  ;;  %v10608_v15 = vadd.f32 %v15197_v19, %v10512_v17  ;;  %v10523_v6 = vadd.f32 %v12087_v27, %v15190_v4  ;;  %v10350_v1 = vpop.f32.mrf.mxu0 }
 0x474   : > { %v10514_v45 = vpop.f32.mrf.mxu1 }
 0x475   : > { %10675 = vst.msk [vmem:[%s15206_s19 + $0x70] sm:$0xff] %vm10660_vm13, %v10642_v26  ;;  %v10640_v0 = vmax.f32 %v10608_v15, 0.0  ;;  %v10611_v52 = vadd.f32 %v15197_v19, %v10523_v6  ;;  %v10515_v29 = vadd.f32 %v10514_v45, %v15192_v55  ;;  %v12068_v24 = vpop.f32.mrf.mxu0 }
 0x476   : > { %v12090_v3 = vpop.f32.mrf.mxu1 }
 0x477   : > { %10673 = vst.msk [vmem:[%s15206_s19 + $0x60] sm:$0xff] %vm10660_vm13, %v10640_v0  ;;  %v10643_v62 = vmax.f32 %v10611_v52, 0.0  ;;  %v10609_v39 = vadd.f32 %v15197_v19, %v10515_v29  ;;  %v10536_v51 = vadd.f32 %v12090_v3, %v15200_v12  ;;  %v10363_v58 = vpop.f32.mrf.mxu0 }
 0x478   : > { %v10527_v4 = vpop.f32.mrf.mxu1 }
 0x479   : > { %10676 = vst.msk [vmem:[%s15206_s19 + $0x78] sm:$0xff] %vm10660_vm13, %v10643_v62  ;;  %v10641_v16 = vmax.f32 %v10609_v39, 0.0  ;;  %v10614_v63 = vadd.f32 %v15197_v19, %v10536_v51  ;;  %v10528_v31 = vadd.f32 %v10527_v4, %v15209_v5  ;;  %v12069_v45 = vpop.f32.mrf.mxu0 }
 0x47a   : > { %v12091_v55 = vpop.f32.mrf.mxu1 }
 0x47b   : > { %10674 = vst.msk [vmem:[%s15206_s19 + $0x68] sm:$0xff] %vm10660_vm13, %v10641_v16  ;;  %v10646_v50 = vmax.f32 %v10614_v63, 0.0  ;;  %v10612_v44 = vadd.f32 %v15197_v19, %v10528_v31  ;;  %v10539_v40 = vadd.f32 %v12091_v55, %v15217_v57  ;;  %v10366_v4 = vpop.f32.mrf.mxu0 }
 0x47c   : > { %v10530_v12 = vpop.f32.mrf.mxu1 }
 0x47d   : > { %10679 = vst.msk [vmem:[%s15206_s19 + $0x90] sm:$0xff] %vm10660_vm13, %v10646_v50  ;;  %v10644_v46 = vmax.f32 %v10612_v44, 0.0  ;;  %v10615_v25 = vadd.f32 %v15197_v19, %v10539_v40  ;;  %v10531_v22 = vadd.f32 %v10530_v12, %v15225_v13 }
 0x47e   : > { %v12094_v5 = vpop.f32.mrf.mxu1 }
 0x47f   : > { %10677 = vst.msk [vmem:[%s15206_s19 + $0x80] sm:$0xff] %vm10660_vm13, %v10644_v46  ;;  %v10647_v59 = vmax.f32 %v10615_v25, 0.0  ;;  %v10613_v18 = vadd.f32 %v15197_v19, %v10531_v22  ;;  %v10552_v61 = vadd.f32 %v12094_v5, %v15233_v21 }
 0x480   : > { %v10543_v57 = vpop.f32.mrf.mxu1 }
 0x481   : > { %10680 = vst.msk [vmem:[%s15206_s19 + $0x98] sm:$0xff] %vm10660_vm13, %v10647_v59  ;;  %v10645_v56 = vmax.f32 %v10613_v18, 0.0  ;;  %v10618_v32 = vadd.f32 %v15197_v19, %v10552_v61  ;;  %v10544_v2 = vadd.f32 %v10543_v57, %v10331_v49 }
 0x482   : > { %v12095_v8 = vpop.f32.mrf.mxu1 }
 0x483   : > { %10678 = vst.msk [vmem:[%s15206_s19 + $0x88] sm:$0xff] %vm10660_vm13, %v10645_v56  ;;  %v10650_v13 = vmax.f32 %v10618_v32, 0.0  ;;  %v10616_v42 = vadd.f32 %v15197_v19, %v10544_v2  ;;  %v10555_v23 = vadd.f32 %v12095_v8, %v12061_v60 }
 0x484   : > { %v10546_v43 = vpop.f32.mrf.mxu1 }
 0x485   : > { %10683 = vst.msk [vmem:[%s15206_s19 + $0xb0] sm:$0xff] %vm10660_vm13, %v10650_v13  ;;  %v10648_v21 = vmax.f32 %v10616_v42, 0.0  ;;  %v10619_v47 = vadd.f32 %v15197_v19, %v10555_v23  ;;  %v10547_v7 = vadd.f32 %v10546_v43, %v10334_v37 }
 0x486   : > { %v12098_v30 = vpop.f32.mrf.mxu1 }
 0x487   : > { %10681 = vst.msk [vmem:[%s15206_s19 + $0xa0] sm:$0xff] %vm10660_vm13, %v10648_v21  ;;  %v10651_v11 = vmax.f32 %v10619_v47, 0.0  ;;  %v10617_v38 = vadd.f32 %v15197_v19, %v10547_v7  ;;  %v10568_v20 = vadd.f32 %v12098_v30, %v12064_v48 }
 0x488   : > { %v10559_v49 = vpop.f32.mrf.mxu1 }
 0x489   : > { %10684 = vst.msk [vmem:[%s15206_s19 + $0xb8] sm:$0xff] %vm10660_vm13, %v10651_v11  ;;  %v10649_v53 = vmax.f32 %v10617_v38, 0.0  ;;  %v10622_v41 = vadd.f32 %v15197_v19, %v10568_v20  ;;  %v10560_v35 = vadd.f32 %v10559_v49, %v10347_v36 }
 0x48a   : > { %v12099_v10 = vpop.f32.mrf.mxu1 }
 0x48b   : > { %10682 = vst.msk [vmem:[%s15206_s19 + $0xa8] sm:$0xff] %vm10660_vm13, %v10649_v53  ;;  %v10654_v9 = vmax.f32 %v10622_v41, 0.0  ;;  %v10620_v54 = vadd.f32 %v15197_v19, %v10560_v35  ;;  %v10571_v14 = vadd.f32 %v12099_v10, %v12065_v28 }
 0x48c   : > { %v10562_v60 = vpop.f32.mrf.mxu1 }
 0x48d   : > { %10687 = vst.msk [vmem:[%s15206_s19 + $0xd0] sm:$0xff] %vm10660_vm13, %v10654_v9  ;;  %v10652_v33 = vmax.f32 %v10620_v54, 0.0  ;;  %v10623_v34 = vadd.f32 %v15197_v19, %v10571_v14  ;;  %v10563_v17 = vadd.f32 %v10562_v60, %v10350_v1 }
 0x48e   : > { %v12102_v27 = vpop.f32.mrf.mxu1 }
 0x48f   : > { %10685 = vst.msk [vmem:[%s15206_s19 + $0xc0] sm:$0xff] %vm10660_vm13, %v10652_v33  ;;  %v10655_v26 = vmax.f32 %v10623_v34, 0.0  ;;  %v10621_v15 = vadd.f32 %v15197_v19, %v10563_v17  ;;  %v10584_v6 = vadd.f32 %v12102_v27, %v12068_v24 }
 0x490   : > { %v10575_v37 = vpop.f32.mrf.mxu1 }
 0x491   : > { %10688 = vst.msk [vmem:[%s15206_s19 + $0xd8] sm:$0xff] %vm10660_vm13, %v10655_v26  ;;  %v10653_v0 = vmax.f32 %v10621_v15, 0.0  ;;  %v10626_v52 = vadd.f32 %v15197_v19, %v10584_v6  ;;  %v10576_v29 = vadd.f32 %v10575_v37, %v10363_v58 }
 0x492   : > { %v12103_v3 = vpop.f32.mrf.mxu1 }
 0x493   : > { %10686 = vst.msk [vmem:[%s15206_s19 + $0xc8] sm:$0xff] %vm10660_vm13, %v10653_v0  ;;  %v10658_v62 = vmax.f32 %v10626_v52, 0.0  ;;  %v10624_v39 = vadd.f32 %v15197_v19, %v10576_v29  ;;  %v10587_v51 = vadd.f32 %v12103_v3, %v12069_v45 }
 0x494   : > { %v10578_v48 = vpop.f32.mrf.mxu1 }
 0x495   : > { %10691 = vst.msk [vmem:[%s15206_s19 + $0xf0] sm:$0xff] %vm10660_vm13, %v10658_v62  ;;  %v10656_v16 = vmax.f32 %v10624_v39, 0.0  ;;  %v10627_v63 = vadd.f32 %v15197_v19, %v10587_v51  ;;  %v10579_v31 = vadd.f32 %v10578_v48, %v10366_v4 }
 0x497   : > { %10689 = vst.msk [vmem:[%s15206_s19 + $0xe0] sm:$0xff] %vm10660_vm13, %v10656_v16  ;;  %v10659_v55 = vmax.f32 %v10627_v63, 0.0  ;;  %v10625_v50 = vadd.f32 %v15197_v19, %v10579_v31 }
 0x499   : > { %10692 = vst.msk [vmem:[%s15206_s19 + $0xf8] sm:$0xff] %vm10660_vm13, %v10659_v55  ;;  %v10657_v44 = vmax.f32 %v10625_v50, 0.0 }
 0x49b   : > { %10690 = vst.msk [vmem:[%s15206_s19 + $0xe8] sm:$0xff] %vm10660_vm13, %v10657_v44 }
 0x49c PF: > { %s18_s29 = sadd.s32 1, %s12306_s29   ;;  %s15549_s27 = smov %s12302_s28 }
 0x49d   : > { %p15_p5 = scmp.ge.s32.totalorder %s18_s29, 4   ;;  %s15550_s28 = smov %s15552_s30 }
 0x49f   :  { %17 = sbr.rel (!%p15_p5) target bundleno = 2 (0x2), region = 94 }

</bundles_post_ra>
